<compile_context>
chip_gen: v7x
topology: tpu7x:2x2x1
jax: 0.10.0
libtpu: 0.0.40
codegen_flags: <defaults>
</compile_context>

<pallas_src>
import jax
import jax.numpy as jnp
from jax import lax
from jax.experimental import pallas as pl
from jax.experimental.pallas import tpu as pltpu

BIGNET_DIM = 128          # lane-aligned stand-in for the homework's BIGNET_DIM
LORA_DIM = 32
NUM_BLOCKS = 6
LAYERS_PER_BLOCK = 3
NUM_LAYERS = NUM_BLOCKS * LAYERS_PER_BLOCK   # 18 LoRALinear layers
NUM_LN = NUM_BLOCKS - 1                      # 5 LayerNorms
HALF_DTYPE = jnp.bfloat16
LN_EPS = 1e-5


# ------------------------------ kernel helpers ------------------------------

def _layer_norm(h, gamma, beta):
    """LayerNorm with independent E[x] / E[x^2] reductions (both XLU reduces
    can issue back-to-back instead of reduce -> subtract -> reduce)."""
    mean = jnp.mean(h, axis=-1, keepdims=True)
    msq = jnp.mean(h * h, axis=-1, keepdims=True)
    var = jnp.maximum(msq - mean * mean, 0.0)
    return (h - mean) * lax.rsqrt(var + LN_EPS) * gamma + beta


# ------------------------- fused kernel: bf16 fast path ----------------------

def fused_forward_bf16_kernel(x_ref, waug_ref, b_ref, bT_ref, g_ref, beta_ref, o_ref):
    """Entire LoraBigNet: (Block -> LN) x5 -> Block, fully unrolled.

    waug_ref[l] is [W_l ; A_l] stacked along the output dim ([D + r, D], bf16),
    so one MXU pass gives both the base output and the LoRA down-projection.
    """
    D = o_ref.shape[-1]
    h = x_ref[...]                                      # [tb, D] f32
    for blk in range(NUM_BLOCKS):
        res = h
        for j in range(LAYERS_PER_BLOCK):
            l = blk * LAYERS_PER_BLOCK + j              # static layer index
            h_half = h.astype(HALF_DTYPE)
            y = lax.dot_general(h_half, waug_ref[l],
                                (((1,), (1,)), ((), ())),
                                preferred_element_type=jnp.float32)   # [tb, D+r]
            base = y[:, :D] + b_ref[l].astype(jnp.float32)            # [tb, D]
            z = y[:, D:].astype(HALF_DTYPE)                           # [tb, r]
            lora = lax.dot_general(z, bT_ref[l],
                                   (((1,), (0,)), ((), ())),
                                   preferred_element_type=jnp.float32)  # [tb, D]
            h = base + lora
            if j < LAYERS_PER_BLOCK - 1:
                h = jnp.maximum(h, 0.0)                 # ReLU between linears
        h = h + res                                     # residual
        if blk < NUM_BLOCKS - 1:
            h = _layer_norm(h, g_ref[blk], beta_ref[blk])
    o_ref[...] = h


# ----------------- fused kernel: torch-exact fp32 LoRA path ------------------

def fused_forward_f32_kernel(x_ref, w_ref, b_ref, a_ref, bT_ref, g_ref, beta_ref, o_ref):
    """Same network, LoRA adapter kept in float32 (matches torch numerics)."""
    h = x_ref[...]
    for blk in range(NUM_BLOCKS):
        res = h
        for j in range(LAYERS_PER_BLOCK):
            l = blk * LAYERS_PER_BLOCK + j
            base = lax.dot_general(h.astype(HALF_DTYPE), w_ref[l],
                                   (((1,), (1,)), ((), ())),
                                   preferred_element_type=jnp.float32)
            base = base + b_ref[l].astype(jnp.float32)
            z = lax.dot_general(h, a_ref[l], (((1,), (1,)), ((), ())),
                                preferred_element_type=jnp.float32)     # [tb, r]
            lora = lax.dot_general(z, bT_ref[l], (((1,), (0,)), ((), ())),
                                   preferred_element_type=jnp.float32)  # [tb, D]
            h = base + lora
            if j < LAYERS_PER_BLOCK - 1:
                h = jnp.maximum(h, 0.0)
        h = h + res
        if blk < NUM_BLOCKS - 1:
            h = _layer_norm(h, g_ref[blk], beta_ref[blk])
    o_ref[...] = h


# ---------------------------------- wrapper ----------------------------------

def _pick_batch_tile(B):
    """tb: multiple of 16 (bf16 sublane packing), 16..256 rows, and >= 2 grid
    steps so v7x can shard the parallel batch axis across both TensorCores."""
    for tb in (256, 128, 64, 32, 16):
        if B % tb == 0 and B // tb >= 2:
            return tb
    return B   # tiny-batch fallback: single grid step


def lora_bignet_forward(x, params, *, tb=None, lora_dtype="bf16"):
    """Single pallas_call over batch tiles; all weights VMEM-resident
    (single-buffered via untiled memory_space=VMEM inputs)."""
    B, D = x.shape
    tb = _pick_batch_tile(B) if tb is None else tb
    assert B % tb == 0, "batch must be divisible by the tile size"
    assert tb % 16 == 0 or tb == B, "tb should be a multiple of 16"

    # Untiled, VMEM-resident, single-buffered parameter inputs.
    resident = pl.BlockSpec(memory_space=pltpu.MemorySpace.VMEM)
    x_spec = pl.BlockSpec((tb, D), lambda i: (i, 0))
    out_spec = pl.BlockSpec((tb, D), lambda i: (i, 0))
    cp = pltpu.CompilerParams(
        dimension_semantics=("parallel",),
        vmem_limit_bytes=48 * 1024 * 1024,   # < 56 MiB budget (v7x physical 64 MiB)
    )
    out_shape = jax.ShapeDtypeStruct((B, D), jnp.float32)

    if lora_dtype == "bf16":
        # Fast path: pack [W | A] along the output dim (one MXU pass per layer).
        # TODO(synk): precompute this packing once at load time for real models.
        w_aug = jnp.concatenate(
            [params["w"], params["lora_a"].astype(HALF_DTYPE)], axis=1)   # (18, D+r, D)
        bT = params["lora_bT"].astype(HALF_DTYPE)
        return pl.pallas_call(
            fused_forward_bf16_kernel,
            out_shape=out_shape,
            grid=(B // tb,),
            in_specs=[x_spec, resident, resident, resident, resident, resident],
            out_specs=out_spec,
            compiler_params=cp,
        )(x, w_aug, params["b"], bT, params["ln_g"], params["ln_b"])

    # Torch-exact fp32 LoRA path.
    return pl.pallas_call(
        fused_forward_f32_kernel,
        out_shape=out_shape,
        grid=(B // tb,),
        in_specs=[x_spec, resident, resident, resident, resident, resident, resident],
        out_specs=out_spec,
        compiler_params=cp,
    )(x, params["w"], params["b"], params["lora_a"], params["lora_bT"],
      params["ln_g"], params["ln_b"])


# ------------------------- parameter initialization -------------------------

def init_params(key, dim=BIGNET_DIM, lora_dim=LORA_DIM, *, zero_lora_b=True):
    """Stacked parameters. zero_lora_b=True matches torch's zeros_ init for
    lora_b; set False in tests so the LoRA matmuls are actually exercised."""
    ws, bs, las, lbTs = [], [], [], []
    keys = jax.random.split(key, NUM_LAYERS)
    bound = 1.0 / (dim ** 0.5)                       # torch.nn.Linear default init
    # kaiming_uniform_(a=sqrt(5)): bound = sqrt(6 / ((1 + a^2) * fan_in))
    a_bound = (6.0 / ((1.0 + 5.0) * dim)) ** 0.5
    for l in range(NUM_LAYERS):
        kw, kb, ka, kbb = jax.random.split(keys[l], 4)
        ws.append(jax.random.uniform(kw, (dim, dim), jnp.float32, -bound, bound)
                  .astype(HALF_DTYPE))
        bs.append(jax.random.uniform(kb, (1, dim), jnp.float32, -bound, bound)
                  .astype(HALF_DTYPE))
        las.append(jax.random.uniform(ka, (lora_dim, dim), jnp.float32,
                                      -a_bound, a_bound))
        if zero_lora_b:
            lbTs.append(jnp.zeros((lora_dim, dim), jnp.float32))
        else:
            lbTs.append(jax.random.uniform(kbb, (lora_dim, dim), jnp.float32,
                                           -0.1, 0.1))
    return {
        "w": jnp.stack(ws),                                    # (18, D, D)  bf16 [out, in]
        "b": jnp.stack(bs),                                    # (18, 1, D)  bf16
        "lora_a": jnp.stack(las),                              # (18, r, D)  f32  [r, in]
        "lora_bT": jnp.stack(lbTs),                            # (18, r, D)  f32  [r, out] (pre-transposed)
        "ln_g": jnp.ones((NUM_LN, 1, dim), jnp.float32),       # (5, 1, D)
        "ln_b": jnp.zeros((NUM_LN, 1, dim), jnp.float32),      # (5, 1, D)
    }


# ------------------------------ pure-JAX reference ------------------------------

def _ref_forward(x, params, *, lora_bf16=True):
    w, b = params["w"], params["b"]
    a, bT = params["lora_a"], params["lora_bT"]
    g, beta = params["ln_g"], params["ln_b"]
    h = x
    for blk in range(NUM_BLOCKS):
        res = h
        for j in range(LAYERS_PER_BLOCK):
            l = blk * LAYERS_PER_BLOCK + j
            hb = h.astype(HALF_DTYPE)
            base = lax.dot_general(hb, w[l], (((1,), (1,)), ((), ())),
                                   preferred_element_type=jnp.float32)
            base = base + b[l].astype(jnp.float32)
            if lora_bf16:
                z = lax.dot_general(hb, a[l].astype(HALF_DTYPE),
                                    (((1,), (1,)), ((), ())),
                                    preferred_element_type=jnp.float32)
                lora = lax.dot_general(z.astype(HALF_DTYPE),
                                       bT[l].astype(HALF_DTYPE),
                                       (((1,), (0,)), ((), ())),
                                       preferred_element_type=jnp.float32)
            else:
                lora = (h @ a[l].T) @ bT[l]
            h = base + lora
            if j < LAYERS_PER_BLOCK - 1:
                h = jnp.maximum(h, 0.0)
        h = h + res
        if blk < NUM_BLOCKS - 1:
            mean = jnp.mean(h, axis=-1, keepdims=True)
            var = jnp.mean((h - mean) ** 2, axis=-1, keepdims=True)
            h = (h - mean) * lax.rsqrt(var + LN_EPS) * g[blk] + beta[blk]
    return h


if __name__ == "__main__":
    key = jax.random.PRNGKey(0)
    k_x, k_p = jax.random.split(key)
    B = 256                                          # tb=128 -> grid=(2,) (v7x megacore)
    x = jax.random.normal(k_x, (B, BIGNET_DIM), jnp.float32)

    # Randomized lora_b so the LoRA matmuls (and the packed [W|A] layout) are
    # actually validated — torch's default zeros_ init would contribute 0.
    params = init_params(k_p, zero_lora_b=False)

    # Fast path (default): bf16 LoRA, fused [W|A] single MXU pass per layer.
    out = jax.block_until_ready(lora_bignet_forward(x, params))
    ref = jax.block_until_ready(_ref_forward(x, params, lora_bf16=True))
    assert out.shape == (B, BIGNET_DIM) and out.dtype == jnp.float32
    assert jnp.allclose(out, ref, atol=2e-3, rtol=2e-3), "mismatch (bf16 fast path)"

    # Torch-exact fp32 LoRA path.
    out32 = jax.block_until_ready(lora_bignet_forward(x, params, lora_dtype="float32"))
    ref32 = jax.block_until_ready(_ref_forward(x, params, lora_bf16=False))
    assert jnp.allclose(out32, ref32, atol=2e-3, rtol=2e-3), "mismatch (fp32 path)"

    # Torch-default init (lora_b == 0): adapter must contribute exactly nothing.
    params0 = init_params(k_p, zero_lora_b=True)
    out0 = jax.block_until_ready(lora_bignet_forward(x, params0))
    ref0 = jax.block_until_ready(_ref_forward(x, params0, lora_bf16=True))
    assert jnp.allclose(out0, ref0, atol=2e-3, rtol=2e-3), "mismatch (zero lora_b)"

    print("KERNEL_OK")
</pallas_src>

<mosaic_0001>
module attributes {stable_mosaic.version = 11 : i64} {
  func.func @fused_forward_bf16_kernel(%arg0: i32, %arg1: memref<128x128xf32, #tpu.memory_space<vmem>>, %arg2: memref<18x160x128xbf16, #tpu.memory_space<vmem>>, %arg3: memref<18x1x128xbf16, #tpu.memory_space<vmem>>, %arg4: memref<18x32x128xbf16, #tpu.memory_space<vmem>>, %arg5: memref<5x1x128xf32, #tpu.memory_space<vmem>>, %arg6: memref<5x1x128xf32, #tpu.memory_space<vmem>>, %arg7: memref<128x128xf32, #tpu.memory_space<vmem>>) attributes {dimension_semantics = [#tpu.dimension_semantics<parallel>], iteration_bounds = array<i64: 2>, scalar_prefetch = 0 : i64, scratch_operands = 0 : i64, tpu.core_type = #tpu.core_type<tc>, window_params = [{transform_indices = @transform_0, window_bounds = array<i64: 128, 128>}, {pipeline_mode = #tpu.pipeline_mode<synchronous>, transform_indices = @transform_1, window_bounds = array<i64: 18, 160, 128>}, {pipeline_mode = #tpu.pipeline_mode<synchronous>, transform_indices = @transform_2, window_bounds = array<i64: 18, 1, 128>}, {pipeline_mode = #tpu.pipeline_mode<synchronous>, transform_indices = @transform_3, window_bounds = array<i64: 18, 32, 128>}, {pipeline_mode = #tpu.pipeline_mode<synchronous>, transform_indices = @transform_4, window_bounds = array<i64: 5, 1, 128>}, {pipeline_mode = #tpu.pipeline_mode<synchronous>, transform_indices = @transform_5, window_bounds = array<i64: 5, 1, 128>}, {transform_indices = @transform_6, window_bounds = array<i64: 128, 128>}]} {
    %c0 = arith.constant 0 : index
    %c0_0 = arith.constant 0 : index
    %0 = vector.load %arg1[%c0, %c0_0] : memref<128x128xf32, #tpu.memory_space<vmem>>, vector<128x128xf32>
    %1 = arith.truncf %0 : vector<128x128xf32> to vector<128x128xbf16>
    %c0_1 = arith.constant 0 : index
    %c0_2 = arith.constant 0 : index
    %c0_3 = arith.constant 0 : index
    %2 = vector.load %arg2[%c0_1, %c0_2, %c0_3] : memref<18x160x128xbf16, #tpu.memory_space<vmem>>, vector<1x160x128xbf16>
    %3 = vector.shape_cast %2 : vector<1x160x128xbf16> to vector<160x128xbf16>
    %cst = arith.constant dense<0.000000e+00> : vector<128x160xf32>
    %4 = tpu.matmul %1, %3, %cst {dimension_numbers = #tpu.dot_dimension_numbers<[1], [1], [0], [0], [0, 0, 1, 0], [], []>} : vector<128x128xbf16>, vector<160x128xbf16>, vector<128x160xf32> -> vector<128x160xf32>
    %5 = vector.extract_strided_slice %4 {offsets = [0, 0], sizes = [128, 128], strides = [1, 1]} : vector<128x160xf32> to vector<128x128xf32>
    %c0_4 = arith.constant 0 : index
    %c0_5 = arith.constant 0 : index
    %c0_6 = arith.constant 0 : index
    %6 = vector.load %arg3[%c0_4, %c0_5, %c0_6] : memref<18x1x128xbf16, #tpu.memory_space<vmem>>, vector<1x1x128xbf16>
    %7 = vector.shape_cast %6 : vector<1x1x128xbf16> to vector<1x128xbf16>
    %8 = arith.extf %7 : vector<1x128xbf16> to vector<1x128xf32>
    %9 = vector.broadcast %8 : vector<1x128xf32> to vector<128x128xf32>
    %10 = arith.addf %5, %9 : vector<128x128xf32>
    %11 = vector.extract_strided_slice %4 {offsets = [0, 128], sizes = [128, 32], strides = [1, 1]} : vector<128x160xf32> to vector<128x32xf32>
    %12 = arith.truncf %11 : vector<128x32xf32> to vector<128x32xbf16>
    %c0_7 = arith.constant 0 : index
    %c0_8 = arith.constant 0 : index
    %c0_9 = arith.constant 0 : index
    %13 = vector.load %arg4[%c0_7, %c0_8, %c0_9] : memref<18x32x128xbf16, #tpu.memory_space<vmem>>, vector<1x32x128xbf16>
    %14 = vector.shape_cast %13 : vector<1x32x128xbf16> to vector<32x128xbf16>
    %cst_10 = arith.constant dense<0.000000e+00> : vector<128x128xf32>
    %15 = tpu.matmul %12, %14, %cst_10 {dimension_numbers = #tpu.dot_dimension_numbers<[1], [0], [0], [1], [0, 0, 1, 1], [], []>} : vector<128x32xbf16>, vector<32x128xbf16>, vector<128x128xf32> -> vector<128x128xf32>
    %16 = arith.addf %10, %15 : vector<128x128xf32>
    %cst_11 = arith.constant 0.000000e+00 : f32
    %17 = vector.broadcast %cst_11 : f32 to vector<128x128xf32>
    %18 = arith.maximumf %16, %17 : vector<128x128xf32>
    %19 = arith.truncf %18 : vector<128x128xf32> to vector<128x128xbf16>
    %c1 = arith.constant 1 : index
    %c0_12 = arith.constant 0 : index
    %c0_13 = arith.constant 0 : index
    %20 = vector.load %arg2[%c1, %c0_12, %c0_13] : memref<18x160x128xbf16, #tpu.memory_space<vmem>>, vector<1x160x128xbf16>
    %21 = vector.shape_cast %20 : vector<1x160x128xbf16> to vector<160x128xbf16>
    %cst_14 = arith.constant dense<0.000000e+00> : vector<128x160xf32>
    %22 = tpu.matmul %19, %21, %cst_14 {dimension_numbers = #tpu.dot_dimension_numbers<[1], [1], [0], [0], [0, 0, 1, 0], [], []>} : vector<128x128xbf16>, vector<160x128xbf16>, vector<128x160xf32> -> vector<128x160xf32>
    %23 = vector.extract_strided_slice %22 {offsets = [0, 0], sizes = [128, 128], strides = [1, 1]} : vector<128x160xf32> to vector<128x128xf32>
    %c1_15 = arith.constant 1 : index
    %c0_16 = arith.constant 0 : index
    %c0_17 = arith.constant 0 : index
    %24 = vector.load %arg3[%c1_15, %c0_16, %c0_17] : memref<18x1x128xbf16, #tpu.memory_space<vmem>>, vector<1x1x128xbf16>
    %25 = vector.shape_cast %24 : vector<1x1x128xbf16> to vector<1x128xbf16>
    %26 = arith.extf %25 : vector<1x128xbf16> to vector<1x128xf32>
    %27 = vector.broadcast %26 : vector<1x128xf32> to vector<128x128xf32>
    %28 = arith.addf %23, %27 : vector<128x128xf32>
    %29 = vector.extract_strided_slice %22 {offsets = [0, 128], sizes = [128, 32], strides = [1, 1]} : vector<128x160xf32> to vector<128x32xf32>
    %30 = arith.truncf %29 : vector<128x32xf32> to vector<128x32xbf16>
    %c1_18 = arith.constant 1 : index
    %c0_19 = arith.constant 0 : index
    %c0_20 = arith.constant 0 : index
    %31 = vector.load %arg4[%c1_18, %c0_19, %c0_20] : memref<18x32x128xbf16, #tpu.memory_space<vmem>>, vector<1x32x128xbf16>
    %32 = vector.shape_cast %31 : vector<1x32x128xbf16> to vector<32x128xbf16>
    %cst_21 = arith.constant dense<0.000000e+00> : vector<128x128xf32>
    %33 = tpu.matmul %30, %32, %cst_21 {dimension_numbers = #tpu.dot_dimension_numbers<[1], [0], [0], [1], [0, 0, 1, 1], [], []>} : vector<128x32xbf16>, vector<32x128xbf16>, vector<128x128xf32> -> vector<128x128xf32>
    %34 = arith.addf %28, %33 : vector<128x128xf32>
    %cst_22 = arith.constant 0.000000e+00 : f32
    %35 = vector.broadcast %cst_22 : f32 to vector<128x128xf32>
    %36 = arith.maximumf %34, %35 : vector<128x128xf32>
    %37 = arith.truncf %36 : vector<128x128xf32> to vector<128x128xbf16>
    %c2 = arith.constant 2 : index
    %c0_23 = arith.constant 0 : index
    %c0_24 = arith.constant 0 : index
    %38 = vector.load %arg2[%c2, %c0_23, %c0_24] : memref<18x160x128xbf16, #tpu.memory_space<vmem>>, vector<1x160x128xbf16>
    %39 = vector.shape_cast %38 : vector<1x160x128xbf16> to vector<160x128xbf16>
    %cst_25 = arith.constant dense<0.000000e+00> : vector<128x160xf32>
    %40 = tpu.matmul %37, %39, %cst_25 {dimension_numbers = #tpu.dot_dimension_numbers<[1], [1], [0], [0], [0, 0, 1, 0], [], []>} : vector<128x128xbf16>, vector<160x128xbf16>, vector<128x160xf32> -> vector<128x160xf32>
    %41 = vector.extract_strided_slice %40 {offsets = [0, 0], sizes = [128, 128], strides = [1, 1]} : vector<128x160xf32> to vector<128x128xf32>
    %c2_26 = arith.constant 2 : index
    %c0_27 = arith.constant 0 : index
    %c0_28 = arith.constant 0 : index
    %42 = vector.load %arg3[%c2_26, %c0_27, %c0_28] : memref<18x1x128xbf16, #tpu.memory_space<vmem>>, vector<1x1x128xbf16>
    %43 = vector.shape_cast %42 : vector<1x1x128xbf16> to vector<1x128xbf16>
    %44 = arith.extf %43 : vector<1x128xbf16> to vector<1x128xf32>
    %45 = vector.broadcast %44 : vector<1x128xf32> to vector<128x128xf32>
    %46 = arith.addf %41, %45 : vector<128x128xf32>
    %47 = vector.extract_strided_slice %40 {offsets = [0, 128], sizes = [128, 32], strides = [1, 1]} : vector<128x160xf32> to vector<128x32xf32>
    %48 = arith.truncf %47 : vector<128x32xf32> to vector<128x32xbf16>
    %c2_29 = arith.constant 2 : index
    %c0_30 = arith.constant 0 : index
    %c0_31 = arith.constant 0 : index
    %49 = vector.load %arg4[%c2_29, %c0_30, %c0_31] : memref<18x32x128xbf16, #tpu.memory_space<vmem>>, vector<1x32x128xbf16>
    %50 = vector.shape_cast %49 : vector<1x32x128xbf16> to vector<32x128xbf16>
    %cst_32 = arith.constant dense<0.000000e+00> : vector<128x128xf32>
    %51 = tpu.matmul %48, %50, %cst_32 {dimension_numbers = #tpu.dot_dimension_numbers<[1], [0], [0], [1], [0, 0, 1, 1], [], []>} : vector<128x32xbf16>, vector<32x128xbf16>, vector<128x128xf32> -> vector<128x128xf32>
    %52 = arith.addf %46, %51 : vector<128x128xf32>
    %53 = arith.addf %52, %0 : vector<128x128xf32>
    %c0_33 = arith.constant 0 : index
    %c0_34 = arith.constant 0 : index
    %c0_35 = arith.constant 0 : index
    %54 = vector.load %arg5[%c0_33, %c0_34, %c0_35] : memref<5x1x128xf32, #tpu.memory_space<vmem>>, vector<1x1x128xf32>
    %55 = vector.shape_cast %54 : vector<1x1x128xf32> to vector<1x128xf32>
    %c0_36 = arith.constant 0 : index
    %c0_37 = arith.constant 0 : index
    %c0_38 = arith.constant 0 : index
    %56 = vector.load %arg6[%c0_36, %c0_37, %c0_38] : memref<5x1x128xf32, #tpu.memory_space<vmem>>, vector<1x1x128xf32>
    %57 = vector.shape_cast %56 : vector<1x1x128xf32> to vector<1x128xf32>
    %cst_39 = arith.constant dense<0.000000e+00> : vector<128xf32>
    %58 = vector.multi_reduction <add>, %53, %cst_39 [1] : vector<128x128xf32> to vector<128xf32>
    %59 = vector.shape_cast %58 : vector<128xf32> to vector<128x1xf32>
    %cst_40 = arith.constant 1.280000e+02 : f32
    %60 = vector.broadcast %cst_40 : f32 to vector<128x1xf32>
    %61 = arith.divf %59, %60 : vector<128x1xf32>
    %62 = arith.mulf %53, %53 : vector<128x128xf32>
    %cst_41 = arith.constant dense<0.000000e+00> : vector<128xf32>
    %63 = vector.multi_reduction <add>, %62, %cst_41 [1] : vector<128x128xf32> to vector<128xf32>
    %64 = vector.shape_cast %63 : vector<128xf32> to vector<128x1xf32>
    %cst_42 = arith.constant 1.280000e+02 : f32
    %65 = vector.broadcast %cst_42 : f32 to vector<128x1xf32>
    %66 = arith.divf %64, %65 : vector<128x1xf32>
    %67 = arith.mulf %61, %61 : vector<128x1xf32>
    %68 = arith.subf %66, %67 : vector<128x1xf32>
    %cst_43 = arith.constant 0.000000e+00 : f32
    %69 = vector.broadcast %cst_43 : f32 to vector<128x1xf32>
    %70 = arith.maximumf %68, %69 : vector<128x1xf32>
    %71 = vector.broadcast %61 : vector<128x1xf32> to vector<128x128xf32>
    %72 = arith.subf %53, %71 : vector<128x128xf32>
    %cst_44 = arith.constant 9.99999974E-6 : f32
    %73 = vector.broadcast %cst_44 : f32 to vector<128x1xf32>
    %74 = arith.addf %70, %73 : vector<128x1xf32>
    %75 = math.rsqrt %74 : vector<128x1xf32>
    %76 = vector.broadcast %75 : vector<128x1xf32> to vector<128x128xf32>
    %77 = arith.mulf %72, %76 : vector<128x128xf32>
    %78 = vector.broadcast %55 : vector<1x128xf32> to vector<128x128xf32>
    %79 = arith.mulf %77, %78 : vector<128x128xf32>
    %80 = vector.broadcast %57 : vector<1x128xf32> to vector<128x128xf32>
    %81 = arith.addf %79, %80 : vector<128x128xf32>
    %82 = arith.truncf %81 : vector<128x128xf32> to vector<128x128xbf16>
    %c3 = arith.constant 3 : index
    %c0_45 = arith.constant 0 : index
    %c0_46 = arith.constant 0 : index
    %83 = vector.load %arg2[%c3, %c0_45, %c0_46] : memref<18x160x128xbf16, #tpu.memory_space<vmem>>, vector<1x160x128xbf16>
    %84 = vector.shape_cast %83 : vector<1x160x128xbf16> to vector<160x128xbf16>
    %cst_47 = arith.constant dense<0.000000e+00> : vector<128x160xf32>
    %85 = tpu.matmul %82, %84, %cst_47 {dimension_numbers = #tpu.dot_dimension_numbers<[1], [1], [0], [0], [0, 0, 1, 0], [], []>} : vector<128x128xbf16>, vector<160x128xbf16>, vector<128x160xf32> -> vector<128x160xf32>
    %86 = vector.extract_strided_slice %85 {offsets = [0, 0], sizes = [128, 128], strides = [1, 1]} : vector<128x160xf32> to vector<128x128xf32>
    %c3_48 = arith.constant 3 : index
    %c0_49 = arith.constant 0 : index
    %c0_50 = arith.constant 0 : index
    %87 = vector.load %arg3[%c3_48, %c0_49, %c0_50] : memref<18x1x128xbf16, #tpu.memory_space<vmem>>, vector<1x1x128xbf16>
    %88 = vector.shape_cast %87 : vector<1x1x128xbf16> to vector<1x128xbf16>
    %89 = arith.extf %88 : vector<1x128xbf16> to vector<1x128xf32>
    %90 = vector.broadcast %89 : vector<1x128xf32> to vector<128x128xf32>
    %91 = arith.addf %86, %90 : vector<128x128xf32>
    %92 = vector.extract_strided_slice %85 {offsets = [0, 128], sizes = [128, 32], strides = [1, 1]} : vector<128x160xf32> to vector<128x32xf32>
    %93 = arith.truncf %92 : vector<128x32xf32> to vector<128x32xbf16>
    %c3_51 = arith.constant 3 : index
    %c0_52 = arith.constant 0 : index
    %c0_53 = arith.constant 0 : index
    %94 = vector.load %arg4[%c3_51, %c0_52, %c0_53] : memref<18x32x128xbf16, #tpu.memory_space<vmem>>, vector<1x32x128xbf16>
    %95 = vector.shape_cast %94 : vector<1x32x128xbf16> to vector<32x128xbf16>
    %cst_54 = arith.constant dense<0.000000e+00> : vector<128x128xf32>
    %96 = tpu.matmul %93, %95, %cst_54 {dimension_numbers = #tpu.dot_dimension_numbers<[1], [0], [0], [1], [0, 0, 1, 1], [], []>} : vector<128x32xbf16>, vector<32x128xbf16>, vector<128x128xf32> -> vector<128x128xf32>
    %97 = arith.addf %91, %96 : vector<128x128xf32>
    %cst_55 = arith.constant 0.000000e+00 : f32
    %98 = vector.broadcast %cst_55 : f32 to vector<128x128xf32>
    %99 = arith.maximumf %97, %98 : vector<128x128xf32>
    %100 = arith.truncf %99 : vector<128x128xf32> to vector<128x128xbf16>
    %c4 = arith.constant 4 : index
    %c0_56 = arith.constant 0 : index
    %c0_57 = arith.constant 0 : index
    %101 = vector.load %arg2[%c4, %c0_56, %c0_57] : memref<18x160x128xbf16, #tpu.memory_space<vmem>>, vector<1x160x128xbf16>
    %102 = vector.shape_cast %101 : vector<1x160x128xbf16> to vector<160x128xbf16>
    %cst_58 = arith.constant dense<0.000000e+00> : vector<128x160xf32>
    %103 = tpu.matmul %100, %102, %cst_58 {dimension_numbers = #tpu.dot_dimension_numbers<[1], [1], [0], [0], [0, 0, 1, 0], [], []>} : vector<128x128xbf16>, vector<160x128xbf16>, vector<128x160xf32> -> vector<128x160xf32>
    %104 = vector.extract_strided_slice %103 {offsets = [0, 0], sizes = [128, 128], strides = [1, 1]} : vector<128x160xf32> to vector<128x128xf32>
    %c4_59 = arith.constant 4 : index
    %c0_60 = arith.constant 0 : index
    %c0_61 = arith.constant 0 : index
    %105 = vector.load %arg3[%c4_59, %c0_60, %c0_61] : memref<18x1x128xbf16, #tpu.memory_space<vmem>>, vector<1x1x128xbf16>
    %106 = vector.shape_cast %105 : vector<1x1x128xbf16> to vector<1x128xbf16>
    %107 = arith.extf %106 : vector<1x128xbf16> to vector<1x128xf32>
    %108 = vector.broadcast %107 : vector<1x128xf32> to vector<128x128xf32>
    %109 = arith.addf %104, %108 : vector<128x128xf32>
    %110 = vector.extract_strided_slice %103 {offsets = [0, 128], sizes = [128, 32], strides = [1, 1]} : vector<128x160xf32> to vector<128x32xf32>
    %111 = arith.truncf %110 : vector<128x32xf32> to vector<128x32xbf16>
    %c4_62 = arith.constant 4 : index
    %c0_63 = arith.constant 0 : index
    %c0_64 = arith.constant 0 : index
    %112 = vector.load %arg4[%c4_62, %c0_63, %c0_64] : memref<18x32x128xbf16, #tpu.memory_space<vmem>>, vector<1x32x128xbf16>
    %113 = vector.shape_cast %112 : vector<1x32x128xbf16> to vector<32x128xbf16>
    %cst_65 = arith.constant dense<0.000000e+00> : vector<128x128xf32>
    %114 = tpu.matmul %111, %113, %cst_65 {dimension_numbers = #tpu.dot_dimension_numbers<[1], [0], [0], [1], [0, 0, 1, 1], [], []>} : vector<128x32xbf16>, vector<32x128xbf16>, vector<128x128xf32> -> vector<128x128xf32>
    %115 = arith.addf %109, %114 : vector<128x128xf32>
    %cst_66 = arith.constant 0.000000e+00 : f32
    %116 = vector.broadcast %cst_66 : f32 to vector<128x128xf32>
    %117 = arith.maximumf %115, %116 : vector<128x128xf32>
    %118 = arith.truncf %117 : vector<128x128xf32> to vector<128x128xbf16>
    %c5 = arith.constant 5 : index
    %c0_67 = arith.constant 0 : index
    %c0_68 = arith.constant 0 : index
    %119 = vector.load %arg2[%c5, %c0_67, %c0_68] : memref<18x160x128xbf16, #tpu.memory_space<vmem>>, vector<1x160x128xbf16>
    %120 = vector.shape_cast %119 : vector<1x160x128xbf16> to vector<160x128xbf16>
    %cst_69 = arith.constant dense<0.000000e+00> : vector<128x160xf32>
    %121 = tpu.matmul %118, %120, %cst_69 {dimension_numbers = #tpu.dot_dimension_numbers<[1], [1], [0], [0], [0, 0, 1, 0], [], []>} : vector<128x128xbf16>, vector<160x128xbf16>, vector<128x160xf32> -> vector<128x160xf32>
    %122 = vector.extract_strided_slice %121 {offsets = [0, 0], sizes = [128, 128], strides = [1, 1]} : vector<128x160xf32> to vector<128x128xf32>
    %c5_70 = arith.constant 5 : index
    %c0_71 = arith.constant 0 : index
    %c0_72 = arith.constant 0 : index
    %123 = vector.load %arg3[%c5_70, %c0_71, %c0_72] : memref<18x1x128xbf16, #tpu.memory_space<vmem>>, vector<1x1x128xbf16>
    %124 = vector.shape_cast %123 : vector<1x1x128xbf16> to vector<1x128xbf16>
    %125 = arith.extf %124 : vector<1x128xbf16> to vector<1x128xf32>
    %126 = vector.broadcast %125 : vector<1x128xf32> to vector<128x128xf32>
    %127 = arith.addf %122, %126 : vector<128x128xf32>
    %128 = vector.extract_strided_slice %121 {offsets = [0, 128], sizes = [128, 32], strides = [1, 1]} : vector<128x160xf32> to vector<128x32xf32>
    %129 = arith.truncf %128 : vector<128x32xf32> to vector<128x32xbf16>
    %c5_73 = arith.constant 5 : index
    %c0_74 = arith.constant 0 : index
    %c0_75 = arith.constant 0 : index
    %130 = vector.load %arg4[%c5_73, %c0_74, %c0_75] : memref<18x32x128xbf16, #tpu.memory_space<vmem>>, vector<1x32x128xbf16>
    %131 = vector.shape_cast %130 : vector<1x32x128xbf16> to vector<32x128xbf16>
    %cst_76 = arith.constant dense<0.000000e+00> : vector<128x128xf32>
    %132 = tpu.matmul %129, %131, %cst_76 {dimension_numbers = #tpu.dot_dimension_numbers<[1], [0], [0], [1], [0, 0, 1, 1], [], []>} : vector<128x32xbf16>, vector<32x128xbf16>, vector<128x128xf32> -> vector<128x128xf32>
    %133 = arith.addf %127, %132 : vector<128x128xf32>
    %134 = arith.addf %133, %81 : vector<128x128xf32>
    %c1_77 = arith.constant 1 : index
    %c0_78 = arith.constant 0 : index
    %c0_79 = arith.constant 0 : index
    %135 = vector.load %arg5[%c1_77, %c0_78, %c0_79] : memref<5x1x128xf32, #tpu.memory_space<vmem>>, vector<1x1x128xf32>
    %136 = vector.shape_cast %135 : vector<1x1x128xf32> to vector<1x128xf32>
    %c1_80 = arith.constant 1 : index
    %c0_81 = arith.constant 0 : index
    %c0_82 = arith.constant 0 : index
    %137 = vector.load %arg6[%c1_80, %c0_81, %c0_82] : memref<5x1x128xf32, #tpu.memory_space<vmem>>, vector<1x1x128xf32>
    %138 = vector.shape_cast %137 : vector<1x1x128xf32> to vector<1x128xf32>
    %cst_83 = arith.constant dense<0.000000e+00> : vector<128xf32>
    %139 = vector.multi_reduction <add>, %134, %cst_83 [1] : vector<128x128xf32> to vector<128xf32>
    %140 = vector.shape_cast %139 : vector<128xf32> to vector<128x1xf32>
    %cst_84 = arith.constant 1.280000e+02 : f32
    %141 = vector.broadcast %cst_84 : f32 to vector<128x1xf32>
    %142 = arith.divf %140, %141 : vector<128x1xf32>
    %143 = arith.mulf %134, %134 : vector<128x128xf32>
    %cst_85 = arith.constant dense<0.000000e+00> : vector<128xf32>
    %144 = vector.multi_reduction <add>, %143, %cst_85 [1] : vector<128x128xf32> to vector<128xf32>
    %145 = vector.shape_cast %144 : vector<128xf32> to vector<128x1xf32>
    %cst_86 = arith.constant 1.280000e+02 : f32
    %146 = vector.broadcast %cst_86 : f32 to vector<128x1xf32>
    %147 = arith.divf %145, %146 : vector<128x1xf32>
    %148 = arith.mulf %142, %142 : vector<128x1xf32>
    %149 = arith.subf %147, %148 : vector<128x1xf32>
    %cst_87 = arith.constant 0.000000e+00 : f32
    %150 = vector.broadcast %cst_87 : f32 to vector<128x1xf32>
    %151 = arith.maximumf %149, %150 : vector<128x1xf32>
    %152 = vector.broadcast %142 : vector<128x1xf32> to vector<128x128xf32>
    %153 = arith.subf %134, %152 : vector<128x128xf32>
    %cst_88 = arith.constant 9.99999974E-6 : f32
    %154 = vector.broadcast %cst_88 : f32 to vector<128x1xf32>
    %155 = arith.addf %151, %154 : vector<128x1xf32>
    %156 = math.rsqrt %155 : vector<128x1xf32>
    %157 = vector.broadcast %156 : vector<128x1xf32> to vector<128x128xf32>
    %158 = arith.mulf %153, %157 : vector<128x128xf32>
    %159 = vector.broadcast %136 : vector<1x128xf32> to vector<128x128xf32>
    %160 = arith.mulf %158, %159 : vector<128x128xf32>
    %161 = vector.broadcast %138 : vector<1x128xf32> to vector<128x128xf32>
    %162 = arith.addf %160, %161 : vector<128x128xf32>
    %163 = arith.truncf %162 : vector<128x128xf32> to vector<128x128xbf16>
    %c6 = arith.constant 6 : index
    %c0_89 = arith.constant 0 : index
    %c0_90 = arith.constant 0 : index
    %164 = vector.load %arg2[%c6, %c0_89, %c0_90] : memref<18x160x128xbf16, #tpu.memory_space<vmem>>, vector<1x160x128xbf16>
    %165 = vector.shape_cast %164 : vector<1x160x128xbf16> to vector<160x128xbf16>
    %cst_91 = arith.constant dense<0.000000e+00> : vector<128x160xf32>
    %166 = tpu.matmul %163, %165, %cst_91 {dimension_numbers = #tpu.dot_dimension_numbers<[1], [1], [0], [0], [0, 0, 1, 0], [], []>} : vector<128x128xbf16>, vector<160x128xbf16>, vector<128x160xf32> -> vector<128x160xf32>
    %167 = vector.extract_strided_slice %166 {offsets = [0, 0], sizes = [128, 128], strides = [1, 1]} : vector<128x160xf32> to vector<128x128xf32>
    %c6_92 = arith.constant 6 : index
    %c0_93 = arith.constant 0 : index
    %c0_94 = arith.constant 0 : index
    %168 = vector.load %arg3[%c6_92, %c0_93, %c0_94] : memref<18x1x128xbf16, #tpu.memory_space<vmem>>, vector<1x1x128xbf16>
    %169 = vector.shape_cast %168 : vector<1x1x128xbf16> to vector<1x128xbf16>
    %170 = arith.extf %169 : vector<1x128xbf16> to vector<1x128xf32>
    %171 = vector.broadcast %170 : vector<1x128xf32> to vector<128x128xf32>
    %172 = arith.addf %167, %171 : vector<128x128xf32>
    %173 = vector.extract_strided_slice %166 {offsets = [0, 128], sizes = [128, 32], strides = [1, 1]} : vector<128x160xf32> to vector<128x32xf32>
    %174 = arith.truncf %173 : vector<128x32xf32> to vector<128x32xbf16>
    %c6_95 = arith.constant 6 : index
    %c0_96 = arith.constant 0 : index
    %c0_97 = arith.constant 0 : index
    %175 = vector.load %arg4[%c6_95, %c0_96, %c0_97] : memref<18x32x128xbf16, #tpu.memory_space<vmem>>, vector<1x32x128xbf16>
    %176 = vector.shape_cast %175 : vector<1x32x128xbf16> to vector<32x128xbf16>
    %cst_98 = arith.constant dense<0.000000e+00> : vector<128x128xf32>
    %177 = tpu.matmul %174, %176, %cst_98 {dimension_numbers = #tpu.dot_dimension_numbers<[1], [0], [0], [1], [0, 0, 1, 1], [], []>} : vector<128x32xbf16>, vector<32x128xbf16>, vector<128x128xf32> -> vector<128x128xf32>
    %178 = arith.addf %172, %177 : vector<128x128xf32>
    %cst_99 = arith.constant 0.000000e+00 : f32
    %179 = vector.broadcast %cst_99 : f32 to vector<128x128xf32>
    %180 = arith.maximumf %178, %179 : vector<128x128xf32>
    %181 = arith.truncf %180 : vector<128x128xf32> to vector<128x128xbf16>
    %c7 = arith.constant 7 : index
    %c0_100 = arith.constant 0 : index
    %c0_101 = arith.constant 0 : index
    %182 = vector.load %arg2[%c7, %c0_100, %c0_101] : memref<18x160x128xbf16, #tpu.memory_space<vmem>>, vector<1x160x128xbf16>
    %183 = vector.shape_cast %182 : vector<1x160x128xbf16> to vector<160x128xbf16>
    %cst_102 = arith.constant dense<0.000000e+00> : vector<128x160xf32>
    %184 = tpu.matmul %181, %183, %cst_102 {dimension_numbers = #tpu.dot_dimension_numbers<[1], [1], [0], [0], [0, 0, 1, 0], [], []>} : vector<128x128xbf16>, vector<160x128xbf16>, vector<128x160xf32> -> vector<128x160xf32>
    %185 = vector.extract_strided_slice %184 {offsets = [0, 0], sizes = [128, 128], strides = [1, 1]} : vector<128x160xf32> to vector<128x128xf32>
    %c7_103 = arith.constant 7 : index
    %c0_104 = arith.constant 0 : index
    %c0_105 = arith.constant 0 : index
    %186 = vector.load %arg3[%c7_103, %c0_104, %c0_105] : memref<18x1x128xbf16, #tpu.memory_space<vmem>>, vector<1x1x128xbf16>
    %187 = vector.shape_cast %186 : vector<1x1x128xbf16> to vector<1x128xbf16>
    %188 = arith.extf %187 : vector<1x128xbf16> to vector<1x128xf32>
    %189 = vector.broadcast %188 : vector<1x128xf32> to vector<128x128xf32>
    %190 = arith.addf %185, %189 : vector<128x128xf32>
    %191 = vector.extract_strided_slice %184 {offsets = [0, 128], sizes = [128, 32], strides = [1, 1]} : vector<128x160xf32> to vector<128x32xf32>
    %192 = arith.truncf %191 : vector<128x32xf32> to vector<128x32xbf16>
    %c7_106 = arith.constant 7 : index
    %c0_107 = arith.constant 0 : index
    %c0_108 = arith.constant 0 : index
    %193 = vector.load %arg4[%c7_106, %c0_107, %c0_108] : memref<18x32x128xbf16, #tpu.memory_space<vmem>>, vector<1x32x128xbf16>
    %194 = vector.shape_cast %193 : vector<1x32x128xbf16> to vector<32x128xbf16>
    %cst_109 = arith.constant dense<0.000000e+00> : vector<128x128xf32>
    %195 = tpu.matmul %192, %194, %cst_109 {dimension_numbers = #tpu.dot_dimension_numbers<[1], [0], [0], [1], [0, 0, 1, 1], [], []>} : vector<128x32xbf16>, vector<32x128xbf16>, vector<128x128xf32> -> vector<128x128xf32>
    %196 = arith.addf %190, %195 : vector<128x128xf32>
    %cst_110 = arith.constant 0.000000e+00 : f32
    %197 = vector.broadcast %cst_110 : f32 to vector<128x128xf32>
    %198 = arith.maximumf %196, %197 : vector<128x128xf32>
    %199 = arith.truncf %198 : vector<128x128xf32> to vector<128x128xbf16>
    %c8 = arith.constant 8 : index
    %c0_111 = arith.constant 0 : index
    %c0_112 = arith.constant 0 : index
    %200 = vector.load %arg2[%c8, %c0_111, %c0_112] : memref<18x160x128xbf16, #tpu.memory_space<vmem>>, vector<1x160x128xbf16>
    %201 = vector.shape_cast %200 : vector<1x160x128xbf16> to vector<160x128xbf16>
    %cst_113 = arith.constant dense<0.000000e+00> : vector<128x160xf32>
    %202 = tpu.matmul %199, %201, %cst_113 {dimension_numbers = #tpu.dot_dimension_numbers<[1], [1], [0], [0], [0, 0, 1, 0], [], []>} : vector<128x128xbf16>, vector<160x128xbf16>, vector<128x160xf32> -> vector<128x160xf32>
    %203 = vector.extract_strided_slice %202 {offsets = [0, 0], sizes = [128, 128], strides = [1, 1]} : vector<128x160xf32> to vector<128x128xf32>
    %c8_114 = arith.constant 8 : index
    %c0_115 = arith.constant 0 : index
    %c0_116 = arith.constant 0 : index
    %204 = vector.load %arg3[%c8_114, %c0_115, %c0_116] : memref<18x1x128xbf16, #tpu.memory_space<vmem>>, vector<1x1x128xbf16>
    %205 = vector.shape_cast %204 : vector<1x1x128xbf16> to vector<1x128xbf16>
    %206 = arith.extf %205 : vector<1x128xbf16> to vector<1x128xf32>
    %207 = vector.broadcast %206 : vector<1x128xf32> to vector<128x128xf32>
    %208 = arith.addf %203, %207 : vector<128x128xf32>
    %209 = vector.extract_strided_slice %202 {offsets = [0, 128], sizes = [128, 32], strides = [1, 1]} : vector<128x160xf32> to vector<128x32xf32>
    %210 = arith.truncf %209 : vector<128x32xf32> to vector<128x32xbf16>
    %c8_117 = arith.constant 8 : index
    %c0_118 = arith.constant 0 : index
    %c0_119 = arith.constant 0 : index
    %211 = vector.load %arg4[%c8_117, %c0_118, %c0_119] : memref<18x32x128xbf16, #tpu.memory_space<vmem>>, vector<1x32x128xbf16>
    %212 = vector.shape_cast %211 : vector<1x32x128xbf16> to vector<32x128xbf16>
    %cst_120 = arith.constant dense<0.000000e+00> : vector<128x128xf32>
    %213 = tpu.matmul %210, %212, %cst_120 {dimension_numbers = #tpu.dot_dimension_numbers<[1], [0], [0], [1], [0, 0, 1, 1], [], []>} : vector<128x32xbf16>, vector<32x128xbf16>, vector<128x128xf32> -> vector<128x128xf32>
    %214 = arith.addf %208, %213 : vector<128x128xf32>
    %215 = arith.addf %214, %162 : vector<128x128xf32>
    %c2_121 = arith.constant 2 : index
    %c0_122 = arith.constant 0 : index
    %c0_123 = arith.constant 0 : index
    %216 = vector.load %arg5[%c2_121, %c0_122, %c0_123] : memref<5x1x128xf32, #tpu.memory_space<vmem>>, vector<1x1x128xf32>
    %217 = vector.shape_cast %216 : vector<1x1x128xf32> to vector<1x128xf32>
    %c2_124 = arith.constant 2 : index
    %c0_125 = arith.constant 0 : index
    %c0_126 = arith.constant 0 : index
    %218 = vector.load %arg6[%c2_124, %c0_125, %c0_126] : memref<5x1x128xf32, #tpu.memory_space<vmem>>, vector<1x1x128xf32>
    %219 = vector.shape_cast %218 : vector<1x1x128xf32> to vector<1x128xf32>
    %cst_127 = arith.constant dense<0.000000e+00> : vector<128xf32>
    %220 = vector.multi_reduction <add>, %215, %cst_127 [1] : vector<128x128xf32> to vector<128xf32>
    %221 = vector.shape_cast %220 : vector<128xf32> to vector<128x1xf32>
    %cst_128 = arith.constant 1.280000e+02 : f32
    %222 = vector.broadcast %cst_128 : f32 to vector<128x1xf32>
    %223 = arith.divf %221, %222 : vector<128x1xf32>
    %224 = arith.mulf %215, %215 : vector<128x128xf32>
    %cst_129 = arith.constant dense<0.000000e+00> : vector<128xf32>
    %225 = vector.multi_reduction <add>, %224, %cst_129 [1] : vector<128x128xf32> to vector<128xf32>
    %226 = vector.shape_cast %225 : vector<128xf32> to vector<128x1xf32>
    %cst_130 = arith.constant 1.280000e+02 : f32
    %227 = vector.broadcast %cst_130 : f32 to vector<128x1xf32>
    %228 = arith.divf %226, %227 : vector<128x1xf32>
    %229 = arith.mulf %223, %223 : vector<128x1xf32>
    %230 = arith.subf %228, %229 : vector<128x1xf32>
    %cst_131 = arith.constant 0.000000e+00 : f32
    %231 = vector.broadcast %cst_131 : f32 to vector<128x1xf32>
    %232 = arith.maximumf %230, %231 : vector<128x1xf32>
    %233 = vector.broadcast %223 : vector<128x1xf32> to vector<128x128xf32>
    %234 = arith.subf %215, %233 : vector<128x128xf32>
    %cst_132 = arith.constant 9.99999974E-6 : f32
    %235 = vector.broadcast %cst_132 : f32 to vector<128x1xf32>
    %236 = arith.addf %232, %235 : vector<128x1xf32>
    %237 = math.rsqrt %236 : vector<128x1xf32>
    %238 = vector.broadcast %237 : vector<128x1xf32> to vector<128x128xf32>
    %239 = arith.mulf %234, %238 : vector<128x128xf32>
    %240 = vector.broadcast %217 : vector<1x128xf32> to vector<128x128xf32>
    %241 = arith.mulf %239, %240 : vector<128x128xf32>
    %242 = vector.broadcast %219 : vector<1x128xf32> to vector<128x128xf32>
    %243 = arith.addf %241, %242 : vector<128x128xf32>
    %244 = arith.truncf %243 : vector<128x128xf32> to vector<128x128xbf16>
    %c9 = arith.constant 9 : index
    %c0_133 = arith.constant 0 : index
    %c0_134 = arith.constant 0 : index
    %245 = vector.load %arg2[%c9, %c0_133, %c0_134] : memref<18x160x128xbf16, #tpu.memory_space<vmem>>, vector<1x160x128xbf16>
    %246 = vector.shape_cast %245 : vector<1x160x128xbf16> to vector<160x128xbf16>
    %cst_135 = arith.constant dense<0.000000e+00> : vector<128x160xf32>
    %247 = tpu.matmul %244, %246, %cst_135 {dimension_numbers = #tpu.dot_dimension_numbers<[1], [1], [0], [0], [0, 0, 1, 0], [], []>} : vector<128x128xbf16>, vector<160x128xbf16>, vector<128x160xf32> -> vector<128x160xf32>
    %248 = vector.extract_strided_slice %247 {offsets = [0, 0], sizes = [128, 128], strides = [1, 1]} : vector<128x160xf32> to vector<128x128xf32>
    %c9_136 = arith.constant 9 : index
    %c0_137 = arith.constant 0 : index
    %c0_138 = arith.constant 0 : index
    %249 = vector.load %arg3[%c9_136, %c0_137, %c0_138] : memref<18x1x128xbf16, #tpu.memory_space<vmem>>, vector<1x1x128xbf16>
    %250 = vector.shape_cast %249 : vector<1x1x128xbf16> to vector<1x128xbf16>
    %251 = arith.extf %250 : vector<1x128xbf16> to vector<1x128xf32>
    %252 = vector.broadcast %251 : vector<1x128xf32> to vector<128x128xf32>
    %253 = arith.addf %248, %252 : vector<128x128xf32>
    %254 = vector.extract_strided_slice %247 {offsets = [0, 128], sizes = [128, 32], strides = [1, 1]} : vector<128x160xf32> to vector<128x32xf32>
    %255 = arith.truncf %254 : vector<128x32xf32> to vector<128x32xbf16>
    %c9_139 = arith.constant 9 : index
    %c0_140 = arith.constant 0 : index
    %c0_141 = arith.constant 0 : index
    %256 = vector.load %arg4[%c9_139, %c0_140, %c0_141] : memref<18x32x128xbf16, #tpu.memory_space<vmem>>, vector<1x32x128xbf16>
    %257 = vector.shape_cast %256 : vector<1x32x128xbf16> to vector<32x128xbf16>
    %cst_142 = arith.constant dense<0.000000e+00> : vector<128x128xf32>
    %258 = tpu.matmul %255, %257, %cst_142 {dimension_numbers = #tpu.dot_dimension_numbers<[1], [0], [0], [1], [0, 0, 1, 1], [], []>} : vector<128x32xbf16>, vector<32x128xbf16>, vector<128x128xf32> -> vector<128x128xf32>
    %259 = arith.addf %253, %258 : vector<128x128xf32>
    %cst_143 = arith.constant 0.000000e+00 : f32
    %260 = vector.broadcast %cst_143 : f32 to vector<128x128xf32>
    %261 = arith.maximumf %259, %260 : vector<128x128xf32>
    %262 = arith.truncf %261 : vector<128x128xf32> to vector<128x128xbf16>
    %c10 = arith.constant 10 : index
    %c0_144 = arith.constant 0 : index
    %c0_145 = arith.constant 0 : index
    %263 = vector.load %arg2[%c10, %c0_144, %c0_145] : memref<18x160x128xbf16, #tpu.memory_space<vmem>>, vector<1x160x128xbf16>
    %264 = vector.shape_cast %263 : vector<1x160x128xbf16> to vector<160x128xbf16>
    %cst_146 = arith.constant dense<0.000000e+00> : vector<128x160xf32>
    %265 = tpu.matmul %262, %264, %cst_146 {dimension_numbers = #tpu.dot_dimension_numbers<[1], [1], [0], [0], [0, 0, 1, 0], [], []>} : vector<128x128xbf16>, vector<160x128xbf16>, vector<128x160xf32> -> vector<128x160xf32>
    %266 = vector.extract_strided_slice %265 {offsets = [0, 0], sizes = [128, 128], strides = [1, 1]} : vector<128x160xf32> to vector<128x128xf32>
    %c10_147 = arith.constant 10 : index
    %c0_148 = arith.constant 0 : index
    %c0_149 = arith.constant 0 : index
    %267 = vector.load %arg3[%c10_147, %c0_148, %c0_149] : memref<18x1x128xbf16, #tpu.memory_space<vmem>>, vector<1x1x128xbf16>
    %268 = vector.shape_cast %267 : vector<1x1x128xbf16> to vector<1x128xbf16>
    %269 = arith.extf %268 : vector<1x128xbf16> to vector<1x128xf32>
    %270 = vector.broadcast %269 : vector<1x128xf32> to vector<128x128xf32>
    %271 = arith.addf %266, %270 : vector<128x128xf32>
    %272 = vector.extract_strided_slice %265 {offsets = [0, 128], sizes = [128, 32], strides = [1, 1]} : vector<128x160xf32> to vector<128x32xf32>
    %273 = arith.truncf %272 : vector<128x32xf32> to vector<128x32xbf16>
    %c10_150 = arith.constant 10 : index
    %c0_151 = arith.constant 0 : index
    %c0_152 = arith.constant 0 : index
    %274 = vector.load %arg4[%c10_150, %c0_151, %c0_152] : memref<18x32x128xbf16, #tpu.memory_space<vmem>>, vector<1x32x128xbf16>
    %275 = vector.shape_cast %274 : vector<1x32x128xbf16> to vector<32x128xbf16>
    %cst_153 = arith.constant dense<0.000000e+00> : vector<128x128xf32>
    %276 = tpu.matmul %273, %275, %cst_153 {dimension_numbers = #tpu.dot_dimension_numbers<[1], [0], [0], [1], [0, 0, 1, 1], [], []>} : vector<128x32xbf16>, vector<32x128xbf16>, vector<128x128xf32> -> vector<128x128xf32>
    %277 = arith.addf %271, %276 : vector<128x128xf32>
    %cst_154 = arith.constant 0.000000e+00 : f32
    %278 = vector.broadcast %cst_154 : f32 to vector<128x128xf32>
    %279 = arith.maximumf %277, %278 : vector<128x128xf32>
    %280 = arith.truncf %279 : vector<128x128xf32> to vector<128x128xbf16>
    %c11 = arith.constant 11 : index
    %c0_155 = arith.constant 0 : index
    %c0_156 = arith.constant 0 : index
    %281 = vector.load %arg2[%c11, %c0_155, %c0_156] : memref<18x160x128xbf16, #tpu.memory_space<vmem>>, vector<1x160x128xbf16>
    %282 = vector.shape_cast %281 : vector<1x160x128xbf16> to vector<160x128xbf16>
    %cst_157 = arith.constant dense<0.000000e+00> : vector<128x160xf32>
    %283 = tpu.matmul %280, %282, %cst_157 {dimension_numbers = #tpu.dot_dimension_numbers<[1], [1], [0], [0], [0, 0, 1, 0], [], []>} : vector<128x128xbf16>, vector<160x128xbf16>, vector<128x160xf32> -> vector<128x160xf32>
    %284 = vector.extract_strided_slice %283 {offsets = [0, 0], sizes = [128, 128], strides = [1, 1]} : vector<128x160xf32> to vector<128x128xf32>
    %c11_158 = arith.constant 11 : index
    %c0_159 = arith.constant 0 : index
    %c0_160 = arith.constant 0 : index
    %285 = vector.load %arg3[%c11_158, %c0_159, %c0_160] : memref<18x1x128xbf16, #tpu.memory_space<vmem>>, vector<1x1x128xbf16>
    %286 = vector.shape_cast %285 : vector<1x1x128xbf16> to vector<1x128xbf16>
    %287 = arith.extf %286 : vector<1x128xbf16> to vector<1x128xf32>
    %288 = vector.broadcast %287 : vector<1x128xf32> to vector<128x128xf32>
    %289 = arith.addf %284, %288 : vector<128x128xf32>
    %290 = vector.extract_strided_slice %283 {offsets = [0, 128], sizes = [128, 32], strides = [1, 1]} : vector<128x160xf32> to vector<128x32xf32>
    %291 = arith.truncf %290 : vector<128x32xf32> to vector<128x32xbf16>
    %c11_161 = arith.constant 11 : index
    %c0_162 = arith.constant 0 : index
    %c0_163 = arith.constant 0 : index
    %292 = vector.load %arg4[%c11_161, %c0_162, %c0_163] : memref<18x32x128xbf16, #tpu.memory_space<vmem>>, vector<1x32x128xbf16>
    %293 = vector.shape_cast %292 : vector<1x32x128xbf16> to vector<32x128xbf16>
    %cst_164 = arith.constant dense<0.000000e+00> : vector<128x128xf32>
    %294 = tpu.matmul %291, %293, %cst_164 {dimension_numbers = #tpu.dot_dimension_numbers<[1], [0], [0], [1], [0, 0, 1, 1], [], []>} : vector<128x32xbf16>, vector<32x128xbf16>, vector<128x128xf32> -> vector<128x128xf32>
    %295 = arith.addf %289, %294 : vector<128x128xf32>
    %296 = arith.addf %295, %243 : vector<128x128xf32>
    %c3_165 = arith.constant 3 : index
    %c0_166 = arith.constant 0 : index
    %c0_167 = arith.constant 0 : index
    %297 = vector.load %arg5[%c3_165, %c0_166, %c0_167] : memref<5x1x128xf32, #tpu.memory_space<vmem>>, vector<1x1x128xf32>
    %298 = vector.shape_cast %297 : vector<1x1x128xf32> to vector<1x128xf32>
    %c3_168 = arith.constant 3 : index
    %c0_169 = arith.constant 0 : index
    %c0_170 = arith.constant 0 : index
    %299 = vector.load %arg6[%c3_168, %c0_169, %c0_170] : memref<5x1x128xf32, #tpu.memory_space<vmem>>, vector<1x1x128xf32>
    %300 = vector.shape_cast %299 : vector<1x1x128xf32> to vector<1x128xf32>
    %cst_171 = arith.constant dense<0.000000e+00> : vector<128xf32>
    %301 = vector.multi_reduction <add>, %296, %cst_171 [1] : vector<128x128xf32> to vector<128xf32>
    %302 = vector.shape_cast %301 : vector<128xf32> to vector<128x1xf32>
    %cst_172 = arith.constant 1.280000e+02 : f32
    %303 = vector.broadcast %cst_172 : f32 to vector<128x1xf32>
    %304 = arith.divf %302, %303 : vector<128x1xf32>
    %305 = arith.mulf %296, %296 : vector<128x128xf32>
    %cst_173 = arith.constant dense<0.000000e+00> : vector<128xf32>
    %306 = vector.multi_reduction <add>, %305, %cst_173 [1] : vector<128x128xf32> to vector<128xf32>
    %307 = vector.shape_cast %306 : vector<128xf32> to vector<128x1xf32>
    %cst_174 = arith.constant 1.280000e+02 : f32
    %308 = vector.broadcast %cst_174 : f32 to vector<128x1xf32>
    %309 = arith.divf %307, %308 : vector<128x1xf32>
    %310 = arith.mulf %304, %304 : vector<128x1xf32>
    %311 = arith.subf %309, %310 : vector<128x1xf32>
    %cst_175 = arith.constant 0.000000e+00 : f32
    %312 = vector.broadcast %cst_175 : f32 to vector<128x1xf32>
    %313 = arith.maximumf %311, %312 : vector<128x1xf32>
    %314 = vector.broadcast %304 : vector<128x1xf32> to vector<128x128xf32>
    %315 = arith.subf %296, %314 : vector<128x128xf32>
    %cst_176 = arith.constant 9.99999974E-6 : f32
    %316 = vector.broadcast %cst_176 : f32 to vector<128x1xf32>
    %317 = arith.addf %313, %316 : vector<128x1xf32>
    %318 = math.rsqrt %317 : vector<128x1xf32>
    %319 = vector.broadcast %318 : vector<128x1xf32> to vector<128x128xf32>
    %320 = arith.mulf %315, %319 : vector<128x128xf32>
    %321 = vector.broadcast %298 : vector<1x128xf32> to vector<128x128xf32>
    %322 = arith.mulf %320, %321 : vector<128x128xf32>
    %323 = vector.broadcast %300 : vector<1x128xf32> to vector<128x128xf32>
    %324 = arith.addf %322, %323 : vector<128x128xf32>
    %325 = arith.truncf %324 : vector<128x128xf32> to vector<128x128xbf16>
    %c12 = arith.constant 12 : index
    %c0_177 = arith.constant 0 : index
    %c0_178 = arith.constant 0 : index
    %326 = vector.load %arg2[%c12, %c0_177, %c0_178] : memref<18x160x128xbf16, #tpu.memory_space<vmem>>, vector<1x160x128xbf16>
    %327 = vector.shape_cast %326 : vector<1x160x128xbf16> to vector<160x128xbf16>
    %cst_179 = arith.constant dense<0.000000e+00> : vector<128x160xf32>
    %328 = tpu.matmul %325, %327, %cst_179 {dimension_numbers = #tpu.dot_dimension_numbers<[1], [1], [0], [0], [0, 0, 1, 0], [], []>} : vector<128x128xbf16>, vector<160x128xbf16>, vector<128x160xf32> -> vector<128x160xf32>
    %329 = vector.extract_strided_slice %328 {offsets = [0, 0], sizes = [128, 128], strides = [1, 1]} : vector<128x160xf32> to vector<128x128xf32>
    %c12_180 = arith.constant 12 : index
    %c0_181 = arith.constant 0 : index
    %c0_182 = arith.constant 0 : index
    %330 = vector.load %arg3[%c12_180, %c0_181, %c0_182] : memref<18x1x128xbf16, #tpu.memory_space<vmem>>, vector<1x1x128xbf16>
    %331 = vector.shape_cast %330 : vector<1x1x128xbf16> to vector<1x128xbf16>
    %332 = arith.extf %331 : vector<1x128xbf16> to vector<1x128xf32>
    %333 = vector.broadcast %332 : vector<1x128xf32> to vector<128x128xf32>
    %334 = arith.addf %329, %333 : vector<128x128xf32>
    %335 = vector.extract_strided_slice %328 {offsets = [0, 128], sizes = [128, 32], strides = [1, 1]} : vector<128x160xf32> to vector<128x32xf32>
    %336 = arith.truncf %335 : vector<128x32xf32> to vector<128x32xbf16>
    %c12_183 = arith.constant 12 : index
    %c0_184 = arith.constant 0 : index
    %c0_185 = arith.constant 0 : index
    %337 = vector.load %arg4[%c12_183, %c0_184, %c0_185] : memref<18x32x128xbf16, #tpu.memory_space<vmem>>, vector<1x32x128xbf16>
    %338 = vector.shape_cast %337 : vector<1x32x128xbf16> to vector<32x128xbf16>
    %cst_186 = arith.constant dense<0.000000e+00> : vector<128x128xf32>
    %339 = tpu.matmul %336, %338, %cst_186 {dimension_numbers = #tpu.dot_dimension_numbers<[1], [0], [0], [1], [0, 0, 1, 1], [], []>} : vector<128x32xbf16>, vector<32x128xbf16>, vector<128x128xf32> -> vector<128x128xf32>
    %340 = arith.addf %334, %339 : vector<128x128xf32>
    %cst_187 = arith.constant 0.000000e+00 : f32
    %341 = vector.broadcast %cst_187 : f32 to vector<128x128xf32>
    %342 = arith.maximumf %340, %341 : vector<128x128xf32>
    %343 = arith.truncf %342 : vector<128x128xf32> to vector<128x128xbf16>
    %c13 = arith.constant 13 : index
    %c0_188 = arith.constant 0 : index
    %c0_189 = arith.constant 0 : index
    %344 = vector.load %arg2[%c13, %c0_188, %c0_189] : memref<18x160x128xbf16, #tpu.memory_space<vmem>>, vector<1x160x128xbf16>
    %345 = vector.shape_cast %344 : vector<1x160x128xbf16> to vector<160x128xbf16>
    %cst_190 = arith.constant dense<0.000000e+00> : vector<128x160xf32>
    %346 = tpu.matmul %343, %345, %cst_190 {dimension_numbers = #tpu.dot_dimension_numbers<[1], [1], [0], [0], [0, 0, 1, 0], [], []>} : vector<128x128xbf16>, vector<160x128xbf16>, vector<128x160xf32> -> vector<128x160xf32>
    %347 = vector.extract_strided_slice %346 {offsets = [0, 0], sizes = [128, 128], strides = [1, 1]} : vector<128x160xf32> to vector<128x128xf32>
    %c13_191 = arith.constant 13 : index
    %c0_192 = arith.constant 0 : index
    %c0_193 = arith.constant 0 : index
    %348 = vector.load %arg3[%c13_191, %c0_192, %c0_193] : memref<18x1x128xbf16, #tpu.memory_space<vmem>>, vector<1x1x128xbf16>
    %349 = vector.shape_cast %348 : vector<1x1x128xbf16> to vector<1x128xbf16>
    %350 = arith.extf %349 : vector<1x128xbf16> to vector<1x128xf32>
    %351 = vector.broadcast %350 : vector<1x128xf32> to vector<128x128xf32>
    %352 = arith.addf %347, %351 : vector<128x128xf32>
    %353 = vector.extract_strided_slice %346 {offsets = [0, 128], sizes = [128, 32], strides = [1, 1]} : vector<128x160xf32> to vector<128x32xf32>
    %354 = arith.truncf %353 : vector<128x32xf32> to vector<128x32xbf16>
    %c13_194 = arith.constant 13 : index
    %c0_195 = arith.constant 0 : index
    %c0_196 = arith.constant 0 : index
    %355 = vector.load %arg4[%c13_194, %c0_195, %c0_196] : memref<18x32x128xbf16, #tpu.memory_space<vmem>>, vector<1x32x128xbf16>
    %356 = vector.shape_cast %355 : vector<1x32x128xbf16> to vector<32x128xbf16>
    %cst_197 = arith.constant dense<0.000000e+00> : vector<128x128xf32>
    %357 = tpu.matmul %354, %356, %cst_197 {dimension_numbers = #tpu.dot_dimension_numbers<[1], [0], [0], [1], [0, 0, 1, 1], [], []>} : vector<128x32xbf16>, vector<32x128xbf16>, vector<128x128xf32> -> vector<128x128xf32>
    %358 = arith.addf %352, %357 : vector<128x128xf32>
    %cst_198 = arith.constant 0.000000e+00 : f32
    %359 = vector.broadcast %cst_198 : f32 to vector<128x128xf32>
    %360 = arith.maximumf %358, %359 : vector<128x128xf32>
    %361 = arith.truncf %360 : vector<128x128xf32> to vector<128x128xbf16>
    %c14 = arith.constant 14 : index
    %c0_199 = arith.constant 0 : index
    %c0_200 = arith.constant 0 : index
    %362 = vector.load %arg2[%c14, %c0_199, %c0_200] : memref<18x160x128xbf16, #tpu.memory_space<vmem>>, vector<1x160x128xbf16>
    %363 = vector.shape_cast %362 : vector<1x160x128xbf16> to vector<160x128xbf16>
    %cst_201 = arith.constant dense<0.000000e+00> : vector<128x160xf32>
    %364 = tpu.matmul %361, %363, %cst_201 {dimension_numbers = #tpu.dot_dimension_numbers<[1], [1], [0], [0], [0, 0, 1, 0], [], []>} : vector<128x128xbf16>, vector<160x128xbf16>, vector<128x160xf32> -> vector<128x160xf32>
    %365 = vector.extract_strided_slice %364 {offsets = [0, 0], sizes = [128, 128], strides = [1, 1]} : vector<128x160xf32> to vector<128x128xf32>
    %c14_202 = arith.constant 14 : index
    %c0_203 = arith.constant 0 : index
    %c0_204 = arith.constant 0 : index
    %366 = vector.load %arg3[%c14_202, %c0_203, %c0_204] : memref<18x1x128xbf16, #tpu.memory_space<vmem>>, vector<1x1x128xbf16>
    %367 = vector.shape_cast %366 : vector<1x1x128xbf16> to vector<1x128xbf16>
    %368 = arith.extf %367 : vector<1x128xbf16> to vector<1x128xf32>
    %369 = vector.broadcast %368 : vector<1x128xf32> to vector<128x128xf32>
    %370 = arith.addf %365, %369 : vector<128x128xf32>
    %371 = vector.extract_strided_slice %364 {offsets = [0, 128], sizes = [128, 32], strides = [1, 1]} : vector<128x160xf32> to vector<128x32xf32>
    %372 = arith.truncf %371 : vector<128x32xf32> to vector<128x32xbf16>
    %c14_205 = arith.constant 14 : index
    %c0_206 = arith.constant 0 : index
    %c0_207 = arith.constant 0 : index
    %373 = vector.load %arg4[%c14_205, %c0_206, %c0_207] : memref<18x32x128xbf16, #tpu.memory_space<vmem>>, vector<1x32x128xbf16>
    %374 = vector.shape_cast %373 : vector<1x32x128xbf16> to vector<32x128xbf16>
    %cst_208 = arith.constant dense<0.000000e+00> : vector<128x128xf32>
    %375 = tpu.matmul %372, %374, %cst_208 {dimension_numbers = #tpu.dot_dimension_numbers<[1], [0], [0], [1], [0, 0, 1, 1], [], []>} : vector<128x32xbf16>, vector<32x128xbf16>, vector<128x128xf32> -> vector<128x128xf32>
    %376 = arith.addf %370, %375 : vector<128x128xf32>
    %377 = arith.addf %376, %324 : vector<128x128xf32>
    %c4_209 = arith.constant 4 : index
    %c0_210 = arith.constant 0 : index
    %c0_211 = arith.constant 0 : index
    %378 = vector.load %arg5[%c4_209, %c0_210, %c0_211] : memref<5x1x128xf32, #tpu.memory_space<vmem>>, vector<1x1x128xf32>
    %379 = vector.shape_cast %378 : vector<1x1x128xf32> to vector<1x128xf32>
    %c4_212 = arith.constant 4 : index
    %c0_213 = arith.constant 0 : index
    %c0_214 = arith.constant 0 : index
    %380 = vector.load %arg6[%c4_212, %c0_213, %c0_214] : memref<5x1x128xf32, #tpu.memory_space<vmem>>, vector<1x1x128xf32>
    %381 = vector.shape_cast %380 : vector<1x1x128xf32> to vector<1x128xf32>
    %cst_215 = arith.constant dense<0.000000e+00> : vector<128xf32>
    %382 = vector.multi_reduction <add>, %377, %cst_215 [1] : vector<128x128xf32> to vector<128xf32>
    %383 = vector.shape_cast %382 : vector<128xf32> to vector<128x1xf32>
    %cst_216 = arith.constant 1.280000e+02 : f32
    %384 = vector.broadcast %cst_216 : f32 to vector<128x1xf32>
    %385 = arith.divf %383, %384 : vector<128x1xf32>
    %386 = arith.mulf %377, %377 : vector<128x128xf32>
    %cst_217 = arith.constant dense<0.000000e+00> : vector<128xf32>
    %387 = vector.multi_reduction <add>, %386, %cst_217 [1] : vector<128x128xf32> to vector<128xf32>
    %388 = vector.shape_cast %387 : vector<128xf32> to vector<128x1xf32>
    %cst_218 = arith.constant 1.280000e+02 : f32
    %389 = vector.broadcast %cst_218 : f32 to vector<128x1xf32>
    %390 = arith.divf %388, %389 : vector<128x1xf32>
    %391 = arith.mulf %385, %385 : vector<128x1xf32>
    %392 = arith.subf %390, %391 : vector<128x1xf32>
    %cst_219 = arith.constant 0.000000e+00 : f32
    %393 = vector.broadcast %cst_219 : f32 to vector<128x1xf32>
    %394 = arith.maximumf %392, %393 : vector<128x1xf32>
    %395 = vector.broadcast %385 : vector<128x1xf32> to vector<128x128xf32>
    %396 = arith.subf %377, %395 : vector<128x128xf32>
    %cst_220 = arith.constant 9.99999974E-6 : f32
    %397 = vector.broadcast %cst_220 : f32 to vector<128x1xf32>
    %398 = arith.addf %394, %397 : vector<128x1xf32>
    %399 = math.rsqrt %398 : vector<128x1xf32>
    %400 = vector.broadcast %399 : vector<128x1xf32> to vector<128x128xf32>
    %401 = arith.mulf %396, %400 : vector<128x128xf32>
    %402 = vector.broadcast %379 : vector<1x128xf32> to vector<128x128xf32>
    %403 = arith.mulf %401, %402 : vector<128x128xf32>
    %404 = vector.broadcast %381 : vector<1x128xf32> to vector<128x128xf32>
    %405 = arith.addf %403, %404 : vector<128x128xf32>
    %406 = arith.truncf %405 : vector<128x128xf32> to vector<128x128xbf16>
    %c15 = arith.constant 15 : index
    %c0_221 = arith.constant 0 : index
    %c0_222 = arith.constant 0 : index
    %407 = vector.load %arg2[%c15, %c0_221, %c0_222] : memref<18x160x128xbf16, #tpu.memory_space<vmem>>, vector<1x160x128xbf16>
    %408 = vector.shape_cast %407 : vector<1x160x128xbf16> to vector<160x128xbf16>
    %cst_223 = arith.constant dense<0.000000e+00> : vector<128x160xf32>
    %409 = tpu.matmul %406, %408, %cst_223 {dimension_numbers = #tpu.dot_dimension_numbers<[1], [1], [0], [0], [0, 0, 1, 0], [], []>} : vector<128x128xbf16>, vector<160x128xbf16>, vector<128x160xf32> -> vector<128x160xf32>
    %410 = vector.extract_strided_slice %409 {offsets = [0, 0], sizes = [128, 128], strides = [1, 1]} : vector<128x160xf32> to vector<128x128xf32>
    %c15_224 = arith.constant 15 : index
    %c0_225 = arith.constant 0 : index
    %c0_226 = arith.constant 0 : index
    %411 = vector.load %arg3[%c15_224, %c0_225, %c0_226] : memref<18x1x128xbf16, #tpu.memory_space<vmem>>, vector<1x1x128xbf16>
    %412 = vector.shape_cast %411 : vector<1x1x128xbf16> to vector<1x128xbf16>
    %413 = arith.extf %412 : vector<1x128xbf16> to vector<1x128xf32>
    %414 = vector.broadcast %413 : vector<1x128xf32> to vector<128x128xf32>
    %415 = arith.addf %410, %414 : vector<128x128xf32>
    %416 = vector.extract_strided_slice %409 {offsets = [0, 128], sizes = [128, 32], strides = [1, 1]} : vector<128x160xf32> to vector<128x32xf32>
    %417 = arith.truncf %416 : vector<128x32xf32> to vector<128x32xbf16>
    %c15_227 = arith.constant 15 : index
    %c0_228 = arith.constant 0 : index
    %c0_229 = arith.constant 0 : index
    %418 = vector.load %arg4[%c15_227, %c0_228, %c0_229] : memref<18x32x128xbf16, #tpu.memory_space<vmem>>, vector<1x32x128xbf16>
    %419 = vector.shape_cast %418 : vector<1x32x128xbf16> to vector<32x128xbf16>
    %cst_230 = arith.constant dense<0.000000e+00> : vector<128x128xf32>
    %420 = tpu.matmul %417, %419, %cst_230 {dimension_numbers = #tpu.dot_dimension_numbers<[1], [0], [0], [1], [0, 0, 1, 1], [], []>} : vector<128x32xbf16>, vector<32x128xbf16>, vector<128x128xf32> -> vector<128x128xf32>
    %421 = arith.addf %415, %420 : vector<128x128xf32>
    %cst_231 = arith.constant 0.000000e+00 : f32
    %422 = vector.broadcast %cst_231 : f32 to vector<128x128xf32>
    %423 = arith.maximumf %421, %422 : vector<128x128xf32>
    %424 = arith.truncf %423 : vector<128x128xf32> to vector<128x128xbf16>
    %c16 = arith.constant 16 : index
    %c0_232 = arith.constant 0 : index
    %c0_233 = arith.constant 0 : index
    %425 = vector.load %arg2[%c16, %c0_232, %c0_233] : memref<18x160x128xbf16, #tpu.memory_space<vmem>>, vector<1x160x128xbf16>
    %426 = vector.shape_cast %425 : vector<1x160x128xbf16> to vector<160x128xbf16>
    %cst_234 = arith.constant dense<0.000000e+00> : vector<128x160xf32>
    %427 = tpu.matmul %424, %426, %cst_234 {dimension_numbers = #tpu.dot_dimension_numbers<[1], [1], [0], [0], [0, 0, 1, 0], [], []>} : vector<128x128xbf16>, vector<160x128xbf16>, vector<128x160xf32> -> vector<128x160xf32>
    %428 = vector.extract_strided_slice %427 {offsets = [0, 0], sizes = [128, 128], strides = [1, 1]} : vector<128x160xf32> to vector<128x128xf32>
    %c16_235 = arith.constant 16 : index
    %c0_236 = arith.constant 0 : index
    %c0_237 = arith.constant 0 : index
    %429 = vector.load %arg3[%c16_235, %c0_236, %c0_237] : memref<18x1x128xbf16, #tpu.memory_space<vmem>>, vector<1x1x128xbf16>
    %430 = vector.shape_cast %429 : vector<1x1x128xbf16> to vector<1x128xbf16>
    %431 = arith.extf %430 : vector<1x128xbf16> to vector<1x128xf32>
    %432 = vector.broadcast %431 : vector<1x128xf32> to vector<128x128xf32>
    %433 = arith.addf %428, %432 : vector<128x128xf32>
    %434 = vector.extract_strided_slice %427 {offsets = [0, 128], sizes = [128, 32], strides = [1, 1]} : vector<128x160xf32> to vector<128x32xf32>
    %435 = arith.truncf %434 : vector<128x32xf32> to vector<128x32xbf16>
    %c16_238 = arith.constant 16 : index
    %c0_239 = arith.constant 0 : index
    %c0_240 = arith.constant 0 : index
    %436 = vector.load %arg4[%c16_238, %c0_239, %c0_240] : memref<18x32x128xbf16, #tpu.memory_space<vmem>>, vector<1x32x128xbf16>
    %437 = vector.shape_cast %436 : vector<1x32x128xbf16> to vector<32x128xbf16>
    %cst_241 = arith.constant dense<0.000000e+00> : vector<128x128xf32>
    %438 = tpu.matmul %435, %437, %cst_241 {dimension_numbers = #tpu.dot_dimension_numbers<[1], [0], [0], [1], [0, 0, 1, 1], [], []>} : vector<128x32xbf16>, vector<32x128xbf16>, vector<128x128xf32> -> vector<128x128xf32>
    %439 = arith.addf %433, %438 : vector<128x128xf32>
    %cst_242 = arith.constant 0.000000e+00 : f32
    %440 = vector.broadcast %cst_242 : f32 to vector<128x128xf32>
    %441 = arith.maximumf %439, %440 : vector<128x128xf32>
    %442 = arith.truncf %441 : vector<128x128xf32> to vector<128x128xbf16>
    %c17 = arith.constant 17 : index
    %c0_243 = arith.constant 0 : index
    %c0_244 = arith.constant 0 : index
    %443 = vector.load %arg2[%c17, %c0_243, %c0_244] : memref<18x160x128xbf16, #tpu.memory_space<vmem>>, vector<1x160x128xbf16>
    %444 = vector.shape_cast %443 : vector<1x160x128xbf16> to vector<160x128xbf16>
    %cst_245 = arith.constant dense<0.000000e+00> : vector<128x160xf32>
    %445 = tpu.matmul %442, %444, %cst_245 {dimension_numbers = #tpu.dot_dimension_numbers<[1], [1], [0], [0], [0, 0, 1, 0], [], []>} : vector<128x128xbf16>, vector<160x128xbf16>, vector<128x160xf32> -> vector<128x160xf32>
    %446 = vector.extract_strided_slice %445 {offsets = [0, 0], sizes = [128, 128], strides = [1, 1]} : vector<128x160xf32> to vector<128x128xf32>
    %c17_246 = arith.constant 17 : index
    %c0_247 = arith.constant 0 : index
    %c0_248 = arith.constant 0 : index
    %447 = vector.load %arg3[%c17_246, %c0_247, %c0_248] : memref<18x1x128xbf16, #tpu.memory_space<vmem>>, vector<1x1x128xbf16>
    %448 = vector.shape_cast %447 : vector<1x1x128xbf16> to vector<1x128xbf16>
    %449 = arith.extf %448 : vector<1x128xbf16> to vector<1x128xf32>
    %450 = vector.broadcast %449 : vector<1x128xf32> to vector<128x128xf32>
    %451 = arith.addf %446, %450 : vector<128x128xf32>
    %452 = vector.extract_strided_slice %445 {offsets = [0, 128], sizes = [128, 32], strides = [1, 1]} : vector<128x160xf32> to vector<128x32xf32>
    %453 = arith.truncf %452 : vector<128x32xf32> to vector<128x32xbf16>
    %c17_249 = arith.constant 17 : index
    %c0_250 = arith.constant 0 : index
    %c0_251 = arith.constant 0 : index
    %454 = vector.load %arg4[%c17_249, %c0_250, %c0_251] : memref<18x32x128xbf16, #tpu.memory_space<vmem>>, vector<1x32x128xbf16>
    %455 = vector.shape_cast %454 : vector<1x32x128xbf16> to vector<32x128xbf16>
    %cst_252 = arith.constant dense<0.000000e+00> : vector<128x128xf32>
    %456 = tpu.matmul %453, %455, %cst_252 {dimension_numbers = #tpu.dot_dimension_numbers<[1], [0], [0], [1], [0, 0, 1, 1], [], []>} : vector<128x32xbf16>, vector<32x128xbf16>, vector<128x128xf32> -> vector<128x128xf32>
    %457 = arith.addf %451, %456 : vector<128x128xf32>
    %458 = arith.addf %457, %405 : vector<128x128xf32>
    %c0_253 = arith.constant 0 : index
    %c0_254 = arith.constant 0 : index
    %459 = vector.load %arg7[%c0_253, %c0_254] : memref<128x128xf32, #tpu.memory_space<vmem>>, vector<128x128xf32>
    tpu.vector_store %arg7[%c0_253, %c0_254], %458 {strides = array<i32>} : memref<128x128xf32, #tpu.memory_space<vmem>>, vector<128x128xf32>,
    return
  }
  func.func @transform_0(%arg0: i32) -> (i32, i32) {
    %c0_i32 = arith.constant 0 : i32
    %c0_i32_0 = arith.constant 0 : i32
    return %arg0, %c0_i32 : i32, i32
  }
  func.func @transform_1(%arg0: i32) -> (i32, i32, i32) {
    %c0_i32 = arith.constant 0 : i32
    %c0_i32_0 = arith.constant 0 : i32
    %c0_i32_1 = arith.constant 0 : i32
    %c0_i32_2 = arith.constant 0 : i32
    return %c0_i32, %c0_i32_0, %c0_i32_1 : i32, i32, i32
  }
  func.func @transform_2(%arg0: i32) -> (i32, i32, i32) {
    %c0_i32 = arith.constant 0 : i32
    %c0_i32_0 = arith.constant 0 : i32
    %c0_i32_1 = arith.constant 0 : i32
    %c0_i32_2 = arith.constant 0 : i32
    return %c0_i32, %c0_i32_0, %c0_i32_1 : i32, i32, i32
  }
  func.func @transform_3(%arg0: i32) -> (i32, i32, i32) {
    %c0_i32 = arith.constant 0 : i32
    %c0_i32_0 = arith.constant 0 : i32
    %c0_i32_1 = arith.constant 0 : i32
    %c0_i32_2 = arith.constant 0 : i32
    return %c0_i32, %c0_i32_0, %c0_i32_1 : i32, i32, i32
  }
  func.func @transform_4(%arg0: i32) -> (i32, i32, i32) {
    %c0_i32 = arith.constant 0 : i32
    %c0_i32_0 = arith.constant 0 : i32
    %c0_i32_1 = arith.constant 0 : i32
    %c0_i32_2 = arith.constant 0 : i32
    return %c0_i32, %c0_i32_0, %c0_i32_1 : i32, i32, i32
  }
  func.func @transform_5(%arg0: i32) -> (i32, i32, i32) {
    %c0_i32 = arith.constant 0 : i32
    %c0_i32_0 = arith.constant 0 : i32
    %c0_i32_1 = arith.constant 0 : i32
    %c0_i32_2 = arith.constant 0 : i32
    return %c0_i32, %c0_i32_0, %c0_i32_1 : i32, i32, i32
  }
  func.func @transform_6(%arg0: i32) -> (i32, i32) {
    %c0_i32 = arith.constant 0 : i32
    %c0_i32_0 = arith.constant 0 : i32
    return %arg0, %c0_i32 : i32, i32
  }
}

</mosaic_0001>

<bundles_post_ra>
// kernel: tpu_custom_call.1
= control target key start
LH: loop header
LB: loop body
LE: loop exit
PB: predicated region body
PF: predicated region fallthrough
CT: control target
= control target key end

     0   :  { %11 = vsyncpa [#allocation3], 0  ;;  %s13915_s0 = inlined_call_operand.hbm [shape: f32[256,128], index: 0, kind: input, shape index: {}]   ;;  %s13916_s1 = inlined_call_operand.hbm [shape: bf16[18,160,128], index: 1, kind: input, shape index: {}]   ;;  %s13917_s2 = inlined_call_operand.vmem [shape: bf16[18,1,128], index: 2, kind: input, shape index: {}]   ;;  %s13918_s3 = inlined_call_operand.hbm [shape: bf16[18,32,128], index: 3, kind: input, shape index: {}]   ;;  %s13919_s4 = inlined_call_operand.vmem [shape: f32[5,1,128], index: 4, kind: input, shape index: {}]   ;;  %s13920_s5 = inlined_call_operand.vmem [shape: f32[5,1,128], index: 5, kind: input, shape index: {}]   ;;  %s13921_s6 = inlined_call_operand.hbm [shape: f32[256,128], index: 6, kind: output, shape index: {}]  }
   0x1   :  { %13 = vsyncpa [#allocation3 + $0x1], 0 }
   0x2   :  { %14 = vsyncpa [#allocation6], 0 }
   0x3   :  { %15 = vsyncpa [#allocation4], 0 }
   0x4   :  { %17 = vsyncpa [#allocation4 + $0x1], 0  ;;  %s10676_s21 = smov 0   ;;  %s10678_s22 = smov 0  }
   0x5   :  { %s10680_s23 = smov 0   ;;  %s10682_s24 = smov 0  }
   0x6 LB: > { %s10697_s25 = sadd.s32 4294967295, %s10628_s24   ;;  %s9051_s26 = sadd.s32 4294967294, %s10628_s24   ;;  %s10628_s24 = sphi %s10682_s24, %s13941_s24   ;;  %s10624_s23 = sphi %s10680_s23, %s13940_s23   ;;  %s10620_s22 = sphi %s10678_s22, %s13939_s22   ;;  %s10616_s21 = sphi %s10676_s21, %s13938_s21  }
   0x7   : > { %p43_p0 = scmp.ne.s32.totalorder %s10620_s22, %s10616_s21  ;;  %p13922_p1 = scmp.eq.s32.totalorder %s10697_s25, 0 }
   0x8   : > { %p178_p3 = scmp.eq.s32.totalorder %s9051_s26, 1  ;;  %p9052_p5 = scmp.ge.s32.totalorder %s10628_s24, 1 }
   0x9   : > { %p10706_p4 = por %p13922_p1, %p43_p0  ;;  %p185_p7 = scmp.lt.s32.totalorder %s10628_s24, 3 }
   0xa   : > { %p10711_p6 = por %p178_p3, %p43_p0  ;;  %s10630_s30 = smov [#allocation5]  }
   0xb   : > { %s13925_s27 = scalar_select %p10706_p4, 1, 0 }
   0xc   : > { %s13926_s28 = scalar_select %p10711_p6, 1, 0 }
   0xd   : > { %p10716_p8 = pnand %p9052_p5, %p185_p7  ;;  %s197_s7 = sshll.u32 %s10630_s30, 4  ;;  %s10720_s7 = int_to_ptr.vmem [resolvable:$true] %s197_s7 }
   0xe   : > { %s10631_s9 = smov [#allocation7]   ;;  %s10472_s13 = scalar_lea.hbm %s13916_s1, 23040 }
   0xf   : > { %p10018_p9 = pneg %p10716_p8  ;;  %s213_s10 = sshll.u32 %s10631_s9, 4  ;;  %s10731_s10 = int_to_ptr.vmem [resolvable:$true] %s213_s10 }
  0x10   : > { %p10473_p12 = scmp.ne.s32.totalorder %s13916_s1, %s10472_s13  ;;  %p10479_p5 = scmp.lt.u32.totalorder %s10472_s13, %s13916_s1 }
  0x11   : > { %p10727_p11 = pnand %p10018_p9, %p13922_p1 }
  0x13   : > { %p10474_p13 = pneg %p10727_p11 }
  0x15   : > { %p10475_p0 = pnand %p10474_p13, %p10473_p12 }
  0x17   : > { %p10476_p3 = pneg %p10475_p0 }
  0x19   : > { %p10481_p7 = pnand %p10479_p5, %p10476_p3 }
  0x1b   : > { %10484 = shalt.err (!%p10481_p7)
}
  0x1c   : > { %s10485_s18 = scalar_lea.vmem %s10720_s7, 23040  ;;  %p10493_p2 = scmp.lt.s32.totalorder %s10720_s7, %s10720_s7 }
  0x1d   : > { %p10486_p9 = scmp.ne.s32.totalorder %s10720_s7, %s10485_s18  ;;  %p10494_p12 = scmp.lt.s32.totalorder %s10485_s18, %s10485_s18 }
  0x1f   : > { %p10488_p10 = pnand %p10486_p9, %p10474_p13  ;;  %p10495_p0 = por %p10494_p12, %p10493_p2 }
  0x21   : > { %p10489_p1 = pneg %p10488_p10 }
  0x23   : > { %p10496_p6 = pnand %p10495_p0, %p10489_p1 }
  0x25   : > { %10499 = shalt.err (!%p10496_p6)
}
  0x26   : > { %s10632_s19 = smov 64   ;;  %s10633_s20 = smov 4  }
  0x27   : > { %10021 = dma.hbm_to_vmem [thread:$0]  (!%p10727_p11), %s13916_s1, 23040, %s10720_s7, [#allocation6], %s10632_s19, %s10632_s19, %s10633_s20  }
  0x28   : > { %s10500_s12 = scalar_lea.hbm %s13918_s3, 4608 }
  0x29   : > { %p10501_p2 = scmp.ne.s32.totalorder %s13918_s3, %s10500_s12  ;;  %p10507_p10 = scmp.lt.u32.totalorder %s10500_s12, %s13918_s3 }
  0x2b   : > { %p10503_p1 = pnand %p10501_p2, %p10474_p13 }
  0x2d   : > { %p10504_p6 = pneg %p10503_p1 }
  0x2f   : > { %p10509_p3 = pnand %p10507_p10, %p10504_p6 }
  0x31   : > { %10512 = shalt.err (!%p10509_p3)
}
  0x32   : > { %s10513_s7 = scalar_lea.vmem %s10731_s10, 4608  ;;  %p10521_p12 = scmp.lt.s32.totalorder %s10731_s10, %s10731_s10 }
  0x33   : > { %p10514_p5 = scmp.ne.s32.totalorder %s10731_s10, %s10513_s7  ;;  %p10522_p0 = scmp.lt.s32.totalorder %s10513_s7, %s10513_s7 }
  0x35   : > { %p10516_p7 = pnand %p10514_p5, %p10474_p13  ;;  %p10523_p2 = por %p10522_p0, %p10521_p12 }
  0x37   : > { %p10517_p9 = pneg %p10516_p7 }
  0x39   : > { %p10524_p1 = pnand %p10523_p2, %p10517_p9 }
  0x3b   : > { %10527 = shalt.err (!%p10524_p1)
}
  0x3c   : > { %10024 = dma.hbm_to_vmem [thread:$0]  (!%p10727_p11), %s13918_s3, 4608, %s10731_s10, [#allocation6], %s10632_s19, %s10632_s19, %s10633_s20  }
  0x3d   : > { %s10786_s26 = sadd.s32 1, %s10628_s24   ;;  %s30_s8 = sadd.s32 1, %s10624_s23 }
  0x3e   : > { %s27_s30 = ssub.s32 %s10628_s24, %s10786_s26  ;;  %p37_p13 = scmp.ne.s32.totalorder %s10624_s23, %s10620_s22 }
  0x3f   : > { %p28_p6 = scmp.eq.s32.totalorder %s27_s30, 0  ;;  %p38_p10 = scmp.eq.s32.totalorder %s10628_s24, 0 }
  0x40   : > { %p13929_p3 = scmp.eq.s32.totalorder %s10697_s25, 1  ;;  %p10035_p7 = scmp.lt.s32.totalorder %s10628_s24, 2 }
  0x41   : > { %s10802_s11 = scalar_select %p28_p6, %s10624_s23, %s30_s8  }
  0x42   : > { %p10796_p5 = por %p13929_p3, %p37_p13  ;;  %p39_p9 = por %p38_p10, %p37_p13 }
  0x43   : > { %s233_s12 = sand.u32 1, %s10624_s23   ;;  %s9464_s10 = sshll.u32 %s10628_s24, 11 }
  0x44   : > { %s13930_s9 = scalar_select %p10796_p5, 1, 0 }
  0x45   : > { %s9056_s13 = sshll.u32 %s233_s12, 7  ;;  %s10809_s14 = scalar_lea.hbm %s13915_s0, %s9464_s10 }
  0x46   : > { %s237_s15 = scalar_lea.vmem [#allocation2], %s9056_s13  ;;  %p10813_p11 = pnand %p10035_p7, %p39_p9 }
  0x47   : > { %s244_s16 = sshll.u32 %s237_s15, 4  ;;  %s10817_s17 = scalar_lea.sflag [#allocation3], %s233_s12  ;;  %s10811_s16 = int_to_ptr.vmem [resolvable:$true] %s244_s16 }
  0x48   : > { %s10528_s18 = scalar_lea.hbm %s10809_s14, 2048  ;;  %p10530_p0 = pneg %p10813_p11 }
  0x49   : > { %p10529_p12 = scmp.ne.s32.totalorder %s10809_s14, %s10528_s18  ;;  %s10533_s13 = scalar_lea.hbm %s13915_s0, 4096 }
  0x4a   : > { %p10534_p13 = scmp.lt.u32.totalorder %s10809_s14, %s13915_s0  ;;  %p10535_p6 = scmp.lt.u32.totalorder %s10533_s13, %s10528_s18 }
  0x4b   : > { %p10531_p2 = pnand %p10530_p0, %p10529_p12  ;;  %p10537_p3 = scmp.lt.u32.totalorder %s10528_s18, %s10809_s14 }
  0x4c   : > { %p10536_p10 = por %p10535_p6, %p10534_p13 }
  0x4d   : > { %p10532_p1 = pneg %p10531_p2 }
  0x4e   : > { %p10538_p7 = por %p10537_p3, %p10536_p10 }
  0x50   : > { %p10539_p9 = pnand %p10538_p7, %p10532_p1 }
  0x52   : > { %10542 = shalt.err (!%p10539_p9)
}
  0x53   : > { %s10543_s12 = scalar_lea.vmem %s10811_s16, 2048  ;;  %s10634_s20 = smov [#allocation2]  }
  0x54   : > { %p10544_p12 = scmp.ne.s32.totalorder %s10811_s16, %s10543_s12  ;;  %s10548_s15 = sshll.u32 %s10634_s20, 4  ;;  %s10549_s15 = int_to_ptr.vmem [resolvable:$false] %s10548_s15 }
  0x55   : > { %s10550_s8 = scalar_lea.vmem %s10549_s15, 4096  ;;  %p10551_p4 = scmp.lt.s32.totalorder %s10811_s16, %s10549_s15 }
  0x56   : > { %p10546_p2 = pnand %p10544_p12, %p10530_p0  ;;  %p10552_p13 = scmp.lt.s32.totalorder %s10550_s8, %s10543_s12 }
  0x58   : > { %p10547_p5 = pneg %p10546_p2  ;;  %p10553_p6 = por %p10552_p13, %p10551_p4 }
  0x5a   : > { %p10554_p10 = pnand %p10553_p6, %p10547_p5 }
  0x5c   : > { %10557 = shalt.err (!%p10554_p10)
}
  0x5d   : > { %s10635_s18 = smov 128   ;;  %s10636_s30 = smov 8  }
  0x5e   : > { %10028 = dma.hbm_to_vmem [thread:$0]  (!%p10813_p11), %s10809_s14, 2048, %s10811_s16, %s10817_s17, %s10635_s18, %s10635_s18, %s10636_s30  }
  0x5f   : > { %256 = sbr.rel (%p10716_p8) target bundleno = 9131 (0x23ab), region = 44  ;;  %s10848_s13 = sand.u32 (!%p10716_p8), 1, %s10620_s22  }
  0x60   : > { %s9060_s10 = sshll.u32 (!%p10716_p8), %s10848_s13, 7  ;;  %s259_s19 = scalar_lea.sflag (!%p10716_p8), [#allocation3], %s10848_s13 }
  0x61   : > { %s10854_s12 = scalar_lea.vmem (!%p10716_p8), [#allocation2], %s9060_s10  ;;  %p13932_p4 = scmp.ne.s32.totalorder (!%p10716_p8), %s13925_s27, 0 }
  0x66   : > { %10603 = dma.done.wait (%p13932_p4), %s259_s19, 2048  }
  0x67   : > { %10605 = vsyncadd (%p13932_p4), %s259_s19, 4294965248  ;;  %p13933_p5 = scmp.eq.s32.totalorder %s10697_s25, 0 }
  0x69   : > { %10607 = dma.done.wait (%p13933_p5), [#allocation6], 27648   ;;  %p13934_p8 = pmov %p13933_p5 }
  0x6a   : > { %v10637_v0 = vmov 0   ;;  %v10080_v1 = vld [vmem:[#allocation5] sm:$0xff]   ;;  %v10081_v2 = vld [vmem:[#allocation5 + $0x8] sm:$0xff]   ;;  %v10082_v3 = vld [vmem:[#allocation5 + $0x10] sm:$0xff]   ;;  %vm565_vm0 = vcmask 261120   ;;  %s13812_s7 = scalar_lea.vmem [#allocation8], %s9060_s10 }
  0x6b   : > { %10609 = vsyncadd (%p13934_p8), [#allocation6], 4294939648  ;;  %406 = vmatprep.subr.bf16.mxu0 %v10637_v0  ;;  %438 = vmatprep.mubr.bf16.mxu0 %v10637_v0  ;;  %v10083_v4 = vld [vmem:[#allocation5 + $0x18] sm:$0xff]   ;;  %v10084_v5 = vld [vmem:[#allocation5 + $0x20] sm:$0xff]   ;;  %s9465_s10 = sshll.u32 %s10697_s25, 11  ;;  %s8959_s17 = sshll.u32 %s13812_s7, 4  ;;  %s13867_s17 = int_to_ptr.vmem [resolvable:$true] %s8959_s17 }
  0x6c   : > { %407 = vmatpush1.bf16.xpose.msra.mxu0 %v10080_v1  ;;  %v10085_v6 = vld [vmem:[#allocation5 + $0x28] sm:$0xff]   ;;  %v10086_v7 = vld [vmem:[#allocation5 + $0x30] sm:$0xff]   ;;  %v10087_v8 = vld [vmem:[#allocation5 + $0x38] sm:$0xff]   ;;  %s13865_s8 = scalar_lea.hbm %s13921_s6, %s9465_s10  ;;  %s8946_s25 = scalar_lea.sflag [#allocation4], %s10848_s13 }
  0x6d   : > { %408 = vmatprep.subr.bf16.mxu0 %v10637_v0  ;;  %v10088_v9 = vld [vmem:[#allocation5 + $0x40] sm:$0xff]   ;;  %v10089_v10 = vld [vmem:[#allocation5 + $0x48] sm:$0xff]   ;;  %v304_v14 = vld [vmem:[%s10854_s12 + $0x10] sm:$0xff]  ;;  %s10558_s18 = scalar_lea.vmem %s13867_s17, 2048  ;;  %p13935_p0 = scmp.ne.s32.totalorder %s13930_s9, 0 }
  0x6e   : > { %v302_v11 = vld [vmem:[%s10854_s12] sm:$0xff]  ;;  %v303_v12 = vld [vmem:[%s10854_s12 + $0x8] sm:$0xff]  ;;  %v305_v15 = vld [vmem:[%s10854_s12 + $0x18] sm:$0xff]  ;;  %p10559_p11 = scmp.ne.s32.totalorder %s13867_s17, %s10558_s18  ;;  %s10638_s30 = smov [#allocation8]  }
  0x6f   : > { %v318_v13 = vpack.c.bf16 %v303_v12, %v302_v11  ;;  %v319_v16 = vpack.c.bf16 %v305_v15, %v304_v14  ;;  %v306_v17 = vld [vmem:[%s10854_s12 + $0x20] sm:$0xff]  ;;  %v307_v18 = vld [vmem:[%s10854_s12 + $0x28] sm:$0xff]  ;;  %v308_v20 = vld [vmem:[%s10854_s12 + $0x30] sm:$0xff]  ;;  %s10562_s19 = sshll.u32 %s10638_s30, 4  ;;  %s10563_s19 = int_to_ptr.vmem [resolvable:$false] %s10562_s19 }
  0x70   : > { %v320_v19 = vpack.c.bf16 %v307_v18, %v306_v17  ;;  %v309_v21 = vld [vmem:[%s10854_s12 + $0x38] sm:$0xff]  ;;  %v310_v23 = vld [vmem:[%s10854_s12 + $0x40] sm:$0xff]  ;;  %v311_v24 = vld [vmem:[%s10854_s12 + $0x48] sm:$0xff]  ;;  %p10560_p1 = pnand %p10559_p11, %p13935_p0  ;;  %p10565_p7 = scmp.lt.s32.totalorder %s13867_s17, %s10563_s19 }
  0x71   : > { %v321_v22 = vpack.c.bf16 %v309_v21, %v308_v20  ;;  %v322_v25 = vpack.c.bf16 %v311_v24, %v310_v23  ;;  %v312_v26 = vld [vmem:[%s10854_s12 + $0x50] sm:$0xff]  ;;  %v313_v27 = vld [vmem:[%s10854_s12 + $0x58] sm:$0xff]  ;;  %v314_v29 = vld [vmem:[%s10854_s12 + $0x60] sm:$0xff] }
  0x72   : > { %v323_v28 = vpack.c.bf16 %v313_v27, %v312_v26  ;;  %v315_v30 = vld [vmem:[%s10854_s12 + $0x68] sm:$0xff]  ;;  %v316_v32 = vld [vmem:[%s10854_s12 + $0x70] sm:$0xff]  ;;  %v317_v33 = vld [vmem:[%s10854_s12 + $0x78] sm:$0xff]  ;;  %v521_v26 = vlaneseq  ;;  %p10561_p3 = pneg %p10560_p1 }
  0x73   : > { %v324_v31 = vpack.c.bf16 %v315_v30, %v314_v29  ;;  %v325_v34 = vpack.c.bf16 %v317_v33, %v316_v32  ;;  %v10090_v35 = vld [vmem:[#allocation7] sm:$0xff]   ;;  %v10091_v36 = vld [vmem:[#allocation7 + $0x8] sm:$0xff]   ;;  %v10092_v46 = vld [vmem:[#allocation5 + $0x50] sm:$0xff]  }
  0x74   : > { %409 = vmatpush1.bf16.xpose.msra.mxu0 %v10081_v2  ;;  %9646 = vmatprep.subr.bf16.mxu1 %v10090_v35  ;;  %v10093_v52 = vld [vmem:[#allocation5 + $0x58] sm:$0xff]   ;;  %v10094_v58 = vld [vmem:[#allocation5 + $0x60] sm:$0xff]   ;;  %v10095_v1 = vld [vmem:[#allocation5 + $0x68] sm:$0xff]   ;;  %v522_v27 = vshrl.u32 %v521_v26, 7 }
  0x75   : > { %410 = vmatprep.subr.bf16.mxu0 %v10637_v0  ;;  %9647 = vmatpush3.bf16.msra.mxu1 %v10090_v35  ;;  %v10099_v21 = vld [vmem:[#allocation5 + $0x88] sm:$0xff]   ;;  %v10101_v23 = vld [vmem:[#allocation5 + $0x98] sm:$0xff]   ;;  %v10102_v24 = vld [vmem:[#allocation7 + $0x10] sm:$0xff]  }
  0x76   : > { %9648 = vmatprep.subr.bf16.mxu1 %v10091_v36  ;;  %v10953_v30 = vsub.s32 0, %v522_v27 }
  0x79   : > { %9649 = vmatpush3.bf16.msra.mxu1 %v10091_v36 }
  0x7a   : > { %808 = vmatprep.subr.bf16.mxu1 %v10637_v0 }
  0x7c   : > { %411 = vmatpush1.bf16.xpose.msra.mxu0 %v10082_v3 }
  0x7d   : > { %412 = vmatprep.subr.bf16.mxu0 %v10637_v0 }
  0x84   : > { %413 = vmatpush1.bf16.xpose.msra.mxu0 %v10083_v4 }
  0x85   : > { %414 = vmatprep.subr.bf16.mxu0 %v10637_v0 }
  0x8c   : > { %415 = vmatpush1.bf16.xpose.msra.mxu0 %v10084_v5 }
  0x8d   : > { %416 = vmatprep.subr.bf16.mxu0 %v10637_v0 }
  0x94   : > { %417 = vmatpush1.bf16.xpose.msra.mxu0 %v10085_v6 }
  0x95   : > { %418 = vmatprep.subr.bf16.mxu0 %v10637_v0 }
  0x9c   : > { %419 = vmatpush1.bf16.xpose.msra.mxu0 %v10086_v7  ;;  %v10096_v7 = vld [vmem:[#allocation5 + $0x70] sm:$0xff]  }
  0x9d   : > { %420 = vmatprep.subr.bf16.mxu0 %v10637_v0 }
  0xa4   : > { %421 = vmatpush1.bf16.xpose.msra.mxu0 %v10087_v8 }
  0xa5   : > { %422 = vmatprep.subr.bf16.mxu0 %v10637_v0 }
  0xac   : > { %423 = vmatpush1.bf16.xpose.msra.mxu0 %v10088_v9 }
  0xad   : > { %424 = vmatprep.subr.bf16.mxu0 %v10637_v0 }
  0xb4   : > { %425 = vmatpush1.bf16.xpose.msra.mxu0 %v10089_v10 }
  0xb5   : > { %9666 = vmatprep.subr.bf16.mxu0 %v10102_v24 }
  0xbb   : > { %439 = vmatmul.mubr.bf16.vlgmr.msra.gmra.mrb[0].mxu0 %v318_v13  ;;  %v10097_v13 = vld [vmem:[#allocation5 + $0x78] sm:$0xff]  }
  0xbc   : > { %448 = vmatprep.mubr.bf16.mxu0 %v10637_v0  ;;  %9667 = vmatpush3.bf16.msra.mxu0 %v10102_v24 }
  0xc3   : > { %449 = vmatmul.mubr.bf16.gmra.mrb[4].mxu0 %v319_v16 }
  0xc4   : > { %458 = vmatprep.mubr.bf16.mxu0 %v10637_v0 }
  0xcb   : > { %459 = vmatmul.mubr.bf16.gmra.mrb[8].mxu0 %v320_v19  ;;  %v10098_v19 = vld [vmem:[#allocation5 + $0x80] sm:$0xff]  }
  0xcc   : > { %468 = vmatprep.mubr.bf16.mxu0 %v10637_v0 }
  0xd3   : > { %469 = vmatmul.mubr.bf16.gmra.mrb[12].mxu0 %v321_v22  ;;  %v10100_v22 = vld [vmem:[#allocation5 + $0x90] sm:$0xff]  }
  0xd4   : > { %478 = vmatprep.mubr.bf16.mxu0 %v10637_v0 }
  0xdb   : > { %479 = vmatmul.mubr.bf16.gmra.mrb[16].mxu0 %v322_v25  ;;  %v10103_v25 = vld [vmem:[#allocation7 + $0x18] sm:$0xff]  }
  0xdc   : > { %488 = vmatprep.mubr.bf16.mxu0 %v10637_v0  ;;  %9668 = vmatprep.subr.bf16.mxu0 %v10103_v25 }
  0xdd   : > { %9669 = vmatpush3.bf16.msra.mxu0 %v10103_v25 }
  0xe3   : > { %489 = vmatmul.mubr.bf16.gmra.mrb[20].mxu0 %v323_v28  ;;  %v519_v28 = vld [vmem:[%s13917_s2] sm:$0x1] }
  0xe4   : > { %498 = vmatprep.mubr.bf16.mxu0 %v10637_v0  ;;  %v520_v29 = vunpack.c.l.bf16 %v519_v28 }
  0xeb   : > { %499 = vmatmul.mubr.bf16.gmra.mrb[24].mxu0 %v324_v31  ;;  %v10956_v31 = vrot.slane %v520_v29, %v10953_v30 }
  0xec   : > { %508 = vmatprep.mubr.bf16.mxu0 %v10637_v0 }
  0xf3   : > { %509 = vmatmul.mubr.bf16.gmra.mrb[28].mxu0 %v325_v34 }
 0x18e   : > { %v10899_v37 = vpop.f32.mrb[0].mxu0 }
 0x18f   : > { %v442_v38 = vpop.f32.mrb[1].mxu0  ;;  %v525_v33 = vadd.f32 %v10956_v31, %v10899_v37 }
 0x190   : > { %v10901_v39 = vpop.f32.mrb[2].mxu0 }
 0x191   : > { %v446_v40 = vpop.f32.mrb[3].mxu0 }
 0x192   : > { %v541_v41 = vpack.c.bf16 %v446_v40, %v442_v38  ;;  %v526_v40 = vadd.f32 %v10956_v31, %v10901_v39 }
 0x194   : > { %9650 = vmatprep.mubr.msk.bf16.mxu1 %vm565_vm0, %v541_v41 }
 0x196   : > { %v10904_v42 = vpop.f32.mrb[4].mxu0 }
 0x197   : > { %v452_v43 = vpop.f32.mrb[5].mxu0  ;;  %v527_v32 = vadd.f32 %v10956_v31, %v10904_v42 }
 0x198   : > { %v10906_v44 = vpop.f32.mrb[6].mxu0 }
 0x199   : > { %v456_v45 = vpop.f32.mrb[7].mxu0  ;;  %v528_v35 = vadd.f32 %v10956_v31, %v10906_v44 }
 0x19a   : > { %v542_v47 = vpack.c.bf16 %v456_v45, %v452_v43 }
 0x19c   : > { %9651 = vmatmul.mubr.msk.bf16.vlgmr.msra.gmra.mrb[0].mxu1 %vm565_vm0, %v542_v47 }
 0x19d   : > { %809 = vmatpush1.bf16.xpose.msra.mxu1 %v10092_v46 }
 0x19e   : > { %v10909_v48 = vpop.f32.mrb[8].mxu0  ;;  %810 = vmatprep.subr.bf16.mxu1 %v10637_v0 }
 0x19f   : > { %v462_v49 = vpop.f32.mrb[9].mxu0  ;;  %v529_v39 = vadd.f32 %v10956_v31, %v10909_v48 }
 0x1a0   : > { %v10912_v50 = vpop.f32.mrb[10].mxu0 }
 0x1a1   : > { %v466_v51 = vpop.f32.mrb[11].mxu0 }
 0x1a2   : > { %v543_v53 = vpack.c.bf16 %v466_v51, %v462_v49 }
 0x1a4   : > { %9654 = vmatprep.mubr.msk.bf16.mxu1 %vm565_vm0, %v543_v53 }
 0x1a5   : > { %811 = vmatpush1.bf16.xpose.msra.mxu1 %v10093_v52 }
 0x1a6   : > { %v10915_v54 = vpop.f32.mrb[12].mxu0  ;;  %812 = vmatprep.subr.bf16.mxu1 %v10637_v0 }
 0x1a7   : > { %v472_v55 = vpop.f32.mrb[13].mxu0  ;;  %v531_v44 = vadd.f32 %v10956_v31, %v10915_v54 }
 0x1a8   : > { %v10918_v56 = vpop.f32.mrb[14].mxu0 }
 0x1a9   : > { %v476_v57 = vpop.f32.mrb[15].mxu0 }
 0x1aa   : > { %v544_v59 = vpack.c.bf16 %v476_v57, %v472_v55  ;;  %v532_v57 = vadd.f32 %v10956_v31, %v10918_v56 }
 0x1ac   : > { %9655 = vmatmul.mubr.msk.bf16.gmra.mrb[4].mxu1 %vm565_vm0, %v544_v59 }
 0x1ad   : > { %813 = vmatpush1.bf16.xpose.msra.mxu1 %v10094_v58 }
 0x1ae   : > { %v10921_v60 = vpop.f32.mrb[16].mxu0  ;;  %814 = vmatprep.subr.bf16.mxu1 %v10637_v0 }
 0x1af   : > { %v482_v61 = vpop.f32.mrb[17].mxu0  ;;  %v533_v56 = vadd.f32 %v10956_v31, %v10921_v60 }
 0x1b0   : > { %v10924_v62 = vpop.f32.mrb[18].mxu0 }
 0x1b1   : > { %v486_v63 = vpop.f32.mrb[19].mxu0 }
 0x1b2   : > { %v545_v2 = vpack.c.bf16 %v486_v63, %v482_v61  ;;  %v530_v61 = vadd.f32 %v10956_v31, %v10912_v50 }
 0x1b4   : > { %9658 = vmatprep.mubr.msk.bf16.mxu1 %vm565_vm0, %v545_v2 }
 0x1b5   : > { %815 = vmatpush1.bf16.xpose.msra.mxu1 %v10095_v1 }
 0x1b6   : > { %v10927_v3 = vpop.f32.mrb[20].mxu0  ;;  %816 = vmatprep.subr.bf16.mxu1 %v10637_v0 }
 0x1b7   : > { %v492_v4 = vpop.f32.mrb[21].mxu0  ;;  %v535_v50 = vadd.f32 %v10956_v31, %v10927_v3 }
 0x1b8   : > { %v10930_v5 = vpop.f32.mrb[22].mxu0 }
 0x1b9   : > { %v496_v6 = vpop.f32.mrb[23].mxu0 }
 0x1ba   : > { %v546_v8 = vpack.c.bf16 %v496_v6, %v492_v4 }
 0x1bc   : > { %9659 = vmatmul.mubr.msk.bf16.gmra.mrb[8].mxu1 %vm565_vm0, %v546_v8 }
 0x1bd   : > { %817 = vmatpush1.bf16.xpose.msra.mxu1 %v10096_v7 }
 0x1be   : > { %v10933_v9 = vpop.f32.mrb[24].mxu0  ;;  %818 = vmatprep.subr.bf16.mxu1 %v10637_v0 }
 0x1bf   : > { %v502_v10 = vpop.f32.mrb[25].mxu0 }
 0x1c0   : > { %v10936_v11 = vpop.f32.mrb[26].mxu0 }
 0x1c1   : > { %v506_v12 = vpop.f32.mrb[27].mxu0 }
 0x1c2   : > { %v547_v14 = vpack.c.bf16 %v506_v12, %v502_v10 }
 0x1c4   : > { %9662 = vmatprep.mubr.msk.bf16.mxu1 %vm565_vm0, %v547_v14  ;;  %v536_v14 = vadd.f32 %v10956_v31, %v10930_v5  ;;  %v537_v5 = vadd.f32 %v10956_v31, %v10933_v9 }
 0x1c5   : > { %819 = vmatpush1.bf16.xpose.msra.mxu1 %v10097_v13 }
 0x1c6   : > { %v10939_v15 = vpop.f32.mrb[28].mxu0  ;;  %820 = vmatprep.subr.bf16.mxu1 %v10637_v0 }
 0x1c7   : > { %v512_v16 = vpop.f32.mrb[29].mxu0 }
 0x1c8   : > { %v10942_v17 = vpop.f32.mrb[30].mxu0 }
 0x1c9   : > { %v516_v18 = vpop.f32.mrb[31].mxu0 }
 0x1ca   : > { %v548_v20 = vpack.c.bf16 %v516_v18, %v512_v16 }
 0x1cc   : > { %9663 = vmatmul.mubr.msk.bf16.gmra.mrb[12].mxu1 %vm565_vm0, %v548_v20 }
 0x1cd   : > { %821 = vmatpush1.bf16.xpose.msra.mxu1 %v10098_v19  ;;  %840 = vmatprep.mubr.bf16.mxu1 %v10637_v0  ;;  %v534_v19 = vadd.f32 %v10956_v31, %v10924_v62  ;;  %v539_v62 = vadd.f32 %v10956_v31, %v10939_v15 }
 0x1ce   : > { %822 = vmatprep.subr.bf16.mxu1 %v10637_v0 }
 0x1d5   : > { %823 = vmatpush1.bf16.xpose.msra.mxu1 %v10099_v21 }
 0x1d6   : > { %824 = vmatprep.subr.bf16.mxu1 %v10637_v0 }
 0x1dd   : > { %825 = vmatpush1.bf16.xpose.msra.mxu1 %v10100_v22 }
 0x1de   : > { %826 = vmatprep.subr.bf16.mxu1 %v10637_v0 }
 0x1e5   : > { %827 = vmatpush1.bf16.xpose.msra.mxu1 %v10101_v23 }
 0x1e6   : > { %1211 = vmatprep.subr.bf16.mxu1 %v10637_v0 }
 0x26f   : > { %v9652_v34 = vpop.f32.mrb[0].mxu1 }
 0x270   : > { %v689_v36 = vadd.f32 %v9652_v34, %v527_v32  ;;  %v624_v38 = vpop.f32.mrb[1].mxu1  ;;  %v540_v32 = vadd.f32 %v10956_v31, %v10942_v17  ;;  %v10105_v17 = vld [vmem:[#allocation5 + $0xa8] sm:$0xff]  }
 0x271   : > { %v687_v41 = vadd.f32 %v624_v38, %v525_v33  ;;  %v9653_v43 = vpop.f32.mrb[2].mxu1 }
 0x272   : > { %v690_v45 = vadd.f32 %v9653_v43, %v528_v35  ;;  %v627_v46 = vpop.f32.mrb[3].mxu1  ;;  %v705_v49 = vmax.f32 %v689_v36, 0.0  ;;  %v538_v35 = vadd.f32 %v10956_v31, %v10936_v11  ;;  %v10104_v11 = vld [vmem:[#allocation5 + $0xa0] sm:$0xff]   ;;  %v10106_v31 = vld [vmem:[#allocation5 + $0xb0] sm:$0xff]  }
 0x273   : > { %v688_v47 = vadd.f32 %v627_v46, %v526_v40  ;;  %v703_v42 = vmax.f32 %v687_v41, 0.0 }
 0x274   : > { %v706_v51 = vmax.f32 %v690_v45, 0.0 }
 0x275   : > { %v704_v52 = vmax.f32 %v688_v47, 0.0 }
 0x276   : > { %v720_v53 = vpack.c.bf16 %v706_v51, %v705_v49  ;;  %v10107_v51 = vld [vmem:[#allocation5 + $0xb8] sm:$0xff]  }
 0x277   : > { %v719_v37 = vpack.c.bf16 %v704_v52, %v703_v42  ;;  %v10108_v42 = vld [vmem:[#allocation5 + $0xc0] sm:$0xff]   ;;  %v10109_v52 = vld [vmem:[#allocation5 + $0xc8] sm:$0xff]  }
 0x279   : > { %841 = vmatmul.mubr.bf16.vlgmr.msra.gmra.mrb[16].mxu1 %v719_v37  ;;  %v10111_v37 = vld [vmem:[#allocation5 + $0xd8] sm:$0xff]  }
 0x27a   : > { %850 = vmatprep.mubr.bf16.mxu1 %v10637_v0  ;;  %1212 = vmatpush1.bf16.xpose.msra.mxu1 %v10104_v11 }
 0x27b   : > { %1213 = vmatprep.subr.bf16.mxu1 %v10637_v0 }
 0x27f   : > { %v9656_v55 = vpop.f32.mrb[4].mxu1 }
 0x280   : > { %v693_v58 = vadd.f32 %v9656_v55, %v531_v44  ;;  %v640_v59 = vpop.f32.mrb[5].mxu1  ;;  %v10112_v44 = vld [vmem:[#allocation5 + $0xe0] sm:$0xff]  }
 0x281   : > { %v691_v63 = vadd.f32 %v640_v59, %v529_v39  ;;  %v9657_v1 = vpop.f32.mrb[6].mxu1  ;;  %851 = vmatmul.mubr.bf16.gmra.mrb[20].mxu1 %v720_v53  ;;  %v10110_v53 = vld [vmem:[#allocation5 + $0xd0] sm:$0xff]  }
 0x282   : > { %v694_v2 = vadd.f32 %v9657_v1, %v532_v57  ;;  %v643_v4 = vpop.f32.mrb[7].mxu1  ;;  %860 = vmatprep.mubr.bf16.mxu1 %v10637_v0  ;;  %v709_v6 = vmax.f32 %v693_v58, 0.0  ;;  %1214 = vmatpush1.bf16.xpose.msra.mxu1 %v10105_v17 }
 0x283   : > { %v692_v54 = vadd.f32 %v643_v4, %v530_v61  ;;  %v707_v48 = vmax.f32 %v691_v63, 0.0  ;;  %1215 = vmatprep.subr.bf16.mxu1 %v10637_v0 }
 0x284   : > { %v710_v7 = vmax.f32 %v694_v2, 0.0 }
 0x285   : > { %v708_v8 = vmax.f32 %v692_v54, 0.0 }
 0x286   : > { %v722_v10 = vpack.c.bf16 %v710_v7, %v709_v6 }
 0x287   : > { %v721_v12 = vpack.c.bf16 %v708_v8, %v707_v48 }
 0x289   : > { %861 = vmatmul.mubr.bf16.gmra.mrb[24].mxu1 %v721_v12 }
 0x28a   : > { %870 = vmatprep.mubr.bf16.mxu1 %v10637_v0  ;;  %1216 = vmatpush1.bf16.xpose.msra.mxu1 %v10106_v31 }
 0x28b   : > { %1217 = vmatprep.subr.bf16.mxu1 %v10637_v0 }
 0x28f   : > { %v9660_v13 = vpop.f32.mrb[8].mxu1 }
 0x290   : > { %v697_v16 = vadd.f32 %v9660_v13, %v535_v50  ;;  %v656_v18 = vpop.f32.mrb[9].mxu1 }
 0x291   : > { %v695_v20 = vadd.f32 %v656_v18, %v533_v56  ;;  %v9661_v21 = vpop.f32.mrb[10].mxu1  ;;  %871 = vmatmul.mubr.bf16.gmra.mrb[28].mxu1 %v722_v10 }
 0x292   : > { %v698_v22 = vadd.f32 %v9661_v21, %v536_v14  ;;  %v659_v23 = vpop.f32.mrb[11].mxu1  ;;  %880 = vmatprep.mubr.bf16.mxu1 %v10637_v0  ;;  %v713_v24 = vmax.f32 %v697_v16, 0.0  ;;  %1218 = vmatpush1.bf16.xpose.msra.mxu1 %v10107_v51 }
 0x293   : > { %v696_v3 = vadd.f32 %v659_v23, %v534_v19  ;;  %v711_v60 = vmax.f32 %v695_v20, 0.0  ;;  %1219 = vmatprep.subr.bf16.mxu1 %v10637_v0 }
 0x294   : > { %v714_v25 = vmax.f32 %v698_v22, 0.0 }
 0x295   : > { %v712_v26 = vmax.f32 %v696_v3, 0.0 }
 0x296   : > { %v724_v27 = vpack.c.bf16 %v714_v25, %v713_v24 }
 0x297   : > { %v723_v28 = vpack.c.bf16 %v712_v26, %v711_v60 }
 0x299   : > { %881 = vmatmul.mubr.bf16.gmra.mrb[32].mxu1 %v723_v28 }
 0x29a   : > { %890 = vmatprep.mubr.bf16.mxu1 %v10637_v0  ;;  %1220 = vmatpush1.bf16.xpose.msra.mxu1 %v10108_v42 }
 0x29b   : > { %1221 = vmatprep.subr.bf16.mxu1 %v10637_v0 }
 0x29f   : > { %v9664_v29 = vpop.f32.mrb[12].mxu1 }
 0x2a0   : > { %v701_v33 = vadd.f32 %v9664_v29, %v539_v62  ;;  %v672_v34 = vpop.f32.mrb[13].mxu1 }
 0x2a1   : > { %v699_v36 = vadd.f32 %v672_v34, %v537_v5  ;;  %v9665_v38 = vpop.f32.mrb[14].mxu1  ;;  %891 = vmatmul.mubr.bf16.gmra.mrb[36].mxu1 %v724_v27  ;;  %v10113_v34 = vld [vmem:[#allocation5 + $0xe8] sm:$0xff]  }
 0x2a2   : > { %v702_v40 = vadd.f32 %v9665_v38, %v540_v32  ;;  %v675_v41 = vpop.f32.mrb[15].mxu1  ;;  %900 = vmatprep.mubr.bf16.mxu1 %v10637_v0  ;;  %v717_v43 = vmax.f32 %v701_v33, 0.0  ;;  %1222 = vmatpush1.bf16.xpose.msra.mxu1 %v10109_v52  ;;  %v9094_v38 = vld [vmem:[%s13917_s2 + $0x1] sm:$0x1] }
 0x2a3   : > { %v700_v15 = vadd.f32 %v675_v41, %v538_v35  ;;  %v715_v9 = vmax.f32 %v699_v36, 0.0  ;;  %1223 = vmatprep.subr.bf16.mxu1 %v10637_v0  ;;  %v10114_v35 = vld [vmem:[#allocation7 + $0x20] sm:$0xff]   ;;  %v10115_v36 = vld [vmem:[#allocation7 + $0x28] sm:$0xff]  }
 0x2a4   : > { %v718_v45 = vmax.f32 %v702_v40, 0.0  ;;  %9686 = vmatprep.subr.bf16.mxu0 %v10114_v35  ;;  %v923_v40 = vunpack.c.l.bf16 %v9094_v38 }
 0x2a5   : > { %v716_v46 = vmax.f32 %v700_v15, 0.0 }
 0x2a6   : > { %v726_v47 = vpack.c.bf16 %v718_v45, %v717_v43  ;;  %v11049_v41 = vrot.slane %v923_v40, %v10953_v30 }
 0x2a7   : > { %v725_v49 = vpack.c.bf16 %v716_v46, %v715_v9 }
 0x2a9   : > { %901 = vmatmul.mubr.bf16.gmra.mrb[40].mxu1 %v725_v49 }
 0x2aa   : > { %910 = vmatprep.mubr.bf16.mxu1 %v10637_v0  ;;  %1224 = vmatpush1.bf16.xpose.msra.mxu1 %v10110_v53 }
 0x2ab   : > { %1225 = vmatprep.subr.bf16.mxu1 %v10637_v0 }
 0x2b1   : > { %911 = vmatmul.mubr.bf16.gmra.mrb[44].mxu1 %v726_v47 }
 0x2b2   : > { %1243 = vmatprep.mubr.bf16.mxu1 %v10637_v0  ;;  %1226 = vmatpush1.bf16.xpose.msra.mxu1 %v10111_v37 }
 0x2b3   : > { %1227 = vmatprep.subr.bf16.mxu1 %v10637_v0 }
 0x2ba   : > { %1228 = vmatpush1.bf16.xpose.msra.mxu1 %v10112_v44 }
 0x2bb   : > { %1229 = vmatprep.subr.bf16.mxu1 %v10637_v0 }
 0x2c2   : > { %1230 = vmatpush1.bf16.xpose.msra.mxu1 %v10113_v34 }
 0x2c3   : > { %1885 = vmatprep.subr.bf16.mxu1 %v10637_v0 }
 0x34c   : > { %v11006_v39 = vpop.f32.mrb[16].mxu1 }
 0x34d   : > { %v844_v55 = vpop.f32.mrb[17].mxu1  ;;  %v928_v43 = vadd.f32 %v11049_v41, %v11006_v39 }
 0x34e   : > { %v11009_v57 = vpop.f32.mrb[18].mxu1 }
 0x34f   : > { %v848_v58 = vpop.f32.mrb[19].mxu1  ;;  %v929_v49 = vadd.f32 %v11049_v41, %v11009_v57 }
 0x350   : > { %v944_v59 = vpack.c.bf16 %v848_v58, %v844_v55 }
 0x352   : > { %9670 = vmatprep.mubr.msk.bf16.mxu0 %vm565_vm0, %v944_v59 }
 0x354   : > { %v852_v61 = vpop.f32.mrb[20].mxu1 }
 0x355   : > { %v854_v63 = vpop.f32.mrb[21].mxu1  ;;  %v930_v15 = vadd.f32 %v11049_v41, %v852_v61 }
 0x356   : > { %v856_v1 = vpop.f32.mrb[22].mxu1 }
 0x357   : > { %v858_v2 = vpop.f32.mrb[23].mxu1  ;;  %v931_v9 = vadd.f32 %v11049_v41, %v856_v1 }
 0x358   : > { %v945_v4 = vpack.c.bf16 %v858_v2, %v854_v63 }
 0x35a   : > { %9671 = vmatmul.mubr.msk.bf16.vlgmr.msra.gmra.mrb[32].mxu0 %vm565_vm0, %v945_v4 }
 0x35b   : > { %9687 = vmatpush3.bf16.msra.mxu0 %v10114_v35 }
 0x35c   : > { %v11013_v54 = vpop.f32.mrb[24].mxu1  ;;  %9688 = vmatprep.subr.bf16.mxu0 %v10115_v36 }
 0x35d   : > { %v864_v6 = vpop.f32.mrb[25].mxu1  ;;  %v932_v57 = vadd.f32 %v11049_v41, %v11013_v54 }
 0x35e   : > { %v11015_v7 = vpop.f32.mrb[26].mxu1 }
 0x35f   : > { %v868_v48 = vpop.f32.mrb[27].mxu1  ;;  %9689 = vmatpush3.bf16.msra.mxu0 %v10115_v36  ;;  %v933_v2 = vadd.f32 %v11049_v41, %v11015_v7 }
 0x360   : > { %v946_v8 = vpack.c.bf16 %v868_v48, %v864_v6  ;;  %2288 = vmatprep.subr.bf16.mxu0 %v10637_v0 }
 0x362   : > { %9674 = vmatprep.mubr.msk.bf16.mxu0 %vm565_vm0, %v946_v8 }
 0x364   : > { %v11018_v10 = vpop.f32.mrb[28].mxu1 }
 0x365   : > { %v874_v12 = vpop.f32.mrb[29].mxu1  ;;  %v934_v39 = vadd.f32 %v11049_v41, %v11018_v10 }
 0x366   : > { %v11020_v50 = vpop.f32.mrb[30].mxu1 }
 0x367   : > { %v878_v56 = vpop.f32.mrb[31].mxu1  ;;  %v935_v61 = vadd.f32 %v11049_v41, %v11020_v50 }
 0x368   : > { %v947_v13 = vpack.c.bf16 %v878_v56, %v874_v12 }
 0x36a   : > { %9675 = vmatmul.mubr.msk.bf16.gmra.mrb[36].mxu0 %vm565_vm0, %v947_v13 }
 0x36c   : > { %v11023_v14 = vpop.f32.mrb[32].mxu1 }
 0x36d   : > { %v884_v16 = vpop.f32.mrb[33].mxu1  ;;  %v936_v50 = vadd.f32 %v11049_v41, %v11023_v14 }
 0x36e   : > { %v11025_v18 = vpop.f32.mrb[34].mxu1 }
 0x36f   : > { %v888_v19 = vpop.f32.mrb[35].mxu1 }
 0x370   : > { %v948_v20 = vpack.c.bf16 %v888_v19, %v884_v16 }
 0x372   : > { %9678 = vmatprep.mubr.msk.bf16.mxu0 %vm565_vm0, %v948_v20 }
 0x374   : > { %v11028_v21 = vpop.f32.mrb[36].mxu1 }
 0x375   : > { %v894_v22 = vpop.f32.mrb[37].mxu1  ;;  %v938_v7 = vadd.f32 %v11049_v41, %v11028_v21 }
 0x376   : > { %v11030_v23 = vpop.f32.mrb[38].mxu1 }
 0x377   : > { %v898_v3 = vpop.f32.mrb[39].mxu1 }
 0x378   : > { %v949_v24 = vpack.c.bf16 %v898_v3, %v894_v22  ;;  %v939_v22 = vadd.f32 %v11049_v41, %v11030_v23 }
 0x37a   : > { %9679 = vmatmul.mubr.msk.bf16.gmra.mrb[40].mxu0 %vm565_vm0, %v949_v24 }
 0x37c   : > { %v11033_v25 = vpop.f32.mrb[40].mxu1 }
 0x37d   : > { %v904_v60 = vpop.f32.mrb[41].mxu1  ;;  %v940_v23 = vadd.f32 %v11049_v41, %v11033_v25 }
 0x37e   : > { %v11035_v26 = vpop.f32.mrb[42].mxu1 }
 0x37f   : > { %v908_v27 = vpop.f32.mrb[43].mxu1 }
 0x380   : > { %v950_v28 = vpack.c.bf16 %v908_v27, %v904_v60  ;;  %v937_v60 = vadd.f32 %v11049_v41, %v11025_v18 }
 0x382   : > { %9682 = vmatprep.mubr.msk.bf16.mxu0 %vm565_vm0, %v950_v28 }
 0x384   : > { %v11038_v62 = vpop.f32.mrb[44].mxu1 }
 0x385   : > { %v914_v5 = vpop.f32.mrb[45].mxu1  ;;  %v942_v18 = vadd.f32 %v11049_v41, %v11038_v62 }
 0x386   : > { %v11040_v29 = vpop.f32.mrb[46].mxu1 }
 0x387   : > { %v918_v32 = vpop.f32.mrb[47].mxu1 }
 0x388   : > { %v951_v33 = vpack.c.bf16 %v918_v32, %v914_v5 }
 0x38a   : > { %9683 = vmatmul.mubr.msk.bf16.gmra.mrb[44].mxu0 %vm565_vm0, %v951_v33 }
 0x42d   : > { %v9672_v45 = vpop.f32.mrb[32].mxu0 }
 0x42e   : > { %v1092_v46 = vadd.f32 %v9672_v45, %v930_v15  ;;  %v1027_v47 = vpop.f32.mrb[33].mxu0  ;;  %v943_v15 = vadd.f32 %v11049_v41, %v11040_v29 }
 0x42f   : > { %v1090_v11 = vadd.f32 %v1027_v47, %v928_v43  ;;  %v9673_v17 = vpop.f32.mrb[34].mxu0 }
 0x430   : > { %v1093_v31 = vadd.f32 %v9673_v17, %v931_v9  ;;  %v1030_v51 = vpop.f32.mrb[35].mxu0  ;;  %v1108_v52 = vmax.f32 %v1092_v46, 0.0  ;;  %v941_v9 = vadd.f32 %v11049_v41, %v11035_v26 }
 0x431   : > { %v1091_v42 = vadd.f32 %v1030_v51, %v929_v49  ;;  %v1106_v37 = vmax.f32 %v1090_v11, 0.0 }
 0x432   : > { %v1109_v53 = vmax.f32 %v1093_v31, 0.0 }
 0x433   : > { %v1107_v44 = vmax.f32 %v1091_v42, 0.0 }
 0x434   : > { %v1123_v55 = vpack.c.bf16 %v1109_v53, %v1108_v52 }
 0x435   : > { %v1122_v58 = vpack.c.bf16 %v1107_v44, %v1106_v37 }
 0x437   : > { %1244 = vmatmul.mubr.bf16.vlgmr.msra.gmra.mrb[48].mxu1 %v1122_v58 }
 0x438   : > { %1253 = vmatprep.mubr.bf16.mxu1 %v10637_v0 }
 0x43d   : > { %v9676_v59 = vpop.f32.mrb[36].mxu0 }
 0x43e   : > { %v1096_v63 = vadd.f32 %v9676_v59, %v934_v39  ;;  %v1043_v1 = vpop.f32.mrb[37].mxu0 }
 0x43f   : > { %v1094_v4 = vadd.f32 %v1043_v1, %v932_v57  ;;  %v9677_v6 = vpop.f32.mrb[38].mxu0  ;;  %1254 = vmatmul.mubr.bf16.gmra.mrb[52].mxu1 %v1123_v55 }
 0x440   : > { %v1097_v48 = vadd.f32 %v9677_v6, %v935_v61  ;;  %v1046_v8 = vpop.f32.mrb[39].mxu0  ;;  %1263 = vmatprep.mubr.bf16.mxu1 %v10637_v0  ;;  %v1112_v12 = vmax.f32 %v1096_v63, 0.0 }
 0x441   : > { %v1095_v10 = vadd.f32 %v1046_v8, %v933_v2  ;;  %v1110_v54 = vmax.f32 %v1094_v4, 0.0 }
 0x442   : > { %v1113_v56 = vmax.f32 %v1097_v48, 0.0 }
 0x443   : > { %v1111_v13 = vmax.f32 %v1095_v10, 0.0 }
 0x444   : > { %v1125_v16 = vpack.c.bf16 %v1113_v56, %v1112_v12 }
 0x445   : > { %v1124_v19 = vpack.c.bf16 %v1111_v13, %v1110_v54 }
 0x447   : > { %1264 = vmatmul.mubr.bf16.gmra.mrb[56].mxu1 %v1124_v19 }
 0x448   : > { %1273 = vmatprep.mubr.bf16.mxu1 %v10637_v0 }
 0x44d   : > { %v9680_v20 = vpop.f32.mrb[40].mxu0 }
 0x44e   : > { %v1100_v3 = vadd.f32 %v9680_v20, %v938_v7  ;;  %v1059_v24 = vpop.f32.mrb[41].mxu0 }
 0x44f   : > { %v1098_v27 = vadd.f32 %v1059_v24, %v936_v50  ;;  %v9681_v28 = vpop.f32.mrb[42].mxu0  ;;  %1274 = vmatmul.mubr.bf16.gmra.mrb[60].mxu1 %v1125_v16 }
 0x450   : > { %v1101_v5 = vadd.f32 %v9681_v28, %v939_v22  ;;  %v1062_v32 = vpop.f32.mrb[43].mxu0  ;;  %1283 = vmatprep.mubr.bf16.mxu1 %v10637_v0  ;;  %v1116_v33 = vmax.f32 %v1100_v3, 0.0 }
 0x451   : > { %v1099_v21 = vadd.f32 %v1062_v32, %v937_v60  ;;  %v1114_v14 = vmax.f32 %v1098_v27, 0.0 }
 0x452   : > { %v1117_v34 = vmax.f32 %v1101_v5, 0.0 }
 0x453   : > { %v1115_v35 = vmax.f32 %v1099_v21, 0.0 }
 0x454   : > { %v1127_v36 = vpack.c.bf16 %v1117_v34, %v1116_v33 }
 0x455   : > { %v1126_v38 = vpack.c.bf16 %v1115_v35, %v1114_v14  ;;  %v10116_v14 = vld [vmem:[#allocation5 + $0xf0] sm:$0xff]   ;;  %v10117_v35 = vld [vmem:[#allocation5 + $0xf8] sm:$0xff]  }
 0x456   : > { %1886 = vmatpush1.bf16.xpose.msra.mxu1 %v10116_v14  ;;  %v10123_v14 = vld [vmem:[#allocation5 + $0x128] sm:$0xff]  }
 0x457   : > { %1284 = vmatmul.mubr.bf16.gmra.mrb[64].mxu1 %v1126_v38  ;;  %1887 = vmatprep.subr.bf16.mxu1 %v10637_v0  ;;  %v10119_v38 = vld [vmem:[#allocation5 + $0x108] sm:$0xff]  }
 0x458   : > { %1293 = vmatprep.mubr.bf16.mxu1 %v10637_v0 }
 0x45d   : > { %v9684_v40 = vpop.f32.mrb[44].mxu0 }
 0x45e   : > { %v1104_v43 = vadd.f32 %v9684_v40, %v942_v18  ;;  %v1075_v45 = vpop.f32.mrb[45].mxu0  ;;  %1888 = vmatpush1.bf16.xpose.msra.mxu1 %v10117_v35  ;;  %v10120_v18 = vld [vmem:[#allocation5 + $0x110] sm:$0xff]   ;;  %v9115_v40 = vld [vmem:[%s13917_s2 + $0x2] sm:$0x1]  ;;  %v10463_v35 = vld [vmem:[%s10854_s12 + $0x38] sm:$0xff] }
 0x45f   : > { %v1102_v46 = vadd.f32 %v1075_v45, %v940_v23  ;;  %v9685_v47 = vpop.f32.mrb[46].mxu0  ;;  %1294 = vmatmul.mubr.bf16.gmra.mrb[68].mxu1 %v1127_v36  ;;  %1889 = vmatprep.subr.bf16.mxu1 %v10637_v0  ;;  %v10118_v36 = vld [vmem:[#allocation5 + $0x100] sm:$0xff]   ;;  %v10121_v23 = vld [vmem:[#allocation5 + $0x118] sm:$0xff]  }
 0x460   : > { %v1105_v49 = vadd.f32 %v9685_v47, %v943_v15  ;;  %v1078_v11 = vpop.f32.mrb[47].mxu0  ;;  %1303 = vmatprep.mubr.bf16.mxu1 %v10637_v0  ;;  %v1120_v17 = vmax.f32 %v1104_v43, 0.0  ;;  %v1326_v15 = vunpack.c.l.bf16 %v9115_v40 }
 0x461   : > { %v1103_v62 = vadd.f32 %v1078_v11, %v941_v9  ;;  %v1118_v25 = vmax.f32 %v1102_v46, 0.0 }
 0x462   : > { %v1121_v31 = vmax.f32 %v1105_v49, 0.0  ;;  %v11140_v43 = vrot.slane %v1326_v15, %v10953_v30 }
 0x463   : > { %v1119_v51 = vmax.f32 %v1103_v62, 0.0 }
 0x464   : > { %v1129_v42 = vpack.c.bf16 %v1121_v31, %v1120_v17 }
 0x465   : > { %v1128_v52 = vpack.c.bf16 %v1119_v51, %v1118_v25 }
 0x466   : > { %1890 = vmatpush1.bf16.xpose.msra.mxu1 %v10118_v36 }
 0x467   : > { %1304 = vmatmul.mubr.bf16.gmra.mrb[72].mxu1 %v1128_v52  ;;  %1891 = vmatprep.subr.bf16.mxu1 %v10637_v0  ;;  %v10456_v52 = vld [vmem:[%s10854_s12] sm:$0xff] }
 0x468   : > { %1313 = vmatprep.mubr.bf16.mxu1 %v10637_v0 }
 0x46e   : > { %1892 = vmatpush1.bf16.xpose.msra.mxu1 %v10119_v38 }
 0x46f   : > { %1314 = vmatmul.mubr.bf16.gmra.mrb[76].mxu1 %v1129_v42  ;;  %1893 = vmatprep.subr.bf16.mxu1 %v10637_v0 }
 0x470   : > { %1917 = vmatprep.mubr.bf16.mxu1 %v10637_v0 }
 0x476   : > { %1894 = vmatpush1.bf16.xpose.msra.mxu1 %v10120_v18 }
 0x477   : > { %1895 = vmatprep.subr.bf16.mxu1 %v10637_v0 }
 0x47e   : > { %1896 = vmatpush1.bf16.xpose.msra.mxu1 %v10121_v23 }
 0x47f   : > { %1897 = vmatprep.subr.bf16.mxu1 %v10637_v0 }
 0x50a   : > { %v11089_v26 = vpop.f32.mrb[48].mxu1 }
 0x50b   : > { %v1247_v29 = vpop.f32.mrb[49].mxu1  ;;  %v1331_v9 = vadd.f32 %v11140_v43, %v11089_v26 }
 0x50c   : > { %v11091_v41 = vpop.f32.mrb[50].mxu1 }
 0x50d   : > { %v1251_v53 = vpop.f32.mrb[51].mxu1  ;;  %v1332_v62 = vadd.f32 %v11140_v43, %v11091_v41 }
 0x50e   : > { %v1347_v37 = vpack.c.bf16 %v1251_v53, %v1247_v29  ;;  %v10457_v53 = vld [vmem:[%s10854_s12 + $0x8] sm:$0xff] }
 0x510   : > { %9690 = vmatprep.mubr.msk.bf16.mxu0 %vm565_vm0, %v1347_v37 }
 0x512   : > { %v11094_v44 = vpop.f32.mrb[52].mxu1 }
 0x513   : > { %v1257_v55 = vpop.f32.mrb[53].mxu1  ;;  %v1333_v45 = vadd.f32 %v11140_v43, %v11094_v44  ;;  %v10458_v44 = vld [vmem:[%s10854_s12 + $0x10] sm:$0xff] }
 0x514   : > { %v11096_v58 = vpop.f32.mrb[54].mxu1 }
 0x515   : > { %v1261_v39 = vpop.f32.mrb[55].mxu1  ;;  %v1334_v47 = vadd.f32 %v11140_v43, %v11096_v58  ;;  %v10459_v58 = vld [vmem:[%s10854_s12 + $0x18] sm:$0xff] }
 0x516   : > { %v1348_v57 = vpack.c.bf16 %v1261_v39, %v1257_v55 }
 0x518   : > { %9691 = vmatmul.mubr.msk.bf16.vlgmr.msra.gmra.mrb[48].mxu0 %vm565_vm0, %v1348_v57 }
 0x51a   : > { %v11099_v59 = vpop.f32.mrb[56].mxu1 }
 0x51b   : > { %v1267_v61 = vpop.f32.mrb[57].mxu1 }
 0x51c   : > { %v11101_v63 = vpop.f32.mrb[58].mxu1 }
 0x51d   : > { %v1271_v1 = vpop.f32.mrb[59].mxu1 }
 0x51e   : > { %v1349_v2 = vpack.c.bf16 %v1271_v1, %v1267_v61  ;;  %v1335_v61 = vadd.f32 %v11140_v43, %v11099_v59 }
 0x520   : > { %9694 = vmatprep.mubr.msk.bf16.mxu0 %vm565_vm0, %v1349_v2 }
 0x522   : > { %v11104_v4 = vpop.f32.mrb[60].mxu1 }
 0x523   : > { %v1277_v6 = vpop.f32.mrb[61].mxu1  ;;  %v1337_v57 = vadd.f32 %v11140_v43, %v11104_v4 }
 0x524   : > { %v11106_v48 = vpop.f32.mrb[62].mxu1 }
 0x525   : > { %v1281_v8 = vpop.f32.mrb[63].mxu1 }
 0x526   : > { %v1350_v10 = vpack.c.bf16 %v1281_v8, %v1277_v6  ;;  %v1338_v6 = vadd.f32 %v11140_v43, %v11106_v48  ;;  %v10122_v48 = vld [vmem:[#allocation5 + $0x120] sm:$0xff]  }
 0x527   : > { %1898 = vmatpush1.bf16.xpose.msra.mxu1 %v10122_v48 }
 0x528   : > { %9695 = vmatmul.mubr.msk.bf16.gmra.mrb[52].mxu0 %vm565_vm0, %v1350_v10  ;;  %1899 = vmatprep.subr.bf16.mxu1 %v10637_v0 }
 0x52a   : > { %v11109_v12 = vpop.f32.mrb[64].mxu1 }
 0x52b   : > { %v1287_v56 = vpop.f32.mrb[65].mxu1  ;;  %v1339_v18 = vadd.f32 %v11140_v43, %v11109_v12 }
 0x52c   : > { %v11111_v54 = vpop.f32.mrb[66].mxu1 }
 0x52d   : > { %v1291_v13 = vpop.f32.mrb[67].mxu1 }
 0x52e   : > { %v1351_v16 = vpack.c.bf16 %v1291_v13, %v1287_v56  ;;  %v1336_v56 = vadd.f32 %v11140_v43, %v11101_v63 }
 0x52f   : > { %1900 = vmatpush1.bf16.xpose.msra.mxu1 %v10123_v14  ;;  %v11273_v14 = vld [vmem:[#allocation7 + $0x30] sm:$0xff]  }
 0x530   : > { %9698 = vmatprep.mubr.msk.bf16.mxu0 %vm565_vm0, %v1351_v16  ;;  %1901 = vmatprep.subr.bf16.mxu1 %v10637_v0 }
 0x532   : > { %v11114_v19 = vpop.f32.mrb[68].mxu1 }
 0x533   : > { %v1297_v7 = vpop.f32.mrb[69].mxu1  ;;  %v1341_v38 = vadd.f32 %v11140_v43, %v11114_v19  ;;  %v1340_v19 = vadd.f32 %v11140_v43, %v11111_v54 }
 0x534   : > { %v11116_v50 = vpop.f32.mrb[70].mxu1 }
 0x535   : > { %v1301_v20 = vpop.f32.mrb[71].mxu1  ;;  %v1342_v15 = vadd.f32 %v11140_v43, %v11116_v50  ;;  %v10124_v50 = vld [vmem:[#allocation5 + $0x130] sm:$0xff]  }
 0x536   : > { %v1352_v22 = vpack.c.bf16 %v1301_v20, %v1297_v7 }
 0x537   : > { %1902 = vmatpush1.bf16.xpose.msra.mxu1 %v10124_v50 }
 0x538   : > { %9699 = vmatmul.mubr.msk.bf16.gmra.mrb[56].mxu0 %vm565_vm0, %v1352_v22  ;;  %v10460_v22 = vld [vmem:[%s10854_s12 + $0x20] sm:$0xff]  ;;  %1903 = vmatprep.subr.bf16.mxu1 %v10637_v0 }
 0x53a   : > { %v11119_v3 = vpop.f32.mrb[72].mxu1 }
 0x53b   : > { %v1307_v24 = vpop.f32.mrb[73].mxu1 }
 0x53c   : > { %v11121_v60 = vpop.f32.mrb[74].mxu1 }
 0x53d   : > { %v1311_v27 = vpop.f32.mrb[75].mxu1 }
 0x53e   : > { %v1353_v28 = vpack.c.bf16 %v1311_v27, %v1307_v24  ;;  %v10461_v27 = vld [vmem:[%s10854_s12 + $0x28] sm:$0xff] }
 0x540   : > { %9702 = vmatprep.mubr.msk.bf16.mxu0 %vm565_vm0, %v1353_v28 }
 0x542   : > { %v11124_v5 = vpop.f32.mrb[76].mxu1 }
 0x543   : > { %v1317_v32 = vpop.f32.mrb[77].mxu1 }
 0x544   : > { %v11126_v21 = vpop.f32.mrb[78].mxu1 }
 0x545   : > { %v1321_v33 = vpop.f32.mrb[79].mxu1 }
 0x546   : > { %v1354_v34 = vpack.c.bf16 %v1321_v33, %v1317_v32  ;;  %v10462_v33 = vld [vmem:[%s10854_s12 + $0x30] sm:$0xff] }
 0x548   : > { %9703 = vmatmul.mubr.msk.bf16.gmra.mrb[60].mxu0 %vm565_vm0, %v1354_v34 }
 0x549   : > { %2320 = vmatprep.mubr.bf16.mxu0 %v10637_v0 }
 0x5eb   : > { %v9692_v46 = vpop.f32.mrb[48].mxu0 }
 0x5ec   : > { %v1495_v49 = vadd.f32 %v9692_v46, %v1333_v45  ;;  %v1430_v11 = vpop.f32.mrb[49].mxu0 }
 0x5ed   : > { %v1493_v17 = vadd.f32 %v1430_v11, %v1331_v9  ;;  %v9693_v31 = vpop.f32.mrb[50].mxu0 }
 0x5ee   : > { %v1496_v25 = vadd.f32 %v9693_v31, %v1334_v47  ;;  %v1433_v51 = vpop.f32.mrb[51].mxu0  ;;  %v11163_v55 = vadd.f32 %v10458_v44, %v1495_v49 }
 0x5ef   : > { %v1494_v42 = vadd.f32 %v1433_v51, %v1332_v62  ;;  %v11151_v29 = vadd.f32 %v10456_v52, %v1493_v17  ;;  %v10464_v17 = vld [vmem:[%s10854_s12 + $0x40] sm:$0xff]  ;;  %v10466_v52 = vld [vmem:[%s10854_s12 + $0x50] sm:$0xff] }
 0x5f0   : > { %v11167_v39 = vadd.f32 %v10459_v58, %v1496_v25  ;;  %v1578_v2 = vmul.f32 %v11163_v55, %v11163_v55  ;;  %v10465_v25 = vld [vmem:[%s10854_s12 + $0x48] sm:$0xff]  ;;  %v1345_v58 = vadd.f32 %v11140_v43, %v11124_v5  ;;  %v1344_v5 = vadd.f32 %v11140_v43, %v11121_v60 }
 0x5f1   : > { %1527 = vadd.xlane.f32.xlu0 %v11151_v29  ;;  %v1576_v26 = vmul.f32 %v11151_v29, %v11151_v29  ;;  %v11157_v37 = vadd.f32 %v10457_v53, %v1494_v42  ;;  %v10125_v53 = vld [vmem:[#allocation5 + $0x138] sm:$0xff]  }
 0x5f2   : > { %v1579_v59 = vmul.f32 %v11167_v39, %v11167_v39  ;;  %1904 = vmatpush1.bf16.xpose.msra.mxu1 %v10125_v53 }
 0x5f3   : > { %1592 = vadd.xlane.f32.xlu1 %v1576_v26  ;;  %v1577_v41 = vmul.f32 %v11157_v37, %v11157_v37  ;;  %9706 = vmatprep.subr.bf16.mxu1 %v11273_v14 }
 0x5f5   : > { %1529 = vadd.xlane.f32.xlu0 %v11157_v37 }
 0x5f7   : > { %1594 = vadd.xlane.f32.xlu1 %v1577_v41  ;;  %v10467_v41 = vld [vmem:[%s10854_s12 + $0x58] sm:$0xff] }
 0x5f9   : > { %1531 = vadd.xlane.f32.xlu0 %v11163_v55 }
 0x5fb   : > { %1533 = vadd.xlane.f32.xlu1 %v11167_v39  ;;  %v9696_v1 = vpop.f32.mrb[52].mxu0 }
 0x5fc   : > { %v1499_v8 = vadd.f32 %v9696_v1, %v1337_v57  ;;  %v1446_v10 = vpop.f32.mrb[53].mxu0  ;;  %v1343_v57 = vadd.f32 %v11140_v43, %v11119_v3 }
 0x5fd   : > { %v1497_v4 = vadd.f32 %v1446_v10, %v1335_v61  ;;  %1596 = vadd.xlane.f32.xlu0 %v1578_v2  ;;  %v9697_v13 = vpop.f32.mrb[54].mxu0  ;;  %v1346_v2 = vadd.f32 %v11140_v43, %v11126_v21  ;;  %v10469_v21 = vld [vmem:[%s10854_s12 + $0x68] sm:$0xff] }
 0x5fe   : > { %v1500_v16 = vadd.f32 %v9697_v13, %v1338_v6  ;;  %v1449_v7 = vpop.f32.mrb[55].mxu0  ;;  %v11196_v34 = vadd.f32 %v10462_v33, %v1499_v8 }
 0x5ff   : > { %v1498_v20 = vadd.f32 %v1449_v7, %v1336_v56  ;;  %1598 = vadd.xlane.f32.xlu1 %v1579_v59  ;;  %v11183_v24 = vadd.f32 %v10460_v22, %v1497_v4  ;;  %v10470_v22 = vld [vmem:[%s10854_s12 + $0x70] sm:$0xff] }
 0x600   : > { %v11200_v36 = vadd.f32 %v10463_v35, %v1500_v16  ;;  %v1582_v40 = vmul.f32 %v11196_v34, %v11196_v34  ;;  %v10468_v16 = vld [vmem:[%s10854_s12 + $0x60] sm:$0xff] }
 0x601   : > { %1535 = vadd.xlane.f32.xlu0 %v11183_v24  ;;  %v11187_v63 = vadd.f32 %v10461_v27, %v1498_v20  ;;  %v1580_v28 = vmul.f32 %v11183_v24, %v11183_v24  ;;  %v10471_v27 = vld [vmem:[%s10854_s12 + $0x78] sm:$0xff]  ;;  %s10564_s12 = scalar_lea.vmem %s10563_s19, 4096 }
 0x602   : > { %v1583_v47 = vmul.f32 %v11200_v36, %v11200_v36  ;;  %p10566_p9 = scmp.lt.s32.totalorder %s10564_s12, %s10558_s18 }
 0x603   : > { %1537 = vadd.xlane.f32.xlu1 %v11187_v63  ;;  %v1581_v32 = vmul.f32 %v11187_v63, %v11187_v63 }
 0x604   : > { %p10567_p12 = por %p10566_p9, %p10565_p7 }
 0x605   : > { %1600 = vadd.xlane.f32.xlu0 %v1580_v28 }
 0x606   : > { %p10568_p2 = pnand %p10567_p12, %p10561_p3 }
 0x607   : > { %1602 = vadd.xlane.f32.xlu1 %v1581_v32 }
 0x609   : > { %1539 = vadd.xlane.f32.xlu0 %v11196_v34 }
 0x60b   : > { %1541 = vadd.xlane.f32.xlu1 %v11200_v36  ;;  %v9700_v23 = vpop.f32.mrb[56].mxu0 }
 0x60c   : > { %v1503_v45 = vadd.f32 %v9700_v23, %v1341_v38  ;;  %v1462_v9 = vpop.f32.mrb[57].mxu0 }
 0x60d   : > { %v1501_v46 = vadd.f32 %v1462_v9, %v1339_v18  ;;  %1604 = vadd.xlane.f32.xlu0 %v1582_v40  ;;  %v9701_v12 = vpop.f32.mrb[58].mxu0 }
 0x60e   : > { %v1504_v49 = vadd.f32 %v9701_v12, %v1342_v15  ;;  %v1465_v11 = vpop.f32.mrb[59].mxu0  ;;  %v11230_v26 = vadd.f32 %v10466_v52, %v1503_v45 }
 0x60f   : > { %v1502_v62 = vadd.f32 %v1465_v11, %v1340_v19  ;;  %1606 = vadd.xlane.f32.xlu1 %v1583_v47  ;;  %v11217_v31 = vadd.f32 %v10464_v17, %v1501_v46 }
 0x610   : > { %v11234_v44 = vadd.f32 %v10467_v41, %v1504_v49  ;;  %v1586_v1 = vmul.f32 %v11230_v26, %v11230_v26 }
 0x611   : > { %1543 = vadd.xlane.f32.xlu0 %v11217_v31  ;;  %v11221_v54 = vadd.f32 %v10465_v25, %v1502_v62  ;;  %v1584_v51 = vmul.f32 %v11217_v31, %v11217_v31 }
 0x612   : > { %v1587_v3 = vmul.f32 %v11234_v44, %v11234_v44 }
 0x613   : > { %1545 = vadd.xlane.f32.xlu1 %v11221_v54  ;;  %v1585_v42 = vmul.f32 %v11221_v54, %v11221_v54 }
 0x615   : > { %1608 = vadd.xlane.f32.xlu0 %v1584_v51 }
 0x617   : > { %1610 = vadd.xlane.f32.xlu1 %v1585_v42 }
 0x619   : > { %1547 = vadd.xlane.f32.xlu0 %v11230_v26 }
 0x61b   : > { %1549 = vadd.xlane.f32.xlu1 %v11234_v44  ;;  %v9704_v61 = vpop.f32.mrb[60].mxu0 }
 0x61c   : > { %v1507_v6 = vadd.f32 %v9704_v61, %v1345_v58  ;;  %v1478_v8 = vpop.f32.mrb[61].mxu0 }
 0x61d   : > { %v1505_v10 = vadd.f32 %v1478_v8, %v1343_v57  ;;  %1612 = vadd.xlane.f32.xlu0 %v1586_v1  ;;  %v9705_v56 = vpop.f32.mrb[62].mxu0 }
 0x61e   : > { %v1508_v4 = vadd.f32 %v9705_v56, %v1346_v2  ;;  %v1481_v13 = vpop.f32.mrb[63].mxu0  ;;  %v11262_v48 = vadd.f32 %v10470_v22, %v1507_v6 }
 0x61f   : > { %v1506_v59 = vadd.f32 %v1481_v13, %v1344_v5  ;;  %1614 = vadd.xlane.f32.xlu1 %v1587_v3  ;;  %v11250_v7 = vadd.f32 %v10468_v16, %v1505_v10 }
 0x620   : > { %v11266_v28 = vadd.f32 %v10471_v27, %v1508_v4  ;;  %v1590_v32 = vmul.f32 %v11262_v48, %v11262_v48 }
 0x621   : > { %1551 = vadd.xlane.f32.xlu0 %v11250_v7  ;;  %v11254_v20 = vadd.f32 %v10469_v21, %v1506_v59  ;;  %v1588_v60 = vmul.f32 %v11250_v7, %v11250_v7 }
 0x622   : > { %v1591_v33 = vmul.f32 %v11266_v28, %v11266_v28 }
 0x623   : > { %1553 = vadd.xlane.f32.xlu1 %v11254_v20  ;;  %v1589_v43 = vmul.f32 %v11254_v20, %v11254_v20 }
 0x625   : > { %1616 = vadd.xlane.f32.xlu0 %v1588_v60 }
 0x627   : > { %1618 = vadd.xlane.f32.xlu1 %v1589_v43 }
 0x629   : > { %1555 = vadd.xlane.f32.xlu0 %v11262_v48 }
 0x62b   : > { %1557 = vadd.xlane.f32.xlu1 %v11266_v28 }
 0x62d   : > { %1620 = vadd.xlane.f32.xlu0 %v1590_v32 }
 0x62f   : > { %1622 = vadd.xlane.f32.xlu1 %v1591_v33 }
 0x67e   : > { %v1528_v35 = vpop.xlane.xlu0 %1527 }
 0x67f   : > { %v1560_v38 = vmul.f32 0.0078125, %v1528_v35 }
 0x680   : > { %v1593_v18 = vpop.xlane.xlu1 %1592 }
 0x681   : > { %v1640_v23 = vmul.f32 %v1560_v38, %v1560_v38  ;;  %v1624_v40 = vmul.f32 0.0078125, %v1593_v18  ;;  %v1688_v4 = vsub.f32 %v11151_v29, %v1560_v38  ;;  %v11296_v29 = vld [vmem:[%s13919_s4] ss:$0 sm:$0xff] }
 0x682   : > { %v1530_v15 = vpop.xlane.xlu0 %1529 }
 0x683   : > { %v1656_v45 = vsub.f32 %v1624_v40, %v1640_v23  ;;  %v1561_v9 = vmul.f32 0.0078125, %v1530_v15 }
 0x684   : > { %v1595_v19 = vpop.xlane.xlu1 %1594 }
 0x685   : > { %v1672_v46 = vmax.f32 %v1656_v45, 0.0  ;;  %v1641_v12 = vmul.f32 %v1561_v9, %v1561_v9  ;;  %v1625_v47 = vmul.f32 0.0078125, %v1595_v19  ;;  %v1689_v38 = vsub.f32 %v11157_v37, %v1561_v9 }
 0x686   : > { %v1532_v49 = vpop.xlane.xlu0 %1531 }
 0x687   : > { %v1704_v11 = vadd.f32 1e-05, %v1672_v46  ;;  %v1657_v62 = vsub.f32 %v1625_v47, %v1641_v12  ;;  %v11276_v17 = vmul.f32 0.0078125, %v1532_v49 }
 0x688   : > { %v1534_v50 = vpop.xlane.xlu1 %1533 }
 0x689   : > { %10296 = vrsqrt.f32 %v1704_v11  ;;  %v1673_v25 = vmax.f32 %v1657_v62, 0.0  ;;  %v11278_v51 = vmul.f32 0.0078125, %v1534_v50  ;;  %v1642_v53 = vmul.f32 %v11276_v17, %v11276_v17  ;;  %v11305_v11 = vld [vmem:[%s13920_s5] ss:$0 sm:$0xff] }
 0x68a   : > { %v1597_v42 = vpop.xlane.xlu0 %1596 }
 0x68b   : > { %v1705_v52 = vadd.f32 1e-05, %v1673_v25  ;;  %v1626_v41 = vmul.f32 0.0078125, %v1597_v42  ;;  %v1643_v57 = vmul.f32 %v11278_v51, %v11278_v51 }
 0x68c   : > { %v1599_v58 = vpop.xlane.xlu1 %1598 }
 0x68d   : > { %10298 = vrsqrt.f32 %v1705_v52  ;;  %v1658_v61 = vsub.f32 %v1626_v41, %v1642_v53  ;;  %v1627_v1 = vmul.f32 0.0078125, %v1599_v58  ;;  %v1690_v52 = vsub.f32 %v11163_v55, %v11276_v17 }
 0x68e   : > { %v1536_v2 = vpop.xlane.xlu0 %1535 }
 0x68f   : > { %v1674_v6 = vmax.f32 %v1658_v61, 0.0  ;;  %v1659_v8 = vsub.f32 %v1627_v1, %v1643_v57  ;;  %v11284_v5 = vmul.f32 0.0078125, %v1536_v2 }
 0x690   : > { %v1538_v10 = vpop.xlane.xlu1 %1537 }
 0x691   : > { %v1706_v56 = vadd.f32 1e-05, %v1674_v6  ;;  %v1675_v3 = vmax.f32 %v1659_v8, 0.0  ;;  %v11287_v13 = vmul.f32 0.0078125, %v1538_v10  ;;  %v1644_v60 = vmul.f32 %v11284_v5, %v11284_v5  ;;  %v10127_v10 = vld [vmem:[#allocation7 + $0x38] sm:$0xff]  }
 0x692   : > { %v1601_v59 = vpop.xlane.xlu0 %1600  ;;  %v1691_v6 = vsub.f32 %v11167_v39, %v11278_v51 }
 0x693   : > { %v10297_v16 = vpop.eup %10296  ;;  %10300 = vrsqrt.f32 %v1706_v56  ;;  %v1707_v21 = vadd.f32 1e-05, %v1675_v3  ;;  %v1628_v43 = vmul.f32 0.0078125, %v1601_v59  ;;  %v1645_v32 = vmul.f32 %v11287_v13, %v11287_v13 }
 0x694   : > { %v1736_v22 = vmul.f32 %v10297_v16, %v1688_v4  ;;  %v1603_v27 = vpop.xlane.xlu1 %1602 }
 0x695   : > { %10302 = vrsqrt.f32 %v1707_v21  ;;  %v1660_v33 = vsub.f32 %v1628_v43, %v1644_v60  ;;  %v1629_v35 = vmul.f32 0.0078125, %v1603_v27 }
 0x696   : > { %v1540_v18 = vpop.xlane.xlu0 %1539  ;;  %v1758_v12 = vmul.f32 %v11296_v29, %v1736_v22 }
 0x697   : > { %v10299_v23 = vpop.eup %10298  ;;  %v1676_v40 = vmax.f32 %v1660_v33, 0.0  ;;  %v1661_v15 = vsub.f32 %v1629_v35, %v1645_v32  ;;  %v11299_v45 = vmul.f32 0.0078125, %v1540_v18 }
 0x698   : > { %v1737_v19 = vmul.f32 %v10299_v23, %v1689_v38  ;;  %v1542_v46 = vpop.xlane.xlu1 %1541  ;;  %v11315_v41 = vadd.f32 %v11305_v11, %v1758_v12  ;;  %v1692_v38 = vsub.f32 %v11183_v24, %v11284_v5  ;;  %v1693_v12 = vsub.f32 %v11187_v63, %v11287_v13 }
 0x699   : > { %v1708_v47 = vadd.f32 1e-05, %v1676_v40  ;;  %v1677_v49 = vmax.f32 %v1661_v15, 0.0  ;;  %v11307_v62 = vmul.f32 0.0078125, %v1542_v46  ;;  %v1646_v25 = vmul.f32 %v11299_v45, %v11299_v45 }
 0x69a   : > { %v1605_v37 = vpop.xlane.xlu0 %1604  ;;  %v1759_v9 = vmul.f32 %v11296_v29, %v1737_v19 }
 0x69b   : > { %10304 = vrsqrt.f32 %v1708_v47  ;;  %v1709_v50 = vadd.f32 1e-05, %v1677_v49  ;;  %v1630_v42 = vmul.f32 0.0078125, %v1605_v37  ;;  %v1647_v61 = vmul.f32 %v11307_v62, %v11307_v62 }
 0x69c   : > { %v1607_v53 = vpop.xlane.xlu1 %1606  ;;  %v11318_v58 = vadd.f32 %v11305_v11, %v1759_v9 }
 0x69d   : > { %v10301_v57 = vpop.eup %10300  ;;  %10306 = vrsqrt.f32 %v1709_v50  ;;  %v1662_v1 = vsub.f32 %v1630_v42, %v1646_v25  ;;  %v1631_v2 = vmul.f32 0.0078125, %v1607_v53 }
 0x69e   : > { %v1544_v8 = vpop.xlane.xlu0 %1543  ;;  %v1796_v55 = vpack.c.bf16 %v11318_v58, %v11315_v41  ;;  %v1738_v17 = vmul.f32 %v10301_v57, %v1690_v52 }
 0x69f   : > { %v10303_v56 = vpop.eup %10302  ;;  %v1678_v3 = vmax.f32 %v1662_v1, 0.0  ;;  %v1663_v4 = vsub.f32 %v1631_v2, %v1647_v61  ;;  %v11326_v59 = vmul.f32 0.0078125, %v1544_v8  ;;  %v1694_v8 = vsub.f32 %v11196_v34, %v11299_v45 }
 0x6a0   : > { %v1546_v16 = vpop.xlane.xlu1 %1545  ;;  %1918 = vmatmul.mubr.bf16.vlgmr.msra.gmra.mrb[80].mxu1 %v1796_v55  ;;  %v1739_v21 = vmul.f32 %v10303_v56, %v1691_v6  ;;  %v1760_v60 = vmul.f32 %v11296_v29, %v1738_v17 }
 0x6a1   : > { %v1710_v43 = vadd.f32 1e-05, %v1678_v3  ;;  %v1679_v22 = vmax.f32 %v1663_v4, 0.0  ;;  %1927 = vmatprep.mubr.bf16.mxu1 %v10637_v0  ;;  %9707 = vmatpush3.bf16.msra.mxu1 %v11273_v14  ;;  %v11331_v39 = vmul.f32 0.0078125, %v1546_v16  ;;  %v1648_v33 = vmul.f32 %v11326_v59, %v11326_v59 }
 0x6a2   : > { %v1609_v51 = vpop.xlane.xlu0 %1608  ;;  %v1761_v27 = vmul.f32 %v11296_v29, %v1739_v21  ;;  %9708 = vmatprep.subr.bf16.mxu1 %v10127_v10  ;;  %v11339_v23 = vadd.f32 %v11305_v11, %v1760_v60  ;;  %v1695_v21 = vsub.f32 %v11200_v36, %v11307_v62 }
 0x6a3   : > { %10308 = vrsqrt.f32 %v1710_v43  ;;  %v1711_v32 = vadd.f32 1e-05, %v1679_v22  ;;  %v1632_v35 = vmul.f32 0.0078125, %v1609_v51  ;;  %v1649_v15 = vmul.f32 %v11331_v39, %v11331_v39 }
 0x6a4   : > { %v1611_v18 = vpop.xlane.xlu1 %1610  ;;  %v11342_v14 = vadd.f32 %v11305_v11, %v1761_v27 }
 0x6a5   : > { %v10305_v40 = vpop.eup %10304  ;;  %10310 = vrsqrt.f32 %v1711_v32  ;;  %v1664_v19 = vsub.f32 %v1632_v35, %v1648_v33  ;;  %v1633_v46 = vmul.f32 0.0078125, %v1611_v18  ;;  %9709 = vmatpush3.bf16.msra.mxu1 %v10127_v10 }
 0x6a6   : > { %v1548_v47 = vpop.xlane.xlu0 %1547  ;;  %v1797_v24 = vpack.c.bf16 %v11342_v14, %v11339_v23  ;;  %v1740_v5 = vmul.f32 %v10305_v40, %v1692_v38 }
 0x6a7   : > { %v10307_v49 = vpop.eup %10306  ;;  %v1680_v37 = vmax.f32 %v1664_v19, 0.0  ;;  %v1665_v9 = vsub.f32 %v1633_v46, %v1649_v15  ;;  %v11350_v50 = vmul.f32 0.0078125, %v1548_v47 }
 0x6a8   : > { %v1550_v25 = vpop.xlane.xlu1 %1549  ;;  %1928 = vmatmul.mubr.bf16.gmra.mrb[84].mxu1 %v1797_v24  ;;  %v1741_v42 = vmul.f32 %v10307_v49, %v1693_v12  ;;  %v1762_v52 = vmul.f32 %v11296_v29, %v1740_v5  ;;  %v1696_v12 = vsub.f32 %v11217_v31, %v11326_v59 }
 0x6a9   : > { %v1712_v53 = vadd.f32 1e-05, %v1680_v37  ;;  %v1681_v57 = vmax.f32 %v1665_v9, 0.0  ;;  %1937 = vmatprep.mubr.bf16.mxu1 %v10637_v0  ;;  %v11354_v63 = vmul.f32 0.0078125, %v1550_v25  ;;  %v1650_v2 = vmul.f32 %v11350_v50, %v11350_v50 }
 0x6aa   : > { %v1613_v13 = vpop.xlane.xlu0 %1612  ;;  %v1763_v61 = vmul.f32 %v11296_v29, %v1741_v42  ;;  %v11362_v17 = vadd.f32 %v11305_v11, %v1762_v52  ;;  %v1697_v42 = vsub.f32 %v11221_v54, %v11331_v39 }
 0x6ab   : > { %10312 = vrsqrt.f32 %v1712_v53  ;;  %v1713_v1 = vadd.f32 1e-05, %v1681_v57  ;;  %v1634_v6 = vmul.f32 0.0078125, %v1613_v13  ;;  %v1651_v3 = vmul.f32 %v11354_v63, %v11354_v63 }
 0x6ac   : > { %v1615_v55 = vpop.xlane.xlu1 %1614  ;;  %v11365_v10 = vadd.f32 %v11305_v11, %v1763_v61 }
 0x6ad   : > { %v10309_v56 = vpop.eup %10308  ;;  %10314 = vrsqrt.f32 %v1713_v1  ;;  %v1666_v4 = vsub.f32 %v1634_v6, %v1650_v2  ;;  %v1635_v16 = vmul.f32 0.0078125, %v1615_v55 }
 0x6ae   : > { %v1552_v60 = vpop.xlane.xlu0 %1551  ;;  %v1798_v34 = vpack.c.bf16 %v11365_v10, %v11362_v17  ;;  %v1742_v45 = vmul.f32 %v10309_v56, %v1694_v8 }
 0x6af   : > { %v10311_v43 = vpop.eup %10310  ;;  %v1682_v22 = vmax.f32 %v1666_v4, 0.0  ;;  %v1667_v51 = vsub.f32 %v1635_v16, %v1651_v3  ;;  %v11373_v27 = vmul.f32 0.0078125, %v1552_v60 }
 0x6b0   : > { %1938 = vmatmul.mubr.bf16.gmra.mrb[88].mxu1 %v1798_v34  ;;  %v1554_v32 = vpop.xlane.xlu1 %1553  ;;  %v1743_v33 = vmul.f32 %v10311_v43, %v1695_v21  ;;  %v1764_v35 = vmul.f32 %v11296_v29, %v1742_v45  ;;  %v1698_v21 = vsub.f32 %v11230_v26, %v11350_v50 }
 0x6b1   : > { %v1714_v38 = vadd.f32 1e-05, %v1682_v22  ;;  %v1683_v18 = vmax.f32 %v1667_v51, 0.0  ;;  %1947 = vmatprep.mubr.bf16.mxu1 %v10637_v0  ;;  %v11377_v36 = vmul.f32 0.0078125, %v1554_v32  ;;  %v1652_v19 = vmul.f32 %v11373_v27, %v11373_v27 }
 0x6b2   : > { %v1617_v62 = vpop.xlane.xlu0 %1616  ;;  %v1765_v40 = vmul.f32 %v11296_v29, %v1743_v33  ;;  %v11385_v24 = vadd.f32 %v11305_v11, %v1764_v35  ;;  %v1699_v33 = vsub.f32 %v11234_v44, %v11354_v63  ;;  %v1700_v44 = vsub.f32 %v11250_v7, %v11373_v27 }
 0x6b3   : > { %10316 = vrsqrt.f32 %v1714_v38  ;;  %v1715_v15 = vadd.f32 1e-05, %v1683_v18  ;;  %v1636_v46 = vmul.f32 0.0078125, %v1617_v62  ;;  %v1653_v37 = vmul.f32 %v11377_v36, %v11377_v36 }
 0x6b4   : > { %v1619_v47 = vpop.xlane.xlu1 %1618  ;;  %v11388_v5 = vadd.f32 %v11305_v11, %v1765_v40 }
 0x6b5   : > { %v10313_v49 = vpop.eup %10312  ;;  %10318 = vrsqrt.f32 %v1715_v15  ;;  %v1668_v9 = vsub.f32 %v1636_v46, %v1652_v19  ;;  %v1637_v25 = vmul.f32 0.0078125, %v1619_v47 }
 0x6b6   : > { %v1556_v52 = vpop.xlane.xlu0 %1555  ;;  %v1799_v31 = vpack.c.bf16 %v11388_v5, %v11385_v24  ;;  %v1744_v59 = vmul.f32 %v10313_v49, %v1696_v12 }
 0x6b7   : > { %v10315_v53 = vpop.eup %10314  ;;  %v1684_v57 = vmax.f32 %v1668_v9, 0.0  ;;  %v1669_v13 = vsub.f32 %v1637_v25, %v1653_v37  ;;  %v1574_v61 = vmul.f32 0.0078125, %v1556_v52  ;;  %v1701_v37 = vsub.f32 %v11254_v20, %v11377_v36 }
 0x6b8   : > { %1948 = vmatmul.mubr.bf16.gmra.mrb[92].mxu1 %v1799_v31  ;;  %v1558_v1 = vpop.xlane.xlu1 %1557  ;;  %v1745_v2 = vmul.f32 %v10315_v53, %v1697_v42  ;;  %v1766_v6 = vmul.f32 %v11296_v29, %v1744_v59 }
 0x6b9   : > { %v1716_v8 = vadd.f32 1e-05, %v1684_v57  ;;  %v1685_v55 = vmax.f32 %v1669_v13, 0.0  ;;  %1957 = vmatprep.mubr.bf16.mxu1 %v10637_v0  ;;  %v1575_v56 = vmul.f32 0.0078125, %v1558_v1  ;;  %v1654_v4 = vmul.f32 %v1574_v61, %v1574_v61 }
 0x6ba   : > { %v1621_v54 = vpop.xlane.xlu0 %1620  ;;  %v1767_v39 = vmul.f32 %v11296_v29, %v1745_v2  ;;  %v11402_v34 = vadd.f32 %v11305_v11, %v1766_v6  ;;  %v1702_v31 = vsub.f32 %v11262_v48, %v1574_v61 }
 0x6bb   : > { %10320 = vrsqrt.f32 %v1716_v8  ;;  %v1717_v3 = vadd.f32 1e-05, %v1685_v55  ;;  %v1638_v16 = vmul.f32 0.0078125, %v1621_v54  ;;  %v1655_v22 = vmul.f32 %v1575_v56, %v1575_v56  ;;  %v10128_v55 = vld [vmem:[#allocation5 + $0x140] sm:$0xff]   ;;  %v10130_v54 = vld [vmem:[#allocation5 + $0x150] sm:$0xff]  }
 0x6bc   : > { %v1623_v60 = vpop.xlane.xlu1 %1622  ;;  %v11405_v45 = vadd.f32 %v11305_v11, %v1767_v39  ;;  %v1703_v53 = vsub.f32 %v11266_v28, %v1575_v56  ;;  %2289 = vmatpush1.bf16.xpose.msra.mxu0 %v10128_v55  ;;  %v10129_v56 = vld [vmem:[#allocation5 + $0x148] sm:$0xff]  }
 0x6bd   : > { %v10317_v43 = vpop.eup %10316  ;;  %10322 = vrsqrt.f32 %v1717_v3  ;;  %v1670_v51 = vsub.f32 %v1638_v16, %v1654_v4  ;;  %v1639_v32 = vmul.f32 0.0078125, %v1623_v60  ;;  %2290 = vmatprep.subr.bf16.mxu0 %v10637_v0  ;;  %v10133_v39 = vld [vmem:[#allocation5 + $0x168] sm:$0xff]   ;;  %v10134_v3 = vld [vmem:[#allocation5 + $0x170] sm:$0xff]   ;;  %v10135_v4 = vld [vmem:[#allocation5 + $0x178] sm:$0xff]  }
 0x6be   : > { %v1800_v35 = vpack.c.bf16 %v11405_v45, %v11402_v34  ;;  %v1746_v38 = vmul.f32 %v10317_v43, %v1698_v21  ;;  %v10136_v16 = vld [vmem:[#allocation5 + $0x180] sm:$0xff]  }
 0x6bf   : > { %v10319_v26 = vpop.eup %10318  ;;  %v1686_v50 = vmax.f32 %v1670_v51, 0.0  ;;  %v1671_v18 = vsub.f32 %v1639_v32, %v1655_v22 }
 0x6c0   : > { %1958 = vmatmul.mubr.bf16.gmra.mrb[96].mxu1 %v1800_v35  ;;  %v1747_v62 = vmul.f32 %v10319_v26, %v1699_v33  ;;  %v1768_v40 = vmul.f32 %v11296_v29, %v1746_v38 }
 0x6c1   : > { %v1718_v15 = vadd.f32 1e-05, %v1686_v50  ;;  %v1687_v19 = vmax.f32 %v1671_v18, 0.0  ;;  %1967 = vmatprep.mubr.bf16.mxu1 %v10637_v0 }
 0x6c2   : > { %v1769_v46 = vmul.f32 %v11296_v29, %v1747_v62  ;;  %v11417_v63 = vadd.f32 %v11305_v11, %v1768_v40 }
 0x6c3   : > { %10324 = vrsqrt.f32 %v1718_v15  ;;  %v1719_v12 = vadd.f32 1e-05, %v1687_v19 }
 0x6c4   : > { %v11420_v47 = vadd.f32 %v11305_v11, %v1769_v46  ;;  %2291 = vmatpush1.bf16.xpose.msra.mxu0 %v10129_v56 }
 0x6c5   : > { %v10321_v49 = vpop.eup %10320  ;;  %10326 = vrsqrt.f32 %v1719_v12  ;;  %2292 = vmatprep.subr.bf16.mxu0 %v10637_v0 }
 0x6c6   : > { %v1801_v9 = vpack.c.bf16 %v11420_v47, %v11417_v63  ;;  %v1748_v25 = vmul.f32 %v10321_v49, %v1700_v44 }
 0x6c7   : > { %v10323_v42 = vpop.eup %10322 }
 0x6c8   : > { %1968 = vmatmul.mubr.bf16.gmra.mrb[100].mxu1 %v1801_v9  ;;  %v1749_v52 = vmul.f32 %v10323_v42, %v1701_v37  ;;  %v1770_v7 = vmul.f32 %v11296_v29, %v1748_v25 }
 0x6c9   : > { %1977 = vmatprep.mubr.bf16.mxu1 %v10637_v0 }
 0x6ca   : > { %v1771_v27 = vmul.f32 %v11296_v29, %v1749_v52  ;;  %v11431_v59 = vadd.f32 %v11305_v11, %v1770_v7 }
 0x6cc   : > { %v11434_v20 = vadd.f32 %v11305_v11, %v1771_v27  ;;  %2293 = vmatpush1.bf16.xpose.msra.mxu0 %v10130_v54 }
 0x6cd   : > { %v10325_v36 = vpop.eup %10324  ;;  %2294 = vmatprep.subr.bf16.mxu0 %v10637_v0 }
 0x6ce   : > { %v1802_v57 = vpack.c.bf16 %v11434_v20, %v11431_v59  ;;  %v1750_v13 = vmul.f32 %v10325_v36, %v1702_v31 }
 0x6cf   : > { %v10327_v1 = vpop.eup %10326 }
 0x6d0   : > { %1978 = vmatmul.mubr.bf16.gmra.mrb[104].mxu1 %v1802_v57  ;;  %v1751_v2 = vmul.f32 %v10327_v1, %v1703_v53  ;;  %v1772_v6 = vmul.f32 %v11296_v29, %v1750_v13 }
 0x6d1   : > { %1987 = vmatprep.mubr.bf16.mxu1 %v10637_v0 }
 0x6d2   : > { %v1773_v48 = vmul.f32 %v11296_v29, %v1751_v2  ;;  %v11443_v61 = vadd.f32 %v11305_v11, %v1772_v6  ;;  %v10131_v29 = vld [vmem:[#allocation5 + $0x158] sm:$0xff]  }
 0x6d4   : > { %v11446_v8 = vadd.f32 %v11305_v11, %v1773_v48  ;;  %2295 = vmatpush1.bf16.xpose.msra.mxu0 %v10131_v29  ;;  %v10132_v11 = vld [vmem:[#allocation5 + $0x160] sm:$0xff]   ;;  %v10137_v29 = vld [vmem:[#allocation5 + $0x188] sm:$0xff]  }
 0x6d5   : > { %2296 = vmatprep.subr.bf16.mxu0 %v10637_v0 }
 0x6d6   : > { %v1803_v28 = vpack.c.bf16 %v11446_v8, %v11443_v61 }
 0x6d8   : > { %1988 = vmatmul.mubr.bf16.gmra.mrb[108].mxu1 %v1803_v28 }
 0x6dc   : > { %2297 = vmatpush1.bf16.xpose.msra.mxu0 %v10132_v11  ;;  %v10138_v11 = vld [vmem:[#allocation7 + $0x40] sm:$0xff]  }
 0x6dd   : > { %2298 = vmatprep.subr.bf16.mxu0 %v10637_v0  ;;  %9726 = vmatprep.subr.bf16.mxu1 %v10138_v11 }
 0x6e4   : > { %2299 = vmatpush1.bf16.xpose.msra.mxu0 %v10133_v39  ;;  %v10139_v39 = vld [vmem:[#allocation7 + $0x48] sm:$0xff]  }
 0x6e5   : > { %2300 = vmatprep.subr.bf16.mxu0 %v10637_v0 }
 0x6ec   : > { %2301 = vmatpush1.bf16.xpose.msra.mxu0 %v10134_v3  ;;  %v9138_v3 = vld [vmem:[%s13917_s2 + $0x3] sm:$0x1] }
 0x6ed   : > { %2302 = vmatprep.subr.bf16.mxu0 %v10637_v0 }
 0x6f4   : > { %2303 = vmatpush1.bf16.xpose.msra.mxu0 %v10135_v4  ;;  %v2000_v4 = vunpack.c.l.bf16 %v9138_v3 }
 0x6f5   : > { %2304 = vmatprep.subr.bf16.mxu0 %v10637_v0 }
 0x6fc   : > { %2305 = vmatpush1.bf16.xpose.msra.mxu0 %v10136_v16  ;;  %v11498_v16 = vrot.slane %v2000_v4, %v10953_v30 }
 0x6fd   : > { %2306 = vmatprep.subr.bf16.mxu0 %v10637_v0 }
 0x704   : > { %2307 = vmatpush1.bf16.xpose.msra.mxu0 %v10137_v29 }
 0x705   : > { %2691 = vmatprep.subr.bf16.mxu0 %v10637_v0 }
 0x773   : > { %v11458_v21 = vpop.f32.mrb[80].mxu1 }
 0x774   : > { %v1921_v60 = vpop.f32.mrb[81].mxu1 }
 0x775   : > { %v11461_v43 = vpop.f32.mrb[82].mxu1 }
 0x776   : > { %v1925_v22 = vpop.f32.mrb[83].mxu1 }
 0x777   : > { %v2021_v51 = vpack.c.bf16 %v1925_v22, %v1921_v60  ;;  %v2005_v22 = vadd.f32 %v11498_v16, %v11458_v21 }
 0x779   : > { %9710 = vmatprep.mubr.msk.bf16.mxu1 %vm565_vm0, %v2021_v51 }
 0x77b   : > { %v1929_v32 = vpop.f32.mrb[84].mxu1 }
 0x77c   : > { %v1931_v33 = vpop.f32.mrb[85].mxu1  ;;  %v2007_v60 = vadd.f32 %v11498_v16, %v1929_v32 }
 0x77d   : > { %v1933_v35 = vpop.f32.mrb[86].mxu1 }
 0x77e   : > { %v1935_v38 = vpop.f32.mrb[87].mxu1 }
 0x77f   : > { %v2022_v26 = vpack.c.bf16 %v1935_v38, %v1931_v33  ;;  %v2008_v33 = vadd.f32 %v11498_v16, %v1933_v35 }
 0x781   : > { %9711 = vmatmul.mubr.msk.bf16.vlgmr.msra.gmra.mrb[112].mxu1 %vm565_vm0, %v2022_v26 }
 0x782   : > { %9727 = vmatpush3.bf16.msra.mxu1 %v10138_v11 }
 0x783   : > { %v11465_v50 = vpop.f32.mrb[88].mxu1  ;;  %9728 = vmatprep.subr.bf16.mxu1 %v10139_v39 }
 0x784   : > { %v1941_v18 = vpop.f32.mrb[89].mxu1  ;;  %v2009_v35 = vadd.f32 %v11498_v16, %v11465_v50 }
 0x785   : > { %v11467_v62 = vpop.f32.mrb[90].mxu1 }
 0x786   : > { %v1945_v40 = vpop.f32.mrb[91].mxu1  ;;  %9729 = vmatpush3.bf16.msra.mxu1 %v10139_v39 }
 0x787   : > { %v2023_v15 = vpack.c.bf16 %v1945_v40, %v1941_v18  ;;  %v2006_v18 = vadd.f32 %v11498_v16, %v11461_v43 }
 0x789   : > { %9714 = vmatprep.mubr.msk.bf16.mxu1 %vm565_vm0, %v2023_v15 }
 0x78b   : > { %v1949_v19 = vpop.f32.mrb[92].mxu1 }
 0x78c   : > { %v1951_v46 = vpop.f32.mrb[93].mxu1  ;;  %v2011_v21 = vadd.f32 %v11498_v16, %v1949_v19 }
 0x78d   : > { %v11470_v12 = vpop.f32.mrb[94].mxu1 }
 0x78e   : > { %v1955_v44 = vpop.f32.mrb[95].mxu1 }
 0x78f   : > { %v2024_v49 = vpack.c.bf16 %v1955_v44, %v1951_v46 }
 0x791   : > { %9715 = vmatmul.mubr.msk.bf16.gmra.mrb[116].mxu1 %vm565_vm0, %v2024_v49 }
 0x793   : > { %v11473_v37 = vpop.f32.mrb[96].mxu1 }
 0x794   : > { %v1961_v9 = vpop.f32.mrb[97].mxu1 }
 0x795   : > { %v11475_v25 = vpop.f32.mrb[98].mxu1 }
 0x796   : > { %v1965_v42 = vpop.f32.mrb[99].mxu1 }
 0x797   : > { %v2025_v52 = vpack.c.bf16 %v1965_v42, %v1961_v9 }
 0x799   : > { %9718 = vmatprep.mubr.msk.bf16.mxu1 %vm565_vm0, %v2025_v52 }
 0x79b   : > { %v11478_v7 = vpop.f32.mrb[100].mxu1 }
 0x79c   : > { %v1971_v27 = vpop.f32.mrb[101].mxu1 }
 0x79d   : > { %v11480_v31 = vpop.f32.mrb[102].mxu1 }
 0x79e   : > { %v1975_v36 = vpop.f32.mrb[103].mxu1 }
 0x79f   : > { %v2026_v53 = vpack.c.bf16 %v1975_v36, %v1971_v27 }
 0x7a1   : > { %9719 = vmatmul.mubr.msk.bf16.gmra.mrb[120].mxu1 %vm565_vm0, %v2026_v53  ;;  %v2012_v53 = vadd.f32 %v11498_v16, %v11470_v12  ;;  %v2013_v12 = vadd.f32 %v11498_v16, %v11473_v37 }
 0x7a3   : > { %v11483_v57 = vpop.f32.mrb[104].mxu1 }
 0x7a4   : > { %v1981_v13 = vpop.f32.mrb[105].mxu1 }
 0x7a5   : > { %v11485_v1 = vpop.f32.mrb[106].mxu1 }
 0x7a6   : > { %v1985_v2 = vpop.f32.mrb[107].mxu1 }
 0x7a7   : > { %v2027_v6 = vpack.c.bf16 %v1985_v2, %v1981_v13 }
 0x7a9   : > { %9722 = vmatprep.mubr.msk.bf16.mxu1 %vm565_vm0, %v2027_v6  ;;  %v2010_v6 = vadd.f32 %v11498_v16, %v11467_v62  ;;  %v2015_v62 = vadd.f32 %v11498_v16, %v11478_v7 }
 0x7ab   : > { %v11488_v48 = vpop.f32.mrb[108].mxu1 }
 0x7ac   : > { %v1991_v28 = vpop.f32.mrb[109].mxu1 }
 0x7ad   : > { %v11490_v55 = vpop.f32.mrb[110].mxu1 }
 0x7ae   : > { %v1995_v56 = vpop.f32.mrb[111].mxu1 }
 0x7af   : > { %v2028_v54 = vpack.c.bf16 %v1995_v56, %v1991_v28 }
 0x7b1   : > { %9723 = vmatmul.mubr.msk.bf16.gmra.mrb[124].mxu1 %vm565_vm0, %v2028_v54 }
 0x854   : > { %v9712_v51 = vpop.f32.mrb[112].mxu1 }
 0x855   : > { %v2169_v38 = vadd.f32 %v9712_v51, %v2007_v60  ;;  %v2104_v26 = vpop.f32.mrb[113].mxu1  ;;  %v2016_v51 = vadd.f32 %v11498_v16, %v11480_v31  ;;  %v2017_v31 = vadd.f32 %v11498_v16, %v11483_v57 }
 0x856   : > { %v2167_v40 = vadd.f32 %v2104_v26, %v2005_v22  ;;  %v9713_v15 = vpop.f32.mrb[114].mxu1  ;;  %v2014_v26 = vadd.f32 %v11498_v16, %v11475_v25  ;;  %v2019_v25 = vadd.f32 %v11498_v16, %v11488_v48 }
 0x857   : > { %v2170_v46 = vadd.f32 %v9713_v15, %v2008_v33  ;;  %v2107_v44 = vpop.f32.mrb[115].mxu1  ;;  %v2185_v9 = vmax.f32 %v2169_v38, 0.0 }
 0x858   : > { %v2168_v49 = vadd.f32 %v2107_v44, %v2006_v18  ;;  %v2183_v52 = vmax.f32 %v2167_v40, 0.0 }
 0x859   : > { %v2186_v42 = vmax.f32 %v2170_v46, 0.0 }
 0x85a   : > { %v2184_v32 = vmax.f32 %v2168_v49, 0.0 }
 0x85b   : > { %v2200_v27 = vpack.c.bf16 %v2186_v42, %v2185_v9 }
 0x85c   : > { %v2199_v36 = vpack.c.bf16 %v2184_v32, %v2183_v52 }
 0x85e   : > { %2321 = vmatmul.mubr.bf16.vlgmr.msra.gmra.mrb[64].mxu0 %v2199_v36 }
 0x85f   : > { %2330 = vmatprep.mubr.bf16.mxu0 %v10637_v0 }
 0x864   : > { %v9716_v43 = vpop.f32.mrb[116].mxu1 }
 0x865   : > { %v2173_v13 = vadd.f32 %v9716_v43, %v2011_v21  ;;  %v2120_v2 = vpop.f32.mrb[117].mxu1 }
 0x866   : > { %v2171_v28 = vadd.f32 %v2120_v2, %v2009_v35  ;;  %v9717_v56 = vpop.f32.mrb[118].mxu1  ;;  %2331 = vmatmul.mubr.bf16.gmra.mrb[68].mxu0 %v2200_v27  ;;  %v2020_v27 = vadd.f32 %v11498_v16, %v11490_v55  ;;  %v2018_v35 = vadd.f32 %v11498_v16, %v11485_v1  ;;  %v10140_v1 = vld [vmem:[#allocation5 + $0x190] sm:$0xff]   ;;  %v10141_v55 = vld [vmem:[#allocation5 + $0x198] sm:$0xff]   ;;  %v10142_v16 = vld [vmem:[#allocation5 + $0x1a0] sm:$0xff]  }
 0x867   : > { %v2174_v54 = vadd.f32 %v9717_v56, %v2012_v53  ;;  %v2123_v29 = vpop.f32.mrb[119].mxu1  ;;  %2340 = vmatprep.mubr.bf16.mxu0 %v10637_v0  ;;  %v2189_v11 = vmax.f32 %v2173_v13, 0.0  ;;  %2692 = vmatpush1.bf16.xpose.msra.mxu0 %v10140_v1 }
 0x868   : > { %v2172_v19 = vadd.f32 %v2123_v29, %v2010_v6  ;;  %v2187_v50 = vmax.f32 %v2171_v28, 0.0  ;;  %2693 = vmatprep.subr.bf16.mxu0 %v10637_v0 }
 0x869   : > { %v2190_v39 = vmax.f32 %v2174_v54, 0.0 }
 0x86a   : > { %v2188_v3 = vmax.f32 %v2172_v19, 0.0  ;;  %v10143_v19 = vld [vmem:[#allocation5 + $0x1a8] sm:$0xff]  }
 0x86b   : > { %v2202_v4 = vpack.c.bf16 %v2190_v39, %v2189_v11  ;;  %v10144_v11 = vld [vmem:[#allocation5 + $0x1b0] sm:$0xff]   ;;  %v10145_v39 = vld [vmem:[#allocation5 + $0x1b8] sm:$0xff]  }
 0x86c   : > { %v2201_v60 = vpack.c.bf16 %v2188_v3, %v2187_v50  ;;  %v10146_v50 = vld [vmem:[#allocation5 + $0x1c0] sm:$0xff]   ;;  %v10147_v3 = vld [vmem:[#allocation5 + $0x1c8] sm:$0xff]  }
 0x86e   : > { %2341 = vmatmul.mubr.bf16.gmra.mrb[72].mxu0 %v2201_v60 }
 0x86f   : > { %2350 = vmatprep.mubr.bf16.mxu0 %v10637_v0  ;;  %2694 = vmatpush1.bf16.xpose.msra.mxu0 %v10141_v55 }
 0x870   : > { %2695 = vmatprep.subr.bf16.mxu0 %v10637_v0 }
 0x874   : > { %v9720_v22 = vpop.f32.mrb[120].mxu1 }
 0x875   : > { %v2177_v33 = vadd.f32 %v9720_v22, %v2015_v62  ;;  %v2136_v38 = vpop.f32.mrb[121].mxu1 }
 0x876   : > { %v2175_v18 = vadd.f32 %v2136_v38, %v2013_v12  ;;  %v9721_v40 = vpop.f32.mrb[122].mxu1  ;;  %2351 = vmatmul.mubr.bf16.gmra.mrb[76].mxu0 %v2202_v4  ;;  %v10148_v4 = vld [vmem:[#allocation5 + $0x1d0] sm:$0xff]  }
 0x877   : > { %v2178_v15 = vadd.f32 %v9721_v40, %v2016_v51  ;;  %v2139_v46 = vpop.f32.mrb[123].mxu1  ;;  %2360 = vmatprep.mubr.bf16.mxu0 %v10637_v0  ;;  %v2193_v44 = vmax.f32 %v2177_v33, 0.0  ;;  %2696 = vmatpush1.bf16.xpose.msra.mxu0 %v10142_v16 }
 0x878   : > { %v2176_v7 = vadd.f32 %v2139_v46, %v2014_v26  ;;  %v2191_v37 = vmax.f32 %v2175_v18, 0.0  ;;  %2697 = vmatprep.subr.bf16.mxu0 %v10637_v0 }
 0x879   : > { %v2194_v49 = vmax.f32 %v2178_v15, 0.0 }
 0x87a   : > { %v2192_v9 = vmax.f32 %v2176_v7, 0.0 }
 0x87b   : > { %v2204_v42 = vpack.c.bf16 %v2194_v49, %v2193_v44 }
 0x87c   : > { %v2203_v52 = vpack.c.bf16 %v2192_v9, %v2191_v37 }
 0x87e   : > { %2361 = vmatmul.mubr.bf16.gmra.mrb[80].mxu0 %v2203_v52 }
 0x87f   : > { %2370 = vmatprep.mubr.bf16.mxu0 %v10637_v0  ;;  %2698 = vmatpush1.bf16.xpose.msra.mxu0 %v10143_v19  ;;  %v10149_v19 = vld [vmem:[#allocation5 + $0x1d8] sm:$0xff]  }
 0x880   : > { %2699 = vmatprep.subr.bf16.mxu0 %v10637_v0 }
 0x884   : > { %v9724_v32 = vpop.f32.mrb[124].mxu1 }
 0x885   : > { %v2181_v36 = vadd.f32 %v9724_v32, %v2019_v25  ;;  %v2152_v21 = vpop.f32.mrb[125].mxu1 }
 0x886   : > { %v2179_v43 = vadd.f32 %v2152_v21, %v2017_v31  ;;  %v9725_v53 = vpop.f32.mrb[126].mxu1  ;;  %2371 = vmatmul.mubr.bf16.gmra.mrb[84].mxu0 %v2204_v42 }
 0x887   : > { %v2182_v13 = vadd.f32 %v9725_v53, %v2020_v27  ;;  %v2155_v2 = vpop.f32.mrb[127].mxu1  ;;  %2380 = vmatprep.mubr.bf16.mxu0 %v10637_v0  ;;  %v2197_v6 = vmax.f32 %v2181_v36, 0.0  ;;  %2700 = vmatpush1.bf16.xpose.msra.mxu0 %v10144_v11  ;;  %v10150_v11 = vld [vmem:[#allocation7 + $0x50] sm:$0xff]  }
 0x888   : > { %v2180_v48 = vadd.f32 %v2155_v2, %v2018_v35  ;;  %v2195_v57 = vmax.f32 %v2179_v43, 0.0  ;;  %2701 = vmatprep.subr.bf16.mxu0 %v10637_v0  ;;  %9746 = vmatprep.subr.bf16.mxu1 %v10150_v11 }
 0x889   : > { %v2198_v28 = vmax.f32 %v2182_v13, 0.0 }
 0x88a   : > { %v2196_v56 = vmax.f32 %v2180_v48, 0.0 }
 0x88b   : > { %v2206_v54 = vpack.c.bf16 %v2198_v28, %v2197_v6 }
 0x88c   : > { %v2205_v29 = vpack.c.bf16 %v2196_v56, %v2195_v57 }
 0x88e   : > { %2381 = vmatmul.mubr.bf16.gmra.mrb[88].mxu0 %v2205_v29 }
 0x88f   : > { %2390 = vmatprep.mubr.bf16.mxu0 %v10637_v0  ;;  %2702 = vmatpush1.bf16.xpose.msra.mxu0 %v10145_v39  ;;  %v10151_v39 = vld [vmem:[#allocation7 + $0x58] sm:$0xff]  }
 0x890   : > { %2703 = vmatprep.subr.bf16.mxu0 %v10637_v0 }
 0x896   : > { %2391 = vmatmul.mubr.bf16.gmra.mrb[92].mxu0 %v2206_v54 }
 0x897   : > { %2723 = vmatprep.mubr.bf16.mxu0 %v10637_v0  ;;  %2704 = vmatpush1.bf16.xpose.msra.mxu0 %v10146_v50  ;;  %v9159_v50 = vld [vmem:[%s13917_s2 + $0x4] sm:$0x1] }
 0x898   : > { %2705 = vmatprep.subr.bf16.mxu0 %v10637_v0 }
 0x89f   : > { %2706 = vmatpush1.bf16.xpose.msra.mxu0 %v10147_v3  ;;  %v2403_v3 = vunpack.c.l.bf16 %v9159_v50 }
 0x8a0   : > { %2707 = vmatprep.subr.bf16.mxu0 %v10637_v0 }
 0x8a7   : > { %2708 = vmatpush1.bf16.xpose.msra.mxu0 %v10148_v4  ;;  %v11585_v4 = vrot.slane %v2403_v3, %v10953_v30 }
 0x8a8   : > { %2709 = vmatprep.subr.bf16.mxu0 %v10637_v0 }
 0x8af   : > { %2710 = vmatpush1.bf16.xpose.msra.mxu0 %v10149_v19 }
 0x931   : > { %v11545_v60 = vpop.f32.mrb[64].mxu0 }
 0x932   : > { %v2324_v62 = vpop.f32.mrb[65].mxu0 }
 0x933   : > { %v11548_v12 = vpop.f32.mrb[66].mxu0 }
 0x934   : > { %v2328_v22 = vpop.f32.mrb[67].mxu0 }
 0x935   : > { %v2424_v51 = vpack.c.bf16 %v2328_v22, %v2324_v62  ;;  %v2408_v22 = vadd.f32 %v11585_v4, %v11545_v60 }
 0x937   : > { %9730 = vmatprep.mubr.msk.bf16.mxu1 %vm565_vm0, %v2424_v51 }
 0x939   : > { %v2332_v33 = vpop.f32.mrb[68].mxu0 }
 0x93a   : > { %v2334_v38 = vpop.f32.mrb[69].mxu0  ;;  %v2410_v62 = vadd.f32 %v11585_v4, %v2332_v33 }
 0x93b   : > { %v2336_v26 = vpop.f32.mrb[70].mxu0 }
 0x93c   : > { %v2338_v18 = vpop.f32.mrb[71].mxu0 }
 0x93d   : > { %v2425_v40 = vpack.c.bf16 %v2338_v18, %v2334_v38  ;;  %v2411_v38 = vadd.f32 %v11585_v4, %v2336_v26 }
 0x93f   : > { %9731 = vmatmul.mubr.msk.bf16.vlgmr.msra.gmra.mrb[128].mxu1 %vm565_vm0, %v2425_v40 }
 0x940   : > { %9747 = vmatpush3.bf16.msra.mxu1 %v10150_v11 }
 0x941   : > { %v11552_v15 = vpop.f32.mrb[72].mxu0  ;;  %9748 = vmatprep.subr.bf16.mxu1 %v10151_v39 }
 0x942   : > { %v2344_v46 = vpop.f32.mrb[73].mxu0  ;;  %v2412_v26 = vadd.f32 %v11585_v4, %v11552_v15 }
 0x943   : > { %v11554_v7 = vpop.f32.mrb[74].mxu0 }
 0x944   : > { %v2348_v44 = vpop.f32.mrb[75].mxu0  ;;  %9749 = vmatpush3.bf16.msra.mxu1 %v10151_v39 }
 0x945   : > { %v2426_v49 = vpack.c.bf16 %v2348_v44, %v2344_v46  ;;  %3366 = vmatprep.subr.bf16.mxu1 %v10637_v0  ;;  %v2409_v46 = vadd.f32 %v11585_v4, %v11548_v12 }
 0x947   : > { %9734 = vmatprep.mubr.msk.bf16.mxu1 %vm565_vm0, %v2426_v49 }
 0x949   : > { %v2352_v37 = vpop.f32.mrb[76].mxu0 }
 0x94a   : > { %v2354_v9 = vpop.f32.mrb[77].mxu0  ;;  %v2414_v60 = vadd.f32 %v11585_v4, %v2352_v37 }
 0x94b   : > { %v11557_v42 = vpop.f32.mrb[78].mxu0 }
 0x94c   : > { %v2358_v52 = vpop.f32.mrb[79].mxu0 }
 0x94d   : > { %v2427_v25 = vpack.c.bf16 %v2358_v52, %v2354_v9 }
 0x94f   : > { %9735 = vmatmul.mubr.msk.bf16.gmra.mrb[132].mxu1 %vm565_vm0, %v2427_v25 }
 0x951   : > { %v11560_v31 = vpop.f32.mrb[80].mxu0 }
 0x952   : > { %v2364_v32 = vpop.f32.mrb[81].mxu0 }
 0x953   : > { %v11562_v27 = vpop.f32.mrb[82].mxu0 }
 0x954   : > { %v2368_v36 = vpop.f32.mrb[83].mxu0 }
 0x955   : > { %v2428_v21 = vpack.c.bf16 %v2368_v36, %v2364_v32 }
 0x957   : > { %9738 = vmatprep.mubr.msk.bf16.mxu1 %vm565_vm0, %v2428_v21 }
 0x959   : > { %v11565_v35 = vpop.f32.mrb[84].mxu0 }
 0x95a   : > { %v2374_v43 = vpop.f32.mrb[85].mxu0 }
 0x95b   : > { %v11567_v53 = vpop.f32.mrb[86].mxu0 }
 0x95c   : > { %v2378_v13 = vpop.f32.mrb[87].mxu0 }
 0x95d   : > { %v2429_v2 = vpack.c.bf16 %v2378_v13, %v2374_v43 }
 0x95f   : > { %9739 = vmatmul.mubr.msk.bf16.gmra.mrb[136].mxu1 %vm565_vm0, %v2429_v2  ;;  %v2415_v2 = vadd.f32 %v11585_v4, %v11557_v42  ;;  %v2416_v42 = vadd.f32 %v11585_v4, %v11560_v31 }
 0x961   : > { %v11570_v48 = vpop.f32.mrb[88].mxu0 }
 0x962   : > { %v2384_v6 = vpop.f32.mrb[89].mxu0 }
 0x963   : > { %v11572_v28 = vpop.f32.mrb[90].mxu0 }
 0x964   : > { %v2388_v57 = vpop.f32.mrb[91].mxu0 }
 0x965   : > { %v2430_v56 = vpack.c.bf16 %v2388_v57, %v2384_v6 }
 0x967   : > { %9742 = vmatprep.mubr.msk.bf16.mxu1 %vm565_vm0, %v2430_v56  ;;  %v2413_v56 = vadd.f32 %v11585_v4, %v11554_v7  ;;  %v2418_v7 = vadd.f32 %v11585_v4, %v11565_v35 }
 0x969   : > { %v11575_v54 = vpop.f32.mrb[92].mxu0 }
 0x96a   : > { %v2394_v29 = vpop.f32.mrb[93].mxu0 }
 0x96b   : > { %v11577_v1 = vpop.f32.mrb[94].mxu0 }
 0x96c   : > { %v2398_v55 = vpop.f32.mrb[95].mxu0 }
 0x96d   : > { %v2431_v16 = vpack.c.bf16 %v2398_v55, %v2394_v29 }
 0x96f   : > { %9743 = vmatmul.mubr.msk.bf16.gmra.mrb[140].mxu1 %vm565_vm0, %v2431_v16 }
 0xa12   : > { %v9732_v51 = vpop.f32.mrb[128].mxu1 }
 0xa13   : > { %v2572_v18 = vadd.f32 %v9732_v51, %v2410_v62  ;;  %v2507_v40 = vpop.f32.mrb[129].mxu1  ;;  %v2419_v51 = vadd.f32 %v11585_v4, %v11567_v53  ;;  %v2420_v53 = vadd.f32 %v11585_v4, %v11570_v48 }
 0xa14   : > { %v2570_v44 = vadd.f32 %v2507_v40, %v2408_v22  ;;  %v9733_v49 = vpop.f32.mrb[130].mxu1  ;;  %v2417_v40 = vadd.f32 %v11585_v4, %v11562_v27  ;;  %v2422_v27 = vadd.f32 %v11585_v4, %v11575_v54 }
 0xa15   : > { %v2573_v9 = vadd.f32 %v9733_v49, %v2411_v38  ;;  %v2510_v52 = vpop.f32.mrb[131].mxu1  ;;  %v2588_v32 = vmax.f32 %v2572_v18, 0.0 }
 0xa16   : > { %v2571_v25 = vadd.f32 %v2510_v52, %v2409_v46  ;;  %v2586_v21 = vmax.f32 %v2570_v44, 0.0 }
 0xa17   : > { %v2589_v36 = vmax.f32 %v2573_v9, 0.0 }
 0xa18   : > { %v2587_v33 = vmax.f32 %v2571_v25, 0.0 }
 0xa19   : > { %v2603_v43 = vpack.c.bf16 %v2589_v36, %v2588_v32 }
 0xa1a   : > { %v2602_v13 = vpack.c.bf16 %v2587_v33, %v2586_v21 }
 0xa1c   : > { %2724 = vmatmul.mubr.bf16.vlgmr.msra.gmra.mrb[96].mxu0 %v2602_v13 }
 0xa1d   : > { %2733 = vmatprep.mubr.bf16.mxu0 %v10637_v0 }
 0xa22   : > { %v9736_v12 = vpop.f32.mrb[132].mxu1 }
 0xa23   : > { %v2576_v6 = vadd.f32 %v9736_v12, %v2414_v60  ;;  %v2523_v57 = vpop.f32.mrb[133].mxu1 }
 0xa24   : > { %v2574_v29 = vadd.f32 %v2523_v57, %v2412_v26  ;;  %v9737_v55 = vpop.f32.mrb[134].mxu1  ;;  %2734 = vmatmul.mubr.bf16.gmra.mrb[100].mxu0 %v2603_v43  ;;  %v2423_v43 = vadd.f32 %v11585_v4, %v11577_v1  ;;  %v2421_v26 = vadd.f32 %v11585_v4, %v11572_v28 }
 0xa25   : > { %v2577_v16 = vadd.f32 %v9737_v55, %v2415_v2  ;;  %v2526_v19 = vpop.f32.mrb[135].mxu1  ;;  %2743 = vmatprep.mubr.bf16.mxu0 %v10637_v0  ;;  %v2592_v11 = vmax.f32 %v2576_v6, 0.0 }
 0xa26   : > { %v2575_v37 = vadd.f32 %v2526_v19, %v2413_v56  ;;  %v2590_v15 = vmax.f32 %v2574_v29, 0.0 }
 0xa27   : > { %v2593_v39 = vmax.f32 %v2577_v16, 0.0 }
 0xa28   : > { %v2591_v50 = vmax.f32 %v2575_v37, 0.0 }
 0xa29   : > { %v2605_v3 = vpack.c.bf16 %v2593_v39, %v2592_v11 }
 0xa2a   : > { %v2604_v62 = vpack.c.bf16 %v2591_v50, %v2590_v15 }
 0xa2c   : > { %2744 = vmatmul.mubr.bf16.gmra.mrb[104].mxu0 %v2604_v62 }
 0xa2d   : > { %2753 = vmatprep.mubr.bf16.mxu0 %v10637_v0 }
 0xa32   : > { %v9740_v22 = vpop.f32.mrb[136].mxu1 }
 0xa33   : > { %v2580_v38 = vadd.f32 %v9740_v22, %v2418_v7  ;;  %v2539_v18 = vpop.f32.mrb[137].mxu1 }
 0xa34   : > { %v2578_v46 = vadd.f32 %v2539_v18, %v2416_v42  ;;  %v9741_v44 = vpop.f32.mrb[138].mxu1  ;;  %2754 = vmatmul.mubr.bf16.gmra.mrb[108].mxu0 %v2605_v3 }
 0xa35   : > { %v2581_v49 = vadd.f32 %v9741_v44, %v2419_v51  ;;  %v2542_v9 = vpop.f32.mrb[139].mxu1  ;;  %2763 = vmatprep.mubr.bf16.mxu0 %v10637_v0  ;;  %v2596_v52 = vmax.f32 %v2580_v38, 0.0 }
 0xa36   : > { %v2579_v35 = vadd.f32 %v2542_v9, %v2417_v40  ;;  %v2594_v31 = vmax.f32 %v2578_v46, 0.0 }
 0xa37   : > { %v2597_v25 = vmax.f32 %v2581_v49, 0.0 }
 0xa38   : > { %v2595_v32 = vmax.f32 %v2579_v35, 0.0 }
 0xa39   : > { %v2607_v36 = vpack.c.bf16 %v2597_v25, %v2596_v52 }
 0xa3a   : > { %v2606_v21 = vpack.c.bf16 %v2595_v32, %v2594_v31 }
 0xa3c   : > { %2764 = vmatmul.mubr.bf16.gmra.mrb[112].mxu0 %v2606_v21 }
 0xa3d   : > { %2773 = vmatprep.mubr.bf16.mxu0 %v10637_v0 }
 0xa42   : > { %v9744_v33 = vpop.f32.mrb[140].mxu1 }
 0xa43   : > { %v2584_v13 = vadd.f32 %v9744_v33, %v2422_v27  ;;  %v2555_v60 = vpop.f32.mrb[141].mxu1 }
 0xa44   : > { %v2582_v12 = vadd.f32 %v2555_v60, %v2420_v53  ;;  %v9745_v2 = vpop.f32.mrb[142].mxu1  ;;  %2774 = vmatmul.mubr.bf16.gmra.mrb[116].mxu0 %v2607_v36 }
 0xa45   : > { %v2585_v6 = vadd.f32 %v9745_v2, %v2423_v43  ;;  %v2558_v57 = vpop.f32.mrb[143].mxu1  ;;  %2783 = vmatprep.mubr.bf16.mxu0 %v10637_v0  ;;  %v2600_v56 = vmax.f32 %v2584_v13, 0.0 }
 0xa46   : > { %v2583_v54 = vadd.f32 %v2558_v57, %v2421_v26  ;;  %v2598_v48 = vmax.f32 %v2582_v12, 0.0 }
 0xa47   : > { %v2601_v29 = vmax.f32 %v2585_v6, 0.0 }
 0xa48   : > { %v2599_v55 = vmax.f32 %v2583_v54, 0.0 }
 0xa49   : > { %v2609_v16 = vpack.c.bf16 %v2601_v29, %v2600_v56  ;;  %v10152_v56 = vld [vmem:[#allocation5 + $0x1e0] sm:$0xff]   ;;  %v10153_v29 = vld [vmem:[#allocation5 + $0x1e8] sm:$0xff]  }
 0xa4a   : > { %v2608_v19 = vpack.c.bf16 %v2599_v55, %v2598_v48  ;;  %v10154_v48 = vld [vmem:[#allocation5 + $0x1f0] sm:$0xff]   ;;  %v10155_v55 = vld [vmem:[#allocation5 + $0x1f8] sm:$0xff]  }
 0xa4c   : > { %2784 = vmatmul.mubr.bf16.gmra.mrb[120].mxu0 %v2608_v19  ;;  %v10157_v19 = vld [vmem:[#allocation5 + $0x208] sm:$0xff]  }
 0xa4d   : > { %2793 = vmatprep.mubr.bf16.mxu0 %v10637_v0 }
 0xa54   : > { %2794 = vmatmul.mubr.bf16.gmra.mrb[124].mxu0 %v2609_v16  ;;  %v10156_v16 = vld [vmem:[#allocation5 + $0x200] sm:$0xff]  }
 0xaef   : > { %v11623_v1 = vpop.f32.mrb[96].mxu0 }
 0xaf0   : > { %v2727_v28 = vpop.f32.mrb[97].mxu0 }
 0xaf1   : > { %v11625_v4 = vpop.f32.mrb[98].mxu0 }
 0xaf2   : > { %v2731_v37 = vpop.f32.mrb[99].mxu0 }
 0xaf3   : > { %v2827_v11 = vpack.c.bf16 %v2731_v37, %v2727_v28  ;;  %v9180_v28 = vld [vmem:[%s13917_s2 + $0x5] sm:$0x1] }
 0xaf4   : > { %v2806_v37 = vunpack.c.l.bf16 %v9180_v28 }
 0xaf5   : > { %9750 = vmatprep.mubr.msk.bf16.mxu1 %vm565_vm0, %v2827_v11 }
 0xaf6   : > { %v11674_v11 = vrot.slane %v2806_v37, %v10953_v30 }
 0xaf7   : > { %v11628_v39 = vpop.f32.mrb[100].mxu0 }
 0xaf8   : > { %v2737_v15 = vpop.f32.mrb[101].mxu0 }
 0xaf9   : > { %v11630_v50 = vpop.f32.mrb[102].mxu0 }
 0xafa   : > { %v2741_v3 = vpop.f32.mrb[103].mxu0 }
 0xafb   : > { %v2828_v62 = vpack.c.bf16 %v2741_v3, %v2737_v15  ;;  %v2813_v15 = vadd.f32 %v11674_v11, %v11628_v39  ;;  %v2811_v3 = vadd.f32 %v11674_v11, %v11623_v1 }
 0xafd   : > { %9751 = vmatmul.mubr.msk.bf16.vlgmr.msra.gmra.mrb[144].mxu1 %vm565_vm0, %v2828_v62 }
 0xafe   : > { %3367 = vmatpush1.bf16.xpose.msra.mxu1 %v10152_v56 }
 0xaff   : > { %v11633_v7 = vpop.f32.mrb[104].mxu0  ;;  %3368 = vmatprep.subr.bf16.mxu1 %v10637_v0 }
 0xb00   : > { %v2747_v42 = vpop.f32.mrb[105].mxu0 }
 0xb01   : > { %v11635_v22 = vpop.f32.mrb[106].mxu0 }
 0xb02   : > { %v2751_v51 = vpop.f32.mrb[107].mxu0 }
 0xb03   : > { %v2829_v38 = vpack.c.bf16 %v2751_v51, %v2747_v42  ;;  %v2814_v42 = vadd.f32 %v11674_v11, %v11630_v50 }
 0xb05   : > { %9754 = vmatprep.mubr.msk.bf16.mxu1 %vm565_vm0, %v2829_v38 }
 0xb06   : > { %3369 = vmatpush1.bf16.xpose.msra.mxu1 %v10153_v29 }
 0xb07   : > { %v11638_v18 = vpop.f32.mrb[108].mxu0  ;;  %3370 = vmatprep.subr.bf16.mxu1 %v10637_v0 }
 0xb08   : > { %v2757_v40 = vpop.f32.mrb[109].mxu0 }
 0xb09   : > { %v11640_v46 = vpop.f32.mrb[110].mxu0 }
 0xb0a   : > { %v2761_v44 = vpop.f32.mrb[111].mxu0 }
 0xb0b   : > { %v2830_v49 = vpack.c.bf16 %v2761_v44, %v2757_v40  ;;  %v2812_v40 = vadd.f32 %v11674_v11, %v11625_v4 }
 0xb0d   : > { %9755 = vmatmul.mubr.msk.bf16.gmra.mrb[148].mxu1 %vm565_vm0, %v2830_v49 }
 0xb0e   : > { %3371 = vmatpush1.bf16.xpose.msra.mxu1 %v10154_v48  ;;  %v10158_v48 = vld [vmem:[#allocation5 + $0x210] sm:$0xff]  }
 0xb0f   : > { %v11643_v9 = vpop.f32.mrb[112].mxu0  ;;  %3372 = vmatprep.subr.bf16.mxu1 %v10637_v0 }
 0xb10   : > { %v2767_v35 = vpop.f32.mrb[113].mxu0  ;;  %v2819_v28 = vadd.f32 %v11674_v11, %v11643_v9 }
 0xb11   : > { %v11645_v52 = vpop.f32.mrb[114].mxu0 }
 0xb12   : > { %v2771_v25 = vpop.f32.mrb[115].mxu0 }
 0xb13   : > { %v2831_v31 = vpack.c.bf16 %v2771_v25, %v2767_v35 }
 0xb15   : > { %9758 = vmatprep.mubr.msk.bf16.mxu1 %vm565_vm0, %v2831_v31 }
 0xb16   : > { %3373 = vmatpush1.bf16.xpose.msra.mxu1 %v10155_v55 }
 0xb17   : > { %v11648_v32 = vpop.f32.mrb[116].mxu0  ;;  %3374 = vmatprep.subr.bf16.mxu1 %v10637_v0 }
 0xb18   : > { %v2777_v36 = vpop.f32.mrb[117].mxu0 }
 0xb19   : > { %v11650_v21 = vpop.f32.mrb[118].mxu0 }
 0xb1a   : > { %v2781_v27 = vpop.f32.mrb[119].mxu0 }
 0xb1b   : > { %v2832_v53 = vpack.c.bf16 %v2781_v27, %v2777_v36  ;;  %v2815_v27 = vadd.f32 %v11674_v11, %v11633_v7 }
 0xb1d   : > { %9759 = vmatmul.mubr.msk.bf16.gmra.mrb[152].mxu1 %vm565_vm0, %v2832_v53 }
 0xb1e   : > { %3375 = vmatpush1.bf16.xpose.msra.mxu1 %v10156_v16  ;;  %v10159_v16 = vld [vmem:[#allocation5 + $0x218] sm:$0xff]  }
 0xb1f   : > { %v11653_v33 = vpop.f32.mrb[120].mxu0  ;;  %3376 = vmatprep.subr.bf16.mxu1 %v10637_v0 }
 0xb20   : > { %v2787_v43 = vpop.f32.mrb[121].mxu0 }
 0xb21   : > { %v11655_v13 = vpop.f32.mrb[122].mxu0 }
 0xb22   : > { %v2791_v60 = vpop.f32.mrb[123].mxu0 }
 0xb23   : > { %v2833_v26 = vpack.c.bf16 %v2791_v60, %v2787_v43 }
 0xb25   : > { %9762 = vmatprep.mubr.msk.bf16.mxu1 %vm565_vm0, %v2833_v26 }
 0xb26   : > { %3377 = vmatpush1.bf16.xpose.msra.mxu1 %v10157_v19  ;;  %v2821_v19 = vadd.f32 %v11674_v11, %v11648_v32  ;;  %v2820_v32 = vadd.f32 %v11674_v11, %v11645_v52 }
 0xb27   : > { %v11658_v12 = vpop.f32.mrb[124].mxu0  ;;  %3378 = vmatprep.subr.bf16.mxu1 %v10637_v0 }
 0xb28   : > { %v2797_v2 = vpop.f32.mrb[125].mxu0 }
 0xb29   : > { %v11660_v6 = vpop.f32.mrb[126].mxu0 }
 0xb2a   : > { %v2801_v57 = vpop.f32.mrb[127].mxu0 }
 0xb2b   : > { %v2834_v54 = vpack.c.bf16 %v2801_v57, %v2797_v2 }
 0xb2d   : > { %9763 = vmatmul.mubr.msk.bf16.gmra.mrb[156].mxu1 %vm565_vm0, %v2834_v54 }
 0xb2e   : > { %3398 = vmatprep.mubr.bf16.mxu1 %v10637_v0  ;;  %3379 = vmatpush1.bf16.xpose.msra.mxu1 %v10158_v48 }
 0xb2f   : > { %3380 = vmatprep.subr.bf16.mxu1 %v10637_v0 }
 0xb36   : > { %3381 = vmatpush1.bf16.xpose.msra.mxu1 %v10159_v16 }
 0xb37   : > { %3382 = vmatprep.subr.bf16.mxu1 %v10637_v0 }
 0xbd0   : > { %v9752_v62 = vpop.f32.mrb[144].mxu1 }
 0xbd1   : > { %v2975_v51 = vadd.f32 %v9752_v62, %v2813_v15  ;;  %v2910_v38 = vpop.f32.mrb[145].mxu1  ;;  %v2822_v15 = vadd.f32 %v11674_v11, %v11650_v21 }
 0xbd2   : > { %v2973_v44 = vadd.f32 %v2910_v38, %v2811_v3  ;;  %v9753_v49 = vpop.f32.mrb[146].mxu1 }
 0xbd3   : > { %v2976_v35 = vadd.f32 %v9753_v49, %v2814_v42  ;;  %v2913_v25 = vpop.f32.mrb[147].mxu1  ;;  %v11697_v50 = vadd.f32 %v2975_v51, %v11339_v23  ;;  %v2818_v23 = vadd.f32 %v11674_v11, %v11640_v46  ;;  %v10160_v49 = vld [vmem:[#allocation5 + $0x220] sm:$0xff]  }
 0xbd4   : > { %v2974_v31 = vadd.f32 %v2913_v25, %v2812_v40  ;;  %v11685_v36 = vadd.f32 %v2973_v44, %v11315_v41  ;;  %3383 = vmatpush1.bf16.xpose.msra.mxu1 %v10160_v49  ;;  %v10161_v25 = vld [vmem:[#allocation5 + $0x228] sm:$0xff]  }
 0xbd5   : > { %v11701_v41 = vadd.f32 %v2976_v35, %v11342_v14  ;;  %v3059_v43 = vmul.f32 %v11697_v50, %v11697_v50  ;;  %v2816_v14 = vadd.f32 %v11674_v11, %v11635_v22  ;;  %3384 = vmatprep.subr.bf16.mxu1 %v10637_v0 }
 0xbd6   : > { %3009 = vadd.xlane.f32.xlu0 %v11685_v36  ;;  %v11689_v1 = vadd.f32 %v2974_v31, %v11318_v58  ;;  %v3057_v39 = vmul.f32 %v11685_v36, %v11685_v36  ;;  %v2817_v58 = vadd.f32 %v11674_v11, %v11638_v18  ;;  %v2825_v31 = vadd.f32 %v11674_v11, %v11658_v12 }
 0xbd7   : > { %v3060_v7 = vmul.f32 %v11701_v41, %v11701_v41  ;;  %v2824_v12 = vadd.f32 %v11674_v11, %v11655_v13 }
 0xbd8   : > { %3011 = vadd.xlane.f32.xlu1 %v11689_v1  ;;  %v3058_v4 = vmul.f32 %v11689_v1, %v11689_v1 }
 0xbda   : > { %3073 = vadd.xlane.f32.xlu0 %v3057_v39  ;;  %v2823_v39 = vadd.f32 %v11674_v11, %v11653_v33 }
 0xbdc   : > { %3075 = vadd.xlane.f32.xlu1 %v3058_v4  ;;  %3385 = vmatpush1.bf16.xpose.msra.mxu1 %v10161_v25 }
 0xbdd   : > { %3769 = vmatprep.subr.bf16.mxu1 %v10637_v0 }
 0xbde   : > { %3013 = vadd.xlane.f32.xlu0 %v11697_v50 }
 0xbe0   : > { %3015 = vadd.xlane.f32.xlu1 %v11701_v41  ;;  %v9756_v53 = vpop.f32.mrb[148].mxu1 }
 0xbe1   : > { %v2979_v60 = vadd.f32 %v9756_v53, %v2817_v58  ;;  %v2926_v26 = vpop.f32.mrb[149].mxu1  ;;  %v2826_v58 = vadd.f32 %v11674_v11, %v11660_v6 }
 0xbe2   : > { %v2977_v2 = vadd.f32 %v2926_v26, %v2815_v27  ;;  %3077 = vadd.xlane.f32.xlu0 %v3059_v43  ;;  %v9757_v18 = vpop.f32.mrb[150].mxu1 }
 0xbe3   : > { %v2980_v57 = vadd.f32 %v9757_v18, %v2818_v23  ;;  %v2929_v54 = vpop.f32.mrb[151].mxu1 }
 0xbe4   : > { %v2978_v56 = vadd.f32 %v2929_v54, %v2816_v14  ;;  %3079 = vadd.xlane.f32.xlu1 %v3060_v7  ;;  %v11717_v29 = vadd.f32 %v2977_v2, %v11362_v17  ;;  %v11730_v17 = vadd.f32 %v2979_v60, %v11385_v24  ;;  %v10162_v7 = vld [vmem:[#allocation7 + $0x60] sm:$0xff]  }
 0xbe5   : > { %9766 = vmatprep.subr.bf16.mxu0 %v10162_v7 }
 0xbe6   : > { %3017 = vadd.xlane.f32.xlu0 %v11717_v29  ;;  %v11721_v46 = vadd.f32 %v2978_v56, %v11365_v10  ;;  %v3061_v22 = vmul.f32 %v11717_v29, %v11717_v29  ;;  %v11734_v10 = vadd.f32 %v2980_v57, %v11388_v5  ;;  %v3063_v24 = vmul.f32 %v11730_v17, %v11730_v17  ;;  %v10163_v57 = vld [vmem:[#allocation7 + $0x68] sm:$0xff]  }
 0xbe7   : > { %9767 = vmatpush3.bf16.msra.mxu0 %v10162_v7 }
 0xbe8   : > { %3019 = vadd.xlane.f32.xlu1 %v11721_v46  ;;  %v3062_v55 = vmul.f32 %v11721_v46, %v11721_v46  ;;  %v3064_v9 = vmul.f32 %v11734_v10, %v11734_v10  ;;  %9768 = vmatprep.subr.bf16.mxu0 %v10163_v57 }
 0xbea   : > { %3081 = vadd.xlane.f32.xlu0 %v3061_v22 }
 0xbeb   : > { %9769 = vmatpush3.bf16.msra.mxu0 %v10163_v57  ;;  %v11828_v57 = vld [vmem:[%s13919_s4 + $0x1] ss:$0 sm:$0xff] }
 0xbec   : > { %3083 = vadd.xlane.f32.xlu1 %v3062_v55 }
 0xbee   : > { %3021 = vadd.xlane.f32.xlu0 %v11730_v17 }
 0xbf0   : > { %3023 = vadd.xlane.f32.xlu1 %v11734_v10  ;;  %v9760_v37 = vpop.f32.mrb[152].mxu1 }
 0xbf1   : > { %v2983_v5 = vadd.f32 %v9760_v37, %v2821_v19  ;;  %v2942_v3 = vpop.f32.mrb[153].mxu1 }
 0xbf2   : > { %v2981_v62 = vadd.f32 %v2942_v3, %v2819_v28  ;;  %3085 = vadd.xlane.f32.xlu0 %v3063_v24  ;;  %v9761_v42 = vpop.f32.mrb[154].mxu1 }
 0xbf3   : > { %v2984_v51 = vadd.f32 %v9761_v42, %v2822_v15  ;;  %v2945_v38 = vpop.f32.mrb[155].mxu1 }
 0xbf4   : > { %v2982_v40 = vadd.f32 %v2945_v38, %v2820_v32  ;;  %3087 = vadd.xlane.f32.xlu1 %v3064_v9  ;;  %v11751_v44 = vadd.f32 %v2981_v62, %v11402_v34  ;;  %v11764_v34 = vadd.f32 %v2983_v5, %v11417_v63 }
 0xbf6   : > { %3025 = vadd.xlane.f32.xlu0 %v11751_v44  ;;  %v11755_v21 = vadd.f32 %v2982_v40, %v11405_v45  ;;  %v3065_v52 = vmul.f32 %v11751_v44, %v11751_v44  ;;  %v11768_v45 = vadd.f32 %v2984_v51, %v11420_v47  ;;  %v3067_v63 = vmul.f32 %v11764_v34, %v11764_v34 }
 0xbf8   : > { %3027 = vadd.xlane.f32.xlu1 %v11755_v21  ;;  %v3066_v35 = vmul.f32 %v11755_v21, %v11755_v21  ;;  %v3068_v33 = vmul.f32 %v11768_v45, %v11768_v45 }
 0xbfa   : > { %3089 = vadd.xlane.f32.xlu0 %v3065_v52 }
 0xbfc   : > { %3091 = vadd.xlane.f32.xlu1 %v3066_v35 }
 0xbfe   : > { %3029 = vadd.xlane.f32.xlu0 %v11764_v34 }
 0xc00   : > { %3031 = vadd.xlane.f32.xlu1 %v11768_v45  ;;  %v9764_v4 = vpop.f32.mrb[156].mxu1 }
 0xc01   : > { %v2987_v47 = vadd.f32 %v9764_v4, %v2825_v31  ;;  %v2958_v27 = vpop.f32.mrb[157].mxu1 }
 0xc02   : > { %v2985_v53 = vadd.f32 %v2958_v27, %v2823_v39  ;;  %3093 = vadd.xlane.f32.xlu0 %v3067_v63  ;;  %v9765_v43 = vpop.f32.mrb[158].mxu1 }
 0xc03   : > { %v2988_v23 = vadd.f32 %v9765_v43, %v2826_v58  ;;  %v2961_v60 = vpop.f32.mrb[159].mxu1  ;;  %v11797_v2 = vadd.f32 %v2987_v47, %v11443_v61 }
 0xc04   : > { %v2986_v26 = vadd.f32 %v2961_v60, %v2824_v12  ;;  %3095 = vadd.xlane.f32.xlu1 %v3068_v33  ;;  %v11785_v14 = vadd.f32 %v2985_v53, %v11431_v59 }
 0xc05   : > { %v11801_v59 = vadd.f32 %v2988_v23, %v11446_v8 }
 0xc06   : > { %3033 = vadd.xlane.f32.xlu0 %v11785_v14  ;;  %v11789_v6 = vadd.f32 %v2986_v26, %v11434_v20  ;;  %v3069_v13 = vmul.f32 %v11785_v14, %v11785_v14  ;;  %v3071_v20 = vmul.f32 %v11797_v2, %v11797_v2 }
 0xc07   : > { %v3072_v18 = vmul.f32 %v11801_v59, %v11801_v59 }
 0xc08   : > { %3035 = vadd.xlane.f32.xlu1 %v11789_v6  ;;  %v3070_v11 = vmul.f32 %v11789_v6, %v11789_v6 }
 0xc0a   : > { %3097 = vadd.xlane.f32.xlu0 %v3069_v13 }
 0xc0c   : > { %3099 = vadd.xlane.f32.xlu1 %v3070_v11 }
 0xc0e   : > { %3037 = vadd.xlane.f32.xlu0 %v11797_v2 }
 0xc10   : > { %3039 = vadd.xlane.f32.xlu1 %v11801_v59 }
 0xc12   : > { %3101 = vadd.xlane.f32.xlu0 %v3071_v20 }
 0xc14   : > { %3103 = vadd.xlane.f32.xlu1 %v3072_v18 }
 0xc63   : > { %v3010_v61 = vpop.xlane.xlu0 %3009 }
 0xc64   : > { %v3041_v54 = vmul.f32 0.0078125, %v3010_v61 }
 0xc65   : > { %v3012_v8 = vpop.xlane.xlu1 %3011 }
 0xc66   : > { %v3042_v56 = vmul.f32 0.0078125, %v3012_v8  ;;  %v3121_v22 = vmul.f32 %v3041_v54, %v3041_v54  ;;  %v3169_v26 = vsub.f32 %v11685_v36, %v3041_v54 }
 0xc67   : > { %v3074_v48 = vpop.xlane.xlu0 %3073 }
 0xc68   : > { %v3105_v55 = vmul.f32 0.0078125, %v3074_v48  ;;  %v3122_v19 = vmul.f32 %v3042_v56, %v3042_v56  ;;  %v3170_v61 = vsub.f32 %v11689_v1, %v3042_v56 }
 0xc69   : > { %v3076_v16 = vpop.xlane.xlu1 %3075 }
 0xc6a   : > { %v3137_v28 = vsub.f32 %v3105_v55, %v3121_v22  ;;  %v3106_v37 = vmul.f32 0.0078125, %v3076_v16 }
 0xc6b   : > { %v3014_v24 = vpop.xlane.xlu0 %3013 }
 0xc6c   : > { %v3153_v15 = vmax.f32 %v3137_v28, 0.0  ;;  %v3138_v5 = vsub.f32 %v3106_v37, %v3122_v19  ;;  %v11808_v3 = vmul.f32 0.0078125, %v3014_v24 }
 0xc6d   : > { %v3016_v32 = vpop.xlane.xlu1 %3015 }
 0xc6e   : > { %v3185_v62 = vadd.f32 1e-05, %v3153_v15  ;;  %v3154_v42 = vmax.f32 %v3138_v5, 0.0  ;;  %v11810_v9 = vmul.f32 0.0078125, %v3016_v32  ;;  %v3123_v40 = vmul.f32 %v11808_v3, %v11808_v3  ;;  %v11837_v15 = vld [vmem:[%s13920_s5 + $0x1] ss:$0 sm:$0xff] }
 0xc6f   : > { %v3078_v51 = vpop.xlane.xlu0 %3077 }
 0xc70   : > { %10328 = vrsqrt.f32 %v3185_v62  ;;  %v3186_v38 = vadd.f32 1e-05, %v3154_v42  ;;  %v3107_v49 = vmul.f32 0.0078125, %v3078_v51  ;;  %v3124_v35 = vmul.f32 %v11810_v9, %v11810_v9 }
 0xc71   : > { %v3080_v52 = vpop.xlane.xlu1 %3079  ;;  %v3171_v51 = vsub.f32 %v11697_v50, %v11808_v3 }
 0xc72   : > { %10330 = vrsqrt.f32 %v3186_v38  ;;  %v3139_v25 = vsub.f32 %v3107_v49, %v3123_v40  ;;  %v3108_v31 = vmul.f32 0.0078125, %v3080_v52 }
 0xc73   : > { %v3018_v39 = vpop.xlane.xlu0 %3017 }
 0xc74   : > { %v3155_v4 = vmax.f32 %v3139_v25, 0.0  ;;  %v3140_v63 = vsub.f32 %v3108_v31, %v3124_v35  ;;  %v11816_v58 = vmul.f32 0.0078125, %v3018_v39  ;;  %v3172_v39 = vsub.f32 %v11701_v41, %v11810_v9 }
 0xc75   : > { %v3020_v47 = vpop.xlane.xlu1 %3019 }
 0xc76   : > { %v3187_v27 = vadd.f32 1e-05, %v3155_v4  ;;  %v3156_v12 = vmax.f32 %v3140_v63, 0.0  ;;  %v11818_v53 = vmul.f32 0.0078125, %v3020_v47  ;;  %v3125_v23 = vmul.f32 %v11816_v58, %v11816_v58 }
 0xc77   : > { %v3082_v43 = vpop.xlane.xlu0 %3081 }
 0xc78   : > { %10332 = vrsqrt.f32 %v3187_v27  ;;  %v3188_v33 = vadd.f32 1e-05, %v3156_v12  ;;  %v3109_v60 = vmul.f32 0.0078125, %v3082_v43  ;;  %v3126_v20 = vmul.f32 %v11818_v53, %v11818_v53 }
 0xc79   : > { %v3084_v13 = vpop.xlane.xlu1 %3083 }
 0xc7a   : > { %v10329_v11 = vpop.eup %10328  ;;  %10334 = vrsqrt.f32 %v3188_v33  ;;  %v3141_v18 = vsub.f32 %v3109_v60, %v3125_v23  ;;  %v3110_v7 = vmul.f32 0.0078125, %v3084_v13 }
 0xc7b   : > { %v3217_v8 = vmul.f32 %v10329_v11, %v3169_v26  ;;  %v3022_v48 = vpop.xlane.xlu0 %3021 }
 0xc7c   : > { %v10331_v22 = vpop.eup %10330  ;;  %v3157_v55 = vmax.f32 %v3141_v18, 0.0  ;;  %v3142_v36 = vsub.f32 %v3110_v7, %v3126_v20  ;;  %v11831_v54 = vmul.f32 0.0078125, %v3022_v48  ;;  %v3173_v7 = vsub.f32 %v11717_v29, %v11816_v58 }
 0xc7d   : > { %v3218_v16 = vmul.f32 %v10331_v22, %v3170_v61  ;;  %v3024_v19 = vpop.xlane.xlu1 %3023  ;;  %v3239_v28 = vmul.f32 %v11828_v57, %v3217_v8 }
 0xc7e   : > { %v3189_v37 = vadd.f32 1e-05, %v3157_v55  ;;  %v3158_v24 = vmax.f32 %v3142_v36, 0.0  ;;  %v11839_v5 = vmul.f32 0.0078125, %v3024_v19  ;;  %v3127_v62 = vmul.f32 %v11831_v54, %v11831_v54 }
 0xc7f   : > { %v3086_v1 = vpop.xlane.xlu0 %3085  ;;  %v3240_v56 = vmul.f32 %v11828_v57, %v3218_v16  ;;  %v11847_v40 = vadd.f32 %v11837_v15, %v3239_v28  ;;  %v3174_v19 = vsub.f32 %v11721_v46, %v11818_v53 }
 0xc80   : > { %10336 = vrsqrt.f32 %v3189_v37  ;;  %v3190_v32 = vadd.f32 1e-05, %v3158_v24  ;;  %v3111_v42 = vmul.f32 0.0078125, %v3086_v1  ;;  %v3128_v35 = vmul.f32 %v11839_v5, %v11839_v5 }
 0xc81   : > { %v3088_v38 = vpop.xlane.xlu1 %3087  ;;  %v11850_v49 = vadd.f32 %v11837_v15, %v3240_v56 }
 0xc82   : > { %v10333_v52 = vpop.eup %10332  ;;  %10338 = vrsqrt.f32 %v3190_v32  ;;  %v3143_v25 = vsub.f32 %v3111_v42, %v3127_v62  ;;  %v3112_v31 = vmul.f32 0.0078125, %v3088_v38 }
 0xc83   : > { %v3026_v4 = vpop.xlane.xlu0 %3025  ;;  %v3277_v50 = vpack.c.bf16 %v11850_v49, %v11847_v40  ;;  %v3219_v3 = vmul.f32 %v10333_v52, %v3171_v51 }
 0xc84   : > { %v10335_v63 = vpop.eup %10334  ;;  %v3159_v47 = vmax.f32 %v3143_v25, 0.0  ;;  %v3144_v27 = vsub.f32 %v3112_v31, %v3128_v35  ;;  %v11858_v12 = vmul.f32 0.0078125, %v3026_v4 }
 0xc85   : > { %v3028_v43 = vpop.xlane.xlu1 %3027  ;;  %3399 = vmatmul.mubr.bf16.vlgmr.msra.gmra.mrb[160].mxu1 %v3277_v50  ;;  %v3220_v33 = vmul.f32 %v10335_v63, %v3172_v39  ;;  %v3241_v23 = vmul.f32 %v11828_v57, %v3219_v3  ;;  %v3175_v39 = vsub.f32 %v11730_v17, %v11831_v54 }
 0xc86   : > { %v3191_v60 = vadd.f32 1e-05, %v3159_v47  ;;  %v3160_v26 = vmax.f32 %v3144_v27, 0.0  ;;  %3408 = vmatprep.mubr.bf16.mxu1 %v10637_v0  ;;  %v11862_v41 = vmul.f32 0.0078125, %v3028_v43  ;;  %v3129_v20 = vmul.f32 %v11858_v12, %v11858_v12 }
 0xc87   : > { %v3090_v9 = vpop.xlane.xlu0 %3089  ;;  %v3242_v13 = vmul.f32 %v11828_v57, %v3220_v33  ;;  %v11870_v8 = vadd.f32 %v11837_v15, %v3241_v23  ;;  %v3176_v33 = vsub.f32 %v11734_v10, %v11839_v5 }
 0xc88   : > { %10340 = vrsqrt.f32 %v3191_v60  ;;  %v3192_v11 = vadd.f32 1e-05, %v3160_v26  ;;  %v3113_v18 = vmul.f32 0.0078125, %v3090_v9  ;;  %v3130_v55 = vmul.f32 %v11862_v41, %v11862_v41 }
 0xc89   : > { %v3092_v61 = vpop.xlane.xlu1 %3091  ;;  %v11873_v48 = vadd.f32 %v11837_v15, %v3242_v13 }
 0xc8a   : > { %v10337_v22 = vpop.eup %10336  ;;  %10342 = vrsqrt.f32 %v3192_v11  ;;  %v3145_v36 = vsub.f32 %v3113_v18, %v3129_v20  ;;  %v3114_v16 = vmul.f32 0.0078125, %v3092_v61 }
 0xc8b   : > { %v3030_v28 = vpop.xlane.xlu0 %3029  ;;  %v3278_v29 = vpack.c.bf16 %v11873_v48, %v11870_v8  ;;  %v3221_v58 = vmul.f32 %v10337_v22, %v3173_v7 }
 0xc8c   : > { %v10339_v37 = vpop.eup %10338  ;;  %v3161_v24 = vmax.f32 %v3145_v36, 0.0  ;;  %v3146_v1 = vsub.f32 %v3114_v16, %v3130_v55  ;;  %v11881_v56 = vmul.f32 0.0078125, %v3030_v28 }
 0xc8d   : > { %v3032_v32 = vpop.xlane.xlu1 %3031  ;;  %3409 = vmatmul.mubr.bf16.gmra.mrb[164].mxu1 %v3278_v29  ;;  %v3222_v62 = vmul.f32 %v10339_v37, %v3174_v19  ;;  %v3243_v42 = vmul.f32 %v11828_v57, %v3221_v58  ;;  %v3177_v19 = vsub.f32 %v11751_v44, %v11858_v12 }
 0xc8e   : > { %v3193_v51 = vadd.f32 1e-05, %v3161_v24  ;;  %v3162_v38 = vmax.f32 %v3146_v1, 0.0  ;;  %3418 = vmatprep.mubr.bf16.mxu1 %v10637_v0  ;;  %v11885_v46 = vmul.f32 0.0078125, %v3032_v32  ;;  %v3131_v25 = vmul.f32 %v11881_v56, %v11881_v56 }
 0xc8f   : > { %v3094_v53 = vpop.xlane.xlu0 %3093  ;;  %v3244_v52 = vmul.f32 %v11828_v57, %v3222_v62  ;;  %v11893_v50 = vadd.f32 %v11837_v15, %v3243_v42  ;;  %v3178_v62 = vsub.f32 %v11755_v21, %v11862_v41 }
 0xc90   : > { %10344 = vrsqrt.f32 %v3193_v51  ;;  %v3194_v35 = vadd.f32 1e-05, %v3162_v38  ;;  %v3115_v31 = vmul.f32 0.0078125, %v3094_v53  ;;  %v3132_v47 = vmul.f32 %v11885_v46, %v11885_v46 }
 0xc91   : > { %v3096_v4 = vpop.xlane.xlu1 %3095  ;;  %v11896_v3 = vadd.f32 %v11837_v15, %v3244_v52 }
 0xc92   : > { %v10341_v63 = vpop.eup %10340  ;;  %10346 = vrsqrt.f32 %v3194_v35  ;;  %v3147_v27 = vsub.f32 %v3115_v31, %v3131_v25  ;;  %v3116_v43 = vmul.f32 0.0078125, %v3096_v4 }
 0xc93   : > { %v3034_v23 = vpop.xlane.xlu0 %3033  ;;  %v3279_v17 = vpack.c.bf16 %v11896_v3, %v11893_v50  ;;  %v3223_v54 = vmul.f32 %v10341_v63, %v3175_v39 }
 0xc94   : > { %v10343_v60 = vpop.eup %10342  ;;  %v3163_v26 = vmax.f32 %v3147_v27, 0.0  ;;  %v3148_v9 = vsub.f32 %v3116_v43, %v3132_v47  ;;  %v11904_v13 = vmul.f32 0.0078125, %v3034_v23 }
 0xc95   : > { %3419 = vmatmul.mubr.bf16.gmra.mrb[168].mxu1 %v3279_v17  ;;  %v3036_v11 = vpop.xlane.xlu1 %3035  ;;  %v3224_v20 = vmul.f32 %v10343_v60, %v3176_v33  ;;  %v3245_v18 = vmul.f32 %v11828_v57, %v3223_v54  ;;  %v3179_v33 = vsub.f32 %v11764_v34, %v11881_v56 }
 0xc96   : > { %v3195_v7 = vadd.f32 1e-05, %v3163_v26  ;;  %v3164_v61 = vmax.f32 %v3148_v9, 0.0  ;;  %3428 = vmatprep.mubr.bf16.mxu1 %v10637_v0  ;;  %v11908_v10 = vmul.f32 0.0078125, %v3036_v11  ;;  %v3133_v36 = vmul.f32 %v11904_v13, %v11904_v13 }
 0xc97   : > { %v3098_v5 = vpop.xlane.xlu0 %3097  ;;  %v3246_v22 = vmul.f32 %v11828_v57, %v3224_v20  ;;  %v11916_v29 = vadd.f32 %v11837_v15, %v3245_v18  ;;  %v3180_v20 = vsub.f32 %v11768_v45, %v11885_v46  ;;  %v3181_v45 = vsub.f32 %v11785_v14, %v11904_v13 }
 0xc98   : > { %10348 = vrsqrt.f32 %v3195_v7  ;;  %v3196_v55 = vadd.f32 1e-05, %v3164_v61  ;;  %v3117_v16 = vmul.f32 0.0078125, %v3098_v5  ;;  %v3134_v24 = vmul.f32 %v11908_v10, %v11908_v10 }
 0xc99   : > { %v3100_v28 = vpop.xlane.xlu1 %3099  ;;  %v11919_v58 = vadd.f32 %v11837_v15, %v3246_v22 }
 0xc9a   : > { %v10345_v37 = vpop.eup %10344  ;;  %10350 = vrsqrt.f32 %v3196_v55  ;;  %v3149_v1 = vsub.f32 %v3117_v16, %v3133_v36  ;;  %v3118_v32 = vmul.f32 0.0078125, %v3100_v28 }
 0xc9b   : > { %v3038_v42 = vpop.xlane.xlu0 %3037  ;;  %v3280_v44 = vpack.c.bf16 %v11919_v58, %v11916_v29  ;;  %v3225_v12 = vmul.f32 %v10345_v37, %v3177_v19 }
 0xc9c   : > { %v10347_v51 = vpop.eup %10346  ;;  %v3165_v38 = vmax.f32 %v3149_v1, 0.0  ;;  %v3150_v53 = vsub.f32 %v3118_v32, %v3134_v24  ;;  %v3055_v52 = vmul.f32 0.0078125, %v3038_v42  ;;  %v3182_v24 = vsub.f32 %v11789_v6, %v11908_v10 }
 0xc9d   : > { %3429 = vmatmul.mubr.bf16.gmra.mrb[172].mxu1 %v3280_v44  ;;  %v3040_v35 = vpop.xlane.xlu1 %3039  ;;  %v3226_v25 = vmul.f32 %v10347_v51, %v3178_v62  ;;  %v3247_v31 = vmul.f32 %v11828_v57, %v3225_v12 }
 0xc9e   : > { %v3197_v39 = vadd.f32 1e-05, %v3165_v38  ;;  %v3166_v4 = vmax.f32 %v3150_v53, 0.0  ;;  %3438 = vmatprep.mubr.bf16.mxu1 %v10637_v0  ;;  %v3056_v63 = vmul.f32 0.0078125, %v3040_v35  ;;  %v3135_v27 = vmul.f32 %v3055_v52, %v3055_v52 }
 0xc9f   : > { %v3102_v21 = vpop.xlane.xlu0 %3101  ;;  %v3248_v41 = vmul.f32 %v11828_v57, %v3226_v25  ;;  %v11933_v17 = vadd.f32 %v11837_v15, %v3247_v31  ;;  %v3183_v44 = vsub.f32 %v11797_v2, %v3055_v52 }
 0xca0   : > { %10352 = vrsqrt.f32 %v3197_v39  ;;  %v3198_v47 = vadd.f32 1e-05, %v3166_v4  ;;  %v3119_v43 = vmul.f32 0.0078125, %v3102_v21  ;;  %v3136_v26 = vmul.f32 %v3056_v63, %v3056_v63  ;;  %v10164_v4 = vld [vmem:[#allocation5 + $0x230] sm:$0xff]  }
 0xca1   : > { %v3104_v23 = vpop.xlane.xlu1 %3103  ;;  %v11936_v54 = vadd.f32 %v11837_v15, %v3248_v41  ;;  %v3184_v51 = vsub.f32 %v11801_v59, %v3056_v63  ;;  %3770 = vmatpush1.bf16.xpose.msra.mxu1 %v10164_v4  ;;  %v10165_v63 = vld [vmem:[#allocation5 + $0x238] sm:$0xff]   ;;  %v10168_v21 = vld [vmem:[#allocation5 + $0x250] sm:$0xff]  }
 0xca2   : > { %v10349_v60 = vpop.eup %10348  ;;  %10354 = vrsqrt.f32 %v3198_v47  ;;  %v3151_v9 = vsub.f32 %v3119_v43, %v3135_v27  ;;  %v3120_v11 = vmul.f32 0.0078125, %v3104_v23  ;;  %3771 = vmatprep.subr.bf16.mxu1 %v10637_v0  ;;  %v10169_v41 = vld [vmem:[#allocation5 + $0x258] sm:$0xff]   ;;  %v10170_v47 = vld [vmem:[#allocation5 + $0x260] sm:$0xff]   ;;  %v10171_v27 = vld [vmem:[#allocation5 + $0x268] sm:$0xff]  }
 0xca3   : > { %v3281_v18 = vpack.c.bf16 %v11936_v54, %v11933_v17  ;;  %v3227_v7 = vmul.f32 %v10349_v60, %v3179_v33  ;;  %v10172_v43 = vld [vmem:[#allocation5 + $0x270] sm:$0xff]  }
 0xca4   : > { %v10351_v34 = vpop.eup %10350  ;;  %v3167_v56 = vmax.f32 %v3151_v9, 0.0  ;;  %v3152_v61 = vsub.f32 %v3120_v11, %v3136_v26 }
 0xca5   : > { %3439 = vmatmul.mubr.bf16.gmra.mrb[176].mxu1 %v3281_v18  ;;  %v3228_v5 = vmul.f32 %v10351_v34, %v3180_v20  ;;  %v3249_v22 = vmul.f32 %v11828_v57, %v3227_v7 }
 0xca6   : > { %v3199_v55 = vadd.f32 1e-05, %v3167_v56  ;;  %v3168_v36 = vmax.f32 %v3152_v61, 0.0  ;;  %3448 = vmatprep.mubr.bf16.mxu1 %v10637_v0 }
 0xca7   : > { %v3250_v16 = vmul.f32 %v11828_v57, %v3228_v5  ;;  %v11948_v46 = vadd.f32 %v11837_v15, %v3249_v22 }
 0xca8   : > { %10356 = vrsqrt.f32 %v3199_v55  ;;  %v3200_v19 = vadd.f32 1e-05, %v3168_v36 }
 0xca9   : > { %v11951_v28 = vadd.f32 %v11837_v15, %v3250_v16  ;;  %3772 = vmatpush1.bf16.xpose.msra.mxu1 %v10165_v63 }
 0xcaa   : > { %v10353_v37 = vpop.eup %10352  ;;  %10358 = vrsqrt.f32 %v3200_v19  ;;  %3773 = vmatprep.subr.bf16.mxu1 %v10637_v0 }
 0xcab   : > { %v3282_v1 = vpack.c.bf16 %v11951_v28, %v11948_v46  ;;  %v3229_v32 = vmul.f32 %v10353_v37, %v3181_v45 }
 0xcac   : > { %v10355_v62 = vpop.eup %10354 }
 0xcad   : > { %3449 = vmatmul.mubr.bf16.gmra.mrb[180].mxu1 %v3282_v1  ;;  %v3230_v42 = vmul.f32 %v10355_v62, %v3182_v24  ;;  %v3251_v14 = vmul.f32 %v11828_v57, %v3229_v32 }
 0xcae   : > { %3458 = vmatprep.mubr.bf16.mxu1 %v10637_v0 }
 0xcaf   : > { %v3252_v13 = vmul.f32 %v11828_v57, %v3230_v42  ;;  %v11962_v12 = vadd.f32 %v11837_v15, %v3251_v14 }
 0xcb1   : > { %v11965_v6 = vadd.f32 %v11837_v15, %v3252_v13 }
 0xcb2   : > { %v10357_v10 = vpop.eup %10356 }
 0xcb3   : > { %v3283_v38 = vpack.c.bf16 %v11965_v6, %v11962_v12  ;;  %v3231_v53 = vmul.f32 %v10357_v10, %v3183_v44 }
 0xcb4   : > { %v10359_v35 = vpop.eup %10358 }
 0xcb5   : > { %3459 = vmatmul.mubr.bf16.gmra.mrb[184].mxu1 %v3283_v38  ;;  %v3232_v25 = vmul.f32 %v10359_v35, %v3184_v51  ;;  %v3253_v31 = vmul.f32 %v11828_v57, %v3231_v53 }
 0xcb6   : > { %3468 = vmatprep.mubr.bf16.mxu1 %v10637_v0 }
 0xcb7   : > { %v3254_v2 = vmul.f32 %v11828_v57, %v3232_v25  ;;  %v11974_v52 = vadd.f32 %v11837_v15, %v3253_v31  ;;  %v10166_v57 = vld [vmem:[#allocation5 + $0x240] sm:$0xff]  }
 0xcb8   : > { %3774 = vmatpush1.bf16.xpose.msra.mxu1 %v10166_v57 }
 0xcb9   : > { %v11977_v39 = vadd.f32 %v11837_v15, %v3254_v2  ;;  %3775 = vmatprep.subr.bf16.mxu1 %v10637_v0  ;;  %v10167_v15 = vld [vmem:[#allocation5 + $0x248] sm:$0xff]  }
 0xcbb   : > { %v3284_v59 = vpack.c.bf16 %v11977_v39, %v11974_v52 }
 0xcbd   : > { %3469 = vmatmul.mubr.bf16.gmra.mrb[188].mxu1 %v3284_v59 }
 0xcbe   : > { %3801 = vmatprep.mubr.bf16.mxu1 %v10637_v0 }
 0xcc0   : > { %3776 = vmatpush1.bf16.xpose.msra.mxu1 %v10167_v15  ;;  %v10173_v15 = vld [vmem:[#allocation5 + $0x278] sm:$0xff]  }
 0xcc1   : > { %3777 = vmatprep.subr.bf16.mxu1 %v10637_v0 }
 0xcc8   : > { %3778 = vmatpush1.bf16.xpose.msra.mxu1 %v10168_v21  ;;  %v10174_v21 = vld [vmem:[#allocation7 + $0x70] sm:$0xff]  }
 0xcc9   : > { %3779 = vmatprep.subr.bf16.mxu1 %v10637_v0  ;;  %9786 = vmatprep.subr.bf16.mxu0 %v10174_v21 }
 0xcd0   : > { %3780 = vmatpush1.bf16.xpose.msra.mxu1 %v10169_v41  ;;  %v10175_v41 = vld [vmem:[#allocation7 + $0x78] sm:$0xff]  }
 0xcd1   : > { %3781 = vmatprep.subr.bf16.mxu1 %v10637_v0 }
 0xcd8   : > { %3782 = vmatpush1.bf16.xpose.msra.mxu1 %v10170_v47  ;;  %v9205_v47 = vld [vmem:[%s13917_s2 + $0x6] sm:$0x1] }
 0xcd9   : > { %3783 = vmatprep.subr.bf16.mxu1 %v10637_v0 }
 0xce0   : > { %3784 = vmatpush1.bf16.xpose.msra.mxu1 %v10171_v27  ;;  %v3481_v27 = vunpack.c.l.bf16 %v9205_v47 }
 0xce1   : > { %3785 = vmatprep.subr.bf16.mxu1 %v10637_v0 }
 0xce8   : > { %3786 = vmatpush1.bf16.xpose.msra.mxu1 %v10172_v43  ;;  %v12030_v43 = vrot.slane %v3481_v27, %v10953_v30 }
 0xce9   : > { %3787 = vmatprep.subr.bf16.mxu1 %v10637_v0 }
 0xcf0   : > { %3788 = vmatpush1.bf16.xpose.msra.mxu1 %v10173_v15 }
 0xd58   : > { %v11990_v33 = vpop.f32.mrb[160].mxu1 }
 0xd59   : > { %v3402_v23 = vpop.f32.mrb[161].mxu1 }
 0xd5a   : > { %v11993_v60 = vpop.f32.mrb[162].mxu1 }
 0xd5b   : > { %v3406_v26 = vpop.f32.mrb[163].mxu1 }
 0xd5c   : > { %v3502_v9 = vpack.c.bf16 %v3406_v26, %v3402_v23  ;;  %v3486_v26 = vadd.f32 %v12030_v43, %v11990_v33 }
 0xd5e   : > { %9770 = vmatprep.mubr.msk.bf16.mxu0 %vm565_vm0, %v3502_v9 }
 0xd60   : > { %v3410_v11 = vpop.f32.mrb[164].mxu1 }
 0xd61   : > { %v3412_v20 = vpop.f32.mrb[165].mxu1  ;;  %v3488_v23 = vadd.f32 %v12030_v43, %v3410_v11 }
 0xd62   : > { %v3414_v18 = vpop.f32.mrb[166].mxu1 }
 0xd63   : > { %v3416_v7 = vpop.f32.mrb[167].mxu1 }
 0xd64   : > { %v3503_v34 = vpack.c.bf16 %v3416_v7, %v3412_v20  ;;  %v3489_v20 = vadd.f32 %v12030_v43, %v3414_v18 }
 0xd66   : > { %9771 = vmatmul.mubr.msk.bf16.vlgmr.msra.gmra.mrb[128].mxu0 %vm565_vm0, %v3503_v34 }
 0xd67   : > { %9787 = vmatpush3.bf16.msra.mxu0 %v10174_v21 }
 0xd68   : > { %v11997_v56 = vpop.f32.mrb[168].mxu1  ;;  %9788 = vmatprep.subr.bf16.mxu0 %v10175_v41 }
 0xd69   : > { %v3422_v61 = vpop.f32.mrb[169].mxu1  ;;  %v3490_v18 = vadd.f32 %v12030_v43, %v11997_v56 }
 0xd6a   : > { %v11999_v5 = vpop.f32.mrb[170].mxu1 }
 0xd6b   : > { %v3426_v22 = vpop.f32.mrb[171].mxu1  ;;  %9789 = vmatpush3.bf16.msra.mxu0 %v10175_v41 }
 0xd6c   : > { %v3504_v55 = vpack.c.bf16 %v3426_v22, %v3422_v61  ;;  %4172 = vmatprep.subr.bf16.mxu0 %v10637_v0  ;;  %v3487_v61 = vadd.f32 %v12030_v43, %v11993_v60 }
 0xd6e   : > { %9774 = vmatprep.mubr.msk.bf16.mxu0 %vm565_vm0, %v3504_v55 }
 0xd70   : > { %v3430_v36 = vpop.f32.mrb[172].mxu1 }
 0xd71   : > { %v3432_v16 = vpop.f32.mrb[173].mxu1  ;;  %v3492_v33 = vadd.f32 %v12030_v43, %v3430_v36 }
 0xd72   : > { %v12002_v19 = vpop.f32.mrb[174].mxu1 }
 0xd73   : > { %v3436_v45 = vpop.f32.mrb[175].mxu1 }
 0xd74   : > { %v3505_v37 = vpack.c.bf16 %v3436_v45, %v3432_v16 }
 0xd76   : > { %9775 = vmatmul.mubr.msk.bf16.gmra.mrb[132].mxu0 %vm565_vm0, %v3505_v37 }
 0xd78   : > { %v12005_v24 = vpop.f32.mrb[176].mxu1 }
 0xd79   : > { %v3442_v1 = vpop.f32.mrb[177].mxu1 }
 0xd7a   : > { %v12007_v32 = vpop.f32.mrb[178].mxu1 }
 0xd7b   : > { %v3446_v62 = vpop.f32.mrb[179].mxu1 }
 0xd7c   : > { %v3506_v42 = vpack.c.bf16 %v3446_v62, %v3442_v1 }
 0xd7e   : > { %9778 = vmatprep.mubr.msk.bf16.mxu0 %vm565_vm0, %v3506_v42 }
 0xd80   : > { %v12010_v14 = vpop.f32.mrb[180].mxu1 }
 0xd81   : > { %v3452_v13 = vpop.f32.mrb[181].mxu1 }
 0xd82   : > { %v12012_v44 = vpop.f32.mrb[182].mxu1 }
 0xd83   : > { %v3456_v10 = vpop.f32.mrb[183].mxu1 }
 0xd84   : > { %v3507_v51 = vpack.c.bf16 %v3456_v10, %v3452_v13 }
 0xd86   : > { %9779 = vmatmul.mubr.msk.bf16.gmra.mrb[136].mxu0 %vm565_vm0, %v3507_v51  ;;  %v3493_v51 = vadd.f32 %v12030_v43, %v12002_v19  ;;  %v3494_v19 = vadd.f32 %v12030_v43, %v12005_v24 }
 0xd88   : > { %v12015_v38 = vpop.f32.mrb[184].mxu1 }
 0xd89   : > { %v3462_v53 = vpop.f32.mrb[185].mxu1 }
 0xd8a   : > { %v12017_v35 = vpop.f32.mrb[186].mxu1 }
 0xd8b   : > { %v3466_v25 = vpop.f32.mrb[187].mxu1 }
 0xd8c   : > { %v3508_v31 = vpack.c.bf16 %v3466_v25, %v3462_v53 }
 0xd8e   : > { %9782 = vmatprep.mubr.msk.bf16.mxu0 %vm565_vm0, %v3508_v31  ;;  %v3491_v31 = vadd.f32 %v12030_v43, %v11999_v5  ;;  %v3496_v5 = vadd.f32 %v12030_v43, %v12010_v14 }
 0xd90   : > { %v12020_v2 = vpop.f32.mrb[188].mxu1 }
 0xd91   : > { %v3472_v59 = vpop.f32.mrb[189].mxu1 }
 0xd92   : > { %v12022_v4 = vpop.f32.mrb[190].mxu1 }
 0xd93   : > { %v3476_v63 = vpop.f32.mrb[191].mxu1 }
 0xd94   : > { %v3509_v57 = vpack.c.bf16 %v3476_v63, %v3472_v59 }
 0xd96   : > { %9783 = vmatmul.mubr.msk.bf16.gmra.mrb[140].mxu0 %vm565_vm0, %v3509_v57 }
 0xe39   : > { %v9772_v9 = vpop.f32.mrb[128].mxu0 }
 0xe3a   : > { %v3650_v7 = vadd.f32 %v9772_v9, %v3488_v23  ;;  %v3585_v34 = vpop.f32.mrb[129].mxu0  ;;  %v3497_v9 = vadd.f32 %v12030_v43, %v12012_v44  ;;  %v3498_v44 = vadd.f32 %v12030_v43, %v12015_v38 }
 0xe3b   : > { %v3648_v22 = vadd.f32 %v3585_v34, %v3486_v26  ;;  %v9773_v55 = vpop.f32.mrb[130].mxu0  ;;  %v3495_v34 = vadd.f32 %v12030_v43, %v12007_v32  ;;  %v3500_v32 = vadd.f32 %v12030_v43, %v12020_v2 }
 0xe3c   : > { %v3651_v16 = vadd.f32 %v9773_v55, %v3489_v20  ;;  %v3588_v45 = vpop.f32.mrb[131].mxu0  ;;  %v3666_v1 = vmax.f32 %v3650_v7, 0.0 }
 0xe3d   : > { %v3649_v37 = vadd.f32 %v3588_v45, %v3487_v61  ;;  %v3664_v42 = vmax.f32 %v3648_v22, 0.0 }
 0xe3e   : > { %v3667_v62 = vmax.f32 %v3651_v16, 0.0 }
 0xe3f   : > { %v3665_v11 = vmax.f32 %v3649_v37, 0.0 }
 0xe40   : > { %v3681_v13 = vpack.c.bf16 %v3667_v62, %v3666_v1 }
 0xe41   : > { %v3680_v10 = vpack.c.bf16 %v3665_v11, %v3664_v42 }
 0xe43   : > { %3802 = vmatmul.mubr.bf16.vlgmr.msra.gmra.mrb[192].mxu1 %v3680_v10 }
 0xe44   : > { %3811 = vmatprep.mubr.bf16.mxu1 %v10637_v0 }
 0xe49   : > { %v9776_v60 = vpop.f32.mrb[132].mxu0 }
 0xe4a   : > { %v3654_v53 = vadd.f32 %v9776_v60, %v3492_v33  ;;  %v3601_v25 = vpop.f32.mrb[133].mxu0 }
 0xe4b   : > { %v3652_v59 = vadd.f32 %v3601_v25, %v3490_v18  ;;  %v9777_v63 = vpop.f32.mrb[134].mxu0  ;;  %3812 = vmatmul.mubr.bf16.gmra.mrb[196].mxu1 %v3681_v13  ;;  %v3501_v13 = vadd.f32 %v12030_v43, %v12022_v4  ;;  %v3499_v18 = vadd.f32 %v12030_v43, %v12017_v35 }
 0xe4c   : > { %v3655_v57 = vadd.f32 %v9777_v63, %v3493_v51  ;;  %v3604_v15 = vpop.f32.mrb[135].mxu0  ;;  %3821 = vmatprep.mubr.bf16.mxu1 %v10637_v0  ;;  %v3670_v21 = vmax.f32 %v3654_v53, 0.0 }
 0xe4d   : > { %v3653_v36 = vadd.f32 %v3604_v15, %v3491_v31  ;;  %v3668_v56 = vmax.f32 %v3652_v59, 0.0 }
 0xe4e   : > { %v3671_v41 = vmax.f32 %v3655_v57, 0.0 }
 0xe4f   : > { %v3669_v47 = vmax.f32 %v3653_v36, 0.0 }
 0xe50   : > { %v3683_v27 = vpack.c.bf16 %v3671_v41, %v3670_v21 }
 0xe51   : > { %v3682_v23 = vpack.c.bf16 %v3669_v47, %v3668_v56 }
 0xe53   : > { %3822 = vmatmul.mubr.bf16.gmra.mrb[200].mxu1 %v3682_v23  ;;  %v10176_v23 = vld [vmem:[#allocation5 + $0x280] sm:$0xff]  }
 0xe54   : > { %3831 = vmatprep.mubr.bf16.mxu1 %v10637_v0 }
 0xe59   : > { %v9780_v26 = vpop.f32.mrb[136].mxu0 }
 0xe5a   : > { %v3658_v20 = vadd.f32 %v9780_v26, %v3496_v5  ;;  %v3617_v7 = vpop.f32.mrb[137].mxu0 }
 0xe5b   : > { %v3656_v61 = vadd.f32 %v3617_v7, %v3494_v19  ;;  %v9781_v22 = vpop.f32.mrb[138].mxu0  ;;  %3832 = vmatmul.mubr.bf16.gmra.mrb[204].mxu1 %v3683_v27  ;;  %v10177_v7 = vld [vmem:[#allocation5 + $0x288] sm:$0xff]  }
 0xe5c   : > { %v3659_v55 = vadd.f32 %v9781_v22, %v3497_v9  ;;  %v3620_v16 = vpop.f32.mrb[139].mxu0  ;;  %3841 = vmatprep.mubr.bf16.mxu1 %v10637_v0  ;;  %v3674_v45 = vmax.f32 %v3658_v20, 0.0 }
 0xe5d   : > { %v3657_v14 = vadd.f32 %v3620_v16, %v3495_v34  ;;  %v3672_v24 = vmax.f32 %v3656_v61, 0.0 }
 0xe5e   : > { %v3675_v37 = vmax.f32 %v3659_v55, 0.0 }
 0xe5f   : > { %v3673_v1 = vmax.f32 %v3657_v14, 0.0  ;;  %v10178_v14 = vld [vmem:[#allocation5 + $0x290] sm:$0xff]  }
 0xe60   : > { %v3685_v62 = vpack.c.bf16 %v3675_v37, %v3674_v45 }
 0xe61   : > { %v3684_v42 = vpack.c.bf16 %v3673_v1, %v3672_v24 }
 0xe63   : > { %3842 = vmatmul.mubr.bf16.gmra.mrb[208].mxu1 %v3684_v42  ;;  %v10179_v42 = vld [vmem:[#allocation5 + $0x298] sm:$0xff]  }
 0xe64   : > { %3851 = vmatprep.mubr.bf16.mxu1 %v10637_v0 }
 0xe69   : > { %v9784_v11 = vpop.f32.mrb[140].mxu0 }
 0xe6a   : > { %v3662_v10 = vadd.f32 %v9784_v11, %v3500_v32  ;;  %v3633_v33 = vpop.f32.mrb[141].mxu0 }
 0xe6b   : > { %v3660_v60 = vadd.f32 %v3633_v33, %v3498_v44  ;;  %v9785_v51 = vpop.f32.mrb[142].mxu0  ;;  %3852 = vmatmul.mubr.bf16.gmra.mrb[212].mxu1 %v3685_v62  ;;  %v10180_v33 = vld [vmem:[#allocation5 + $0x2a0] sm:$0xff]  }
 0xe6c   : > { %v3663_v53 = vadd.f32 %v9785_v51, %v3501_v13  ;;  %v3636_v25 = vpop.f32.mrb[143].mxu0  ;;  %3861 = vmatprep.mubr.bf16.mxu1 %v10637_v0  ;;  %v3678_v31 = vmax.f32 %v3662_v10, 0.0 }
 0xe6d   : > { %v3661_v2 = vadd.f32 %v3636_v25, %v3499_v18  ;;  %v3676_v38 = vmax.f32 %v3660_v60, 0.0 }
 0xe6e   : > { %v3679_v59 = vmax.f32 %v3663_v53, 0.0 }
 0xe6f   : > { %v3677_v63 = vmax.f32 %v3661_v2, 0.0  ;;  %v10181_v2 = vld [vmem:[#allocation5 + $0x2a8] sm:$0xff]  }
 0xe70   : > { %v3687_v57 = vpack.c.bf16 %v3679_v59, %v3678_v31 }
 0xe71   : > { %v3686_v15 = vpack.c.bf16 %v3677_v63, %v3676_v38 }
 0xe73   : > { %3862 = vmatmul.mubr.bf16.gmra.mrb[216].mxu1 %v3686_v15  ;;  %v10182_v15 = vld [vmem:[#allocation5 + $0x2b0] sm:$0xff]  }
 0xe74   : > { %3871 = vmatprep.mubr.bf16.mxu1 %v10637_v0 }
 0xe7b   : > { %3872 = vmatmul.mubr.bf16.gmra.mrb[220].mxu1 %v3687_v57 }
 0xf16   : > { %v12068_v4 = vpop.f32.mrb[192].mxu1 }
 0xf17   : > { %v3805_v35 = vpop.f32.mrb[193].mxu1 }
 0xf18   : > { %v12070_v43 = vpop.f32.mrb[194].mxu1 }
 0xf19   : > { %v3809_v36 = vpop.f32.mrb[195].mxu1 }
 0xf1a   : > { %v3905_v21 = vpack.c.bf16 %v3809_v36, %v3805_v35  ;;  %v10183_v36 = vld [vmem:[#allocation5 + $0x2b8] sm:$0xff]  }
 0xf1c   : > { %9790 = vmatprep.mubr.msk.bf16.mxu0 %vm565_vm0, %v3905_v21  ;;  %v10184_v21 = vld [vmem:[#allocation5 + $0x2c0] sm:$0xff]  }
 0xf1e   : > { %v12073_v41 = vpop.f32.mrb[196].mxu1 }
 0xf1f   : > { %v3815_v56 = vpop.f32.mrb[197].mxu1 }
 0xf20   : > { %v12075_v47 = vpop.f32.mrb[198].mxu1 }
 0xf21   : > { %v3819_v27 = vpop.f32.mrb[199].mxu1 }
 0xf22   : > { %v3906_v5 = vpack.c.bf16 %v3819_v27, %v3815_v56  ;;  %v10185_v56 = vld [vmem:[#allocation5 + $0x2c8] sm:$0xff]   ;;  %v10186_v27 = vld [vmem:[#allocation7 + $0x80] sm:$0xff]  }
 0xf23   : > { %9806 = vmatprep.subr.bf16.mxu1 %v10186_v27 }
 0xf24   : > { %9791 = vmatmul.mubr.msk.bf16.vlgmr.msra.gmra.mrb[144].mxu0 %vm565_vm0, %v3906_v5  ;;  %9807 = vmatpush3.bf16.msra.mxu1 %v10186_v27  ;;  %v9226_v5 = vld [vmem:[%s13917_s2 + $0x7] sm:$0x1] }
 0xf25   : > { %4173 = vmatpush1.bf16.xpose.msra.mxu0 %v10176_v23  ;;  %v10187_v23 = vld [vmem:[#allocation7 + $0x88] sm:$0xff]  }
 0xf26   : > { %v12078_v19 = vpop.f32.mrb[200].mxu1  ;;  %4174 = vmatprep.subr.bf16.mxu0 %v10637_v0  ;;  %9808 = vmatprep.subr.bf16.mxu1 %v10187_v23 }
 0xf27   : > { %v3825_v26 = vpop.f32.mrb[201].mxu1 }
 0xf28   : > { %v12081_v9 = vpop.f32.mrb[202].mxu1  ;;  %9809 = vmatpush3.bf16.msra.mxu1 %v10187_v23 }
 0xf29   : > { %v3829_v20 = vpop.f32.mrb[203].mxu1 }
 0xf2a   : > { %v3907_v34 = vpack.c.bf16 %v3829_v20, %v3825_v26  ;;  %v3884_v26 = vunpack.c.l.bf16 %v9226_v5 }
 0xf2c   : > { %9794 = vmatprep.mubr.msk.bf16.mxu0 %vm565_vm0, %v3907_v34  ;;  %v12123_v20 = vrot.slane %v3884_v26, %v10953_v30 }
 0xf2d   : > { %4175 = vmatpush1.bf16.xpose.msra.mxu0 %v10177_v7 }
 0xf2e   : > { %v12084_v61 = vpop.f32.mrb[204].mxu1  ;;  %4176 = vmatprep.subr.bf16.mxu0 %v10637_v0  ;;  %v3891_v7 = vadd.f32 %v12123_v20, %v12073_v41  ;;  %v3889_v34 = vadd.f32 %v12123_v20, %v12068_v4 }
 0xf2f   : > { %v3835_v22 = vpop.f32.mrb[205].mxu1 }
 0xf30   : > { %v12087_v55 = vpop.f32.mrb[206].mxu1 }
 0xf31   : > { %v3839_v16 = vpop.f32.mrb[207].mxu1 }
 0xf32   : > { %v3908_v45 = vpack.c.bf16 %v3839_v16, %v3835_v22  ;;  %v3892_v16 = vadd.f32 %v12123_v20, %v12075_v47  ;;  %v3895_v47 = vadd.f32 %v12123_v20, %v12084_v61 }
 0xf34   : > { %9795 = vmatmul.mubr.msk.bf16.gmra.mrb[148].mxu0 %vm565_vm0, %v3908_v45 }
 0xf35   : > { %4177 = vmatpush1.bf16.xpose.msra.mxu0 %v10178_v14 }
 0xf36   : > { %v12090_v37 = vpop.f32.mrb[208].mxu1  ;;  %4178 = vmatprep.subr.bf16.mxu0 %v10637_v0 }
 0xf37   : > { %v3845_v24 = vpop.f32.mrb[209].mxu1 }
 0xf38   : > { %v12093_v1 = vpop.f32.mrb[210].mxu1 }
 0xf39   : > { %v3849_v62 = vpop.f32.mrb[211].mxu1 }
 0xf3a   : > { %v3909_v32 = vpack.c.bf16 %v3849_v62, %v3845_v24  ;;  %v3890_v24 = vadd.f32 %v12123_v20, %v12070_v43  ;;  %v3893_v43 = vadd.f32 %v12123_v20, %v12078_v19 }
 0xf3c   : > { %9798 = vmatprep.mubr.msk.bf16.mxu0 %vm565_vm0, %v3909_v32 }
 0xf3d   : > { %4179 = vmatpush1.bf16.xpose.msra.mxu0 %v10179_v42 }
 0xf3e   : > { %v12096_v44 = vpop.f32.mrb[212].mxu1  ;;  %4180 = vmatprep.subr.bf16.mxu0 %v10637_v0 }
 0xf3f   : > { %v3855_v11 = vpop.f32.mrb[213].mxu1 }
 0xf40   : > { %v12099_v13 = vpop.f32.mrb[214].mxu1 }
 0xf41   : > { %v3859_v10 = vpop.f32.mrb[215].mxu1 }
 0xf42   : > { %v3910_v18 = vpack.c.bf16 %v3859_v10, %v3855_v11 }
 0xf44   : > { %9799 = vmatmul.mubr.msk.bf16.gmra.mrb[152].mxu0 %vm565_vm0, %v3910_v18 }
 0xf45   : > { %4181 = vmatpush1.bf16.xpose.msra.mxu0 %v10180_v33 }
 0xf46   : > { %v12102_v60 = vpop.f32.mrb[216].mxu1  ;;  %4182 = vmatprep.subr.bf16.mxu0 %v10637_v0 }
 0xf47   : > { %v3865_v51 = vpop.f32.mrb[217].mxu1 }
 0xf48   : > { %v12105_v53 = vpop.f32.mrb[218].mxu1 }
 0xf49   : > { %v3869_v25 = vpop.f32.mrb[219].mxu1 }
 0xf4a   : > { %v3911_v31 = vpack.c.bf16 %v3869_v25, %v3865_v51 }
 0xf4c   : > { %9802 = vmatprep.mubr.msk.bf16.mxu0 %vm565_vm0, %v3911_v31  ;;  %v3896_v31 = vadd.f32 %v12123_v20, %v12087_v55  ;;  %v3897_v55 = vadd.f32 %v12123_v20, %v12090_v37 }
 0xf4d   : > { %4183 = vmatpush1.bf16.xpose.msra.mxu0 %v10181_v2 }
 0xf4e   : > { %v12108_v59 = vpop.f32.mrb[220].mxu1  ;;  %4184 = vmatprep.subr.bf16.mxu0 %v10637_v0 }
 0xf4f   : > { %v3875_v38 = vpop.f32.mrb[221].mxu1 }
 0xf50   : > { %v12111_v63 = vpop.f32.mrb[222].mxu1 }
 0xf51   : > { %v3879_v57 = vpop.f32.mrb[223].mxu1 }
 0xf52   : > { %v3912_v35 = vpack.c.bf16 %v3879_v57, %v3875_v38 }
 0xf54   : > { %9803 = vmatmul.mubr.msk.bf16.gmra.mrb[156].mxu0 %vm565_vm0, %v3912_v35 }
 0xf55   : > { %4185 = vmatpush1.bf16.xpose.msra.mxu0 %v10182_v15  ;;  %4204 = vmatprep.mubr.bf16.mxu0 %v10637_v0  ;;  %v3894_v15 = vadd.f32 %v12123_v20, %v12081_v9  ;;  %v3899_v9 = vadd.f32 %v12123_v20, %v12096_v44 }
 0xf56   : > { %4186 = vmatprep.subr.bf16.mxu0 %v10637_v0 }
 0xf5d   : > { %4187 = vmatpush1.bf16.xpose.msra.mxu0 %v10183_v36 }
 0xf5e   : > { %4188 = vmatprep.subr.bf16.mxu0 %v10637_v0 }
 0xf65   : > { %4189 = vmatpush1.bf16.xpose.msra.mxu0 %v10184_v21 }
 0xf66   : > { %4190 = vmatprep.subr.bf16.mxu0 %v10637_v0 }
 0xf6d   : > { %4191 = vmatpush1.bf16.xpose.msra.mxu0 %v10185_v56 }
 0xf6e   : > { %4847 = vmatprep.subr.bf16.mxu0 %v10637_v0 }
 0xff7   : > { %v9792_v22 = vpop.f32.mrb[144].mxu0 }
 0xff8   : > { %v4053_v14 = vadd.f32 %v9792_v22, %v3891_v7  ;;  %v3988_v45 = vpop.f32.mrb[145].mxu0  ;;  %v3900_v22 = vadd.f32 %v12123_v20, %v12099_v13  ;;  %v3901_v13 = vadd.f32 %v12123_v20, %v12102_v60 }
 0xff9   : > { %v4051_v62 = vadd.f32 %v3988_v45, %v3889_v34  ;;  %v9793_v42 = vpop.f32.mrb[146].mxu0  ;;  %v3898_v45 = vadd.f32 %v12123_v20, %v12093_v1  ;;  %v3903_v1 = vadd.f32 %v12123_v20, %v12108_v59 }
 0xffa   : > { %v4054_v32 = vadd.f32 %v9793_v42, %v3892_v16  ;;  %v3991_v11 = vpop.f32.mrb[147].mxu0  ;;  %v4069_v33 = vmax.f32 %v4053_v14, 0.0 }
 0xffb   : > { %v4052_v10 = vadd.f32 %v3991_v11, %v3890_v24  ;;  %v4067_v41 = vmax.f32 %v4051_v62, 0.0 }
 0xffc   : > { %v4070_v18 = vmax.f32 %v4054_v32, 0.0 }
 0xffd   : > { %v4068_v51 = vmax.f32 %v4052_v10, 0.0 }
 0xffe   : > { %v4084_v25 = vpack.c.bf16 %v4070_v18, %v4069_v33 }
 0xfff   : > { %v4083_v4 = vpack.c.bf16 %v4068_v51, %v4067_v41 }
0x1001   : > { %4205 = vmatmul.mubr.bf16.vlgmr.msra.gmra.mrb[160].mxu0 %v4083_v4 }
0x1002   : > { %4214 = vmatprep.mubr.bf16.mxu0 %v10637_v0 }
0x1007   : > { %v9796_v2 = vpop.f32.mrb[148].mxu0 }
0x1008   : > { %v4057_v38 = vadd.f32 %v9796_v2, %v3895_v47  ;;  %v4004_v57 = vpop.f32.mrb[149].mxu0 }
0x1009   : > { %v4055_v35 = vadd.f32 %v4004_v57, %v3893_v43  ;;  %v9797_v36 = vpop.f32.mrb[150].mxu0  ;;  %4215 = vmatmul.mubr.bf16.gmra.mrb[164].mxu0 %v4084_v25  ;;  %v3904_v25 = vadd.f32 %v12123_v20, %v12111_v63  ;;  %v3902_v43 = vadd.f32 %v12123_v20, %v12105_v53 }
0x100a   : > { %v4058_v21 = vadd.f32 %v9797_v36, %v3896_v31  ;;  %v4007_v56 = vpop.f32.mrb[151].mxu0  ;;  %4224 = vmatprep.mubr.bf16.mxu0 %v10637_v0  ;;  %v4073_v27 = vmax.f32 %v4057_v38, 0.0 }
0x100b   : > { %v4056_v61 = vadd.f32 %v4007_v56, %v3894_v15  ;;  %v4071_v19 = vmax.f32 %v4055_v35, 0.0 }
0x100c   : > { %v4074_v23 = vmax.f32 %v4058_v21, 0.0 }
0x100d   : > { %v4072_v5 = vmax.f32 %v4056_v61, 0.0 }
0x100e   : > { %v4086_v26 = vpack.c.bf16 %v4074_v23, %v4073_v27 }
0x100f   : > { %v4085_v7 = vpack.c.bf16 %v4072_v5, %v4071_v19 }
0x1011   : > { %4225 = vmatmul.mubr.bf16.gmra.mrb[168].mxu0 %v4085_v7 }
0x1012   : > { %4234 = vmatprep.mubr.bf16.mxu0 %v10637_v0 }
0x1017   : > { %v9800_v34 = vpop.f32.mrb[152].mxu0 }
0x1018   : > { %v4061_v16 = vadd.f32 %v9800_v34, %v3899_v9  ;;  %v4020_v14 = vpop.f32.mrb[153].mxu0 }
0x1019   : > { %v4059_v24 = vadd.f32 %v4020_v14, %v3897_v55  ;;  %v9801_v62 = vpop.f32.mrb[154].mxu0  ;;  %4235 = vmatmul.mubr.bf16.gmra.mrb[172].mxu0 %v4086_v26 }
0x101a   : > { %v4062_v42 = vadd.f32 %v9801_v62, %v3900_v22  ;;  %v4023_v32 = vpop.f32.mrb[155].mxu0  ;;  %4244 = vmatprep.mubr.bf16.mxu0 %v10637_v0  ;;  %v4077_v11 = vmax.f32 %v4061_v16, 0.0 }
0x101b   : > { %v4060_v44 = vadd.f32 %v4023_v32, %v3898_v45  ;;  %v4075_v37 = vmax.f32 %v4059_v24, 0.0 }
0x101c   : > { %v4078_v10 = vmax.f32 %v4062_v42, 0.0 }
0x101d   : > { %v4076_v33 = vmax.f32 %v4060_v44, 0.0 }
0x101e   : > { %v4088_v18 = vpack.c.bf16 %v4078_v10, %v4077_v11 }
0x101f   : > { %v4087_v41 = vpack.c.bf16 %v4076_v33, %v4075_v37 }
0x1021   : > { %4245 = vmatmul.mubr.bf16.gmra.mrb[176].mxu0 %v4087_v41 }
0x1022   : > { %4254 = vmatprep.mubr.bf16.mxu0 %v10637_v0 }
0x1027   : > { %v9804_v51 = vpop.f32.mrb[156].mxu0 }
0x1028   : > { %v4065_v4 = vadd.f32 %v9804_v51, %v3903_v1  ;;  %v4036_v47 = vpop.f32.mrb[157].mxu0 }
0x1029   : > { %v4063_v2 = vadd.f32 %v4036_v47, %v3901_v13  ;;  %v9805_v31 = vpop.f32.mrb[158].mxu0  ;;  %4255 = vmatmul.mubr.bf16.gmra.mrb[180].mxu0 %v4088_v18 }
0x102a   : > { %v4066_v38 = vadd.f32 %v9805_v31, %v3904_v25  ;;  %v4039_v57 = vpop.f32.mrb[159].mxu0  ;;  %4264 = vmatprep.mubr.bf16.mxu0 %v10637_v0  ;;  %v4081_v15 = vmax.f32 %v4065_v4, 0.0 }
0x102b   : > { %v4064_v59 = vadd.f32 %v4039_v57, %v3902_v43  ;;  %v4079_v60 = vmax.f32 %v4063_v2, 0.0 }
0x102c   : > { %v4082_v35 = vmax.f32 %v4066_v38, 0.0 }
0x102d   : > { %v4080_v36 = vmax.f32 %v4064_v59, 0.0 }
0x102e   : > { %v4090_v21 = vpack.c.bf16 %v4082_v35, %v4081_v15  ;;  %v10188_v15 = vld [vmem:[#allocation5 + $0x2d0] sm:$0xff]   ;;  %v10189_v35 = vld [vmem:[#allocation5 + $0x2d8] sm:$0xff]  }
0x102f   : > { %v4089_v56 = vpack.c.bf16 %v4080_v36, %v4079_v60  ;;  %4848 = vmatpush1.bf16.xpose.msra.mxu0 %v10188_v15  ;;  %v10190_v60 = vld [vmem:[#allocation5 + $0x2e0] sm:$0xff]   ;;  %v10191_v36 = vld [vmem:[#allocation5 + $0x2e8] sm:$0xff]  }
0x1030   : > { %4849 = vmatprep.subr.bf16.mxu0 %v10637_v0 }
0x1031   : > { %4265 = vmatmul.mubr.bf16.gmra.mrb[184].mxu0 %v4089_v56  ;;  %v10193_v56 = vld [vmem:[#allocation5 + $0x2f8] sm:$0xff]  }
0x1032   : > { %4274 = vmatprep.mubr.bf16.mxu0 %v10637_v0 }
0x1037   : > { %4850 = vmatpush1.bf16.xpose.msra.mxu0 %v10189_v35 }
0x1038   : > { %4851 = vmatprep.subr.bf16.mxu0 %v10637_v0 }
0x1039   : > { %4275 = vmatmul.mubr.bf16.gmra.mrb[188].mxu0 %v4090_v21  ;;  %v10192_v21 = vld [vmem:[#allocation5 + $0x2f0] sm:$0xff]  }
0x103a   : > { %4879 = vmatprep.mubr.bf16.mxu0 %v10637_v0 }
0x103f   : > { %4852 = vmatpush1.bf16.xpose.msra.mxu0 %v10190_v60  ;;  %v10194_v60 = vld [vmem:[#allocation5 + $0x300] sm:$0xff]  }
0x1040   : > { %4853 = vmatprep.subr.bf16.mxu0 %v10637_v0 }
0x1047   : > { %4854 = vmatpush1.bf16.xpose.msra.mxu0 %v10191_v36 }
0x1048   : > { %4855 = vmatprep.subr.bf16.mxu0 %v10637_v0 }
0x104f   : > { %4856 = vmatpush1.bf16.xpose.msra.mxu0 %v10192_v21 }
0x1050   : > { %4857 = vmatprep.subr.bf16.mxu0 %v10637_v0 }
0x1057   : > { %4858 = vmatpush1.bf16.xpose.msra.mxu0 %v10193_v56 }
0x1058   : > { %4859 = vmatprep.subr.bf16.mxu0 %v10637_v0 }
0x105f   : > { %4860 = vmatpush1.bf16.xpose.msra.mxu0 %v10194_v60 }
0x1060   : > { %4861 = vmatprep.subr.bf16.mxu0 %v10637_v0 }
0x10d4   : > { %v12165_v53 = vpop.f32.mrb[160].mxu0 }
0x10d5   : > { %v4208_v63 = vpop.f32.mrb[161].mxu0 }
0x10d6   : > { %v12167_v20 = vpop.f32.mrb[162].mxu0 }
0x10d7   : > { %v4212_v61 = vpop.f32.mrb[163].mxu0 }
0x10d8   : > { %v4308_v27 = vpack.c.bf16 %v4212_v61, %v4208_v63  ;;  %v9247_v63 = vld [vmem:[%s13917_s2 + $0x8] sm:$0x1] }
0x10d9   : > { %v4287_v61 = vunpack.c.l.bf16 %v9247_v63 }
0x10da   : > { %9810 = vmatprep.mubr.msk.bf16.mxu1 %vm565_vm0, %v4308_v27 }
0x10db   : > { %v12215_v27 = vrot.slane %v4287_v61, %v10953_v30 }
0x10dc   : > { %v12170_v23 = vpop.f32.mrb[164].mxu0 }
0x10dd   : > { %v4218_v19 = vpop.f32.mrb[165].mxu0 }
0x10de   : > { %v12172_v5 = vpop.f32.mrb[166].mxu0 }
0x10df   : > { %v4222_v26 = vpop.f32.mrb[167].mxu0 }
0x10e0   : > { %v4309_v7 = vpack.c.bf16 %v4222_v26, %v4218_v19  ;;  %v4294_v19 = vadd.f32 %v12215_v27, %v12170_v23  ;;  %v4292_v26 = vadd.f32 %v12215_v27, %v12165_v53 }
0x10e2   : > { %9811 = vmatmul.mubr.msk.bf16.vlgmr.msra.gmra.mrb[224].mxu1 %vm565_vm0, %v4309_v7 }
0x10e4   : > { %v12175_v9 = vpop.f32.mrb[168].mxu0 }
0x10e5   : > { %v4228_v55 = vpop.f32.mrb[169].mxu0 }
0x10e6   : > { %v12177_v34 = vpop.f32.mrb[170].mxu0 }
0x10e7   : > { %v4232_v22 = vpop.f32.mrb[171].mxu0 }
0x10e8   : > { %v4310_v16 = vpack.c.bf16 %v4232_v22, %v4228_v55  ;;  %v4295_v55 = vadd.f32 %v12215_v27, %v12172_v5 }
0x10ea   : > { %9814 = vmatprep.mubr.msk.bf16.mxu1 %vm565_vm0, %v4310_v16 }
0x10ec   : > { %v12180_v14 = vpop.f32.mrb[172].mxu0 }
0x10ed   : > { %v4238_v45 = vpop.f32.mrb[173].mxu0 }
0x10ee   : > { %v12182_v24 = vpop.f32.mrb[174].mxu0 }
0x10ef   : > { %v4242_v62 = vpop.f32.mrb[175].mxu0 }
0x10f0   : > { %v4311_v42 = vpack.c.bf16 %v4242_v62, %v4238_v45  ;;  %v4293_v45 = vadd.f32 %v12215_v27, %v12167_v20 }
0x10f2   : > { %9815 = vmatmul.mubr.msk.bf16.gmra.mrb[228].mxu1 %vm565_vm0, %v4311_v42 }
0x10f4   : > { %v12185_v32 = vpop.f32.mrb[176].mxu0 }
0x10f5   : > { %v4248_v44 = vpop.f32.mrb[177].mxu0  ;;  %v4300_v63 = vadd.f32 %v12215_v27, %v12185_v32 }
0x10f6   : > { %v12187_v11 = vpop.f32.mrb[178].mxu0 }
0x10f7   : > { %v4252_v10 = vpop.f32.mrb[179].mxu0 }
0x10f8   : > { %v4312_v37 = vpack.c.bf16 %v4252_v10, %v4248_v44 }
0x10fa   : > { %9818 = vmatprep.mubr.msk.bf16.mxu1 %vm565_vm0, %v4312_v37 }
0x10fc   : > { %v12190_v33 = vpop.f32.mrb[180].mxu0 }
0x10fd   : > { %v4258_v18 = vpop.f32.mrb[181].mxu0  ;;  %v4302_v56 = vadd.f32 %v12215_v27, %v12190_v33  ;;  %v4301_v33 = vadd.f32 %v12215_v27, %v12187_v11 }
0x10fe   : > { %v12192_v41 = vpop.f32.mrb[182].mxu0 }
0x10ff   : > { %v4262_v1 = vpop.f32.mrb[183].mxu0 }
0x1100   : > { %v4313_v13 = vpack.c.bf16 %v4262_v1, %v4258_v18  ;;  %v4296_v1 = vadd.f32 %v12215_v27, %v12175_v9 }
0x1102   : > { %9819 = vmatmul.mubr.msk.bf16.gmra.mrb[232].mxu1 %vm565_vm0, %v4313_v13 }
0x1104   : > { %v12195_v51 = vpop.f32.mrb[184].mxu0 }
0x1105   : > { %v4268_v25 = vpop.f32.mrb[185].mxu0 }
0x1106   : > { %v12197_v4 = vpop.f32.mrb[186].mxu0 }
0x1107   : > { %v4272_v47 = vpop.f32.mrb[187].mxu0 }
0x1108   : > { %v4314_v43 = vpack.c.bf16 %v4272_v47, %v4268_v25 }
0x110a   : > { %9822 = vmatprep.mubr.msk.bf16.mxu1 %vm565_vm0, %v4314_v43  ;;  %v4297_v43 = vadd.f32 %v12215_v27, %v12177_v34 }
0x110c   : > { %v12200_v2 = vpop.f32.mrb[188].mxu0 }
0x110d   : > { %v4278_v31 = vpop.f32.mrb[189].mxu0 }
0x110e   : > { %v12202_v38 = vpop.f32.mrb[190].mxu0 }
0x110f   : > { %v4282_v57 = vpop.f32.mrb[191].mxu0 }
0x1110   : > { %v4315_v59 = vpack.c.bf16 %v4282_v57, %v4278_v31 }
0x1112   : > { %9823 = vmatmul.mubr.msk.bf16.gmra.mrb[236].mxu1 %vm565_vm0, %v4315_v59 }
0x11b5   : > { %v9812_v7 = vpop.f32.mrb[224].mxu1 }
0x11b6   : > { %v4456_v22 = vadd.f32 %v9812_v7, %v4294_v19  ;;  %v4391_v16 = vpop.f32.mrb[225].mxu1 }
0x11b7   : > { %v4454_v62 = vadd.f32 %v4391_v16, %v4292_v26  ;;  %v9813_v42 = vpop.f32.mrb[226].mxu1 }
0x11b8   : > { %v4457_v44 = vadd.f32 %v9813_v42, %v4295_v55  ;;  %v4394_v10 = vpop.f32.mrb[227].mxu1  ;;  %v12238_v5 = vadd.f32 %v4456_v22, %v11870_v8  ;;  %v4299_v8 = vadd.f32 %v12215_v27, %v12182_v24  ;;  %v10196_v42 = vld [vmem:[#allocation5 + $0x310] sm:$0xff]  }
0x11b9   : > { %v12226_v37 = vadd.f32 %v4454_v62, %v11847_v40  ;;  %v4455_v23 = vadd.f32 %v4394_v10, %v4293_v45 }
0x11ba   : > { %v12241_v40 = vadd.f32 %v4457_v44, %v11873_v48  ;;  %v4540_v25 = vmul.f32 %v12238_v5, %v12238_v5 }
0x11bb   : > { %v12229_v18 = vadd.f32 %v4455_v23, %v11850_v49  ;;  %4490 = vadd.xlane.f32.xlu0 %v12226_v37  ;;  %v4538_v53 = vmul.f32 %v12226_v37, %v12226_v37  ;;  %v4298_v49 = vadd.f32 %v12215_v27, %v12180_v14  ;;  %v4306_v23 = vadd.f32 %v12215_v27, %v12200_v2 }
0x11bc   : > { %v4541_v9 = vmul.f32 %v12241_v40, %v12241_v40 }
0x11bd   : > { %4492 = vadd.xlane.f32.xlu1 %v12229_v18  ;;  %v4539_v20 = vmul.f32 %v12229_v18, %v12229_v18 }
0x11bf   : > { %4554 = vadd.xlane.f32.xlu0 %v4538_v53  ;;  %v4304_v53 = vadd.f32 %v12215_v27, %v12195_v51 }
0x11c1   : > { %4556 = vadd.xlane.f32.xlu1 %v4539_v20 }
0x11c3   : > { %4494 = vadd.xlane.f32.xlu0 %v12238_v5 }
0x11c5   : > { %4496 = vadd.xlane.f32.xlu1 %v12241_v40  ;;  %v9816_v13 = vpop.f32.mrb[228].mxu1 }
0x11c6   : > { %v4460_v47 = vadd.f32 %v9816_v13, %v4298_v49  ;;  %v4407_v48 = vpop.f32.mrb[229].mxu1  ;;  %v4307_v49 = vadd.f32 %v12215_v27, %v12202_v38  ;;  %v4305_v13 = vadd.f32 %v12215_v27, %v12197_v4 }
0x11c7   : > { %v4458_v31 = vadd.f32 %v4407_v48, %v4296_v1  ;;  %4558 = vadd.xlane.f32.xlu0 %v4540_v25  ;;  %v9817_v14 = vpop.f32.mrb[230].mxu1 }
0x11c8   : > { %v4461_v57 = vadd.f32 %v9817_v14, %v4299_v8  ;;  %v4410_v59 = vpop.f32.mrb[231].mxu1  ;;  %v12271_v36 = vadd.f32 %v4460_v47, %v11916_v29 }
0x11c9   : > { %v12258_v15 = vadd.f32 %v4458_v31, %v11893_v50  ;;  %v4459_v35 = vadd.f32 %v4410_v59, %v4297_v43  ;;  %4560 = vadd.xlane.f32.xlu1 %v4541_v9  ;;  %v10198_v9 = vld [vmem:[#allocation7 + $0x90] sm:$0xff]  }
0x11ca   : > { %v12274_v21 = vadd.f32 %v4461_v57, %v11919_v58  ;;  %v4544_v29 = vmul.f32 %v12271_v36, %v12271_v36  ;;  %v4303_v58 = vadd.f32 %v12215_v27, %v12192_v41  ;;  %v10199_v57 = vld [vmem:[#allocation7 + $0x98] sm:$0xff]   ;;  %9826 = vmatprep.subr.bf16.mxu1 %v10198_v9 }
0x11cb   : > { %v12261_v24 = vadd.f32 %v4459_v35, %v11896_v3  ;;  %4498 = vadd.xlane.f32.xlu0 %v12258_v15  ;;  %v4542_v34 = vmul.f32 %v12258_v15, %v12258_v15  ;;  %v10195_v3 = vld [vmem:[#allocation5 + $0x308] sm:$0xff]   ;;  %9827 = vmatpush3.bf16.msra.mxu1 %v10198_v9 }
0x11cc   : > { %4862 = vmatpush1.bf16.xpose.msra.mxu0 %v10195_v3  ;;  %v4545_v32 = vmul.f32 %v12274_v21, %v12274_v21  ;;  %9828 = vmatprep.subr.bf16.mxu1 %v10199_v57 }
0x11cd   : > { %4500 = vadd.xlane.f32.xlu1 %v12261_v24  ;;  %v4543_v50 = vmul.f32 %v12261_v24, %v12261_v24  ;;  %4863 = vmatprep.subr.bf16.mxu0 %v10637_v0 }
0x11cf   : > { %4562 = vadd.xlane.f32.xlu0 %v4542_v34  ;;  %9829 = vmatpush3.bf16.msra.mxu1 %v10199_v57  ;;  %v12369_v57 = vld [vmem:[%s13919_s4 + $0x2] ss:$0 sm:$0xff] }
0x11d0   : > { %5250 = vmatprep.subr.bf16.mxu1 %v10637_v0 }
0x11d1   : > { %4564 = vadd.xlane.f32.xlu1 %v4543_v50 }
0x11d3   : > { %4502 = vadd.xlane.f32.xlu0 %v12271_v36 }
0x11d4   : > { %4864 = vmatpush1.bf16.xpose.msra.mxu0 %v10196_v42 }
0x11d5   : > { %4504 = vadd.xlane.f32.xlu1 %v12274_v21  ;;  %v9820_v61 = vpop.f32.mrb[232].mxu1  ;;  %4865 = vmatprep.subr.bf16.mxu0 %v10637_v0 }
0x11d6   : > { %v4464_v19 = vadd.f32 %v9820_v61, %v4302_v56  ;;  %v4423_v26 = vpop.f32.mrb[233].mxu1 }
0x11d7   : > { %v4462_v7 = vadd.f32 %v4423_v26, %v4300_v63  ;;  %4566 = vadd.xlane.f32.xlu0 %v4544_v29  ;;  %v9821_v55 = vpop.f32.mrb[234].mxu1 }
0x11d8   : > { %v4465_v22 = vadd.f32 %v9821_v55, %v4303_v58  ;;  %v4426_v16 = vpop.f32.mrb[235].mxu1  ;;  %v12305_v44 = vadd.f32 %v4464_v19, %v11948_v46 }
0x11d9   : > { %v12292_v45 = vadd.f32 %v4462_v7, %v11933_v17  ;;  %v4463_v62 = vadd.f32 %v4426_v16, %v4301_v33  ;;  %4568 = vadd.xlane.f32.xlu1 %v4545_v32 }
0x11da   : > { %v12308_v10 = vadd.f32 %v4465_v22, %v11951_v28  ;;  %v4548_v46 = vmul.f32 %v12305_v44, %v12305_v44 }
0x11db   : > { %v12295_v41 = vadd.f32 %v4463_v62, %v11936_v54  ;;  %4506 = vadd.xlane.f32.xlu0 %v12292_v45  ;;  %v4546_v11 = vmul.f32 %v12292_v45, %v12292_v45  ;;  %v10197_v54 = vld [vmem:[#allocation5 + $0x318] sm:$0xff]  }
0x11dc   : > { %4866 = vmatpush1.bf16.xpose.msra.mxu0 %v10197_v54  ;;  %v4549_v51 = vmul.f32 %v12308_v10, %v12308_v10 }
0x11dd   : > { %4508 = vadd.xlane.f32.xlu1 %v12295_v41  ;;  %v4547_v17 = vmul.f32 %v12295_v41, %v12295_v41 }
0x11df   : > { %4570 = vadd.xlane.f32.xlu0 %v4546_v11 }
0x11e1   : > { %4572 = vadd.xlane.f32.xlu1 %v4547_v17 }
0x11e3   : > { %4510 = vadd.xlane.f32.xlu0 %v12305_v44 }
0x11e5   : > { %4512 = vadd.xlane.f32.xlu1 %v12308_v10  ;;  %v9824_v20 = vpop.f32.mrb[236].mxu1 }
0x11e6   : > { %v4468_v28 = vadd.f32 %v9824_v20, %v4306_v23  ;;  %v4439_v1 = vpop.f32.mrb[237].mxu1 }
0x11e7   : > { %v4466_v25 = vadd.f32 %v4439_v1, %v4304_v53  ;;  %4574 = vadd.xlane.f32.xlu0 %v4548_v46  ;;  %v9825_v2 = vpop.f32.mrb[238].mxu1 }
0x11e8   : > { %v4469_v8 = vadd.f32 %v9825_v2, %v4307_v49  ;;  %v4442_v47 = vpop.f32.mrb[239].mxu1  ;;  %v12337_v31 = vadd.f32 %v4468_v28, %v11974_v52 }
0x11e9   : > { %v12325_v48 = vadd.f32 %v4466_v25, %v11962_v12  ;;  %v4467_v43 = vadd.f32 %v4442_v47, %v4305_v13  ;;  %4576 = vadd.xlane.f32.xlu1 %v4549_v51 }
0x11ea   : > { %v12340_v12 = vadd.f32 %v4469_v8, %v11977_v39 }
0x11eb   : > { %v12328_v38 = vadd.f32 %v4467_v43, %v11965_v6  ;;  %4514 = vadd.xlane.f32.xlu0 %v12325_v48  ;;  %v4550_v4 = vmul.f32 %v12325_v48, %v12325_v48  ;;  %v4552_v6 = vmul.f32 %v12337_v31, %v12337_v31 }
0x11ec   : > { %v4553_v14 = vmul.f32 %v12340_v12, %v12340_v12 }
0x11ed   : > { %4516 = vadd.xlane.f32.xlu1 %v12328_v38  ;;  %v4551_v27 = vmul.f32 %v12328_v38, %v12328_v38 }
0x11ef   : > { %4578 = vadd.xlane.f32.xlu0 %v4550_v4 }
0x11f1   : > { %4580 = vadd.xlane.f32.xlu1 %v4551_v27 }
0x11f3   : > { %4518 = vadd.xlane.f32.xlu0 %v12337_v31 }
0x11f5   : > { %4520 = vadd.xlane.f32.xlu1 %v12340_v12 }
0x11f7   : > { %4582 = vadd.xlane.f32.xlu0 %v4552_v6 }
0x11f9   : > { %4584 = vadd.xlane.f32.xlu1 %v4553_v14 }
0x1248   : > { %v4491_v52 = vpop.xlane.xlu0 %4490 }
0x1249   : > { %v4522_v39 = vmul.f32 0.0078125, %v4491_v52 }
0x124a   : > { %v4493_v59 = vpop.xlane.xlu1 %4492 }
0x124b   : > { %v4523_v35 = vmul.f32 0.0078125, %v4493_v59  ;;  %v4602_v34 = vmul.f32 %v4522_v39, %v4522_v39  ;;  %v4650_v43 = vsub.f32 %v12226_v37, %v4522_v39 }
0x124c   : > { %v4555_v60 = vpop.xlane.xlu0 %4554 }
0x124d   : > { %v4586_v50 = vmul.f32 0.0078125, %v4555_v60  ;;  %v4603_v56 = vmul.f32 %v4523_v35, %v4523_v35  ;;  %v4651_v52 = vsub.f32 %v12229_v18, %v4523_v35 }
0x124e   : > { %v4557_v3 = vpop.xlane.xlu1 %4556 }
0x124f   : > { %v4618_v63 = vsub.f32 %v4586_v50, %v4602_v34  ;;  %v4587_v61 = vmul.f32 0.0078125, %v4557_v3 }
0x1250   : > { %v4495_v29 = vpop.xlane.xlu0 %4494 }
0x1251   : > { %v4634_v58 = vmax.f32 %v4618_v63, 0.0  ;;  %v4619_v19 = vsub.f32 %v4587_v61, %v4603_v56  ;;  %v12349_v26 = vmul.f32 0.0078125, %v4495_v29 }
0x1252   : > { %v4497_v33 = vpop.xlane.xlu1 %4496 }
0x1253   : > { %v4666_v7 = vadd.f32 1e-05, %v4634_v58  ;;  %v4635_v55 = vmax.f32 %v4619_v19, 0.0  ;;  %v12351_v32 = vmul.f32 0.0078125, %v4497_v33  ;;  %v4604_v62 = vmul.f32 %v12349_v26, %v12349_v26  ;;  %v12378_v58 = vld [vmem:[%s13920_s5 + $0x2] ss:$0 sm:$0xff] }
0x1254   : > { %v4559_v22 = vpop.xlane.xlu0 %4558 }
0x1255   : > { %10360 = vrsqrt.f32 %v4666_v7  ;;  %v4667_v16 = vadd.f32 1e-05, %v4635_v55  ;;  %v4588_v42 = vmul.f32 0.0078125, %v4559_v22  ;;  %v4605_v17 = vmul.f32 %v12351_v32, %v12351_v32 }
0x1256   : > { %v4561_v11 = vpop.xlane.xlu1 %4560  ;;  %v4652_v22 = vsub.f32 %v12238_v5, %v12349_v26 }
0x1257   : > { %10362 = vrsqrt.f32 %v4667_v16  ;;  %v4620_v54 = vsub.f32 %v4588_v42, %v4604_v62  ;;  %v4589_v23 = vmul.f32 0.0078125, %v4561_v11 }
0x1258   : > { %v4499_v53 = vpop.xlane.xlu0 %4498 }
0x1259   : > { %v4636_v20 = vmax.f32 %v4620_v54, 0.0  ;;  %v4621_v46 = vsub.f32 %v4589_v23, %v4605_v17  ;;  %v12357_v49 = vmul.f32 0.0078125, %v4499_v53  ;;  %v4653_v53 = vsub.f32 %v12241_v40, %v12351_v32 }
0x125a   : > { %v4501_v28 = vpop.xlane.xlu1 %4500 }
0x125b   : > { %v4668_v1 = vadd.f32 1e-05, %v4636_v20  ;;  %v4637_v13 = vmax.f32 %v4621_v46, 0.0  ;;  %v12359_v25 = vmul.f32 0.0078125, %v4501_v28  ;;  %v4606_v8 = vmul.f32 %v12357_v49, %v12357_v49 }
0x125c   : > { %v4563_v2 = vpop.xlane.xlu0 %4562 }
0x125d   : > { %10364 = vrsqrt.f32 %v4668_v1  ;;  %v4669_v51 = vadd.f32 1e-05, %v4637_v13  ;;  %v4590_v47 = vmul.f32 0.0078125, %v4563_v2  ;;  %v4607_v6 = vmul.f32 %v12359_v25, %v12359_v25 }
0x125e   : > { %v4565_v4 = vpop.xlane.xlu1 %4564 }
0x125f   : > { %v10361_v27 = vpop.eup %10360  ;;  %10366 = vrsqrt.f32 %v4669_v51  ;;  %v4622_v14 = vsub.f32 %v4590_v47, %v4606_v8  ;;  %v4591_v9 = vmul.f32 0.0078125, %v4565_v4 }
0x1260   : > { %v4698_v59 = vmul.f32 %v10361_v27, %v4650_v43  ;;  %v4503_v60 = vpop.xlane.xlu0 %4502 }
0x1261   : > { %v10363_v34 = vpop.eup %10362  ;;  %v4638_v50 = vmax.f32 %v4622_v14, 0.0  ;;  %v4623_v37 = vsub.f32 %v4591_v9, %v4607_v6  ;;  %v12372_v39 = vmul.f32 0.0078125, %v4503_v60  ;;  %v4654_v9 = vsub.f32 %v12258_v15, %v12357_v49 }
0x1262   : > { %v4699_v3 = vmul.f32 %v10363_v34, %v4651_v52  ;;  %v4505_v56 = vpop.xlane.xlu1 %4504  ;;  %v4720_v63 = vmul.f32 %v12369_v57, %v4698_v59 }
0x1263   : > { %v4670_v61 = vadd.f32 1e-05, %v4638_v50  ;;  %v4639_v29 = vmax.f32 %v4623_v37, 0.0  ;;  %v12380_v19 = vmul.f32 0.0078125, %v4505_v56  ;;  %v4608_v7 = vmul.f32 %v12372_v39, %v12372_v39 }
0x1264   : > { %v4567_v18 = vpop.xlane.xlu0 %4566  ;;  %v4721_v35 = vmul.f32 %v12369_v57, %v4699_v3  ;;  %v12388_v62 = vadd.f32 %v12378_v58, %v4720_v63  ;;  %v4655_v56 = vsub.f32 %v12261_v24, %v12359_v25 }
0x1265   : > { %10368 = vrsqrt.f32 %v4670_v61  ;;  %v4671_v33 = vadd.f32 1e-05, %v4639_v29  ;;  %v4592_v55 = vmul.f32 0.0078125, %v4567_v18  ;;  %v4609_v17 = vmul.f32 %v12380_v19, %v12380_v19 }
0x1266   : > { %v4569_v16 = vpop.xlane.xlu1 %4568  ;;  %v12391_v42 = vadd.f32 %v12378_v58, %v4721_v35 }
0x1267   : > { %v10365_v11 = vpop.eup %10364  ;;  %10370 = vrsqrt.f32 %v4671_v33  ;;  %v4624_v54 = vsub.f32 %v4592_v55, %v4608_v7  ;;  %v4593_v23 = vmul.f32 0.0078125, %v4569_v16 }
0x1268   : > { %v4507_v20 = vpop.xlane.xlu0 %4506  ;;  %v4758_v5 = vpack.c.bf16 %v12391_v42, %v12388_v62  ;;  %v4700_v26 = vmul.f32 %v10365_v11, %v4652_v22 }
0x1269   : > { %v10367_v46 = vpop.eup %10366  ;;  %v4640_v28 = vmax.f32 %v4624_v54, 0.0  ;;  %v4625_v1 = vsub.f32 %v4593_v23, %v4609_v17  ;;  %v12399_v13 = vmul.f32 0.0078125, %v4507_v20 }
0x126a   : > { %v4509_v2 = vpop.xlane.xlu1 %4508  ;;  %4880 = vmatmul.mubr.bf16.vlgmr.msra.gmra.mrb[192].mxu0 %v4758_v5  ;;  %v4701_v51 = vmul.f32 %v10367_v46, %v4653_v53  ;;  %v4722_v8 = vmul.f32 %v12369_v57, %v4700_v26  ;;  %v4656_v53 = vsub.f32 %v12271_v36, %v12372_v39 }
0x126b   : > { %v4672_v47 = vadd.f32 1e-05, %v4640_v28  ;;  %v4641_v43 = vmax.f32 %v4625_v1, 0.0  ;;  %4889 = vmatprep.mubr.bf16.mxu0 %v10637_v0  ;;  %v12403_v40 = vmul.f32 0.0078125, %v4509_v2  ;;  %v4610_v6 = vmul.f32 %v12399_v13, %v12399_v13 }
0x126c   : > { %v4571_v32 = vpop.xlane.xlu0 %4570  ;;  %v4723_v4 = vmul.f32 %v12369_v57, %v4701_v51  ;;  %v12411_v59 = vadd.f32 %v12378_v58, %v4722_v8  ;;  %v4657_v51 = vsub.f32 %v12274_v21, %v12380_v19 }
0x126d   : > { %10372 = vrsqrt.f32 %v4672_v47  ;;  %v4673_v27 = vadd.f32 1e-05, %v4641_v43  ;;  %v4594_v14 = vmul.f32 0.0078125, %v4571_v32  ;;  %v4611_v50 = vmul.f32 %v12403_v40, %v12403_v40 }
0x126e   : > { %v4573_v52 = vpop.xlane.xlu1 %4572  ;;  %v12414_v60 = vadd.f32 %v12378_v58, %v4723_v4 }
0x126f   : > { %v10369_v34 = vpop.eup %10368  ;;  %10374 = vrsqrt.f32 %v4673_v27  ;;  %v4626_v37 = vsub.f32 %v4594_v14, %v4610_v6  ;;  %v4595_v3 = vmul.f32 0.0078125, %v4573_v52 }
0x1270   : > { %v4511_v63 = vpop.xlane.xlu0 %4510  ;;  %v4759_v15 = vpack.c.bf16 %v12414_v60, %v12411_v59  ;;  %v4702_v49 = vmul.f32 %v10369_v34, %v4654_v9 }
0x1271   : > { %v10371_v61 = vpop.eup %10370  ;;  %v4642_v29 = vmax.f32 %v4626_v37, 0.0  ;;  %v4627_v18 = vsub.f32 %v4595_v3, %v4611_v50  ;;  %v12422_v35 = vmul.f32 0.0078125, %v4511_v63 }
0x1272   : > { %v4513_v33 = vpop.xlane.xlu1 %4512  ;;  %4890 = vmatmul.mubr.bf16.gmra.mrb[196].mxu0 %v4759_v15  ;;  %v4703_v7 = vmul.f32 %v10371_v61, %v4655_v56  ;;  %v4724_v55 = vmul.f32 %v12369_v57, %v4702_v49  ;;  %v4658_v56 = vsub.f32 %v12292_v45, %v12399_v13 }
0x1273   : > { %v4674_v22 = vadd.f32 1e-05, %v4642_v29  ;;  %v4643_v16 = vmax.f32 %v4627_v18, 0.0  ;;  %4899 = vmatprep.mubr.bf16.mxu0 %v10637_v0  ;;  %v12426_v24 = vmul.f32 0.0078125, %v4513_v33  ;;  %v4612_v54 = vmul.f32 %v12422_v35, %v12422_v35 }
0x1274   : > { %v4575_v25 = vpop.xlane.xlu0 %4574  ;;  %v4725_v11 = vmul.f32 %v12369_v57, %v4703_v7  ;;  %v12434_v5 = vadd.f32 %v12378_v58, %v4724_v55  ;;  %v4659_v7 = vsub.f32 %v12295_v41, %v12403_v40 }
0x1275   : > { %10376 = vrsqrt.f32 %v4674_v22  ;;  %v4675_v17 = vadd.f32 1e-05, %v4643_v16  ;;  %v4596_v23 = vmul.f32 0.0078125, %v4575_v25  ;;  %v4613_v28 = vmul.f32 %v12426_v24, %v12426_v24 }
0x1276   : > { %v4577_v20 = vpop.xlane.xlu1 %4576  ;;  %v12437_v26 = vadd.f32 %v12378_v58, %v4725_v11 }
0x1277   : > { %v10373_v46 = vpop.eup %10372  ;;  %10378 = vrsqrt.f32 %v4675_v17  ;;  %v4628_v1 = vsub.f32 %v4596_v23, %v4612_v54  ;;  %v4597_v2 = vmul.f32 0.0078125, %v4577_v20 }
0x1278   : > { %v4515_v8 = vpop.xlane.xlu0 %4514  ;;  %v4760_v36 = vpack.c.bf16 %v12437_v26, %v12434_v5  ;;  %v4704_v39 = vmul.f32 %v10373_v46, %v4656_v53 }
0x1279   : > { %v10375_v47 = vpop.eup %10374  ;;  %v4644_v43 = vmax.f32 %v4628_v1, 0.0  ;;  %v4629_v32 = vsub.f32 %v4597_v2, %v4613_v28  ;;  %v12445_v4 = vmul.f32 0.0078125, %v4515_v8 }
0x127a   : > { %4900 = vmatmul.mubr.bf16.gmra.mrb[200].mxu0 %v4760_v36  ;;  %v4517_v27 = vpop.xlane.xlu1 %4516  ;;  %v4705_v6 = vmul.f32 %v10375_v47, %v4657_v51  ;;  %v4726_v14 = vmul.f32 %v12369_v57, %v4704_v39  ;;  %v4660_v51 = vsub.f32 %v12305_v44, %v12422_v35 }
0x127b   : > { %v4676_v9 = vadd.f32 1e-05, %v4644_v43  ;;  %v4645_v52 = vmax.f32 %v4629_v32, 0.0  ;;  %4909 = vmatprep.mubr.bf16.mxu0 %v10637_v0  ;;  %v12449_v21 = vmul.f32 0.0078125, %v4517_v27  ;;  %v4614_v37 = vmul.f32 %v12445_v4, %v12445_v4 }
0x127c   : > { %v4579_v19 = vpop.xlane.xlu0 %4578  ;;  %v4727_v34 = vmul.f32 %v12369_v57, %v4705_v6  ;;  %v12457_v15 = vadd.f32 %v12378_v58, %v4726_v14  ;;  %v4661_v6 = vsub.f32 %v12308_v10, %v12426_v24  ;;  %v4662_v10 = vsub.f32 %v12325_v48, %v12445_v4 }
0x127d   : > { %10380 = vrsqrt.f32 %v4676_v9  ;;  %v4677_v50 = vadd.f32 1e-05, %v4645_v52  ;;  %v4598_v3 = vmul.f32 0.0078125, %v4579_v19  ;;  %v4615_v29 = vmul.f32 %v12449_v21, %v12449_v21 }
0x127e   : > { %v4581_v63 = vpop.xlane.xlu1 %4580  ;;  %v12460_v49 = vadd.f32 %v12378_v58, %v4727_v34 }
0x127f   : > { %v10377_v61 = vpop.eup %10376  ;;  %10382 = vrsqrt.f32 %v4677_v50  ;;  %v4630_v18 = vsub.f32 %v4598_v3, %v4614_v37  ;;  %v4599_v33 = vmul.f32 0.0078125, %v4581_v63 }
0x1280   : > { %v4519_v55 = vpop.xlane.xlu0 %4518  ;;  %v4761_v45 = vpack.c.bf16 %v12460_v49, %v12457_v15  ;;  %v4706_v13 = vmul.f32 %v10377_v61, %v4658_v56 }
0x1281   : > { %v10379_v22 = vpop.eup %10378  ;;  %v4646_v16 = vmax.f32 %v4630_v18, 0.0  ;;  %v4631_v25 = vsub.f32 %v4599_v33, %v4615_v29  ;;  %v4536_v11 = vmul.f32 0.0078125, %v4519_v55  ;;  %v4663_v29 = vsub.f32 %v12328_v38, %v12449_v21 }
0x1282   : > { %4910 = vmatmul.mubr.bf16.gmra.mrb[204].mxu0 %v4761_v45  ;;  %v4521_v17 = vpop.xlane.xlu1 %4520  ;;  %v4707_v54 = vmul.f32 %v10379_v22, %v4659_v7  ;;  %v4728_v23 = vmul.f32 %v12369_v57, %v4706_v13 }
0x1283   : > { %v4678_v53 = vadd.f32 1e-05, %v4646_v16  ;;  %v4647_v20 = vmax.f32 %v4631_v25, 0.0  ;;  %4919 = vmatprep.mubr.bf16.mxu0 %v10637_v0  ;;  %v4537_v46 = vmul.f32 0.0078125, %v4521_v17  ;;  %v4616_v1 = vmul.f32 %v4536_v11, %v4536_v11 }
0x1284   : > { %v4583_v41 = vpop.xlane.xlu0 %4582  ;;  %v4729_v40 = vmul.f32 %v12369_v57, %v4707_v54  ;;  %v12474_v36 = vadd.f32 %v12378_v58, %v4728_v23  ;;  %v4664_v45 = vsub.f32 %v12337_v31, %v4536_v11 }
0x1285   : > { %10384 = vrsqrt.f32 %v4678_v53  ;;  %v4679_v28 = vadd.f32 1e-05, %v4647_v20  ;;  %v4600_v2 = vmul.f32 0.0078125, %v4583_v41  ;;  %v4617_v43 = vmul.f32 %v4537_v46, %v4537_v46 }
0x1286   : > { %v4585_v8 = vpop.xlane.xlu1 %4584  ;;  %v12477_v39 = vadd.f32 %v12378_v58, %v4729_v40  ;;  %v4665_v22 = vsub.f32 %v12340_v12, %v4537_v46 }
0x1287   : > { %v10381_v47 = vpop.eup %10380  ;;  %10386 = vrsqrt.f32 %v4679_v28  ;;  %v4632_v32 = vsub.f32 %v4600_v2, %v4616_v1  ;;  %v4601_v27 = vmul.f32 0.0078125, %v4585_v8 }
0x1288   : > { %v4762_v14 = vpack.c.bf16 %v12477_v39, %v12474_v36  ;;  %v4708_v9 = vmul.f32 %v10381_v47, %v4660_v51  ;;  %v10200_v51 = vld [vmem:[#allocation5 + $0x320] sm:$0xff]  }
0x1289   : > { %v10383_v44 = vpop.eup %10382  ;;  %v4648_v35 = vmax.f32 %v4632_v32, 0.0  ;;  %v4633_v52 = vsub.f32 %v4601_v27, %v4617_v43 }
0x128a   : > { %4920 = vmatmul.mubr.bf16.gmra.mrb[208].mxu0 %v4762_v14  ;;  %v4709_v19 = vmul.f32 %v10383_v44, %v4661_v6  ;;  %v4730_v34 = vmul.f32 %v12369_v57, %v4708_v9  ;;  %v10201_v6 = vld [vmem:[#allocation5 + $0x328] sm:$0xff]  }
0x128b   : > { %v4680_v50 = vadd.f32 1e-05, %v4648_v35  ;;  %v4649_v37 = vmax.f32 %v4633_v52, 0.0  ;;  %4929 = vmatprep.mubr.bf16.mxu0 %v10637_v0 }
0x128c   : > { %v4731_v3 = vmul.f32 %v12369_v57, %v4709_v19  ;;  %v12489_v24 = vadd.f32 %v12378_v58, %v4730_v34  ;;  %v10202_v19 = vld [vmem:[#allocation5 + $0x330] sm:$0xff]  }
0x128d   : > { %10388 = vrsqrt.f32 %v4680_v50  ;;  %v4681_v56 = vadd.f32 1e-05, %v4649_v37 }
0x128e   : > { %v12492_v63 = vadd.f32 %v12378_v58, %v4731_v3 }
0x128f   : > { %v10385_v61 = vpop.eup %10384  ;;  %10390 = vrsqrt.f32 %v4681_v56 }
0x1290   : > { %v4763_v18 = vpack.c.bf16 %v12492_v63, %v12489_v24  ;;  %v4710_v33 = vmul.f32 %v10385_v61, %v4662_v10  ;;  %v10203_v10 = vld [vmem:[#allocation5 + $0x338] sm:$0xff]  }
0x1291   : > { %v10387_v7 = vpop.eup %10386 }
0x1292   : > { %4930 = vmatmul.mubr.bf16.gmra.mrb[212].mxu0 %v4763_v18  ;;  %v4711_v55 = vmul.f32 %v10387_v7, %v4663_v29  ;;  %v4732_v48 = vmul.f32 %v12369_v57, %v4710_v33 }
0x1293   : > { %4939 = vmatprep.mubr.bf16.mxu0 %v10637_v0 }
0x1294   : > { %v4733_v4 = vmul.f32 %v12369_v57, %v4711_v55  ;;  %v12503_v13 = vadd.f32 %v12378_v58, %v4732_v48  ;;  %v10204_v55 = vld [vmem:[#allocation5 + $0x340] sm:$0xff]  }
0x1296   : > { %v12506_v38 = vadd.f32 %v12378_v58, %v4733_v4 }
0x1297   : > { %v10389_v21 = vpop.eup %10388 }
0x1298   : > { %v4764_v16 = vpack.c.bf16 %v12506_v38, %v12503_v13  ;;  %v4712_v25 = vmul.f32 %v10389_v21, %v4664_v45 }
0x1299   : > { %v10391_v17 = vpop.eup %10390 }
0x129a   : > { %4940 = vmatmul.mubr.bf16.gmra.mrb[216].mxu0 %v4764_v16  ;;  %v4713_v54 = vmul.f32 %v10391_v17, %v4665_v22  ;;  %v4734_v23 = vmul.f32 %v12369_v57, %v4712_v25  ;;  %v10205_v16 = vld [vmem:[#allocation5 + $0x348] sm:$0xff]  }
0x129b   : > { %4949 = vmatprep.mubr.bf16.mxu0 %v10637_v0 }
0x129c   : > { %v4735_v31 = vmul.f32 %v12369_v57, %v4713_v54  ;;  %v12515_v11 = vadd.f32 %v12378_v58, %v4734_v23 }
0x129e   : > { %v12518_v53 = vadd.f32 %v12378_v58, %v4735_v31 }
0x12a0   : > { %v4765_v12 = vpack.c.bf16 %v12518_v53, %v12515_v11 }
0x12a2   : > { %4950 = vmatmul.mubr.bf16.gmra.mrb[220].mxu0 %v4765_v12  ;;  %v10206_v12 = vld [vmem:[#allocation5 + $0x350] sm:$0xff]  }
0x133d   : > { %v12522_v20 = vpop.f32.mrb[192].mxu0 }
0x133e   : > { %v4883_v46 = vpop.f32.mrb[193].mxu0 }
0x133f   : > { %v12524_v41 = vpop.f32.mrb[194].mxu0 }
0x1340   : > { %v4887_v40 = vpop.f32.mrb[195].mxu0 }
0x1341   : > { %v4983_v28 = vpack.c.bf16 %v4887_v40, %v4883_v46  ;;  %v10207_v40 = vld [vmem:[#allocation5 + $0x358] sm:$0xff]  }
0x1343   : > { %9830 = vmatprep.mubr.msk.bf16.mxu1 %vm565_vm0, %v4983_v28  ;;  %v10208_v28 = vld [vmem:[#allocation5 + $0x360] sm:$0xff]  }
0x1345   : > { %v12527_v57 = vpop.f32.mrb[196].mxu0 }
0x1346   : > { %v4893_v1 = vpop.f32.mrb[197].mxu0 }
0x1347   : > { %v12529_v2 = vpop.f32.mrb[198].mxu0 }
0x1348   : > { %v4897_v58 = vpop.f32.mrb[199].mxu0 }
0x1349   : > { %v4984_v8 = vpack.c.bf16 %v4897_v58, %v4893_v1  ;;  %v10209_v1 = vld [vmem:[#allocation5 + $0x368] sm:$0xff]   ;;  %v10210_v58 = vld [vmem:[#allocation7 + $0xa0] sm:$0xff]  }
0x134a   : > { %9846 = vmatprep.subr.bf16.mxu0 %v10210_v58 }
0x134b   : > { %9831 = vmatmul.mubr.msk.bf16.vlgmr.msra.gmra.mrb[240].mxu1 %vm565_vm0, %v4984_v8  ;;  %9847 = vmatpush3.bf16.msra.mxu0 %v10210_v58  ;;  %v9272_v8 = vld [vmem:[%s13917_s2 + $0x9] sm:$0x1] }
0x134c   : > { %5251 = vmatpush1.bf16.xpose.msra.mxu1 %v10200_v51  ;;  %v10211_v51 = vld [vmem:[#allocation7 + $0xa8] sm:$0xff]  }
0x134d   : > { %v12532_v47 = vpop.f32.mrb[200].mxu0  ;;  %5252 = vmatprep.subr.bf16.mxu1 %v10637_v0  ;;  %9848 = vmatprep.subr.bf16.mxu0 %v10211_v51 }
0x134e   : > { %v4903_v43 = vpop.f32.mrb[201].mxu0 }
0x134f   : > { %v12535_v32 = vpop.f32.mrb[202].mxu0  ;;  %9849 = vmatpush3.bf16.msra.mxu0 %v10211_v51 }
0x1350   : > { %v4907_v27 = vpop.f32.mrb[203].mxu0 }
0x1351   : > { %v4985_v14 = vpack.c.bf16 %v4907_v27, %v4903_v43  ;;  %v4962_v43 = vunpack.c.l.bf16 %v9272_v8 }
0x1353   : > { %9834 = vmatprep.mubr.msk.bf16.mxu1 %vm565_vm0, %v4985_v14  ;;  %v12577_v27 = vrot.slane %v4962_v43, %v10953_v30 }
0x1354   : > { %5253 = vmatpush1.bf16.xpose.msra.mxu1 %v10201_v6 }
0x1355   : > { %v12538_v9 = vpop.f32.mrb[204].mxu0  ;;  %5254 = vmatprep.subr.bf16.mxu1 %v10637_v0  ;;  %v4969_v6 = vadd.f32 %v12577_v27, %v12527_v57  ;;  %v4967_v14 = vadd.f32 %v12577_v27, %v12522_v20 }
0x1356   : > { %v4913_v44 = vpop.f32.mrb[205].mxu0 }
0x1357   : > { %v12541_v35 = vpop.f32.mrb[206].mxu0 }
0x1358   : > { %v4917_v52 = vpop.f32.mrb[207].mxu0 }
0x1359   : > { %v4986_v34 = vpack.c.bf16 %v4917_v52, %v4913_v44  ;;  %v4970_v52 = vadd.f32 %v12577_v27, %v12529_v2  ;;  %v4973_v2 = vadd.f32 %v12577_v27, %v12538_v9 }
0x135b   : > { %9835 = vmatmul.mubr.msk.bf16.gmra.mrb[244].mxu1 %vm565_vm0, %v4986_v34 }
0x135c   : > { %5255 = vmatpush1.bf16.xpose.msra.mxu1 %v10202_v19 }
0x135d   : > { %v12544_v50 = vpop.f32.mrb[208].mxu0  ;;  %5256 = vmatprep.subr.bf16.mxu1 %v10637_v0 }
0x135e   : > { %v4923_v37 = vpop.f32.mrb[209].mxu0 }
0x135f   : > { %v12547_v3 = vpop.f32.mrb[210].mxu0 }
0x1360   : > { %v4927_v56 = vpop.f32.mrb[211].mxu0 }
0x1361   : > { %v4987_v61 = vpack.c.bf16 %v4927_v56, %v4923_v37  ;;  %v4968_v37 = vadd.f32 %v12577_v27, %v12524_v41  ;;  %v4971_v41 = vadd.f32 %v12577_v27, %v12532_v47 }
0x1363   : > { %9838 = vmatprep.mubr.msk.bf16.mxu1 %vm565_vm0, %v4987_v61 }
0x1364   : > { %5257 = vmatpush1.bf16.xpose.msra.mxu1 %v10203_v10 }
0x1365   : > { %v12550_v29 = vpop.f32.mrb[212].mxu0  ;;  %5258 = vmatprep.subr.bf16.mxu1 %v10637_v0 }
0x1366   : > { %v4933_v18 = vpop.f32.mrb[213].mxu0 }
0x1367   : > { %v12553_v33 = vpop.f32.mrb[214].mxu0 }
0x1368   : > { %v4937_v7 = vpop.f32.mrb[215].mxu0 }
0x1369   : > { %v4988_v48 = vpack.c.bf16 %v4937_v7, %v4933_v18 }
0x136b   : > { %9839 = vmatmul.mubr.msk.bf16.gmra.mrb[248].mxu1 %vm565_vm0, %v4988_v48 }
0x136c   : > { %5259 = vmatpush1.bf16.xpose.msra.mxu1 %v10204_v55 }
0x136d   : > { %v12556_v4 = vpop.f32.mrb[216].mxu0  ;;  %5260 = vmatprep.subr.bf16.mxu1 %v10637_v0 }
0x136e   : > { %v4943_v45 = vpop.f32.mrb[217].mxu0 }
0x136f   : > { %v12559_v21 = vpop.f32.mrb[218].mxu0 }
0x1370   : > { %v4947_v22 = vpop.f32.mrb[219].mxu0 }
0x1371   : > { %v4989_v25 = vpack.c.bf16 %v4947_v22, %v4943_v45 }
0x1373   : > { %9842 = vmatprep.mubr.msk.bf16.mxu1 %vm565_vm0, %v4989_v25  ;;  %v4974_v25 = vadd.f32 %v12577_v27, %v12541_v35  ;;  %v4975_v35 = vadd.f32 %v12577_v27, %v12544_v50 }
0x1374   : > { %5261 = vmatpush1.bf16.xpose.msra.mxu1 %v10205_v16 }
0x1375   : > { %v12562_v17 = vpop.f32.mrb[220].mxu0  ;;  %5262 = vmatprep.subr.bf16.mxu1 %v10637_v0 }
0x1376   : > { %v4953_v54 = vpop.f32.mrb[221].mxu0 }
0x1377   : > { %v12565_v23 = vpop.f32.mrb[222].mxu0 }
0x1378   : > { %v4957_v31 = vpop.f32.mrb[223].mxu0 }
0x1379   : > { %v4990_v46 = vpack.c.bf16 %v4957_v31, %v4953_v54 }
0x137b   : > { %9843 = vmatmul.mubr.msk.bf16.gmra.mrb[252].mxu1 %vm565_vm0, %v4990_v46 }
0x137c   : > { %5263 = vmatpush1.bf16.xpose.msra.mxu1 %v10206_v12  ;;  %5282 = vmatprep.mubr.bf16.mxu1 %v10637_v0  ;;  %v4972_v12 = vadd.f32 %v12577_v27, %v12535_v32  ;;  %v4977_v32 = vadd.f32 %v12577_v27, %v12550_v29 }
0x137d   : > { %5264 = vmatprep.subr.bf16.mxu1 %v10637_v0 }
0x1384   : > { %5265 = vmatpush1.bf16.xpose.msra.mxu1 %v10207_v40 }
0x1385   : > { %5266 = vmatprep.subr.bf16.mxu1 %v10637_v0 }
0x138c   : > { %5267 = vmatpush1.bf16.xpose.msra.mxu1 %v10208_v28 }
0x138d   : > { %5268 = vmatprep.subr.bf16.mxu1 %v10637_v0 }
0x1394   : > { %5269 = vmatpush1.bf16.xpose.msra.mxu1 %v10209_v1 }
0x1395   : > { %5653 = vmatprep.subr.bf16.mxu1 %v10637_v0 }
0x141e   : > { %v9832_v44 = vpop.f32.mrb[240].mxu1 }
0x141f   : > { %v5131_v19 = vadd.f32 %v9832_v44, %v4969_v6  ;;  %v5066_v34 = vpop.f32.mrb[241].mxu1  ;;  %v4978_v44 = vadd.f32 %v12577_v27, %v12553_v33  ;;  %v4979_v33 = vadd.f32 %v12577_v27, %v12556_v4 }
0x1420   : > { %v5129_v56 = vadd.f32 %v5066_v34, %v4967_v14  ;;  %v9833_v10 = vpop.f32.mrb[242].mxu1  ;;  %v4976_v34 = vadd.f32 %v12577_v27, %v12547_v3  ;;  %v4981_v3 = vadd.f32 %v12577_v27, %v12562_v17 }
0x1421   : > { %v5132_v61 = vadd.f32 %v9833_v10, %v4970_v52  ;;  %v5069_v18 = vpop.f32.mrb[243].mxu1  ;;  %v5147_v55 = vmax.f32 %v5131_v19, 0.0 }
0x1422   : > { %v5130_v7 = vadd.f32 %v5069_v18, %v4968_v37  ;;  %v5145_v57 = vmax.f32 %v5129_v56, 0.0 }
0x1423   : > { %v5148_v48 = vmax.f32 %v5132_v61, 0.0 }
0x1424   : > { %v5146_v45 = vmax.f32 %v5130_v7, 0.0 }
0x1425   : > { %v5162_v22 = vpack.c.bf16 %v5148_v48, %v5147_v55 }
0x1426   : > { %v5161_v20 = vpack.c.bf16 %v5146_v45, %v5145_v57 }
0x1428   : > { %5283 = vmatmul.mubr.bf16.vlgmr.msra.gmra.mrb[0].mxu1 %v5161_v20 }
0x1429   : > { %5292 = vmatprep.mubr.bf16.mxu1 %v10637_v0 }
0x142e   : > { %v9836_v16 = vpop.f32.mrb[244].mxu1 }
0x142f   : > { %v5135_v54 = vadd.f32 %v9836_v16, %v4973_v2  ;;  %v5082_v31 = vpop.f32.mrb[245].mxu1 }
0x1430   : > { %v5133_v46 = vadd.f32 %v5082_v31, %v4971_v41  ;;  %v9837_v40 = vpop.f32.mrb[246].mxu1  ;;  %5293 = vmatmul.mubr.bf16.gmra.mrb[4].mxu1 %v5162_v22  ;;  %v4982_v22 = vadd.f32 %v12577_v27, %v12565_v23  ;;  %v4980_v41 = vadd.f32 %v12577_v27, %v12559_v21  ;;  %v10212_v21 = vld [vmem:[#allocation5 + $0x370] sm:$0xff]   ;;  %v10213_v23 = vld [vmem:[#allocation5 + $0x378] sm:$0xff]   ;;  %v10214_v27 = vld [vmem:[#allocation5 + $0x380] sm:$0xff]  }
0x1431   : > { %v5136_v28 = vadd.f32 %v9837_v40, %v4974_v25  ;;  %v5085_v1 = vpop.f32.mrb[247].mxu1  ;;  %5302 = vmatprep.mubr.bf16.mxu1 %v10637_v0  ;;  %v5151_v58 = vmax.f32 %v5135_v54, 0.0  ;;  %5654 = vmatpush1.bf16.xpose.msra.mxu1 %v10212_v21 }
0x1432   : > { %v5134_v9 = vadd.f32 %v5085_v1, %v4972_v12  ;;  %v5149_v47 = vmax.f32 %v5133_v46, 0.0  ;;  %5655 = vmatprep.subr.bf16.mxu1 %v10637_v0 }
0x1433   : > { %v5152_v51 = vmax.f32 %v5136_v28, 0.0 }
0x1434   : > { %v5150_v8 = vmax.f32 %v5134_v9, 0.0  ;;  %v10215_v9 = vld [vmem:[#allocation5 + $0x388] sm:$0xff]  }
0x1435   : > { %v5164_v43 = vpack.c.bf16 %v5152_v51, %v5151_v58  ;;  %v10216_v58 = vld [vmem:[#allocation5 + $0x390] sm:$0xff]   ;;  %v10217_v51 = vld [vmem:[#allocation5 + $0x398] sm:$0xff]  }
0x1436   : > { %v5163_v6 = vpack.c.bf16 %v5150_v8, %v5149_v47  ;;  %v10218_v47 = vld [vmem:[#allocation5 + $0x3a0] sm:$0xff]   ;;  %v10219_v8 = vld [vmem:[#allocation5 + $0x3a8] sm:$0xff]  }
0x1438   : > { %5303 = vmatmul.mubr.bf16.gmra.mrb[8].mxu1 %v5163_v6 }
0x1439   : > { %5312 = vmatprep.mubr.bf16.mxu1 %v10637_v0  ;;  %5656 = vmatpush1.bf16.xpose.msra.mxu1 %v10213_v23 }
0x143a   : > { %5657 = vmatprep.subr.bf16.mxu1 %v10637_v0 }
0x143e   : > { %v9840_v14 = vpop.f32.mrb[248].mxu1 }
0x143f   : > { %v5139_v52 = vadd.f32 %v9840_v14, %v4977_v32  ;;  %v5098_v19 = vpop.f32.mrb[249].mxu1 }
0x1440   : > { %v5137_v37 = vadd.f32 %v5098_v19, %v4975_v35  ;;  %v9841_v56 = vpop.f32.mrb[250].mxu1  ;;  %5313 = vmatmul.mubr.bf16.gmra.mrb[12].mxu1 %v5164_v43  ;;  %v10220_v43 = vld [vmem:[#allocation5 + $0x3b0] sm:$0xff]  }
0x1441   : > { %v5140_v10 = vadd.f32 %v9841_v56, %v4978_v44  ;;  %v5101_v61 = vpop.f32.mrb[251].mxu1  ;;  %5322 = vmatprep.mubr.bf16.mxu1 %v10637_v0  ;;  %v5155_v18 = vmax.f32 %v5139_v52, 0.0  ;;  %5658 = vmatpush1.bf16.xpose.msra.mxu1 %v10214_v27 }
0x1442   : > { %v5138_v29 = vadd.f32 %v5101_v61, %v4976_v34  ;;  %v5153_v50 = vmax.f32 %v5137_v37, 0.0  ;;  %5659 = vmatprep.subr.bf16.mxu1 %v10637_v0 }
0x1443   : > { %v5156_v7 = vmax.f32 %v5140_v10, 0.0 }
0x1444   : > { %v5154_v55 = vmax.f32 %v5138_v29, 0.0 }
0x1445   : > { %v5166_v48 = vpack.c.bf16 %v5156_v7, %v5155_v18 }
0x1446   : > { %v5165_v57 = vpack.c.bf16 %v5154_v55, %v5153_v50 }
0x1448   : > { %5323 = vmatmul.mubr.bf16.gmra.mrb[16].mxu1 %v5165_v57 }
0x1449   : > { %5332 = vmatprep.mubr.bf16.mxu1 %v10637_v0  ;;  %5660 = vmatpush1.bf16.xpose.msra.mxu1 %v10215_v9  ;;  %v10221_v9 = vld [vmem:[#allocation5 + $0x3b8] sm:$0xff]  }
0x144a   : > { %5661 = vmatprep.subr.bf16.mxu1 %v10637_v0 }
0x144e   : > { %v9844_v45 = vpop.f32.mrb[252].mxu1 }
0x144f   : > { %v5143_v20 = vadd.f32 %v9844_v45, %v4981_v3  ;;  %v5114_v2 = vpop.f32.mrb[253].mxu1 }
0x1450   : > { %v5141_v16 = vadd.f32 %v5114_v2, %v4979_v33  ;;  %v9845_v25 = vpop.f32.mrb[254].mxu1  ;;  %5333 = vmatmul.mubr.bf16.gmra.mrb[20].mxu1 %v5166_v48 }
0x1451   : > { %v5144_v54 = vadd.f32 %v9845_v25, %v4982_v22  ;;  %v5117_v31 = vpop.f32.mrb[255].mxu1  ;;  %5342 = vmatprep.mubr.bf16.mxu1 %v10637_v0  ;;  %v5159_v12 = vmax.f32 %v5143_v20, 0.0  ;;  %5662 = vmatpush1.bf16.xpose.msra.mxu1 %v10216_v58  ;;  %v10222_v58 = vld [vmem:[#allocation7 + $0xb0] sm:$0xff]  }
0x1452   : > { %v5142_v17 = vadd.f32 %v5117_v31, %v4980_v41  ;;  %v5157_v4 = vmax.f32 %v5141_v16, 0.0  ;;  %5663 = vmatprep.subr.bf16.mxu1 %v10637_v0  ;;  %9866 = vmatprep.subr.bf16.mxu0 %v10222_v58 }
0x1453   : > { %v5160_v46 = vmax.f32 %v5144_v54, 0.0 }
0x1454   : > { %v5158_v40 = vmax.f32 %v5142_v17, 0.0 }
0x1455   : > { %v5168_v28 = vpack.c.bf16 %v5160_v46, %v5159_v12 }
0x1456   : > { %v5167_v1 = vpack.c.bf16 %v5158_v40, %v5157_v4 }
0x1458   : > { %5343 = vmatmul.mubr.bf16.gmra.mrb[24].mxu1 %v5167_v1 }
0x1459   : > { %5352 = vmatprep.mubr.bf16.mxu1 %v10637_v0  ;;  %5664 = vmatpush1.bf16.xpose.msra.mxu1 %v10217_v51  ;;  %v10223_v51 = vld [vmem:[#allocation7 + $0xb8] sm:$0xff]  }
0x145a   : > { %5665 = vmatprep.subr.bf16.mxu1 %v10637_v0 }
0x1460   : > { %5353 = vmatmul.mubr.bf16.gmra.mrb[28].mxu1 %v5168_v28 }
0x1461   : > { %5685 = vmatprep.mubr.bf16.mxu1 %v10637_v0  ;;  %5666 = vmatpush1.bf16.xpose.msra.mxu1 %v10218_v47  ;;  %v9293_v47 = vld [vmem:[%s13917_s2 + $0xa] sm:$0x1] }
0x1462   : > { %5667 = vmatprep.subr.bf16.mxu1 %v10637_v0 }
0x1469   : > { %5668 = vmatpush1.bf16.xpose.msra.mxu1 %v10219_v8  ;;  %v5365_v8 = vunpack.c.l.bf16 %v9293_v47 }
0x146a   : > { %5669 = vmatprep.subr.bf16.mxu1 %v10637_v0 }
0x1471   : > { %5670 = vmatpush1.bf16.xpose.msra.mxu1 %v10220_v43  ;;  %v12667_v43 = vrot.slane %v5365_v8, %v10953_v30 }
0x1472   : > { %5671 = vmatprep.subr.bf16.mxu1 %v10637_v0 }
0x1479   : > { %5672 = vmatpush1.bf16.xpose.msra.mxu1 %v10221_v9 }
0x14fb   : > { %v12627_v6 = vpop.f32.mrb[0].mxu1 }
0x14fc   : > { %v5286_v32 = vpop.f32.mrb[1].mxu1 }
0x14fd   : > { %v12630_v35 = vpop.f32.mrb[2].mxu1 }
0x14fe   : > { %v5290_v14 = vpop.f32.mrb[3].mxu1 }
0x14ff   : > { %v5386_v44 = vpack.c.bf16 %v5290_v14, %v5286_v32  ;;  %v5370_v14 = vadd.f32 %v12667_v43, %v12627_v6 }
0x1501   : > { %9850 = vmatprep.mubr.msk.bf16.mxu0 %vm565_vm0, %v5386_v44 }
0x1503   : > { %v5294_v52 = vpop.f32.mrb[4].mxu1 }
0x1504   : > { %v5296_v19 = vpop.f32.mrb[5].mxu1  ;;  %v5372_v32 = vadd.f32 %v12667_v43, %v5294_v52 }
0x1505   : > { %v5298_v34 = vpop.f32.mrb[6].mxu1 }
0x1506   : > { %v5300_v37 = vpop.f32.mrb[7].mxu1 }
0x1507   : > { %v5387_v56 = vpack.c.bf16 %v5300_v37, %v5296_v19  ;;  %v5373_v19 = vadd.f32 %v12667_v43, %v5298_v34 }
0x1509   : > { %9851 = vmatmul.mubr.msk.bf16.vlgmr.msra.gmra.mrb[224].mxu0 %vm565_vm0, %v5387_v56 }
0x150a   : > { %9867 = vmatpush3.bf16.msra.mxu0 %v10222_v58 }
0x150b   : > { %v12634_v10 = vpop.f32.mrb[8].mxu1  ;;  %9868 = vmatprep.subr.bf16.mxu0 %v10223_v51 }
0x150c   : > { %v5306_v61 = vpop.f32.mrb[9].mxu1  ;;  %v5374_v34 = vadd.f32 %v12667_v43, %v12634_v10 }
0x150d   : > { %v12636_v29 = vpop.f32.mrb[10].mxu1 }
0x150e   : > { %v5310_v18 = vpop.f32.mrb[11].mxu1  ;;  %9869 = vmatpush3.bf16.msra.mxu0 %v10223_v51 }
0x150f   : > { %v5388_v7 = vpack.c.bf16 %v5310_v18, %v5306_v61  ;;  %6328 = vmatprep.subr.bf16.mxu0 %v10637_v0  ;;  %v5371_v61 = vadd.f32 %v12667_v43, %v12630_v35 }
0x1511   : > { %9854 = vmatprep.mubr.msk.bf16.mxu0 %vm565_vm0, %v5388_v7 }
0x1513   : > { %v5314_v50 = vpop.f32.mrb[12].mxu1 }
0x1514   : > { %v5316_v55 = vpop.f32.mrb[13].mxu1  ;;  %v5376_v6 = vadd.f32 %v12667_v43, %v5314_v50 }
0x1515   : > { %v12639_v48 = vpop.f32.mrb[14].mxu1 }
0x1516   : > { %v5320_v57 = vpop.f32.mrb[15].mxu1 }
0x1517   : > { %v5389_v3 = vpack.c.bf16 %v5320_v57, %v5316_v55 }
0x1519   : > { %9855 = vmatmul.mubr.msk.bf16.gmra.mrb[228].mxu0 %vm565_vm0, %v5389_v3 }
0x151b   : > { %v12642_v33 = vpop.f32.mrb[16].mxu1 }
0x151c   : > { %v5326_v45 = vpop.f32.mrb[17].mxu1 }
0x151d   : > { %v12644_v22 = vpop.f32.mrb[18].mxu1 }
0x151e   : > { %v5330_v20 = vpop.f32.mrb[19].mxu1 }
0x151f   : > { %v5390_v2 = vpack.c.bf16 %v5330_v20, %v5326_v45 }
0x1521   : > { %9858 = vmatprep.mubr.msk.bf16.mxu0 %vm565_vm0, %v5390_v2 }
0x1523   : > { %v12647_v41 = vpop.f32.mrb[20].mxu1 }
0x1524   : > { %v5336_v16 = vpop.f32.mrb[21].mxu1 }
0x1525   : > { %v12649_v25 = vpop.f32.mrb[22].mxu1 }
0x1526   : > { %v5340_v54 = vpop.f32.mrb[23].mxu1 }
0x1527   : > { %v5391_v31 = vpack.c.bf16 %v5340_v54, %v5336_v16 }
0x1529   : > { %9859 = vmatmul.mubr.msk.bf16.gmra.mrb[232].mxu0 %vm565_vm0, %v5391_v31  ;;  %v5377_v31 = vadd.f32 %v12667_v43, %v12639_v48  ;;  %v5378_v48 = vadd.f32 %v12667_v43, %v12642_v33 }
0x152b   : > { %v12652_v17 = vpop.f32.mrb[24].mxu1 }
0x152c   : > { %v5346_v12 = vpop.f32.mrb[25].mxu1 }
0x152d   : > { %v12654_v46 = vpop.f32.mrb[26].mxu1 }
0x152e   : > { %v5350_v4 = vpop.f32.mrb[27].mxu1 }
0x152f   : > { %v5392_v40 = vpack.c.bf16 %v5350_v4, %v5346_v12 }
0x1531   : > { %9862 = vmatprep.mubr.msk.bf16.mxu0 %vm565_vm0, %v5392_v40  ;;  %v5375_v40 = vadd.f32 %v12667_v43, %v12636_v29  ;;  %v5380_v29 = vadd.f32 %v12667_v43, %v12647_v41 }
0x1533   : > { %v12657_v28 = vpop.f32.mrb[28].mxu1 }
0x1534   : > { %v5356_v1 = vpop.f32.mrb[29].mxu1 }
0x1535   : > { %v12659_v21 = vpop.f32.mrb[30].mxu1 }
0x1536   : > { %v5360_v23 = vpop.f32.mrb[31].mxu1 }
0x1537   : > { %v5393_v27 = vpack.c.bf16 %v5360_v23, %v5356_v1 }
0x1539   : > { %9863 = vmatmul.mubr.msk.bf16.gmra.mrb[236].mxu0 %vm565_vm0, %v5393_v27 }
0x15dc   : > { %v9852_v44 = vpop.f32.mrb[224].mxu0 }
0x15dd   : > { %v5534_v37 = vadd.f32 %v9852_v44, %v5372_v32  ;;  %v5469_v56 = vpop.f32.mrb[225].mxu0  ;;  %v5381_v44 = vadd.f32 %v12667_v43, %v12649_v25  ;;  %v5382_v25 = vadd.f32 %v12667_v43, %v12652_v17 }
0x15de   : > { %v5532_v18 = vadd.f32 %v5469_v56, %v5370_v14  ;;  %v9853_v7 = vpop.f32.mrb[226].mxu0  ;;  %v5379_v56 = vadd.f32 %v12667_v43, %v12644_v22  ;;  %v5384_v22 = vadd.f32 %v12667_v43, %v12657_v28 }
0x15df   : > { %v5535_v55 = vadd.f32 %v9853_v7, %v5373_v19  ;;  %v5472_v57 = vpop.f32.mrb[227].mxu0  ;;  %v5550_v45 = vmax.f32 %v5534_v37, 0.0 }
0x15e0   : > { %v5533_v3 = vadd.f32 %v5472_v57, %v5371_v61  ;;  %v5548_v2 = vmax.f32 %v5532_v18, 0.0 }
0x15e1   : > { %v5551_v20 = vmax.f32 %v5535_v55, 0.0 }
0x15e2   : > { %v5549_v52 = vmax.f32 %v5533_v3, 0.0 }
0x15e3   : > { %v5565_v16 = vpack.c.bf16 %v5551_v20, %v5550_v45 }
0x15e4   : > { %v5564_v54 = vpack.c.bf16 %v5549_v52, %v5548_v2 }
0x15e6   : > { %5686 = vmatmul.mubr.bf16.vlgmr.msra.gmra.mrb[32].mxu1 %v5564_v54 }
0x15e7   : > { %5695 = vmatprep.mubr.bf16.mxu1 %v10637_v0 }
0x15ec   : > { %v9856_v35 = vpop.f32.mrb[228].mxu0 }
0x15ed   : > { %v5538_v12 = vadd.f32 %v9856_v35, %v5376_v6  ;;  %v5485_v4 = vpop.f32.mrb[229].mxu0 }
0x15ee   : > { %v5536_v1 = vadd.f32 %v5485_v4, %v5374_v34  ;;  %v9857_v23 = vpop.f32.mrb[230].mxu0  ;;  %5696 = vmatmul.mubr.bf16.gmra.mrb[36].mxu1 %v5565_v16  ;;  %v5385_v16 = vadd.f32 %v12667_v43, %v12659_v21  ;;  %v5383_v34 = vadd.f32 %v12667_v43, %v12654_v46 }
0x15ef   : > { %v5539_v27 = vadd.f32 %v9857_v23, %v5377_v31  ;;  %v5488_v9 = vpop.f32.mrb[231].mxu0  ;;  %5705 = vmatprep.mubr.bf16.mxu1 %v10637_v0  ;;  %v5554_v58 = vmax.f32 %v5538_v12, 0.0 }
0x15f0   : > { %v5537_v50 = vadd.f32 %v5488_v9, %v5375_v40  ;;  %v5552_v10 = vmax.f32 %v5536_v1, 0.0 }
0x15f1   : > { %v5555_v51 = vmax.f32 %v5539_v27, 0.0 }
0x15f2   : > { %v5553_v47 = vmax.f32 %v5537_v50, 0.0 }
0x15f3   : > { %v5567_v8 = vpack.c.bf16 %v5555_v51, %v5554_v58 }
0x15f4   : > { %v5566_v32 = vpack.c.bf16 %v5553_v47, %v5552_v10 }
0x15f6   : > { %5706 = vmatmul.mubr.bf16.gmra.mrb[40].mxu1 %v5566_v32 }
0x15f7   : > { %5715 = vmatprep.mubr.bf16.mxu1 %v10637_v0 }
0x15fc   : > { %v9860_v14 = vpop.f32.mrb[232].mxu0 }
0x15fd   : > { %v5542_v19 = vadd.f32 %v9860_v14, %v5380_v29  ;;  %v5501_v37 = vpop.f32.mrb[233].mxu0 }
0x15fe   : > { %v5540_v61 = vadd.f32 %v5501_v37, %v5378_v48  ;;  %v9861_v18 = vpop.f32.mrb[234].mxu0  ;;  %5716 = vmatmul.mubr.bf16.gmra.mrb[44].mxu1 %v5567_v8 }
0x15ff   : > { %v5543_v7 = vadd.f32 %v9861_v18, %v5381_v44  ;;  %v5504_v55 = vpop.f32.mrb[235].mxu0  ;;  %5725 = vmatprep.mubr.bf16.mxu1 %v10637_v0  ;;  %v5558_v57 = vmax.f32 %v5542_v19, 0.0 }
0x1600   : > { %v5541_v41 = vadd.f32 %v5504_v55, %v5379_v56  ;;  %v5556_v33 = vmax.f32 %v5540_v61, 0.0 }
0x1601   : > { %v5559_v3 = vmax.f32 %v5543_v7, 0.0 }
0x1602   : > { %v5557_v45 = vmax.f32 %v5541_v41, 0.0 }
0x1603   : > { %v5569_v20 = vpack.c.bf16 %v5559_v3, %v5558_v57 }
0x1604   : > { %v5568_v2 = vpack.c.bf16 %v5557_v45, %v5556_v33 }
0x1606   : > { %5726 = vmatmul.mubr.bf16.gmra.mrb[48].mxu1 %v5568_v2 }
0x1607   : > { %5735 = vmatprep.mubr.bf16.mxu1 %v10637_v0 }
0x160c   : > { %v9864_v52 = vpop.f32.mrb[236].mxu0 }
0x160d   : > { %v5546_v54 = vadd.f32 %v9864_v52, %v5384_v22  ;;  %v5517_v6 = vpop.f32.mrb[237].mxu0 }
0x160e   : > { %v5544_v35 = vadd.f32 %v5517_v6, %v5382_v25  ;;  %v9865_v31 = vpop.f32.mrb[238].mxu0  ;;  %5736 = vmatmul.mubr.bf16.gmra.mrb[52].mxu1 %v5569_v20 }
0x160f   : > { %v5547_v12 = vadd.f32 %v9865_v31, %v5385_v16  ;;  %v5520_v4 = vpop.f32.mrb[239].mxu0  ;;  %5745 = vmatprep.mubr.bf16.mxu1 %v10637_v0  ;;  %v5562_v40 = vmax.f32 %v5546_v54, 0.0 }
0x1610   : > { %v5545_v28 = vadd.f32 %v5520_v4, %v5383_v34  ;;  %v5560_v17 = vmax.f32 %v5544_v35, 0.0 }
0x1611   : > { %v5563_v1 = vmax.f32 %v5547_v12, 0.0 }
0x1612   : > { %v5561_v23 = vmax.f32 %v5545_v28, 0.0 }
0x1613   : > { %v5571_v27 = vpack.c.bf16 %v5563_v1, %v5562_v40  ;;  %v10224_v40 = vld [vmem:[#allocation5 + $0x3c0] sm:$0xff]   ;;  %v10225_v1 = vld [vmem:[#allocation5 + $0x3c8] sm:$0xff]  }
0x1614   : > { %v5570_v9 = vpack.c.bf16 %v5561_v23, %v5560_v17  ;;  %v10226_v17 = vld [vmem:[#allocation5 + $0x3d0] sm:$0xff]   ;;  %v10227_v23 = vld [vmem:[#allocation5 + $0x3d8] sm:$0xff]  }
0x1616   : > { %5746 = vmatmul.mubr.bf16.gmra.mrb[56].mxu1 %v5570_v9  ;;  %v10229_v9 = vld [vmem:[#allocation5 + $0x3e8] sm:$0xff]  }
0x1617   : > { %5755 = vmatprep.mubr.bf16.mxu1 %v10637_v0 }
0x161e   : > { %5756 = vmatmul.mubr.bf16.gmra.mrb[60].mxu1 %v5571_v27  ;;  %v10228_v27 = vld [vmem:[#allocation5 + $0x3e0] sm:$0xff]  }
0x16b9   : > { %v12705_v21 = vpop.f32.mrb[32].mxu1 }
0x16ba   : > { %v5689_v46 = vpop.f32.mrb[33].mxu1 }
0x16bb   : > { %v12707_v43 = vpop.f32.mrb[34].mxu1 }
0x16bc   : > { %v5693_v50 = vpop.f32.mrb[35].mxu1 }
0x16bd   : > { %v5789_v58 = vpack.c.bf16 %v5693_v50, %v5689_v46  ;;  %v9314_v46 = vld [vmem:[%s13917_s2 + $0xb] sm:$0x1] }
0x16be   : > { %v5768_v50 = vunpack.c.l.bf16 %v9314_v46 }
0x16bf   : > { %9870 = vmatprep.mubr.msk.bf16.mxu0 %vm565_vm0, %v5789_v58 }
0x16c0   : > { %v12756_v58 = vrot.slane %v5768_v50, %v10953_v30 }
0x16c1   : > { %v12710_v51 = vpop.f32.mrb[36].mxu1 }
0x16c2   : > { %v5699_v10 = vpop.f32.mrb[37].mxu1 }
0x16c3   : > { %v12712_v47 = vpop.f32.mrb[38].mxu1 }
0x16c4   : > { %v5703_v8 = vpop.f32.mrb[39].mxu1 }
0x16c5   : > { %v5790_v32 = vpack.c.bf16 %v5703_v8, %v5699_v10  ;;  %v5775_v10 = vadd.f32 %v12756_v58, %v12710_v51  ;;  %v5773_v8 = vadd.f32 %v12756_v58, %v12705_v21 }
0x16c7   : > { %9871 = vmatmul.mubr.msk.bf16.vlgmr.msra.gmra.mrb[240].mxu0 %vm565_vm0, %v5790_v32 }
0x16c8   : > { %6329 = vmatpush1.bf16.xpose.msra.mxu0 %v10224_v40 }
0x16c9   : > { %v12715_v29 = vpop.f32.mrb[40].mxu1  ;;  %6330 = vmatprep.subr.bf16.mxu0 %v10637_v0 }
0x16ca   : > { %v5709_v48 = vpop.f32.mrb[41].mxu1 }
0x16cb   : > { %v12717_v14 = vpop.f32.mrb[42].mxu1 }
0x16cc   : > { %v5713_v44 = vpop.f32.mrb[43].mxu1 }
0x16cd   : > { %v5791_v19 = vpack.c.bf16 %v5713_v44, %v5709_v48  ;;  %v5776_v48 = vadd.f32 %v12756_v58, %v12712_v47 }
0x16cf   : > { %9874 = vmatprep.mubr.msk.bf16.mxu0 %vm565_vm0, %v5791_v19 }
0x16d0   : > { %6331 = vmatpush1.bf16.xpose.msra.mxu0 %v10225_v1 }
0x16d1   : > { %v12720_v37 = vpop.f32.mrb[44].mxu1  ;;  %6332 = vmatprep.subr.bf16.mxu0 %v10637_v0 }
0x16d2   : > { %v5719_v56 = vpop.f32.mrb[45].mxu1 }
0x16d3   : > { %v12722_v61 = vpop.f32.mrb[46].mxu1 }
0x16d4   : > { %v5723_v18 = vpop.f32.mrb[47].mxu1 }
0x16d5   : > { %v5792_v7 = vpack.c.bf16 %v5723_v18, %v5719_v56  ;;  %v5774_v56 = vadd.f32 %v12756_v58, %v12707_v43 }
0x16d7   : > { %9875 = vmatmul.mubr.msk.bf16.gmra.mrb[244].mxu0 %vm565_vm0, %v5792_v7 }
0x16d8   : > { %6333 = vmatpush1.bf16.xpose.msra.mxu0 %v10226_v17  ;;  %v10230_v17 = vld [vmem:[#allocation5 + $0x3f0] sm:$0xff]  }
0x16d9   : > { %v12725_v55 = vpop.f32.mrb[48].mxu1  ;;  %6334 = vmatprep.subr.bf16.mxu0 %v10637_v0 }
0x16da   : > { %v5729_v41 = vpop.f32.mrb[49].mxu1  ;;  %v5781_v46 = vadd.f32 %v12756_v58, %v12725_v55 }
0x16db   : > { %v12727_v57 = vpop.f32.mrb[50].mxu1 }
0x16dc   : > { %v5733_v3 = vpop.f32.mrb[51].mxu1 }
0x16dd   : > { %v5793_v33 = vpack.c.bf16 %v5733_v3, %v5729_v41 }
0x16df   : > { %9878 = vmatprep.mubr.msk.bf16.mxu0 %vm565_vm0, %v5793_v33 }
0x16e0   : > { %6335 = vmatpush1.bf16.xpose.msra.mxu0 %v10227_v23 }
0x16e1   : > { %v12730_v45 = vpop.f32.mrb[52].mxu1  ;;  %6336 = vmatprep.subr.bf16.mxu0 %v10637_v0 }
0x16e2   : > { %v5739_v20 = vpop.f32.mrb[53].mxu1 }
0x16e3   : > { %v12732_v2 = vpop.f32.mrb[54].mxu1 }
0x16e4   : > { %v5743_v22 = vpop.f32.mrb[55].mxu1 }
0x16e5   : > { %v5794_v25 = vpack.c.bf16 %v5743_v22, %v5739_v20  ;;  %v5777_v22 = vadd.f32 %v12756_v58, %v12715_v29 }
0x16e7   : > { %9879 = vmatmul.mubr.msk.bf16.gmra.mrb[248].mxu0 %vm565_vm0, %v5794_v25 }
0x16e8   : > { %6337 = vmatpush1.bf16.xpose.msra.mxu0 %v10228_v27 }
0x16e9   : > { %v12735_v52 = vpop.f32.mrb[56].mxu1  ;;  %6338 = vmatprep.subr.bf16.mxu0 %v10637_v0 }
0x16ea   : > { %v5749_v16 = vpop.f32.mrb[57].mxu1 }
0x16eb   : > { %v12737_v54 = vpop.f32.mrb[58].mxu1 }
0x16ec   : > { %v5753_v6 = vpop.f32.mrb[59].mxu1 }
0x16ed   : > { %v5795_v34 = vpack.c.bf16 %v5753_v6, %v5749_v16 }
0x16ef   : > { %9882 = vmatprep.mubr.msk.bf16.mxu0 %vm565_vm0, %v5795_v34  ;;  %v5778_v34 = vadd.f32 %v12756_v58, %v12717_v14 }
0x16f0   : > { %6339 = vmatpush1.bf16.xpose.msra.mxu0 %v10229_v9  ;;  %v5783_v9 = vadd.f32 %v12756_v58, %v12730_v45  ;;  %v5782_v45 = vadd.f32 %v12756_v58, %v12727_v57 }
0x16f1   : > { %v12740_v35 = vpop.f32.mrb[60].mxu1  ;;  %6340 = vmatprep.subr.bf16.mxu0 %v10637_v0 }
0x16f2   : > { %v5759_v31 = vpop.f32.mrb[61].mxu1 }
0x16f3   : > { %v12742_v12 = vpop.f32.mrb[62].mxu1 }
0x16f4   : > { %v5763_v4 = vpop.f32.mrb[63].mxu1 }
0x16f5   : > { %v5796_v28 = vpack.c.bf16 %v5763_v4, %v5759_v31 }
0x16f7   : > { %9883 = vmatmul.mubr.msk.bf16.gmra.mrb[252].mxu0 %vm565_vm0, %v5796_v28 }
0x16f8   : > { %6360 = vmatprep.mubr.bf16.mxu0 %v10637_v0  ;;  %6341 = vmatpush1.bf16.xpose.msra.mxu0 %v10230_v17 }
0x16f9   : > { %6342 = vmatprep.subr.bf16.mxu0 %v10637_v0 }
0x179a   : > { %v9872_v32 = vpop.f32.mrb[240].mxu0 }
0x179b   : > { %v5937_v44 = vadd.f32 %v9872_v32, %v5775_v10  ;;  %v5872_v19 = vpop.f32.mrb[241].mxu0 }
0x179c   : > { %v5935_v18 = vadd.f32 %v5872_v19, %v5773_v8  ;;  %v9873_v7 = vpop.f32.mrb[242].mxu0 }
0x179d   : > { %v5938_v41 = vadd.f32 %v9873_v7, %v5776_v48  ;;  %v5875_v3 = vpop.f32.mrb[243].mxu0  ;;  %v12779_v47 = vadd.f32 %v5937_v44, %v12411_v59  ;;  %v5780_v59 = vadd.f32 %v12756_v58, %v12722_v61  ;;  %v10232_v7 = vld [vmem:[#allocation5 + $0x400] sm:$0xff]  }
0x179e   : > { %v12767_v33 = vadd.f32 %v5935_v18, %v12388_v62  ;;  %v5936_v51 = vadd.f32 %v5875_v3, %v5774_v56 }
0x179f   : > { %v12782_v62 = vadd.f32 %v5938_v41, %v12414_v60  ;;  %v6021_v16 = vmul.f32 %v12779_v47, %v12779_v47 }
0x17a0   : > { %v12770_v20 = vadd.f32 %v5936_v51, %v12391_v42  ;;  %5971 = vadd.xlane.f32.xlu0 %v12767_v33  ;;  %v6019_v21 = vmul.f32 %v12767_v33, %v12767_v33  ;;  %v5779_v42 = vadd.f32 %v12756_v58, %v12720_v37  ;;  %v5787_v51 = vadd.f32 %v12756_v58, %v12740_v35 }
0x17a1   : > { %v6022_v29 = vmul.f32 %v12782_v62, %v12782_v62  ;;  %v5786_v35 = vadd.f32 %v12756_v58, %v12737_v54 }
0x17a2   : > { %5973 = vadd.xlane.f32.xlu1 %v12770_v20  ;;  %v6020_v43 = vmul.f32 %v12770_v20, %v12770_v20 }
0x17a4   : > { %6035 = vadd.xlane.f32.xlu0 %v6019_v21  ;;  %v5785_v21 = vadd.f32 %v12756_v58, %v12735_v52 }
0x17a6   : > { %6037 = vadd.xlane.f32.xlu1 %v6020_v43 }
0x17a8   : > { %5975 = vadd.xlane.f32.xlu0 %v12779_v47 }
0x17aa   : > { %5977 = vadd.xlane.f32.xlu1 %v12782_v62  ;;  %v9876_v25 = vpop.f32.mrb[244].mxu0 }
0x17ab   : > { %v5941_v6 = vadd.f32 %v9876_v25, %v5779_v42  ;;  %v5888_v60 = vpop.f32.mrb[245].mxu0 }
0x17ac   : > { %v5939_v31 = vadd.f32 %v5888_v60, %v5777_v22  ;;  %6039 = vadd.xlane.f32.xlu0 %v6021_v16  ;;  %v9877_v37 = vpop.f32.mrb[246].mxu0 }
0x17ad   : > { %v5942_v4 = vadd.f32 %v9877_v37, %v5780_v59  ;;  %v5891_v28 = vpop.f32.mrb[247].mxu0  ;;  %v12812_v23 = vadd.f32 %v5941_v6, %v12457_v15 }
0x17ae   : > { %v12799_v40 = vadd.f32 %v5939_v31, %v12434_v5  ;;  %v5940_v1 = vadd.f32 %v5891_v28, %v5778_v34  ;;  %6041 = vadd.xlane.f32.xlu1 %v6022_v29  ;;  %v10234_v29 = vld [vmem:[#allocation7 + $0xc0] sm:$0xff]  }
0x17af   : > { %v12815_v27 = vadd.f32 %v5942_v4, %v12460_v49  ;;  %v6025_v15 = vmul.f32 %v12812_v23, %v12812_v23  ;;  %v5784_v49 = vadd.f32 %v12756_v58, %v12732_v2  ;;  %v10235_v4 = vld [vmem:[#allocation7 + $0xc8] sm:$0xff]   ;;  %9886 = vmatprep.subr.bf16.mxu1 %v10234_v29 }
0x17b0   : > { %v12802_v61 = vadd.f32 %v5940_v1, %v12437_v26  ;;  %5979 = vadd.xlane.f32.xlu0 %v12799_v40  ;;  %v6023_v14 = vmul.f32 %v12799_v40, %v12799_v40  ;;  %v10231_v26 = vld [vmem:[#allocation5 + $0x3f8] sm:$0xff]   ;;  %9887 = vmatpush3.bf16.msra.mxu1 %v10234_v29 }
0x17b1   : > { %6343 = vmatpush1.bf16.xpose.msra.mxu0 %v10231_v26  ;;  %v6026_v55 = vmul.f32 %v12815_v27, %v12815_v27  ;;  %9888 = vmatprep.subr.bf16.mxu1 %v10235_v4 }
0x17b2   : > { %5981 = vadd.xlane.f32.xlu1 %v12802_v61  ;;  %v6024_v5 = vmul.f32 %v12802_v61, %v12802_v61  ;;  %6344 = vmatprep.subr.bf16.mxu0 %v10637_v0 }
0x17b4   : > { %6043 = vadd.xlane.f32.xlu0 %v6023_v14  ;;  %9889 = vmatpush3.bf16.msra.mxu1 %v10235_v4 }
0x17b6   : > { %6045 = vadd.xlane.f32.xlu1 %v6024_v5 }
0x17b8   : > { %5983 = vadd.xlane.f32.xlu0 %v12812_v23 }
0x17b9   : > { %6345 = vmatpush1.bf16.xpose.msra.mxu0 %v10232_v7 }
0x17ba   : > { %5985 = vadd.xlane.f32.xlu1 %v12815_v27  ;;  %v9880_v50 = vpop.f32.mrb[248].mxu0  ;;  %6346 = vmatprep.subr.bf16.mxu0 %v10637_v0 }
0x17bb   : > { %v5945_v10 = vadd.f32 %v9880_v50, %v5783_v9  ;;  %v5904_v8 = vpop.f32.mrb[249].mxu0 }
0x17bc   : > { %v5943_v32 = vadd.f32 %v5904_v8, %v5781_v46  ;;  %6047 = vadd.xlane.f32.xlu0 %v6025_v15  ;;  %v9881_v48 = vpop.f32.mrb[250].mxu0 }
0x17bd   : > { %v5946_v44 = vadd.f32 %v9881_v48, %v5784_v49  ;;  %v5907_v19 = vpop.f32.mrb[251].mxu0  ;;  %v12846_v41 = vadd.f32 %v5945_v10, %v12489_v24 }
0x17be   : > { %v12833_v56 = vadd.f32 %v5943_v32, %v12474_v36  ;;  %v5944_v18 = vadd.f32 %v5907_v19, %v5782_v45  ;;  %6049 = vadd.xlane.f32.xlu1 %v6026_v55 }
0x17bf   : > { %v12849_v3 = vadd.f32 %v5946_v44, %v12492_v63  ;;  %v6029_v24 = vmul.f32 %v12846_v41, %v12846_v41  ;;  %v5788_v63 = vadd.f32 %v12756_v58, %v12742_v12 }
0x17c0   : > { %v12836_v2 = vadd.f32 %v5944_v18, %v12477_v39  ;;  %5987 = vadd.xlane.f32.xlu0 %v12833_v56  ;;  %v6027_v57 = vmul.f32 %v12833_v56, %v12833_v56  ;;  %v10233_v39 = vld [vmem:[#allocation5 + $0x408] sm:$0xff]  }
0x17c1   : > { %6347 = vmatpush1.bf16.xpose.msra.mxu0 %v10233_v39  ;;  %v6030_v52 = vmul.f32 %v12849_v3, %v12849_v3 }
0x17c2   : > { %5989 = vadd.xlane.f32.xlu1 %v12836_v2  ;;  %v6028_v36 = vmul.f32 %v12836_v2, %v12836_v2  ;;  %6731 = vmatprep.subr.bf16.mxu0 %v10637_v0 }
0x17c4   : > { %6051 = vadd.xlane.f32.xlu0 %v6027_v57 }
0x17c6   : > { %6053 = vadd.xlane.f32.xlu1 %v6028_v36 }
0x17c8   : > { %5991 = vadd.xlane.f32.xlu0 %v12846_v41 }
0x17ca   : > { %5993 = vadd.xlane.f32.xlu1 %v12849_v3  ;;  %v9884_v43 = vpop.f32.mrb[252].mxu0 }
0x17cb   : > { %v5949_v42 = vadd.f32 %v9884_v43, %v5787_v51  ;;  %v5920_v22 = vpop.f32.mrb[253].mxu0 }
0x17cc   : > { %v5947_v25 = vadd.f32 %v5920_v22, %v5785_v21  ;;  %6055 = vadd.xlane.f32.xlu0 %v6029_v24  ;;  %v9885_v16 = vpop.f32.mrb[254].mxu0 }
0x17cd   : > { %v5950_v59 = vadd.f32 %v9885_v16, %v5788_v63  ;;  %v5923_v6 = vpop.f32.mrb[255].mxu0  ;;  %v12879_v31 = vadd.f32 %v5949_v42, %v12515_v11 }
0x17ce   : > { %v12867_v60 = vadd.f32 %v5947_v25, %v12503_v13  ;;  %v5948_v34 = vadd.f32 %v5923_v6, %v5786_v35  ;;  %6057 = vadd.xlane.f32.xlu1 %v6030_v52 }
0x17cf   : > { %v12882_v13 = vadd.f32 %v5950_v59, %v12518_v53 }
0x17d0   : > { %v12870_v12 = vadd.f32 %v5948_v34, %v12506_v38  ;;  %5995 = vadd.xlane.f32.xlu0 %v12867_v60  ;;  %v6031_v54 = vmul.f32 %v12867_v60, %v12867_v60  ;;  %v6033_v38 = vmul.f32 %v12879_v31, %v12879_v31 }
0x17d1   : > { %v6034_v37 = vmul.f32 %v12882_v13, %v12882_v13 }
0x17d2   : > { %5997 = vadd.xlane.f32.xlu1 %v12870_v12  ;;  %v6032_v58 = vmul.f32 %v12870_v12, %v12870_v12 }
0x17d4   : > { %6059 = vadd.xlane.f32.xlu0 %v6031_v54 }
0x17d6   : > { %6061 = vadd.xlane.f32.xlu1 %v6032_v58 }
0x17d8   : > { %5999 = vadd.xlane.f32.xlu0 %v12879_v31 }
0x17da   : > { %6001 = vadd.xlane.f32.xlu1 %v12882_v13 }
0x17dc   : > { %6063 = vadd.xlane.f32.xlu0 %v6033_v38  ;;  %v12908_v38 = vld [vmem:[%s13919_s4 + $0x3] ss:$0 sm:$0xff] }
0x17de   : > { %6065 = vadd.xlane.f32.xlu1 %v6034_v37 }
0x182d   : > { %v5972_v11 = vpop.xlane.xlu0 %5971 }
0x182e   : > { %v6003_v53 = vmul.f32 0.0078125, %v5972_v11 }
0x182f   : > { %v5974_v28 = vpop.xlane.xlu1 %5973 }
0x1830   : > { %v6004_v1 = vmul.f32 0.0078125, %v5974_v28  ;;  %v6083_v14 = vmul.f32 %v6003_v53, %v6003_v53  ;;  %v6131_v34 = vsub.f32 %v12767_v33, %v6003_v53 }
0x1831   : > { %v6036_v17 = vpop.xlane.xlu0 %6035 }
0x1832   : > { %v6067_v5 = vmul.f32 0.0078125, %v6036_v17  ;;  %v6084_v9 = vmul.f32 %v6004_v1, %v6004_v1  ;;  %v6132_v11 = vsub.f32 %v12770_v20, %v6004_v1 }
0x1833   : > { %v6038_v26 = vpop.xlane.xlu1 %6037 }
0x1834   : > { %v6099_v46 = vsub.f32 %v6067_v5, %v6083_v14  ;;  %v6068_v50 = vmul.f32 0.0078125, %v6038_v26 }
0x1835   : > { %v5976_v15 = vpop.xlane.xlu0 %5975 }
0x1836   : > { %v6115_v49 = vmax.f32 %v6099_v46, 0.0  ;;  %v6100_v10 = vsub.f32 %v6068_v50, %v6084_v9  ;;  %v12890_v8 = vmul.f32 0.0078125, %v5976_v15  ;;  %v12919_v50 = vld [vmem:[%s13920_s5 + $0x3] ss:$0 sm:$0xff] }
0x1837   : > { %v5978_v45 = vpop.xlane.xlu1 %5977 }
0x1838   : > { %v6147_v32 = vadd.f32 1e-05, %v6115_v49  ;;  %v6116_v48 = vmax.f32 %v6100_v10, 0.0  ;;  %v12892_v55 = vmul.f32 0.0078125, %v5978_v45  ;;  %v6085_v18 = vmul.f32 %v12890_v8, %v12890_v8 }
0x1839   : > { %v6040_v44 = vpop.xlane.xlu0 %6039 }
0x183a   : > { %10392 = vrsqrt.f32 %v6147_v32  ;;  %v6148_v19 = vadd.f32 1e-05, %v6116_v48  ;;  %v6069_v7 = vmul.f32 0.0078125, %v6040_v44  ;;  %v6086_v36 = vmul.f32 %v12892_v55, %v12892_v55 }
0x183b   : > { %v6042_v57 = vpop.xlane.xlu1 %6041 }
0x183c   : > { %10394 = vrsqrt.f32 %v6148_v19  ;;  %v6101_v39 = vsub.f32 %v6069_v7, %v6085_v18  ;;  %v6070_v51 = vmul.f32 0.0078125, %v6042_v57  ;;  %v6133_v18 = vsub.f32 %v12779_v47, %v12890_v8 }
0x183d   : > { %v5980_v21 = vpop.xlane.xlu0 %5979 }
0x183e   : > { %v6117_v43 = vmax.f32 %v6101_v39, 0.0  ;;  %v6102_v24 = vsub.f32 %v6070_v51, %v6086_v36  ;;  %v12898_v63 = vmul.f32 0.0078125, %v5980_v21 }
0x183f   : > { %v5982_v42 = vpop.xlane.xlu1 %5981 }
0x1840   : > { %v6149_v22 = vadd.f32 1e-05, %v6117_v43  ;;  %v6118_v35 = vmax.f32 %v6102_v24, 0.0  ;;  %v12900_v25 = vmul.f32 0.0078125, %v5982_v42  ;;  %v6087_v59 = vmul.f32 %v12898_v63, %v12898_v63 }
0x1841   : > { %v6044_v16 = vpop.xlane.xlu0 %6043  ;;  %v6134_v43 = vsub.f32 %v12782_v62, %v12892_v55 }
0x1842   : > { %10396 = vrsqrt.f32 %v6149_v22  ;;  %v6150_v52 = vadd.f32 1e-05, %v6118_v35  ;;  %v6071_v6 = vmul.f32 0.0078125, %v6044_v16  ;;  %v6088_v37 = vmul.f32 %v12900_v25, %v12900_v25 }
0x1843   : > { %v6046_v54 = vpop.xlane.xlu1 %6045 }
0x1844   : > { %v10393_v58 = vpop.eup %10392  ;;  %10398 = vrsqrt.f32 %v6150_v52  ;;  %v6103_v29 = vsub.f32 %v6071_v6, %v6087_v59  ;;  %v6072_v4 = vmul.f32 0.0078125, %v6046_v54 }
0x1845   : > { %v6179_v28 = vmul.f32 %v10393_v58, %v6131_v34  ;;  %v5984_v17 = vpop.xlane.xlu0 %5983 }
0x1846   : > { %v10395_v14 = vpop.eup %10394  ;;  %v6119_v5 = vmax.f32 %v6103_v29, 0.0  ;;  %v6104_v33 = vsub.f32 %v6072_v4, %v6088_v37  ;;  %v12913_v53 = vmul.f32 0.0078125, %v5984_v17 }
0x1847   : > { %v6201_v26 = vmul.f32 %v12908_v38, %v6179_v28  ;;  %v6180_v9 = vmul.f32 %v10395_v14, %v6132_v11  ;;  %v5986_v46 = vpop.xlane.xlu1 %5985  ;;  %v6135_v28 = vsub.f32 %v12799_v40, %v12898_v63 }
0x1848   : > { %v6151_v15 = vadd.f32 1e-05, %v6119_v5  ;;  %v6120_v49 = vmax.f32 %v6104_v33, 0.0  ;;  %v12922_v1 = vmul.f32 0.0078125, %v5986_v46  ;;  %v6089_v32 = vmul.f32 %v12913_v53, %v12913_v53 }
0x1849   : > { %v6202_v20 = vmul.f32 %v12908_v38, %v6180_v9  ;;  %v6048_v10 = vpop.xlane.xlu0 %6047  ;;  %v12927_v44 = vadd.f32 %v12919_v50, %v6201_v26  ;;  %v6136_v46 = vsub.f32 %v12802_v61, %v12900_v25 }
0x184a   : > { %10400 = vrsqrt.f32 %v6151_v15  ;;  %v6152_v45 = vadd.f32 1e-05, %v6120_v49  ;;  %v6073_v48 = vmul.f32 0.0078125, %v6048_v10  ;;  %v6090_v36 = vmul.f32 %v12922_v1, %v12922_v1 }
0x184b   : > { %v12930_v19 = vadd.f32 %v12919_v50, %v6202_v20  ;;  %v6050_v7 = vpop.xlane.xlu1 %6049 }
0x184c   : > { %v10397_v57 = vpop.eup %10396  ;;  %10402 = vrsqrt.f32 %v6152_v45  ;;  %v6105_v39 = vsub.f32 %v6073_v48, %v6089_v32  ;;  %v6074_v51 = vmul.f32 0.0078125, %v6050_v7 }
0x184d   : > { %v6239_v21 = vpack.c.bf16 %v12930_v19, %v12927_v44  ;;  %v6181_v24 = vmul.f32 %v10397_v57, %v6133_v18  ;;  %v5988_v42 = vpop.xlane.xlu0 %5987 }
0x184e   : > { %v10399_v22 = vpop.eup %10398  ;;  %v6121_v35 = vmax.f32 %v6105_v39, 0.0  ;;  %v6106_v16 = vsub.f32 %v6074_v51, %v6090_v36  ;;  %v12940_v47 = vmul.f32 0.0078125, %v5988_v42 }
0x184f   : > { %v6203_v8 = vmul.f32 %v12908_v38, %v6181_v24  ;;  %v6182_v52 = vmul.f32 %v10399_v22, %v6134_v43  ;;  %v5990_v59 = vpop.xlane.xlu1 %5989  ;;  %6361 = vmatmul.mubr.bf16.vlgmr.msra.gmra.mrb[0].mxu0 %v6239_v21  ;;  %v6137_v24 = vsub.f32 %v12812_v23, %v12913_v53 }
0x1850   : > { %v6153_v6 = vadd.f32 1e-05, %v6121_v35  ;;  %v6122_v34 = vmax.f32 %v6106_v16, 0.0  ;;  %6370 = vmatprep.mubr.bf16.mxu0 %v10637_v0  ;;  %v12945_v58 = vmul.f32 0.0078125, %v5990_v59  ;;  %v6091_v37 = vmul.f32 %v12940_v47, %v12940_v47 }
0x1851   : > { %v6204_v54 = vmul.f32 %v12908_v38, %v6182_v52  ;;  %v6052_v62 = vpop.xlane.xlu0 %6051  ;;  %v12950_v4 = vadd.f32 %v12919_v50, %v6203_v8  ;;  %v6138_v59 = vsub.f32 %v12815_v27, %v12922_v1 }
0x1852   : > { %10404 = vrsqrt.f32 %v6153_v6  ;;  %v6154_v55 = vadd.f32 1e-05, %v6122_v34  ;;  %v6075_v29 = vmul.f32 0.0078125, %v6052_v62  ;;  %v6092_v5 = vmul.f32 %v12945_v58, %v12945_v58 }
0x1853   : > { %v12953_v11 = vadd.f32 %v12919_v50, %v6204_v54  ;;  %v6054_v17 = vpop.xlane.xlu1 %6053 }
0x1854   : > { %v10401_v14 = vpop.eup %10400  ;;  %10406 = vrsqrt.f32 %v6154_v55  ;;  %v6107_v33 = vsub.f32 %v6075_v29, %v6091_v37  ;;  %v6076_v26 = vmul.f32 0.0078125, %v6054_v17 }
0x1855   : > { %v6240_v9 = vpack.c.bf16 %v12953_v11, %v12950_v4  ;;  %v6183_v15 = vmul.f32 %v10401_v14, %v6135_v28  ;;  %v5992_v49 = vpop.xlane.xlu0 %5991 }
0x1856   : > { %v10403_v20 = vpop.eup %10402  ;;  %v6123_v10 = vmax.f32 %v6107_v33, 0.0  ;;  %v6108_v45 = vsub.f32 %v6076_v26, %v6092_v5  ;;  %v12963_v40 = vmul.f32 0.0078125, %v5992_v49 }
0x1857   : > { %v6205_v63 = vmul.f32 %v12908_v38, %v6183_v15  ;;  %v6184_v32 = vmul.f32 %v10403_v20, %v6136_v46  ;;  %v5994_v48 = vpop.xlane.xlu1 %5993  ;;  %6371 = vmatmul.mubr.bf16.gmra.mrb[4].mxu0 %v6240_v9  ;;  %v6139_v15 = vsub.f32 %v12833_v56, %v12940_v47 }
0x1858   : > { %v6155_v18 = vadd.f32 1e-05, %v6123_v10  ;;  %v6124_v7 = vmax.f32 %v6108_v45, 0.0  ;;  %6380 = vmatprep.mubr.bf16.mxu0 %v10637_v0  ;;  %v12968_v36 = vmul.f32 0.0078125, %v5994_v48  ;;  %v6093_v39 = vmul.f32 %v12963_v40, %v12963_v40 }
0x1859   : > { %v6206_v57 = vmul.f32 %v12908_v38, %v6184_v32  ;;  %v6056_v61 = vpop.xlane.xlu0 %6055  ;;  %v12973_v21 = vadd.f32 %v12919_v50, %v6205_v63  ;;  %v6140_v48 = vsub.f32 %v12836_v2, %v12945_v58 }
0x185a   : > { %10408 = vrsqrt.f32 %v6155_v18  ;;  %v6156_v25 = vadd.f32 1e-05, %v6124_v7  ;;  %v6077_v51 = vmul.f32 0.0078125, %v6056_v61  ;;  %v6094_v35 = vmul.f32 %v12968_v36, %v12968_v36 }
0x185b   : > { %v12976_v43 = vadd.f32 %v12919_v50, %v6206_v57  ;;  %v6058_v42 = vpop.xlane.xlu1 %6057 }
0x185c   : > { %v10405_v22 = vpop.eup %10404  ;;  %10410 = vrsqrt.f32 %v6156_v25  ;;  %v6109_v16 = vsub.f32 %v6077_v51, %v6093_v39  ;;  %v6078_v8 = vmul.f32 0.0078125, %v6058_v42 }
0x185d   : > { %v6241_v52 = vpack.c.bf16 %v12976_v43, %v12973_v21  ;;  %v6185_v6 = vmul.f32 %v10405_v22, %v6137_v24  ;;  %v5996_v34 = vpop.xlane.xlu0 %5995 }
0x185e   : > { %v10407_v54 = vpop.eup %10406  ;;  %v6125_v62 = vmax.f32 %v6109_v16, 0.0  ;;  %v6110_v55 = vsub.f32 %v6078_v8, %v6094_v35  ;;  %v12986_v23 = vmul.f32 0.0078125, %v5996_v34 }
0x185f   : > { %v6207_v53 = vmul.f32 %v12908_v38, %v6185_v6  ;;  %v6186_v37 = vmul.f32 %v10407_v54, %v6138_v59  ;;  %6381 = vmatmul.mubr.bf16.gmra.mrb[8].mxu0 %v6241_v52  ;;  %v5998_v29 = vpop.xlane.xlu1 %5997  ;;  %v6141_v6 = vsub.f32 %v12846_v41, %v12963_v40 }
0x1860   : > { %v6157_v28 = vadd.f32 1e-05, %v6125_v62  ;;  %v6126_v17 = vmax.f32 %v6110_v55, 0.0  ;;  %6390 = vmatprep.mubr.bf16.mxu0 %v10637_v0  ;;  %v12991_v5 = vmul.f32 0.0078125, %v5998_v29  ;;  %v6095_v33 = vmul.f32 %v12986_v23, %v12986_v23 }
0x1861   : > { %v6208_v14 = vmul.f32 %v12908_v38, %v6186_v37  ;;  %v6060_v27 = vpop.xlane.xlu0 %6059  ;;  %v12996_v9 = vadd.f32 %v12919_v50, %v6207_v53  ;;  %v6142_v29 = vsub.f32 %v12849_v3, %v12968_v36  ;;  %v6143_v36 = vsub.f32 %v12867_v60, %v12986_v23 }
0x1862   : > { %10412 = vrsqrt.f32 %v6157_v28  ;;  %v6158_v1 = vadd.f32 1e-05, %v6126_v17  ;;  %v6079_v26 = vmul.f32 0.0078125, %v6060_v27  ;;  %v6096_v10 = vmul.f32 %v12991_v5, %v12991_v5 }
0x1863   : > { %v12999_v46 = vadd.f32 %v12919_v50, %v6208_v14  ;;  %v6062_v49 = vpop.xlane.xlu1 %6061 }
0x1864   : > { %v10409_v20 = vpop.eup %10408  ;;  %10414 = vrsqrt.f32 %v6158_v1  ;;  %v6111_v45 = vsub.f32 %v6079_v26, %v6095_v33  ;;  %v6080_v63 = vmul.f32 0.0078125, %v6062_v49 }
0x1865   : > { %v6242_v32 = vpack.c.bf16 %v12999_v46, %v12996_v9  ;;  %v6187_v18 = vmul.f32 %v10409_v20, %v6139_v15  ;;  %v6000_v7 = vpop.xlane.xlu0 %5999 }
0x1866   : > { %v10411_v57 = vpop.eup %10410  ;;  %v6127_v61 = vmax.f32 %v6111_v45, 0.0  ;;  %v6112_v25 = vsub.f32 %v6080_v63, %v6096_v10  ;;  %v6017_v56 = vmul.f32 0.0078125, %v6000_v7  ;;  %v6144_v45 = vsub.f32 %v12870_v12, %v12991_v5 }
0x1867   : > { %v6209_v47 = vmul.f32 %v12908_v38, %v6187_v18  ;;  %v6188_v39 = vmul.f32 %v10411_v57, %v6140_v48  ;;  %6391 = vmatmul.mubr.bf16.gmra.mrb[12].mxu0 %v6242_v32  ;;  %v6002_v51 = vpop.xlane.xlu1 %6001 }
0x1868   : > { %v6159_v24 = vadd.f32 1e-05, %v6127_v61  ;;  %v6128_v42 = vmax.f32 %v6112_v25, 0.0  ;;  %6400 = vmatprep.mubr.bf16.mxu0 %v10637_v0  ;;  %v6018_v35 = vmul.f32 0.0078125, %v6002_v51  ;;  %v6097_v58 = vmul.f32 %v6017_v56, %v6017_v56 }
0x1869   : > { %v6210_v22 = vmul.f32 %v12908_v38, %v6188_v39  ;;  %v6064_v16 = vpop.xlane.xlu0 %6063  ;;  %v13013_v52 = vadd.f32 %v12919_v50, %v6209_v47  ;;  %v6145_v57 = vsub.f32 %v12879_v31, %v6017_v56 }
0x186a   : > { %10416 = vrsqrt.f32 %v6159_v24  ;;  %v6160_v2 = vadd.f32 1e-05, %v6128_v42  ;;  %v6081_v8 = vmul.f32 0.0078125, %v6064_v16  ;;  %v6098_v62 = vmul.f32 %v6018_v35, %v6018_v35  ;;  %v10241_v16 = vld [vmem:[#allocation5 + $0x438] sm:$0xff]  }
0x186b   : > { %v13016_v59 = vadd.f32 %v12919_v50, %v6210_v22  ;;  %v6066_v34 = vpop.xlane.xlu1 %6065  ;;  %v6146_v5 = vsub.f32 %v12882_v13, %v6018_v35  ;;  %v10236_v13 = vld [vmem:[#allocation5 + $0x410] sm:$0xff]   ;;  %v10237_v22 = vld [vmem:[#allocation5 + $0x418] sm:$0xff]  }
0x186c   : > { %v10413_v54 = vpop.eup %10412  ;;  %10418 = vrsqrt.f32 %v6160_v2  ;;  %v6113_v55 = vsub.f32 %v6081_v8, %v6097_v58  ;;  %v6082_v53 = vmul.f32 0.0078125, %v6066_v34  ;;  %6732 = vmatpush1.bf16.xpose.msra.mxu0 %v10236_v13  ;;  %v10240_v35 = vld [vmem:[#allocation5 + $0x430] sm:$0xff]   ;;  %v10242_v2 = vld [vmem:[#allocation5 + $0x440] sm:$0xff]   ;;  %v10243_v58 = vld [vmem:[#allocation5 + $0x448] sm:$0xff]  }
0x186d   : > { %v6243_v37 = vpack.c.bf16 %v13016_v59, %v13013_v52  ;;  %v6189_v28 = vmul.f32 %v10413_v54, %v6141_v6  ;;  %6733 = vmatprep.subr.bf16.mxu0 %v10637_v0  ;;  %v10244_v8 = vld [vmem:[#allocation5 + $0x450] sm:$0xff]  }
0x186e   : > { %v10415_v17 = vpop.eup %10414  ;;  %v6129_v14 = vmax.f32 %v6113_v55, 0.0  ;;  %v6114_v27 = vsub.f32 %v6082_v53, %v6098_v62 }
0x186f   : > { %v6211_v1 = vmul.f32 %v12908_v38, %v6189_v28  ;;  %v6190_v33 = vmul.f32 %v10415_v17, %v6142_v29  ;;  %6401 = vmatmul.mubr.bf16.gmra.mrb[16].mxu0 %v6243_v37 }
0x1870   : > { %v6161_v41 = vadd.f32 1e-05, %v6129_v14  ;;  %v6130_v40 = vmax.f32 %v6114_v27, 0.0  ;;  %6410 = vmatprep.mubr.bf16.mxu0 %v10637_v0 }
0x1871   : > { %v6212_v26 = vmul.f32 %v12908_v38, %v6190_v33  ;;  %v13028_v49 = vadd.f32 %v12919_v50, %v6211_v1 }
0x1872   : > { %10420 = vrsqrt.f32 %v6161_v41  ;;  %v6162_v15 = vadd.f32 1e-05, %v6130_v40 }
0x1873   : > { %v13031_v3 = vadd.f32 %v12919_v50, %v6212_v26 }
0x1874   : > { %v10417_v20 = vpop.eup %10416  ;;  %10422 = vrsqrt.f32 %v6162_v15  ;;  %6734 = vmatpush1.bf16.xpose.msra.mxu0 %v10237_v22 }
0x1875   : > { %v6244_v10 = vpack.c.bf16 %v13031_v3, %v13028_v49  ;;  %v6191_v63 = vmul.f32 %v10417_v20, %v6143_v36  ;;  %6735 = vmatprep.subr.bf16.mxu0 %v10637_v0 }
0x1876   : > { %v10419_v32 = vpop.eup %10418 }
0x1877   : > { %v6213_v48 = vmul.f32 %v12908_v38, %v6191_v63  ;;  %v6192_v18 = vmul.f32 %v10419_v32, %v6144_v45  ;;  %6411 = vmatmul.mubr.bf16.gmra.mrb[20].mxu0 %v6244_v10 }
0x1878   : > { %6420 = vmatprep.mubr.bf16.mxu0 %v10637_v0 }
0x1879   : > { %v6214_v7 = vmul.f32 %v12908_v38, %v6192_v18  ;;  %v13043_v60 = vadd.f32 %v12919_v50, %v6213_v48 }
0x187b   : > { %v13046_v23 = vadd.f32 %v12919_v50, %v6214_v7 }
0x187c   : > { %v10421_v61 = vpop.eup %10420 }
0x187d   : > { %v6245_v12 = vpack.c.bf16 %v13046_v23, %v13043_v60  ;;  %v6193_v25 = vmul.f32 %v10421_v61, %v6145_v57 }
0x187e   : > { %v10423_v47 = vpop.eup %10422 }
0x187f   : > { %v6215_v39 = vmul.f32 %v12908_v38, %v6193_v25  ;;  %v6194_v51 = vmul.f32 %v10423_v47, %v6146_v5  ;;  %6421 = vmatmul.mubr.bf16.gmra.mrb[24].mxu0 %v6245_v12 }
0x1880   : > { %6430 = vmatprep.mubr.bf16.mxu0 %v10637_v0 }
0x1881   : > { %v6216_v24 = vmul.f32 %v12908_v38, %v6194_v51  ;;  %v13056_v42 = vadd.f32 %v12919_v50, %v6215_v39  ;;  %v10238_v38 = vld [vmem:[#allocation5 + $0x420] sm:$0xff]  }
0x1882   : > { %6736 = vmatpush1.bf16.xpose.msra.mxu0 %v10238_v38 }
0x1883   : > { %v13059_v31 = vadd.f32 %v12919_v50, %v6216_v24  ;;  %6737 = vmatprep.subr.bf16.mxu0 %v10637_v0  ;;  %v10239_v50 = vld [vmem:[#allocation5 + $0x428] sm:$0xff]  }
0x1885   : > { %v6246_v56 = vpack.c.bf16 %v13059_v31, %v13056_v42 }
0x1887   : > { %6431 = vmatmul.mubr.bf16.gmra.mrb[28].mxu0 %v6246_v56 }
0x1888   : > { %6763 = vmatprep.mubr.bf16.mxu0 %v10637_v0 }
0x188a   : > { %6738 = vmatpush1.bf16.xpose.msra.mxu0 %v10239_v50  ;;  %v10245_v50 = vld [vmem:[#allocation5 + $0x458] sm:$0xff]  }
0x188b   : > { %6739 = vmatprep.subr.bf16.mxu0 %v10637_v0 }
0x1892   : > { %6740 = vmatpush1.bf16.xpose.msra.mxu0 %v10240_v35  ;;  %v10246_v35 = vld [vmem:[#allocation7 + $0xd0] sm:$0xff]  }
0x1893   : > { %6741 = vmatprep.subr.bf16.mxu0 %v10637_v0  ;;  %9906 = vmatprep.subr.bf16.mxu1 %v10246_v35 }
0x189a   : > { %6742 = vmatpush1.bf16.xpose.msra.mxu0 %v10241_v16  ;;  %v10247_v16 = vld [vmem:[#allocation7 + $0xd8] sm:$0xff]  }
0x189b   : > { %6743 = vmatprep.subr.bf16.mxu0 %v10637_v0 }
0x18a2   : > { %6744 = vmatpush1.bf16.xpose.msra.mxu0 %v10242_v2  ;;  %v9339_v2 = vld [vmem:[%s13917_s2 + $0xc] sm:$0x1] }
0x18a3   : > { %6745 = vmatprep.subr.bf16.mxu0 %v10637_v0 }
0x18aa   : > { %6746 = vmatpush1.bf16.xpose.msra.mxu0 %v10243_v58  ;;  %v6443_v58 = vunpack.c.l.bf16 %v9339_v2 }
0x18ab   : > { %6747 = vmatprep.subr.bf16.mxu0 %v10637_v0 }
0x18b2   : > { %6748 = vmatpush1.bf16.xpose.msra.mxu0 %v10244_v8  ;;  %v13112_v8 = vrot.slane %v6443_v58, %v10953_v30 }
0x18b3   : > { %6749 = vmatprep.subr.bf16.mxu0 %v10637_v0 }
0x18ba   : > { %6750 = vmatpush1.bf16.xpose.msra.mxu0 %v10245_v50 }
0x1922   : > { %v13072_v6 = vpop.f32.mrb[0].mxu0 }
0x1923   : > { %v6364_v34 = vpop.f32.mrb[1].mxu0 }
0x1924   : > { %v13075_v54 = vpop.f32.mrb[2].mxu0 }
0x1925   : > { %v6368_v62 = vpop.f32.mrb[3].mxu0 }
0x1926   : > { %v6464_v55 = vpack.c.bf16 %v6368_v62, %v6364_v34  ;;  %v6448_v62 = vadd.f32 %v13112_v8, %v13072_v6 }
0x1928   : > { %9890 = vmatprep.mubr.msk.bf16.mxu1 %vm565_vm0, %v6464_v55 }
0x192a   : > { %v6372_v53 = vpop.f32.mrb[4].mxu0 }
0x192b   : > { %v6374_v37 = vpop.f32.mrb[5].mxu0  ;;  %v6450_v34 = vadd.f32 %v13112_v8, %v6372_v53 }
0x192c   : > { %v6376_v29 = vpop.f32.mrb[6].mxu0 }
0x192d   : > { %v6378_v28 = vpop.f32.mrb[7].mxu0 }
0x192e   : > { %v6465_v17 = vpack.c.bf16 %v6378_v28, %v6374_v37  ;;  %v6451_v37 = vadd.f32 %v13112_v8, %v6376_v29 }
0x1930   : > { %9891 = vmatmul.mubr.msk.bf16.vlgmr.msra.gmra.mrb[64].mxu1 %vm565_vm0, %v6465_v17 }
0x1931   : > { %9907 = vmatpush3.bf16.msra.mxu1 %v10246_v35 }
0x1932   : > { %v13079_v14 = vpop.f32.mrb[8].mxu0  ;;  %9908 = vmatprep.subr.bf16.mxu1 %v10247_v16 }
0x1933   : > { %v6384_v27 = vpop.f32.mrb[9].mxu0  ;;  %v6452_v29 = vadd.f32 %v13112_v8, %v13079_v14 }
0x1934   : > { %v13081_v1 = vpop.f32.mrb[10].mxu0 }
0x1935   : > { %v6388_v33 = vpop.f32.mrb[11].mxu0  ;;  %9909 = vmatpush3.bf16.msra.mxu1 %v10247_v16 }
0x1936   : > { %v6466_v41 = vpack.c.bf16 %v6388_v33, %v6384_v27  ;;  %7134 = vmatprep.subr.bf16.mxu1 %v10637_v0  ;;  %v6449_v27 = vadd.f32 %v13112_v8, %v13075_v54 }
0x1938   : > { %9894 = vmatprep.mubr.msk.bf16.mxu1 %vm565_vm0, %v6466_v41 }
0x193a   : > { %v6392_v40 = vpop.f32.mrb[12].mxu0 }
0x193b   : > { %v6394_v26 = vpop.f32.mrb[13].mxu0  ;;  %v6454_v6 = vadd.f32 %v13112_v8, %v6392_v40 }
0x193c   : > { %v13084_v15 = vpop.f32.mrb[14].mxu0 }
0x193d   : > { %v6398_v36 = vpop.f32.mrb[15].mxu0 }
0x193e   : > { %v6467_v20 = vpack.c.bf16 %v6398_v36, %v6394_v26 }
0x1940   : > { %9895 = vmatmul.mubr.msk.bf16.gmra.mrb[68].mxu1 %vm565_vm0, %v6467_v20 }
0x1942   : > { %v13087_v10 = vpop.f32.mrb[16].mxu0 }
0x1943   : > { %v6404_v45 = vpop.f32.mrb[17].mxu0 }
0x1944   : > { %v13089_v63 = vpop.f32.mrb[18].mxu0 }
0x1945   : > { %v6408_v32 = vpop.f32.mrb[19].mxu0 }
0x1946   : > { %v6468_v48 = vpack.c.bf16 %v6408_v32, %v6404_v45 }
0x1948   : > { %9898 = vmatprep.mubr.msk.bf16.mxu1 %vm565_vm0, %v6468_v48 }
0x194a   : > { %v13092_v18 = vpop.f32.mrb[20].mxu0 }
0x194b   : > { %v6414_v7 = vpop.f32.mrb[21].mxu0 }
0x194c   : > { %v13094_v57 = vpop.f32.mrb[22].mxu0 }
0x194d   : > { %v6418_v61 = vpop.f32.mrb[23].mxu0 }
0x194e   : > { %v6469_v12 = vpack.c.bf16 %v6418_v61, %v6414_v7 }
0x1950   : > { %9899 = vmatmul.mubr.msk.bf16.gmra.mrb[72].mxu1 %vm565_vm0, %v6469_v12  ;;  %v6455_v12 = vadd.f32 %v13112_v8, %v13084_v15  ;;  %v6456_v15 = vadd.f32 %v13112_v8, %v13087_v10 }
0x1952   : > { %v13097_v5 = vpop.f32.mrb[24].mxu0 }
0x1953   : > { %v6424_v25 = vpop.f32.mrb[25].mxu0 }
0x1954   : > { %v13099_v47 = vpop.f32.mrb[26].mxu0 }
0x1955   : > { %v6428_v39 = vpop.f32.mrb[27].mxu0 }
0x1956   : > { %v6470_v51 = vpack.c.bf16 %v6428_v39, %v6424_v25 }
0x1958   : > { %9902 = vmatprep.mubr.msk.bf16.mxu1 %vm565_vm0, %v6470_v51  ;;  %v6453_v51 = vadd.f32 %v13112_v8, %v13081_v1  ;;  %v6458_v1 = vadd.f32 %v13112_v8, %v13092_v18 }
0x195a   : > { %v13102_v24 = vpop.f32.mrb[28].mxu0 }
0x195b   : > { %v6434_v56 = vpop.f32.mrb[29].mxu0 }
0x195c   : > { %v13104_v13 = vpop.f32.mrb[30].mxu0 }
0x195d   : > { %v6438_v22 = vpop.f32.mrb[31].mxu0 }
0x195e   : > { %v6471_v38 = vpack.c.bf16 %v6438_v22, %v6434_v56 }
0x1960   : > { %9903 = vmatmul.mubr.msk.bf16.gmra.mrb[76].mxu1 %vm565_vm0, %v6471_v38 }
0x1a03   : > { %v9892_v55 = vpop.f32.mrb[64].mxu1 }
0x1a04   : > { %v6612_v28 = vadd.f32 %v9892_v55, %v6450_v34  ;;  %v6547_v17 = vpop.f32.mrb[65].mxu1  ;;  %v6459_v55 = vadd.f32 %v13112_v8, %v13094_v57  ;;  %v6460_v57 = vadd.f32 %v13112_v8, %v13097_v5 }
0x1a05   : > { %v6610_v33 = vadd.f32 %v6547_v17, %v6448_v62  ;;  %v9893_v41 = vpop.f32.mrb[66].mxu1  ;;  %v6457_v17 = vadd.f32 %v13112_v8, %v13089_v63  ;;  %v6462_v63 = vadd.f32 %v13112_v8, %v13102_v24 }
0x1a06   : > { %v6613_v26 = vadd.f32 %v9893_v41, %v6451_v37  ;;  %v6550_v36 = vpop.f32.mrb[67].mxu1  ;;  %v6628_v45 = vmax.f32 %v6612_v28, 0.0 }
0x1a07   : > { %v6611_v20 = vadd.f32 %v6550_v36, %v6449_v27  ;;  %v6626_v48 = vmax.f32 %v6610_v33, 0.0 }
0x1a08   : > { %v6629_v32 = vmax.f32 %v6613_v26, 0.0 }
0x1a09   : > { %v6627_v53 = vmax.f32 %v6611_v20, 0.0 }
0x1a0a   : > { %v6643_v7 = vpack.c.bf16 %v6629_v32, %v6628_v45 }
0x1a0b   : > { %v6642_v61 = vpack.c.bf16 %v6627_v53, %v6626_v48 }
0x1a0d   : > { %6764 = vmatmul.mubr.bf16.vlgmr.msra.gmra.mrb[32].mxu0 %v6642_v61 }
0x1a0e   : > { %6773 = vmatprep.mubr.bf16.mxu0 %v10637_v0 }
0x1a13   : > { %v9896_v54 = vpop.f32.mrb[68].mxu1 }
0x1a14   : > { %v6616_v25 = vadd.f32 %v9896_v54, %v6454_v6  ;;  %v6563_v39 = vpop.f32.mrb[69].mxu1 }
0x1a15   : > { %v6614_v56 = vadd.f32 %v6563_v39, %v6452_v29  ;;  %v9897_v22 = vpop.f32.mrb[70].mxu1  ;;  %6774 = vmatmul.mubr.bf16.gmra.mrb[36].mxu0 %v6643_v7  ;;  %v6463_v7 = vadd.f32 %v13112_v8, %v13104_v13  ;;  %v6461_v29 = vadd.f32 %v13112_v8, %v13099_v47 }
0x1a16   : > { %v6617_v38 = vadd.f32 %v9897_v22, %v6455_v12  ;;  %v6566_v50 = vpop.f32.mrb[71].mxu1  ;;  %6783 = vmatprep.mubr.bf16.mxu0 %v10637_v0  ;;  %v6632_v35 = vmax.f32 %v6616_v25, 0.0 }
0x1a17   : > { %v6615_v40 = vadd.f32 %v6566_v50, %v6453_v51  ;;  %v6630_v14 = vmax.f32 %v6614_v56, 0.0 }
0x1a18   : > { %v6633_v16 = vmax.f32 %v6617_v38, 0.0 }
0x1a19   : > { %v6631_v2 = vmax.f32 %v6615_v40, 0.0 }
0x1a1a   : > { %v6645_v58 = vpack.c.bf16 %v6633_v16, %v6632_v35 }
0x1a1b   : > { %v6644_v34 = vpack.c.bf16 %v6631_v2, %v6630_v14 }
0x1a1d   : > { %6784 = vmatmul.mubr.bf16.gmra.mrb[40].mxu0 %v6644_v34  ;;  %v10248_v34 = vld [vmem:[#allocation5 + $0x460] sm:$0xff]  }
0x1a1e   : > { %6793 = vmatprep.mubr.bf16.mxu0 %v10637_v0 }
0x1a23   : > { %v9900_v62 = vpop.f32.mrb[72].mxu1 }
0x1a24   : > { %v6620_v37 = vadd.f32 %v9900_v62, %v6458_v1  ;;  %v6579_v28 = vpop.f32.mrb[73].mxu1 }
0x1a25   : > { %v6618_v27 = vadd.f32 %v6579_v28, %v6456_v15  ;;  %v9901_v33 = vpop.f32.mrb[74].mxu1  ;;  %6794 = vmatmul.mubr.bf16.gmra.mrb[44].mxu0 %v6645_v58  ;;  %v10249_v28 = vld [vmem:[#allocation5 + $0x468] sm:$0xff]  }
0x1a26   : > { %v6621_v41 = vadd.f32 %v9901_v33, %v6459_v55  ;;  %v6582_v26 = vpop.f32.mrb[75].mxu1  ;;  %6803 = vmatprep.mubr.bf16.mxu0 %v10637_v0  ;;  %v6636_v36 = vmax.f32 %v6620_v37, 0.0 }
0x1a27   : > { %v6619_v18 = vadd.f32 %v6582_v26, %v6457_v17  ;;  %v6634_v10 = vmax.f32 %v6618_v27, 0.0 }
0x1a28   : > { %v6637_v20 = vmax.f32 %v6621_v41, 0.0 }
0x1a29   : > { %v6635_v45 = vmax.f32 %v6619_v18, 0.0  ;;  %v10250_v18 = vld [vmem:[#allocation5 + $0x470] sm:$0xff]  }
0x1a2a   : > { %v6647_v32 = vpack.c.bf16 %v6637_v20, %v6636_v36 }
0x1a2b   : > { %v6646_v48 = vpack.c.bf16 %v6635_v45, %v6634_v10 }
0x1a2d   : > { %6804 = vmatmul.mubr.bf16.gmra.mrb[48].mxu0 %v6646_v48  ;;  %v10251_v48 = vld [vmem:[#allocation5 + $0x478] sm:$0xff]  }
0x1a2e   : > { %6813 = vmatprep.mubr.bf16.mxu0 %v10637_v0 }
0x1a33   : > { %v9904_v53 = vpop.f32.mrb[76].mxu1 }
0x1a34   : > { %v6624_v61 = vadd.f32 %v9904_v53, %v6462_v63  ;;  %v6595_v6 = vpop.f32.mrb[77].mxu1 }
0x1a35   : > { %v6622_v54 = vadd.f32 %v6595_v6, %v6460_v57  ;;  %v9905_v12 = vpop.f32.mrb[78].mxu1  ;;  %6814 = vmatmul.mubr.bf16.gmra.mrb[52].mxu0 %v6647_v32  ;;  %v10252_v6 = vld [vmem:[#allocation5 + $0x480] sm:$0xff]  }
0x1a36   : > { %v6625_v25 = vadd.f32 %v9905_v12, %v6463_v7  ;;  %v6598_v39 = vpop.f32.mrb[79].mxu1  ;;  %6823 = vmatprep.mubr.bf16.mxu0 %v10637_v0  ;;  %v6640_v51 = vmax.f32 %v6624_v61, 0.0 }
0x1a37   : > { %v6623_v24 = vadd.f32 %v6598_v39, %v6461_v29  ;;  %v6638_v5 = vmax.f32 %v6622_v54, 0.0 }
0x1a38   : > { %v6641_v56 = vmax.f32 %v6625_v25, 0.0 }
0x1a39   : > { %v6639_v22 = vmax.f32 %v6623_v24, 0.0  ;;  %v10253_v24 = vld [vmem:[#allocation5 + $0x488] sm:$0xff]  }
0x1a3a   : > { %v6649_v38 = vpack.c.bf16 %v6641_v56, %v6640_v51 }
0x1a3b   : > { %v6648_v50 = vpack.c.bf16 %v6639_v22, %v6638_v5 }
0x1a3d   : > { %6824 = vmatmul.mubr.bf16.gmra.mrb[56].mxu0 %v6648_v50  ;;  %v10254_v50 = vld [vmem:[#allocation5 + $0x490] sm:$0xff]  }
0x1a3e   : > { %6833 = vmatprep.mubr.bf16.mxu0 %v10637_v0 }
0x1a45   : > { %6834 = vmatmul.mubr.bf16.gmra.mrb[60].mxu0 %v6649_v38 }
0x1ae0   : > { %v13150_v13 = vpop.f32.mrb[32].mxu0 }
0x1ae1   : > { %v6767_v47 = vpop.f32.mrb[33].mxu0 }
0x1ae2   : > { %v13152_v8 = vpop.f32.mrb[34].mxu0 }
0x1ae3   : > { %v6771_v40 = vpop.f32.mrb[35].mxu0 }
0x1ae4   : > { %v6867_v35 = vpack.c.bf16 %v6771_v40, %v6767_v47  ;;  %v10255_v40 = vld [vmem:[#allocation5 + $0x498] sm:$0xff]  }
0x1ae6   : > { %9910 = vmatprep.mubr.msk.bf16.mxu1 %vm565_vm0, %v6867_v35  ;;  %v10256_v35 = vld [vmem:[#allocation5 + $0x4a0] sm:$0xff]  }
0x1ae8   : > { %v13155_v16 = vpop.f32.mrb[36].mxu0 }
0x1ae9   : > { %v6777_v14 = vpop.f32.mrb[37].mxu0 }
0x1aea   : > { %v13157_v2 = vpop.f32.mrb[38].mxu0 }
0x1aeb   : > { %v6781_v58 = vpop.f32.mrb[39].mxu0 }
0x1aec   : > { %v6868_v1 = vpack.c.bf16 %v6781_v58, %v6777_v14  ;;  %v10257_v14 = vld [vmem:[#allocation5 + $0x4a8] sm:$0xff]   ;;  %v10258_v58 = vld [vmem:[#allocation7 + $0xe0] sm:$0xff]  }
0x1aed   : > { %9926 = vmatprep.subr.bf16.mxu0 %v10258_v58 }
0x1aee   : > { %9911 = vmatmul.mubr.msk.bf16.vlgmr.msra.gmra.mrb[80].mxu1 %vm565_vm0, %v6868_v1  ;;  %9927 = vmatpush3.bf16.msra.mxu0 %v10258_v58  ;;  %v9360_v1 = vld [vmem:[%s13917_s2 + $0xd] sm:$0x1] }
0x1aef   : > { %7135 = vmatpush1.bf16.xpose.msra.mxu1 %v10248_v34  ;;  %v10259_v34 = vld [vmem:[#allocation7 + $0xe8] sm:$0xff]  }
0x1af0   : > { %v13160_v15 = vpop.f32.mrb[40].mxu0  ;;  %7136 = vmatprep.subr.bf16.mxu1 %v10637_v0  ;;  %9928 = vmatprep.subr.bf16.mxu0 %v10259_v34 }
0x1af1   : > { %v6787_v62 = vpop.f32.mrb[41].mxu0 }
0x1af2   : > { %v13163_v55 = vpop.f32.mrb[42].mxu0  ;;  %9929 = vmatpush3.bf16.msra.mxu0 %v10259_v34 }
0x1af3   : > { %v6791_v37 = vpop.f32.mrb[43].mxu0 }
0x1af4   : > { %v6869_v17 = vpack.c.bf16 %v6791_v37, %v6787_v62  ;;  %v6846_v62 = vunpack.c.l.bf16 %v9360_v1 }
0x1af6   : > { %9914 = vmatprep.mubr.msk.bf16.mxu1 %vm565_vm0, %v6869_v17  ;;  %v13205_v37 = vrot.slane %v6846_v62, %v10953_v30 }
0x1af7   : > { %7137 = vmatpush1.bf16.xpose.msra.mxu1 %v10249_v28 }
0x1af8   : > { %v13166_v27 = vpop.f32.mrb[44].mxu0  ;;  %7138 = vmatprep.subr.bf16.mxu1 %v10637_v0  ;;  %v6853_v28 = vadd.f32 %v13205_v37, %v13155_v16  ;;  %v6851_v17 = vadd.f32 %v13205_v37, %v13150_v13 }
0x1af9   : > { %v6797_v33 = vpop.f32.mrb[45].mxu0 }
0x1afa   : > { %v13169_v41 = vpop.f32.mrb[46].mxu0 }
0x1afb   : > { %v6801_v26 = vpop.f32.mrb[47].mxu0 }
0x1afc   : > { %v6870_v36 = vpack.c.bf16 %v6801_v26, %v6797_v33  ;;  %v6854_v26 = vadd.f32 %v13205_v37, %v13157_v2  ;;  %v6857_v2 = vadd.f32 %v13205_v37, %v13166_v27 }
0x1afe   : > { %9915 = vmatmul.mubr.msk.bf16.gmra.mrb[84].mxu1 %vm565_vm0, %v6870_v36 }
0x1aff   : > { %7139 = vmatpush1.bf16.xpose.msra.mxu1 %v10250_v18 }
0x1b00   : > { %v13172_v20 = vpop.f32.mrb[48].mxu0  ;;  %7140 = vmatprep.subr.bf16.mxu1 %v10637_v0 }
0x1b01   : > { %v6807_v10 = vpop.f32.mrb[49].mxu0 }
0x1b02   : > { %v13175_v45 = vpop.f32.mrb[50].mxu0 }
0x1b03   : > { %v6811_v32 = vpop.f32.mrb[51].mxu0 }
0x1b04   : > { %v6871_v63 = vpack.c.bf16 %v6811_v32, %v6807_v10  ;;  %v6852_v10 = vadd.f32 %v13205_v37, %v13152_v8  ;;  %v6855_v8 = vadd.f32 %v13205_v37, %v13160_v15 }
0x1b06   : > { %9918 = vmatprep.mubr.msk.bf16.mxu1 %vm565_vm0, %v6871_v63 }
0x1b07   : > { %7141 = vmatpush1.bf16.xpose.msra.mxu1 %v10251_v48 }
0x1b08   : > { %v13178_v57 = vpop.f32.mrb[52].mxu0  ;;  %7142 = vmatprep.subr.bf16.mxu1 %v10637_v0 }
0x1b09   : > { %v6817_v53 = vpop.f32.mrb[53].mxu0 }
0x1b0a   : > { %v13181_v7 = vpop.f32.mrb[54].mxu0 }
0x1b0b   : > { %v6821_v61 = vpop.f32.mrb[55].mxu0 }
0x1b0c   : > { %v6872_v29 = vpack.c.bf16 %v6821_v61, %v6817_v53 }
0x1b0e   : > { %9919 = vmatmul.mubr.msk.bf16.gmra.mrb[88].mxu1 %vm565_vm0, %v6872_v29 }
0x1b0f   : > { %7143 = vmatpush1.bf16.xpose.msra.mxu1 %v10252_v6 }
0x1b10   : > { %v13184_v54 = vpop.f32.mrb[56].mxu0  ;;  %7144 = vmatprep.subr.bf16.mxu1 %v10637_v0 }
0x1b11   : > { %v6827_v12 = vpop.f32.mrb[57].mxu0 }
0x1b12   : > { %v13187_v25 = vpop.f32.mrb[58].mxu0 }
0x1b13   : > { %v6831_v39 = vpop.f32.mrb[59].mxu0 }
0x1b14   : > { %v6873_v51 = vpack.c.bf16 %v6831_v39, %v6827_v12 }
0x1b16   : > { %9922 = vmatprep.mubr.msk.bf16.mxu1 %vm565_vm0, %v6873_v51  ;;  %v6858_v51 = vadd.f32 %v13205_v37, %v13169_v41  ;;  %v6859_v41 = vadd.f32 %v13205_v37, %v13172_v20 }
0x1b17   : > { %7145 = vmatpush1.bf16.xpose.msra.mxu1 %v10253_v24 }
0x1b18   : > { %v13190_v56 = vpop.f32.mrb[60].mxu0  ;;  %7146 = vmatprep.subr.bf16.mxu1 %v10637_v0 }
0x1b19   : > { %v6837_v5 = vpop.f32.mrb[61].mxu0 }
0x1b1a   : > { %v13193_v22 = vpop.f32.mrb[62].mxu0 }
0x1b1b   : > { %v6841_v38 = vpop.f32.mrb[63].mxu0 }
0x1b1c   : > { %v6874_v47 = vpack.c.bf16 %v6841_v38, %v6837_v5 }
0x1b1e   : > { %9923 = vmatmul.mubr.msk.bf16.gmra.mrb[92].mxu1 %vm565_vm0, %v6874_v47 }
0x1b1f   : > { %7147 = vmatpush1.bf16.xpose.msra.mxu1 %v10254_v50  ;;  %7166 = vmatprep.mubr.bf16.mxu1 %v10637_v0  ;;  %v6856_v50 = vadd.f32 %v13205_v37, %v13163_v55  ;;  %v6861_v55 = vadd.f32 %v13205_v37, %v13178_v57 }
0x1b20   : > { %7148 = vmatprep.subr.bf16.mxu1 %v10637_v0 }
0x1b27   : > { %7149 = vmatpush1.bf16.xpose.msra.mxu1 %v10255_v40 }
0x1b28   : > { %7150 = vmatprep.subr.bf16.mxu1 %v10637_v0 }
0x1b2f   : > { %7151 = vmatpush1.bf16.xpose.msra.mxu1 %v10256_v35 }
0x1b30   : > { %7152 = vmatprep.subr.bf16.mxu1 %v10637_v0 }
0x1b37   : > { %7153 = vmatpush1.bf16.xpose.msra.mxu1 %v10257_v14 }
0x1b38   : > { %7809 = vmatprep.subr.bf16.mxu1 %v10637_v0 }
0x1bc1   : > { %v9912_v33 = vpop.f32.mrb[80].mxu1 }
0x1bc2   : > { %v7015_v18 = vadd.f32 %v9912_v33, %v6853_v28  ;;  %v6950_v36 = vpop.f32.mrb[81].mxu1  ;;  %v6862_v33 = vadd.f32 %v13205_v37, %v13181_v7  ;;  %v6863_v7 = vadd.f32 %v13205_v37, %v13184_v54 }
0x1bc3   : > { %v7013_v32 = vadd.f32 %v6950_v36, %v6851_v17  ;;  %v9913_v48 = vpop.f32.mrb[82].mxu1  ;;  %v6860_v36 = vadd.f32 %v13205_v37, %v13175_v45  ;;  %v6865_v45 = vadd.f32 %v13205_v37, %v13190_v56 }
0x1bc4   : > { %v7016_v63 = vadd.f32 %v9913_v48, %v6854_v26  ;;  %v6953_v53 = vpop.f32.mrb[83].mxu1  ;;  %v7031_v6 = vmax.f32 %v7015_v18, 0.0 }
0x1bc5   : > { %v7014_v61 = vadd.f32 %v6953_v53, %v6852_v10  ;;  %v7029_v16 = vmax.f32 %v7013_v32, 0.0 }
0x1bc6   : > { %v7032_v29 = vmax.f32 %v7016_v63, 0.0 }
0x1bc7   : > { %v7030_v12 = vmax.f32 %v7014_v61, 0.0 }
0x1bc8   : > { %v7046_v39 = vpack.c.bf16 %v7032_v29, %v7031_v6 }
0x1bc9   : > { %v7045_v13 = vpack.c.bf16 %v7030_v12, %v7029_v16 }
0x1bcb   : > { %7167 = vmatmul.mubr.bf16.vlgmr.msra.gmra.mrb[96].mxu1 %v7045_v13 }
0x1bcc   : > { %7176 = vmatprep.mubr.bf16.mxu1 %v10637_v0 }
0x1bd1   : > { %v9916_v24 = vpop.f32.mrb[84].mxu1 }
0x1bd2   : > { %v7019_v5 = vadd.f32 %v9916_v24, %v6857_v2  ;;  %v6966_v38 = vpop.f32.mrb[85].mxu1 }
0x1bd3   : > { %v7017_v47 = vadd.f32 %v6966_v38, %v6855_v8  ;;  %v9917_v40 = vpop.f32.mrb[86].mxu1  ;;  %7177 = vmatmul.mubr.bf16.gmra.mrb[100].mxu1 %v7046_v39  ;;  %v6866_v39 = vadd.f32 %v13205_v37, %v13193_v22  ;;  %v6864_v8 = vadd.f32 %v13205_v37, %v13187_v25 }
0x1bd4   : > { %v7020_v35 = vadd.f32 %v9917_v40, %v6858_v51  ;;  %v6969_v14 = vpop.f32.mrb[87].mxu1  ;;  %7186 = vmatprep.mubr.bf16.mxu1 %v10637_v0  ;;  %v7035_v58 = vmax.f32 %v7019_v5, 0.0 }
0x1bd5   : > { %v7018_v27 = vadd.f32 %v6969_v14, %v6856_v50  ;;  %v7033_v15 = vmax.f32 %v7017_v47, 0.0 }
0x1bd6   : > { %v7036_v34 = vmax.f32 %v7020_v35, 0.0 }
0x1bd7   : > { %v7034_v1 = vmax.f32 %v7018_v27, 0.0 }
0x1bd8   : > { %v7048_v62 = vpack.c.bf16 %v7036_v34, %v7035_v58 }
0x1bd9   : > { %v7047_v28 = vpack.c.bf16 %v7034_v1, %v7033_v15 }
0x1bdb   : > { %7187 = vmatmul.mubr.bf16.gmra.mrb[104].mxu1 %v7047_v28 }
0x1bdc   : > { %7196 = vmatprep.mubr.bf16.mxu1 %v10637_v0 }
0x1be1   : > { %v9920_v17 = vpop.f32.mrb[88].mxu1 }
0x1be2   : > { %v7023_v26 = vadd.f32 %v9920_v17, %v6861_v55  ;;  %v6982_v18 = vpop.f32.mrb[89].mxu1 }
0x1be3   : > { %v7021_v10 = vadd.f32 %v6982_v18, %v6859_v41  ;;  %v9921_v32 = vpop.f32.mrb[90].mxu1  ;;  %7197 = vmatmul.mubr.bf16.gmra.mrb[108].mxu1 %v7048_v62 }
0x1be4   : > { %v7024_v48 = vadd.f32 %v9921_v32, %v6862_v33  ;;  %v6985_v63 = vpop.f32.mrb[91].mxu1  ;;  %7206 = vmatprep.mubr.bf16.mxu1 %v10637_v0  ;;  %v7039_v53 = vmax.f32 %v7023_v26, 0.0 }
0x1be5   : > { %v7022_v57 = vadd.f32 %v6985_v63, %v6860_v36  ;;  %v7037_v20 = vmax.f32 %v7021_v10, 0.0 }
0x1be6   : > { %v7040_v61 = vmax.f32 %v7024_v48, 0.0 }
0x1be7   : > { %v7038_v6 = vmax.f32 %v7022_v57, 0.0 }
0x1be8   : > { %v7050_v29 = vpack.c.bf16 %v7040_v61, %v7039_v53 }
0x1be9   : > { %v7049_v16 = vpack.c.bf16 %v7038_v6, %v7037_v20 }
0x1beb   : > { %7207 = vmatmul.mubr.bf16.gmra.mrb[112].mxu1 %v7049_v16 }
0x1bec   : > { %7216 = vmatprep.mubr.bf16.mxu1 %v10637_v0 }
0x1bf1   : > { %v9924_v12 = vpop.f32.mrb[92].mxu1 }
0x1bf2   : > { %v7027_v13 = vadd.f32 %v9924_v12, %v6865_v45  ;;  %v6998_v2 = vpop.f32.mrb[93].mxu1 }
0x1bf3   : > { %v7025_v24 = vadd.f32 %v6998_v2, %v6863_v7  ;;  %v9925_v51 = vpop.f32.mrb[94].mxu1  ;;  %7217 = vmatmul.mubr.bf16.gmra.mrb[116].mxu1 %v7050_v29 }
0x1bf4   : > { %v7028_v5 = vadd.f32 %v9925_v51, %v6866_v39  ;;  %v7001_v38 = vpop.f32.mrb[95].mxu1  ;;  %7226 = vmatprep.mubr.bf16.mxu1 %v10637_v0  ;;  %v7043_v50 = vmax.f32 %v7027_v13, 0.0 }
0x1bf5   : > { %v7026_v56 = vadd.f32 %v7001_v38, %v6864_v8  ;;  %v7041_v54 = vmax.f32 %v7025_v24, 0.0 }
0x1bf6   : > { %v7044_v47 = vmax.f32 %v7028_v5, 0.0 }
0x1bf7   : > { %v7042_v40 = vmax.f32 %v7026_v56, 0.0 }
0x1bf8   : > { %v7052_v35 = vpack.c.bf16 %v7044_v47, %v7043_v50  ;;  %v10260_v50 = vld [vmem:[#allocation5 + $0x4b0] sm:$0xff]   ;;  %v10261_v47 = vld [vmem:[#allocation5 + $0x4b8] sm:$0xff]  }
0x1bf9   : > { %v7051_v14 = vpack.c.bf16 %v7042_v40, %v7041_v54  ;;  %7810 = vmatpush1.bf16.xpose.msra.mxu1 %v10260_v50  ;;  %v10262_v54 = vld [vmem:[#allocation5 + $0x4c0] sm:$0xff]   ;;  %v10263_v40 = vld [vmem:[#allocation5 + $0x4c8] sm:$0xff]  }
0x1bfa   : > { %7811 = vmatprep.subr.bf16.mxu1 %v10637_v0 }
0x1bfb   : > { %7227 = vmatmul.mubr.bf16.gmra.mrb[120].mxu1 %v7051_v14  ;;  %v10265_v14 = vld [vmem:[#allocation5 + $0x4d8] sm:$0xff]  }
0x1bfc   : > { %7236 = vmatprep.mubr.bf16.mxu1 %v10637_v0 }
0x1c01   : > { %7812 = vmatpush1.bf16.xpose.msra.mxu1 %v10261_v47 }
0x1c02   : > { %7813 = vmatprep.subr.bf16.mxu1 %v10637_v0 }
0x1c03   : > { %7237 = vmatmul.mubr.bf16.gmra.mrb[124].mxu1 %v7052_v35  ;;  %v10264_v35 = vld [vmem:[#allocation5 + $0x4d0] sm:$0xff]  }
0x1c04   : > { %7841 = vmatprep.mubr.bf16.mxu1 %v10637_v0 }
0x1c09   : > { %7814 = vmatpush1.bf16.xpose.msra.mxu1 %v10262_v54  ;;  %v10266_v54 = vld [vmem:[#allocation5 + $0x4e0] sm:$0xff]  }
0x1c0a   : > { %7815 = vmatprep.subr.bf16.mxu1 %v10637_v0 }
0x1c11   : > { %7816 = vmatpush1.bf16.xpose.msra.mxu1 %v10263_v40 }
0x1c12   : > { %7817 = vmatprep.subr.bf16.mxu1 %v10637_v0 }
0x1c19   : > { %7818 = vmatpush1.bf16.xpose.msra.mxu1 %v10264_v35 }
0x1c1a   : > { %7819 = vmatprep.subr.bf16.mxu1 %v10637_v0 }
0x1c21   : > { %7820 = vmatpush1.bf16.xpose.msra.mxu1 %v10265_v14 }
0x1c22   : > { %7821 = vmatprep.subr.bf16.mxu1 %v10637_v0 }
0x1c29   : > { %7822 = vmatpush1.bf16.xpose.msra.mxu1 %v10266_v54 }
0x1c2a   : > { %7823 = vmatprep.subr.bf16.mxu1 %v10637_v0 }
0x1c9e   : > { %v13247_v25 = vpop.f32.mrb[96].mxu1 }
0x1c9f   : > { %v7170_v22 = vpop.f32.mrb[97].mxu1 }
0x1ca0   : > { %v13249_v37 = vpop.f32.mrb[98].mxu1 }
0x1ca1   : > { %v7174_v27 = vpop.f32.mrb[99].mxu1 }
0x1ca2   : > { %v7270_v58 = vpack.c.bf16 %v7174_v27, %v7170_v22  ;;  %v9381_v22 = vld [vmem:[%s13917_s2 + $0xe] sm:$0x1] }
0x1ca3   : > { %v7249_v27 = vunpack.c.l.bf16 %v9381_v22 }
0x1ca4   : > { %9930 = vmatprep.mubr.msk.bf16.mxu0 %vm565_vm0, %v7270_v58 }
0x1ca5   : > { %v13297_v58 = vrot.slane %v7249_v27, %v10953_v30 }
0x1ca6   : > { %v13252_v34 = vpop.f32.mrb[100].mxu1 }
0x1ca7   : > { %v7180_v15 = vpop.f32.mrb[101].mxu1 }
0x1ca8   : > { %v13254_v1 = vpop.f32.mrb[102].mxu1 }
0x1ca9   : > { %v7184_v62 = vpop.f32.mrb[103].mxu1 }
0x1caa   : > { %v7271_v28 = vpack.c.bf16 %v7184_v62, %v7180_v15  ;;  %v7256_v15 = vadd.f32 %v13297_v58, %v13252_v34  ;;  %v7254_v62 = vadd.f32 %v13297_v58, %v13247_v25 }
0x1cac   : > { %9931 = vmatmul.mubr.msk.bf16.vlgmr.msra.gmra.mrb[64].mxu0 %vm565_vm0, %v7271_v28 }
0x1cae   : > { %v13257_v55 = vpop.f32.mrb[104].mxu1 }
0x1caf   : > { %v7190_v41 = vpop.f32.mrb[105].mxu1 }
0x1cb0   : > { %v13259_v17 = vpop.f32.mrb[106].mxu1 }
0x1cb1   : > { %v7194_v33 = vpop.f32.mrb[107].mxu1 }
0x1cb2   : > { %v7272_v26 = vpack.c.bf16 %v7194_v33, %v7190_v41  ;;  %v7257_v41 = vadd.f32 %v13297_v58, %v13254_v1 }
0x1cb4   : > { %9934 = vmatprep.mubr.msk.bf16.mxu0 %vm565_vm0, %v7272_v26 }
0x1cb6   : > { %v13262_v18 = vpop.f32.mrb[108].mxu1 }
0x1cb7   : > { %v7200_v36 = vpop.f32.mrb[109].mxu1 }
0x1cb8   : > { %v13264_v10 = vpop.f32.mrb[110].mxu1 }
0x1cb9   : > { %v7204_v32 = vpop.f32.mrb[111].mxu1 }
0x1cba   : > { %v7273_v48 = vpack.c.bf16 %v7204_v32, %v7200_v36  ;;  %v7255_v36 = vadd.f32 %v13297_v58, %v13249_v37 }
0x1cbc   : > { %9935 = vmatmul.mubr.msk.bf16.gmra.mrb[68].mxu0 %vm565_vm0, %v7273_v48 }
0x1cbe   : > { %v13267_v63 = vpop.f32.mrb[112].mxu1 }
0x1cbf   : > { %v7210_v57 = vpop.f32.mrb[113].mxu1  ;;  %v7262_v22 = vadd.f32 %v13297_v58, %v13267_v63 }
0x1cc0   : > { %v13269_v53 = vpop.f32.mrb[114].mxu1 }
0x1cc1   : > { %v7214_v61 = vpop.f32.mrb[115].mxu1 }
0x1cc2   : > { %v7274_v20 = vpack.c.bf16 %v7214_v61, %v7210_v57 }
0x1cc4   : > { %9938 = vmatprep.mubr.msk.bf16.mxu0 %vm565_vm0, %v7274_v20 }
0x1cc6   : > { %v13272_v6 = vpop.f32.mrb[116].mxu1 }
0x1cc7   : > { %v7220_v29 = vpop.f32.mrb[117].mxu1  ;;  %v7264_v14 = vadd.f32 %v13297_v58, %v13272_v6  ;;  %v7263_v6 = vadd.f32 %v13297_v58, %v13269_v53 }
0x1cc8   : > { %v13274_v16 = vpop.f32.mrb[118].mxu1 }
0x1cc9   : > { %v7224_v45 = vpop.f32.mrb[119].mxu1 }
0x1cca   : > { %v7275_v7 = vpack.c.bf16 %v7224_v45, %v7220_v29  ;;  %v7258_v45 = vadd.f32 %v13297_v58, %v13257_v55 }
0x1ccc   : > { %9939 = vmatmul.mubr.msk.bf16.gmra.mrb[72].mxu0 %vm565_vm0, %v7275_v7 }
0x1cce   : > { %v13277_v12 = vpop.f32.mrb[120].mxu1 }
0x1ccf   : > { %v7230_v39 = vpop.f32.mrb[121].mxu1 }
0x1cd0   : > { %v13279_v13 = vpop.f32.mrb[122].mxu1 }
0x1cd1   : > { %v7234_v2 = vpop.f32.mrb[123].mxu1 }
0x1cd2   : > { %v7276_v8 = vpack.c.bf16 %v7234_v2, %v7230_v39 }
0x1cd4   : > { %9942 = vmatprep.mubr.msk.bf16.mxu0 %vm565_vm0, %v7276_v8  ;;  %v7259_v8 = vadd.f32 %v13297_v58, %v13259_v17 }
0x1cd6   : > { %v13282_v24 = vpop.f32.mrb[124].mxu1 }
0x1cd7   : > { %v7240_v51 = vpop.f32.mrb[125].mxu1 }
0x1cd8   : > { %v13284_v5 = vpop.f32.mrb[126].mxu1 }
0x1cd9   : > { %v7244_v38 = vpop.f32.mrb[127].mxu1 }
0x1cda   : > { %v7277_v56 = vpack.c.bf16 %v7244_v38, %v7240_v51 }
0x1cdc   : > { %9943 = vmatmul.mubr.msk.bf16.gmra.mrb[76].mxu0 %vm565_vm0, %v7277_v56 }
0x1d7f   : > { %v9932_v28 = vpop.f32.mrb[64].mxu0 }
0x1d80   : > { %v7418_v33 = vadd.f32 %v9932_v28, %v7256_v15  ;;  %v7353_v26 = vpop.f32.mrb[65].mxu0 }
0x1d81   : > { %v7416_v32 = vadd.f32 %v7353_v26, %v7254_v62  ;;  %v9933_v48 = vpop.f32.mrb[66].mxu0 }
0x1d82   : > { %v7419_v57 = vadd.f32 %v9933_v48, %v7257_v41  ;;  %v7356_v61 = vpop.f32.mrb[67].mxu0  ;;  %v13320_v1 = vadd.f32 %v7418_v33, %v12950_v4  ;;  %v7261_v4 = vadd.f32 %v13297_v58, %v13264_v10  ;;  %v10268_v48 = vld [vmem:[#allocation5 + $0x4f0] sm:$0xff]  }
0x1d83   : > { %v13308_v20 = vadd.f32 %v7416_v32, %v12927_v44  ;;  %v7417_v34 = vadd.f32 %v7356_v61, %v7255_v36 }
0x1d84   : > { %v13323_v44 = vadd.f32 %v7419_v57, %v12953_v11  ;;  %v7502_v39 = vmul.f32 %v13320_v1, %v13320_v1 }
0x1d85   : > { %v13311_v29 = vadd.f32 %v7417_v34, %v12930_v19  ;;  %7452 = vadd.xlane.f32.xlu0 %v13308_v20  ;;  %v7500_v25 = vmul.f32 %v13308_v20, %v13308_v20  ;;  %v7260_v19 = vadd.f32 %v13297_v58, %v13262_v18  ;;  %v7268_v34 = vadd.f32 %v13297_v58, %v13282_v24 }
0x1d86   : > { %v7503_v55 = vmul.f32 %v13323_v44, %v13323_v44 }
0x1d87   : > { %7454 = vadd.xlane.f32.xlu1 %v13311_v29  ;;  %v7501_v37 = vmul.f32 %v13311_v29, %v13311_v29 }
0x1d89   : > { %7516 = vadd.xlane.f32.xlu0 %v7500_v25  ;;  %v7266_v25 = vadd.f32 %v13297_v58, %v13277_v12 }
0x1d8b   : > { %7518 = vadd.xlane.f32.xlu1 %v7501_v37 }
0x1d8d   : > { %7456 = vadd.xlane.f32.xlu0 %v13320_v1 }
0x1d8f   : > { %7458 = vadd.xlane.f32.xlu1 %v13323_v44  ;;  %v9936_v7 = vpop.f32.mrb[68].mxu0 }
0x1d90   : > { %v7422_v2 = vadd.f32 %v9936_v7, %v7260_v19  ;;  %v7369_v11 = vpop.f32.mrb[69].mxu0  ;;  %v7269_v19 = vadd.f32 %v13297_v58, %v13284_v5  ;;  %v7267_v7 = vadd.f32 %v13297_v58, %v13279_v13 }
0x1d91   : > { %v7420_v51 = vadd.f32 %v7369_v11, %v7258_v45  ;;  %7520 = vadd.xlane.f32.xlu0 %v7502_v39  ;;  %v9937_v18 = vpop.f32.mrb[70].mxu0 }
0x1d92   : > { %v7423_v38 = vadd.f32 %v9937_v18, %v7261_v4  ;;  %v7372_v56 = vpop.f32.mrb[71].mxu0  ;;  %v13353_v40 = vadd.f32 %v7422_v2, %v12996_v9 }
0x1d93   : > { %v13340_v50 = vadd.f32 %v7420_v51, %v12973_v21  ;;  %v7421_v47 = vadd.f32 %v7372_v56, %v7259_v8  ;;  %7522 = vadd.xlane.f32.xlu1 %v7503_v55  ;;  %v10270_v55 = vld [vmem:[#allocation7 + $0xf0] sm:$0xff]  }
0x1d94   : > { %v13356_v35 = vadd.f32 %v7423_v38, %v12999_v46  ;;  %v7506_v9 = vmul.f32 %v13353_v40, %v13353_v40  ;;  %v7265_v46 = vadd.f32 %v13297_v58, %v13274_v16  ;;  %v10271_v38 = vld [vmem:[#allocation7 + $0xf8] sm:$0xff]   ;;  %9946 = vmatprep.subr.bf16.mxu0 %v10270_v55 }
0x1d95   : > { %v13343_v10 = vadd.f32 %v7421_v47, %v12976_v43  ;;  %7460 = vadd.xlane.f32.xlu0 %v13340_v50  ;;  %v7504_v17 = vmul.f32 %v13340_v50, %v13340_v50  ;;  %v10267_v43 = vld [vmem:[#allocation5 + $0x4e8] sm:$0xff]   ;;  %9947 = vmatpush3.bf16.msra.mxu0 %v10270_v55 }
0x1d96   : > { %7824 = vmatpush1.bf16.xpose.msra.mxu1 %v10267_v43  ;;  %v7507_v63 = vmul.f32 %v13356_v35, %v13356_v35  ;;  %9948 = vmatprep.subr.bf16.mxu0 %v10271_v38 }
0x1d97   : > { %7462 = vadd.xlane.f32.xlu1 %v13343_v10  ;;  %v7505_v21 = vmul.f32 %v13343_v10, %v13343_v10  ;;  %7825 = vmatprep.subr.bf16.mxu1 %v10637_v0 }
0x1d99   : > { %7524 = vadd.xlane.f32.xlu0 %v7504_v17  ;;  %9949 = vmatpush3.bf16.msra.mxu0 %v10271_v38 }
0x1d9a   : > { %8212 = vmatprep.subr.bf16.mxu0 %v10637_v0 }
0x1d9b   : > { %7526 = vadd.xlane.f32.xlu1 %v7505_v21 }
0x1d9d   : > { %7464 = vadd.xlane.f32.xlu0 %v13353_v40 }
0x1d9e   : > { %7826 = vmatpush1.bf16.xpose.msra.mxu1 %v10268_v48 }
0x1d9f   : > { %7466 = vadd.xlane.f32.xlu1 %v13356_v35  ;;  %v9940_v27 = vpop.f32.mrb[72].mxu0  ;;  %7827 = vmatprep.subr.bf16.mxu1 %v10637_v0 }
0x1da0   : > { %v7426_v15 = vadd.f32 %v9940_v27, %v7264_v14  ;;  %v7385_v62 = vpop.f32.mrb[73].mxu0 }
0x1da1   : > { %v7424_v28 = vadd.f32 %v7385_v62, %v7262_v22  ;;  %7528 = vadd.xlane.f32.xlu0 %v7506_v9  ;;  %v9941_v41 = vpop.f32.mrb[74].mxu0 }
0x1da2   : > { %v7427_v33 = vadd.f32 %v9941_v41, %v7265_v46  ;;  %v7388_v26 = vpop.f32.mrb[75].mxu0  ;;  %v13387_v57 = vadd.f32 %v7426_v15, %v13028_v49 }
0x1da3   : > { %v13374_v36 = vadd.f32 %v7424_v28, %v13013_v52  ;;  %v7425_v32 = vadd.f32 %v7388_v26, %v7263_v6  ;;  %7530 = vadd.xlane.f32.xlu1 %v7507_v63 }
0x1da4   : > { %v13390_v61 = vadd.f32 %v7427_v33, %v13031_v3  ;;  %v7510_v49 = vmul.f32 %v13387_v57, %v13387_v57 }
0x1da5   : > { %v13377_v16 = vadd.f32 %v7425_v32, %v13016_v59  ;;  %7468 = vadd.xlane.f32.xlu0 %v13374_v36  ;;  %v7508_v53 = vmul.f32 %v13374_v36, %v13374_v36  ;;  %v10269_v59 = vld [vmem:[#allocation5 + $0x4f8] sm:$0xff]  }
0x1da6   : > { %7828 = vmatpush1.bf16.xpose.msra.mxu1 %v10269_v59  ;;  %v7511_v12 = vmul.f32 %v13390_v61, %v13390_v61 }
0x1da7   : > { %7470 = vadd.xlane.f32.xlu1 %v13377_v16  ;;  %v7509_v52 = vmul.f32 %v13377_v16, %v13377_v16 }
0x1da9   : > { %7532 = vadd.xlane.f32.xlu0 %v7508_v53 }
0x1dab   : > { %7534 = vadd.xlane.f32.xlu1 %v7509_v52 }
0x1dad   : > { %7472 = vadd.xlane.f32.xlu0 %v13387_v57 }
0x1daf   : > { %7474 = vadd.xlane.f32.xlu1 %v13390_v61  ;;  %v9944_v37 = vpop.f32.mrb[76].mxu0 }
0x1db0   : > { %v7430_v3 = vadd.f32 %v9944_v37, %v7268_v34  ;;  %v7401_v45 = vpop.f32.mrb[77].mxu0 }
0x1db1   : > { %v7428_v39 = vadd.f32 %v7401_v45, %v7266_v25  ;;  %7536 = vadd.xlane.f32.xlu0 %v7510_v49  ;;  %v9945_v24 = vpop.f32.mrb[78].mxu0 }
0x1db2   : > { %v7431_v4 = vadd.f32 %v9945_v24, %v7269_v19  ;;  %v7404_v2 = vpop.f32.mrb[79].mxu0  ;;  %v13419_v51 = vadd.f32 %v7430_v3, %v13056_v42 }
0x1db3   : > { %v13407_v11 = vadd.f32 %v7428_v39, %v13043_v60  ;;  %v7429_v8 = vadd.f32 %v7404_v2, %v7267_v7  ;;  %7538 = vadd.xlane.f32.xlu1 %v7511_v12 }
0x1db4   : > { %v13422_v60 = vadd.f32 %v7431_v4, %v13059_v31 }
0x1db5   : > { %v13410_v5 = vadd.f32 %v7429_v8, %v13046_v23  ;;  %7476 = vadd.xlane.f32.xlu0 %v13407_v11  ;;  %v7512_v13 = vmul.f32 %v13407_v11, %v13407_v11  ;;  %v7514_v23 = vmul.f32 %v13419_v51, %v13419_v51 }
0x1db6   : > { %v7515_v18 = vmul.f32 %v13422_v60, %v13422_v60 }
0x1db7   : > { %7478 = vadd.xlane.f32.xlu1 %v13410_v5  ;;  %v7513_v58 = vmul.f32 %v13410_v5, %v13410_v5 }
0x1db9   : > { %7540 = vadd.xlane.f32.xlu0 %v7512_v13 }
0x1dbb   : > { %7542 = vadd.xlane.f32.xlu1 %v7513_v58 }
0x1dbd   : > { %7480 = vadd.xlane.f32.xlu0 %v13419_v51 }
0x1dbf   : > { %7482 = vadd.xlane.f32.xlu1 %v13422_v60 }
0x1dc1   : > { %7544 = vadd.xlane.f32.xlu0 %v7514_v23  ;;  %v13449_v23 = vld [vmem:[%s13919_s4 + $0x4] ss:$0 sm:$0xff] }
0x1dc3   : > { %7546 = vadd.xlane.f32.xlu1 %v7515_v18 }
0x1e12   : > { %v7453_v42 = vpop.xlane.xlu0 %7452 }
0x1e13   : > { %v7484_v31 = vmul.f32 0.0078125, %v7453_v42 }
0x1e14   : > { %v7455_v56 = vpop.xlane.xlu1 %7454 }
0x1e15   : > { %v7485_v47 = vmul.f32 0.0078125, %v7455_v56  ;;  %v7564_v17 = vmul.f32 %v7484_v31, %v7484_v31  ;;  %v7612_v8 = vsub.f32 %v13308_v20, %v7484_v31 }
0x1e16   : > { %v7517_v54 = vpop.xlane.xlu0 %7516 }
0x1e17   : > { %v7548_v21 = vmul.f32 0.0078125, %v7517_v54  ;;  %v7565_v14 = vmul.f32 %v7485_v47, %v7485_v47  ;;  %v7613_v42 = vsub.f32 %v13311_v29, %v7485_v47 }
0x1e18   : > { %v7519_v43 = vpop.xlane.xlu1 %7518 }
0x1e19   : > { %v7580_v22 = vsub.f32 %v7548_v21, %v7564_v17  ;;  %v7549_v27 = vmul.f32 0.0078125, %v7519_v43 }
0x1e1a   : > { %v7457_v9 = vpop.xlane.xlu0 %7456 }
0x1e1b   : > { %v7596_v46 = vmax.f32 %v7580_v22, 0.0  ;;  %v7581_v15 = vsub.f32 %v7549_v27, %v7565_v14  ;;  %v13431_v62 = vmul.f32 0.0078125, %v7457_v9  ;;  %v13460_v27 = vld [vmem:[%s13920_s5 + $0x4] ss:$0 sm:$0xff] }
0x1e1c   : > { %v7459_v6 = vpop.xlane.xlu1 %7458 }
0x1e1d   : > { %v7628_v28 = vadd.f32 1e-05, %v7596_v46  ;;  %v7597_v41 = vmax.f32 %v7581_v15, 0.0  ;;  %v13433_v63 = vmul.f32 0.0078125, %v7459_v6  ;;  %v7566_v32 = vmul.f32 %v13431_v62, %v13431_v62 }
0x1e1e   : > { %v7521_v33 = vpop.xlane.xlu0 %7520 }
0x1e1f   : > { %10424 = vrsqrt.f32 %v7628_v28  ;;  %v7629_v26 = vadd.f32 1e-05, %v7597_v41  ;;  %v7550_v48 = vmul.f32 0.0078125, %v7521_v33  ;;  %v7567_v52 = vmul.f32 %v13433_v63, %v13433_v63 }
0x1e20   : > { %v7523_v53 = vpop.xlane.xlu1 %7522 }
0x1e21   : > { %10426 = vrsqrt.f32 %v7629_v26  ;;  %v7582_v59 = vsub.f32 %v7550_v48, %v7566_v32  ;;  %v7551_v34 = vmul.f32 0.0078125, %v7523_v53  ;;  %v7614_v32 = vsub.f32 %v13320_v1, %v13431_v62 }
0x1e22   : > { %v7461_v25 = vpop.xlane.xlu0 %7460 }
0x1e23   : > { %v7598_v37 = vmax.f32 %v7582_v59, 0.0  ;;  %v7583_v49 = vsub.f32 %v7551_v34, %v7567_v52  ;;  %v13439_v19 = vmul.f32 0.0078125, %v7461_v25 }
0x1e24   : > { %v7463_v3 = vpop.xlane.xlu1 %7462 }
0x1e25   : > { %v7630_v45 = vadd.f32 1e-05, %v7598_v37  ;;  %v7599_v7 = vmax.f32 %v7583_v49, 0.0  ;;  %v13441_v39 = vmul.f32 0.0078125, %v7463_v3  ;;  %v7568_v4 = vmul.f32 %v13439_v19, %v13439_v19 }
0x1e26   : > { %v7525_v24 = vpop.xlane.xlu0 %7524  ;;  %v7615_v37 = vsub.f32 %v13323_v44, %v13433_v63 }
0x1e27   : > { %10428 = vrsqrt.f32 %v7630_v45  ;;  %v7631_v12 = vadd.f32 1e-05, %v7599_v7  ;;  %v7552_v2 = vmul.f32 0.0078125, %v7525_v24  ;;  %v7569_v18 = vmul.f32 %v13441_v39, %v13441_v39 }
0x1e28   : > { %v7527_v13 = vpop.xlane.xlu1 %7526 }
0x1e29   : > { %v10425_v58 = vpop.eup %10424  ;;  %10430 = vrsqrt.f32 %v7631_v12  ;;  %v7584_v55 = vsub.f32 %v7552_v2, %v7568_v4  ;;  %v7553_v38 = vmul.f32 0.0078125, %v7527_v13 }
0x1e2a   : > { %v7660_v56 = vmul.f32 %v10425_v58, %v7612_v8  ;;  %v7465_v54 = vpop.xlane.xlu0 %7464 }
0x1e2b   : > { %v10427_v17 = vpop.eup %10426  ;;  %v7600_v21 = vmax.f32 %v7584_v55, 0.0  ;;  %v7585_v20 = vsub.f32 %v7553_v38, %v7569_v18  ;;  %v13454_v31 = vmul.f32 0.0078125, %v7465_v54 }
0x1e2c   : > { %v7682_v43 = vmul.f32 %v13449_v23, %v7660_v56  ;;  %v7661_v14 = vmul.f32 %v10427_v17, %v7613_v42  ;;  %v7467_v22 = vpop.xlane.xlu1 %7466  ;;  %v7616_v56 = vsub.f32 %v13340_v50, %v13439_v19 }
0x1e2d   : > { %v7632_v9 = vadd.f32 1e-05, %v7600_v21  ;;  %v7601_v46 = vmax.f32 %v7585_v20, 0.0  ;;  %v13463_v47 = vmul.f32 0.0078125, %v7467_v22  ;;  %v7570_v28 = vmul.f32 %v13454_v31, %v13454_v31 }
0x1e2e   : > { %v7683_v29 = vmul.f32 %v13449_v23, %v7661_v14  ;;  %v7529_v15 = vpop.xlane.xlu0 %7528  ;;  %v13468_v33 = vadd.f32 %v13460_v27, %v7682_v43  ;;  %v7617_v22 = vsub.f32 %v13343_v10, %v13441_v39 }
0x1e2f   : > { %10432 = vrsqrt.f32 %v7632_v9  ;;  %v7633_v6 = vadd.f32 1e-05, %v7601_v46  ;;  %v7554_v41 = vmul.f32 0.0078125, %v7529_v15  ;;  %v7571_v52 = vmul.f32 %v13463_v47, %v13463_v47 }
0x1e30   : > { %v13471_v26 = vadd.f32 %v13460_v27, %v7683_v29  ;;  %v7531_v48 = vpop.xlane.xlu1 %7530 }
0x1e31   : > { %v10429_v53 = vpop.eup %10428  ;;  %10434 = vrsqrt.f32 %v7633_v6  ;;  %v7586_v59 = vsub.f32 %v7554_v41, %v7570_v28  ;;  %v7555_v34 = vmul.f32 0.0078125, %v7531_v48 }
0x1e32   : > { %v7720_v25 = vpack.c.bf16 %v13471_v26, %v13468_v33  ;;  %v7662_v49 = vmul.f32 %v10429_v53, %v7614_v32  ;;  %v7469_v3 = vpop.xlane.xlu0 %7468 }
0x1e33   : > { %v10431_v45 = vpop.eup %10430  ;;  %v7602_v7 = vmax.f32 %v7586_v59, 0.0  ;;  %v7587_v24 = vsub.f32 %v7555_v34, %v7571_v52  ;;  %v13481_v1 = vmul.f32 0.0078125, %v7469_v3 }
0x1e34   : > { %v7684_v62 = vmul.f32 %v13449_v23, %v7662_v49  ;;  %v7663_v12 = vmul.f32 %v10431_v45, %v7615_v37  ;;  %v7471_v4 = vpop.xlane.xlu1 %7470  ;;  %7842 = vmatmul.mubr.bf16.vlgmr.msra.gmra.mrb[128].mxu1 %v7720_v25  ;;  %v7618_v49 = vsub.f32 %v13353_v40, %v13454_v31 }
0x1e35   : > { %v7634_v2 = vadd.f32 1e-05, %v7602_v7  ;;  %v7603_v8 = vmax.f32 %v7587_v24, 0.0  ;;  %7851 = vmatprep.mubr.bf16.mxu1 %v10637_v0  ;;  %v13486_v58 = vmul.f32 0.0078125, %v7471_v4  ;;  %v7572_v18 = vmul.f32 %v13481_v1, %v13481_v1 }
0x1e36   : > { %v7685_v13 = vmul.f32 %v13449_v23, %v7663_v12  ;;  %v7533_v44 = vpop.xlane.xlu0 %7532  ;;  %v13491_v38 = vadd.f32 %v13460_v27, %v7684_v62  ;;  %v7619_v4 = vsub.f32 %v13356_v35, %v13463_v47 }
0x1e37   : > { %10436 = vrsqrt.f32 %v7634_v2  ;;  %v7635_v63 = vadd.f32 1e-05, %v7603_v8  ;;  %v7556_v55 = vmul.f32 0.0078125, %v7533_v44  ;;  %v7573_v21 = vmul.f32 %v13486_v58, %v13486_v58 }
0x1e38   : > { %v13494_v42 = vadd.f32 %v13460_v27, %v7685_v13  ;;  %v7535_v54 = vpop.xlane.xlu1 %7534 }
0x1e39   : > { %v10433_v17 = vpop.eup %10432  ;;  %10438 = vrsqrt.f32 %v7635_v63  ;;  %v7588_v20 = vsub.f32 %v7556_v55, %v7572_v18  ;;  %v7557_v43 = vmul.f32 0.0078125, %v7535_v54 }
0x1e3a   : > { %v7721_v14 = vpack.c.bf16 %v13494_v42, %v13491_v38  ;;  %v7664_v9 = vmul.f32 %v10433_v17, %v7616_v56  ;;  %v7473_v46 = vpop.xlane.xlu0 %7472 }
0x1e3b   : > { %v10435_v29 = vpop.eup %10434  ;;  %v7604_v15 = vmax.f32 %v7588_v20, 0.0  ;;  %v7589_v6 = vsub.f32 %v7557_v43, %v7573_v21  ;;  %v13504_v50 = vmul.f32 0.0078125, %v7473_v46 }
0x1e3c   : > { %v7686_v19 = vmul.f32 %v13449_v23, %v7664_v9  ;;  %v7665_v28 = vmul.f32 %v10435_v29, %v7617_v22  ;;  %v7475_v41 = vpop.xlane.xlu1 %7474  ;;  %7852 = vmatmul.mubr.bf16.gmra.mrb[132].mxu1 %v7721_v14  ;;  %v7620_v9 = vsub.f32 %v13374_v36, %v13481_v1 }
0x1e3d   : > { %v7636_v32 = vadd.f32 1e-05, %v7604_v15  ;;  %v7605_v48 = vmax.f32 %v7589_v6, 0.0  ;;  %7861 = vmatprep.mubr.bf16.mxu1 %v10637_v0  ;;  %v13509_v52 = vmul.f32 0.0078125, %v7475_v41  ;;  %v7574_v59 = vmul.f32 %v13504_v50, %v13504_v50 }
0x1e3e   : > { %v7687_v53 = vmul.f32 %v13449_v23, %v7665_v28  ;;  %v7537_v10 = vpop.xlane.xlu0 %7536  ;;  %v13514_v25 = vadd.f32 %v13460_v27, %v7686_v19  ;;  %v7621_v41 = vsub.f32 %v13377_v16, %v13486_v58 }
0x1e3f   : > { %10440 = vrsqrt.f32 %v7636_v32  ;;  %v7637_v39 = vadd.f32 1e-05, %v7605_v48  ;;  %v7558_v34 = vmul.f32 0.0078125, %v7537_v10  ;;  %v7575_v7 = vmul.f32 %v13509_v52, %v13509_v52 }
0x1e40   : > { %v13517_v37 = vadd.f32 %v13460_v27, %v7687_v53  ;;  %v7539_v3 = vpop.xlane.xlu1 %7538 }
0x1e41   : > { %v10437_v45 = vpop.eup %10436  ;;  %10442 = vrsqrt.f32 %v7637_v39  ;;  %v7590_v24 = vsub.f32 %v7558_v34, %v7574_v59  ;;  %v7559_v62 = vmul.f32 0.0078125, %v7539_v3 }
0x1e42   : > { %v7722_v12 = vpack.c.bf16 %v13517_v37, %v13514_v25  ;;  %v7666_v2 = vmul.f32 %v10437_v45, %v7618_v49  ;;  %v7477_v8 = vpop.xlane.xlu0 %7476 }
0x1e43   : > { %v10439_v13 = vpop.eup %10438  ;;  %v7606_v44 = vmax.f32 %v7590_v24, 0.0  ;;  %v7591_v63 = vsub.f32 %v7559_v62, %v7575_v7  ;;  %v13527_v40 = vmul.f32 0.0078125, %v7477_v8 }
0x1e44   : > { %v7688_v31 = vmul.f32 %v13449_v23, %v7666_v2  ;;  %v7667_v18 = vmul.f32 %v10439_v13, %v7619_v4  ;;  %7862 = vmatmul.mubr.bf16.gmra.mrb[136].mxu1 %v7722_v12  ;;  %v7479_v55 = vpop.xlane.xlu1 %7478  ;;  %v7622_v2 = vsub.f32 %v13387_v57, %v13504_v50 }
0x1e45   : > { %v7638_v56 = vadd.f32 1e-05, %v7606_v44  ;;  %v7607_v54 = vmax.f32 %v7591_v63, 0.0  ;;  %7871 = vmatprep.mubr.bf16.mxu1 %v10637_v0  ;;  %v13532_v21 = vmul.f32 0.0078125, %v7479_v55  ;;  %v7576_v20 = vmul.f32 %v13527_v40, %v13527_v40 }
0x1e46   : > { %v7689_v17 = vmul.f32 %v13449_v23, %v7667_v18  ;;  %v7541_v35 = vpop.xlane.xlu0 %7540  ;;  %v13537_v14 = vadd.f32 %v13460_v27, %v7688_v31  ;;  %v7623_v55 = vsub.f32 %v13390_v61, %v13509_v52  ;;  %v7624_v52 = vsub.f32 %v13407_v11, %v13527_v40 }
0x1e47   : > { %10444 = vrsqrt.f32 %v7638_v56  ;;  %v7639_v47 = vadd.f32 1e-05, %v7607_v54  ;;  %v7560_v43 = vmul.f32 0.0078125, %v7541_v35  ;;  %v7577_v15 = vmul.f32 %v13532_v21, %v13532_v21 }
0x1e48   : > { %v13540_v22 = vadd.f32 %v13460_v27, %v7689_v17  ;;  %v7543_v46 = vpop.xlane.xlu1 %7542 }
0x1e49   : > { %v10441_v29 = vpop.eup %10440  ;;  %10446 = vrsqrt.f32 %v7639_v47  ;;  %v7592_v6 = vsub.f32 %v7560_v43, %v7576_v20  ;;  %v7561_v19 = vmul.f32 0.0078125, %v7543_v46 }
0x1e4a   : > { %v7723_v28 = vpack.c.bf16 %v13540_v22, %v13537_v14  ;;  %v7668_v32 = vmul.f32 %v10441_v29, %v7620_v9  ;;  %v7481_v48 = vpop.xlane.xlu0 %7480 }
0x1e4b   : > { %v10443_v53 = vpop.eup %10442  ;;  %v7608_v10 = vmax.f32 %v7592_v6, 0.0  ;;  %v7593_v39 = vsub.f32 %v7561_v19, %v7577_v15  ;;  %v7498_v36 = vmul.f32 0.0078125, %v7481_v48  ;;  %v7625_v6 = vsub.f32 %v13410_v5, %v13532_v21 }
0x1e4c   : > { %v7690_v1 = vmul.f32 %v13449_v23, %v7668_v32  ;;  %v7669_v59 = vmul.f32 %v10443_v53, %v7621_v41  ;;  %7872 = vmatmul.mubr.bf16.gmra.mrb[140].mxu1 %v7723_v28  ;;  %v7483_v34 = vpop.xlane.xlu1 %7482 }
0x1e4d   : > { %v7640_v49 = vadd.f32 1e-05, %v7608_v10  ;;  %v7609_v3 = vmax.f32 %v7593_v39, 0.0  ;;  %7881 = vmatprep.mubr.bf16.mxu1 %v10637_v0  ;;  %v7499_v7 = vmul.f32 0.0078125, %v7483_v34  ;;  %v7578_v58 = vmul.f32 %v7498_v36, %v7498_v36 }
0x1e4e   : > { %v7691_v45 = vmul.f32 %v13449_v23, %v7669_v59  ;;  %v7545_v24 = vpop.xlane.xlu0 %7544  ;;  %v13554_v12 = vadd.f32 %v13460_v27, %v7690_v1  ;;  %v7626_v53 = vsub.f32 %v13419_v51, %v7498_v36 }
0x1e4f   : > { %10448 = vrsqrt.f32 %v7640_v49  ;;  %v7641_v16 = vadd.f32 1e-05, %v7609_v3  ;;  %v7562_v62 = vmul.f32 0.0078125, %v7545_v24  ;;  %v7579_v44 = vmul.f32 %v7499_v7, %v7499_v7 }
0x1e50   : > { %v13557_v4 = vadd.f32 %v13460_v27, %v7691_v45  ;;  %v7547_v8 = vpop.xlane.xlu1 %7546  ;;  %v7627_v21 = vsub.f32 %v13422_v60, %v7499_v7 }
0x1e51   : > { %v10445_v13 = vpop.eup %10444  ;;  %10450 = vrsqrt.f32 %v7641_v16  ;;  %v7594_v63 = vsub.f32 %v7562_v62, %v7578_v58  ;;  %v7563_v31 = vmul.f32 0.0078125, %v7547_v8 }
0x1e52   : > { %v7724_v18 = vpack.c.bf16 %v13557_v4, %v13554_v12  ;;  %v7670_v56 = vmul.f32 %v10445_v13, %v7622_v2  ;;  %v10272_v2 = vld [vmem:[#allocation5 + $0x500] sm:$0xff]  }
0x1e53   : > { %v10447_v54 = vpop.eup %10446  ;;  %v7610_v17 = vmax.f32 %v7594_v63, 0.0  ;;  %v7595_v35 = vsub.f32 %v7563_v31, %v7579_v44 }
0x1e54   : > { %v7692_v47 = vmul.f32 %v13449_v23, %v7670_v56  ;;  %v7671_v20 = vmul.f32 %v10447_v54, %v7623_v55  ;;  %7882 = vmatmul.mubr.bf16.gmra.mrb[144].mxu1 %v7724_v18  ;;  %v10273_v18 = vld [vmem:[#allocation5 + $0x508] sm:$0xff]  }
0x1e55   : > { %v7642_v57 = vadd.f32 1e-05, %v7610_v17  ;;  %v7611_v50 = vmax.f32 %v7595_v35, 0.0  ;;  %7891 = vmatprep.mubr.bf16.mxu1 %v10637_v0 }
0x1e56   : > { %v7693_v43 = vmul.f32 %v13449_v23, %v7671_v20  ;;  %v13569_v46 = vadd.f32 %v13460_v27, %v7692_v47  ;;  %v10274_v47 = vld [vmem:[#allocation5 + $0x510] sm:$0xff]  }
0x1e57   : > { %10452 = vrsqrt.f32 %v7642_v57  ;;  %v7643_v9 = vadd.f32 1e-05, %v7611_v50 }
0x1e58   : > { %v13572_v61 = vadd.f32 %v13460_v27, %v7693_v43 }
0x1e59   : > { %v10449_v29 = vpop.eup %10448  ;;  %10454 = vrsqrt.f32 %v7643_v9 }
0x1e5a   : > { %v7725_v15 = vpack.c.bf16 %v13572_v61, %v13569_v46  ;;  %v7672_v19 = vmul.f32 %v10449_v29, %v7624_v52  ;;  %v10275_v52 = vld [vmem:[#allocation5 + $0x518] sm:$0xff]  }
0x1e5b   : > { %v10451_v28 = vpop.eup %10450 }
0x1e5c   : > { %v7694_v41 = vmul.f32 %v13449_v23, %v7672_v19  ;;  %v7673_v32 = vmul.f32 %v10451_v28, %v7625_v6  ;;  %7892 = vmatmul.mubr.bf16.gmra.mrb[148].mxu1 %v7725_v15 }
0x1e5d   : > { %7901 = vmatprep.mubr.bf16.mxu1 %v10637_v0 }
0x1e5e   : > { %v7695_v48 = vmul.f32 %v13449_v23, %v7673_v32  ;;  %v13584_v11 = vadd.f32 %v13460_v27, %v7694_v41  ;;  %v10276_v41 = vld [vmem:[#allocation5 + $0x520] sm:$0xff]  }
0x1e60   : > { %v13587_v40 = vadd.f32 %v13460_v27, %v7695_v48 }
0x1e61   : > { %v10453_v10 = vpop.eup %10452 }
0x1e62   : > { %v7726_v5 = vpack.c.bf16 %v13587_v40, %v13584_v11  ;;  %v7674_v39 = vmul.f32 %v10453_v10, %v7626_v53 }
0x1e63   : > { %v10455_v1 = vpop.eup %10454 }
0x1e64   : > { %v7696_v59 = vmul.f32 %v13449_v23, %v7674_v39  ;;  %v7675_v34 = vmul.f32 %v10455_v1, %v7627_v21  ;;  %7902 = vmatmul.mubr.bf16.gmra.mrb[152].mxu1 %v7726_v5  ;;  %v10277_v21 = vld [vmem:[#allocation5 + $0x528] sm:$0xff]  }
0x1e65   : > { %7911 = vmatprep.mubr.bf16.mxu1 %v10637_v0 }
0x1e66   : > { %v7697_v49 = vmul.f32 %v13449_v23, %v7675_v34  ;;  %v13597_v3 = vadd.f32 %v13460_v27, %v7696_v59 }
0x1e68   : > { %v13600_v51 = vadd.f32 %v13460_v27, %v7697_v49 }
0x1e6a   : > { %v7727_v36 = vpack.c.bf16 %v13600_v51, %v13597_v3 }
0x1e6c   : > { %7912 = vmatmul.mubr.bf16.gmra.mrb[156].mxu1 %v7727_v36  ;;  %v10278_v36 = vld [vmem:[#allocation5 + $0x530] sm:$0xff]  }
0x1f07   : > { %v13604_v60 = vpop.f32.mrb[128].mxu1 }
0x1f08   : > { %v7845_v45 = vpop.f32.mrb[129].mxu1 }
0x1f09   : > { %v13606_v7 = vpop.f32.mrb[130].mxu1 }
0x1f0a   : > { %v7849_v24 = vpop.f32.mrb[131].mxu1 }
0x1f0b   : > { %v7945_v16 = vpack.c.bf16 %v7849_v24, %v7845_v45  ;;  %v10279_v24 = vld [vmem:[#allocation5 + $0x538] sm:$0xff]  }
0x1f0d   : > { %9950 = vmatprep.mubr.msk.bf16.mxu0 %vm565_vm0, %v7945_v16  ;;  %v10280_v16 = vld [vmem:[#allocation5 + $0x540] sm:$0xff]  }
0x1f0f   : > { %v13609_v23 = vpop.f32.mrb[132].mxu1 }
0x1f10   : > { %v7855_v58 = vpop.f32.mrb[133].mxu1 }
0x1f11   : > { %v13611_v62 = vpop.f32.mrb[134].mxu1 }
0x1f12   : > { %v7859_v27 = vpop.f32.mrb[135].mxu1 }
0x1f13   : > { %v7946_v8 = vpack.c.bf16 %v7859_v27, %v7855_v58  ;;  %v10281_v58 = vld [vmem:[#allocation5 + $0x548] sm:$0xff]   ;;  %v10282_v27 = vld [vmem:[#allocation7 + $0x100] sm:$0xff]  }
0x1f14   : > { %9966 = vmatprep.subr.bf16.mxu1 %v10282_v27 }
0x1f15   : > { %9951 = vmatmul.mubr.msk.bf16.vlgmr.msra.gmra.mrb[80].mxu0 %vm565_vm0, %v7946_v8  ;;  %9967 = vmatpush3.bf16.msra.mxu1 %v10282_v27  ;;  %v9406_v8 = vld [vmem:[%s13917_s2 + $0xf] sm:$0x1] }
0x1f16   : > { %8213 = vmatpush1.bf16.xpose.msra.mxu0 %v10272_v2  ;;  %v10283_v2 = vld [vmem:[#allocation7 + $0x108] sm:$0xff]  }
0x1f17   : > { %v13614_v13 = vpop.f32.mrb[136].mxu1  ;;  %8214 = vmatprep.subr.bf16.mxu0 %v10637_v0  ;;  %9968 = vmatprep.subr.bf16.mxu1 %v10283_v2 }
0x1f18   : > { %v7865_v44 = vpop.f32.mrb[137].mxu1 }
0x1f19   : > { %v13617_v63 = vpop.f32.mrb[138].mxu1  ;;  %9969 = vmatpush3.bf16.msra.mxu1 %v10283_v2 }
0x1f1a   : > { %v7869_v31 = vpop.f32.mrb[139].mxu1 }
0x1f1b   : > { %v7947_v55 = vpack.c.bf16 %v7869_v31, %v7865_v44  ;;  %v7924_v44 = vunpack.c.l.bf16 %v9406_v8 }
0x1f1d   : > { %9954 = vmatprep.mubr.msk.bf16.mxu0 %vm565_vm0, %v7947_v55  ;;  %v13659_v31 = vrot.slane %v7924_v44, %v10953_v30 }
0x1f1e   : > { %8215 = vmatpush1.bf16.xpose.msra.mxu0 %v10273_v18 }
0x1f1f   : > { %v13620_v56 = vpop.f32.mrb[140].mxu1  ;;  %8216 = vmatprep.subr.bf16.mxu0 %v10637_v0  ;;  %v7931_v18 = vadd.f32 %v13659_v31, %v13609_v23  ;;  %v7929_v55 = vadd.f32 %v13659_v31, %v13604_v60 }
0x1f20   : > { %v7875_v54 = vpop.f32.mrb[141].mxu1 }
0x1f21   : > { %v13623_v17 = vpop.f32.mrb[142].mxu1 }
0x1f22   : > { %v7879_v35 = vpop.f32.mrb[143].mxu1 }
0x1f23   : > { %v7948_v20 = vpack.c.bf16 %v7879_v35, %v7875_v54  ;;  %v7932_v35 = vadd.f32 %v13659_v31, %v13611_v62  ;;  %v7935_v62 = vadd.f32 %v13659_v31, %v13620_v56 }
0x1f25   : > { %9955 = vmatmul.mubr.msk.bf16.gmra.mrb[84].mxu0 %vm565_vm0, %v7948_v20 }
0x1f26   : > { %8217 = vmatpush1.bf16.xpose.msra.mxu0 %v10274_v47 }
0x1f27   : > { %v13626_v57 = vpop.f32.mrb[144].mxu1  ;;  %8218 = vmatprep.subr.bf16.mxu0 %v10637_v0 }
0x1f28   : > { %v7885_v50 = vpop.f32.mrb[145].mxu1 }
0x1f29   : > { %v13629_v43 = vpop.f32.mrb[146].mxu1 }
0x1f2a   : > { %v7889_v9 = vpop.f32.mrb[147].mxu1 }
0x1f2b   : > { %v7949_v29 = vpack.c.bf16 %v7889_v9, %v7885_v50  ;;  %v7930_v50 = vadd.f32 %v13659_v31, %v13606_v7  ;;  %v7933_v7 = vadd.f32 %v13659_v31, %v13614_v13 }
0x1f2d   : > { %9958 = vmatprep.mubr.msk.bf16.mxu0 %vm565_vm0, %v7949_v29 }
0x1f2e   : > { %8219 = vmatpush1.bf16.xpose.msra.mxu0 %v10275_v52 }
0x1f2f   : > { %v13632_v15 = vpop.f32.mrb[148].mxu1  ;;  %8220 = vmatprep.subr.bf16.mxu0 %v10637_v0 }
0x1f30   : > { %v7895_v6 = vpop.f32.mrb[149].mxu1 }
0x1f31   : > { %v13635_v19 = vpop.f32.mrb[150].mxu1 }
0x1f32   : > { %v7899_v28 = vpop.f32.mrb[151].mxu1 }
0x1f33   : > { %v7950_v32 = vpack.c.bf16 %v7899_v28, %v7895_v6 }
0x1f35   : > { %9959 = vmatmul.mubr.msk.bf16.gmra.mrb[88].mxu0 %vm565_vm0, %v7950_v32 }
0x1f36   : > { %8221 = vmatpush1.bf16.xpose.msra.mxu0 %v10276_v41 }
0x1f37   : > { %v13638_v48 = vpop.f32.mrb[152].mxu1  ;;  %8222 = vmatprep.subr.bf16.mxu0 %v10637_v0 }
0x1f38   : > { %v7905_v53 = vpop.f32.mrb[153].mxu1 }
0x1f39   : > { %v13641_v10 = vpop.f32.mrb[154].mxu1 }
0x1f3a   : > { %v7909_v5 = vpop.f32.mrb[155].mxu1 }
0x1f3b   : > { %v7951_v39 = vpack.c.bf16 %v7909_v5, %v7905_v53 }
0x1f3d   : > { %9962 = vmatprep.mubr.msk.bf16.mxu0 %vm565_vm0, %v7951_v39  ;;  %v7936_v39 = vadd.f32 %v13659_v31, %v13623_v17  ;;  %v7937_v17 = vadd.f32 %v13659_v31, %v13626_v57 }
0x1f3e   : > { %8223 = vmatpush1.bf16.xpose.msra.mxu0 %v10277_v21 }
0x1f3f   : > { %v13644_v1 = vpop.f32.mrb[156].mxu1  ;;  %8224 = vmatprep.subr.bf16.mxu0 %v10637_v0 }
0x1f40   : > { %v7915_v59 = vpop.f32.mrb[157].mxu1 }
0x1f41   : > { %v13647_v34 = vpop.f32.mrb[158].mxu1 }
0x1f42   : > { %v7919_v49 = vpop.f32.mrb[159].mxu1 }
0x1f43   : > { %v7952_v45 = vpack.c.bf16 %v7919_v49, %v7915_v59 }
0x1f45   : > { %9963 = vmatmul.mubr.msk.bf16.gmra.mrb[92].mxu0 %vm565_vm0, %v7952_v45 }
0x1f46   : > { %8225 = vmatpush1.bf16.xpose.msra.mxu0 %v10278_v36  ;;  %8244 = vmatprep.mubr.bf16.mxu0 %v10637_v0  ;;  %v7934_v36 = vadd.f32 %v13659_v31, %v13617_v63  ;;  %v7939_v63 = vadd.f32 %v13659_v31, %v13632_v15 }
0x1f47   : > { %8226 = vmatprep.subr.bf16.mxu0 %v10637_v0 }
0x1f4e   : > { %8227 = vmatpush1.bf16.xpose.msra.mxu0 %v10279_v24 }
0x1f4f   : > { %8228 = vmatprep.subr.bf16.mxu0 %v10637_v0 }
0x1f56   : > { %8229 = vmatpush1.bf16.xpose.msra.mxu0 %v10280_v16 }
0x1f57   : > { %8230 = vmatprep.subr.bf16.mxu0 %v10637_v0 }
0x1f5e   : > { %8231 = vmatpush1.bf16.xpose.msra.mxu0 %v10281_v58 }
0x1f5f   : > { %8615 = vmatprep.subr.bf16.mxu0 %v10637_v0 }
0x1fe8   : > { %v9952_v54 = vpop.f32.mrb[80].mxu0 }
0x1fe9   : > { %v8093_v47 = vadd.f32 %v9952_v54, %v7931_v18  ;;  %v8028_v20 = vpop.f32.mrb[81].mxu0  ;;  %v7940_v54 = vadd.f32 %v13659_v31, %v13635_v19  ;;  %v7941_v19 = vadd.f32 %v13659_v31, %v13638_v48 }
0x1fea   : > { %v8091_v9 = vadd.f32 %v8028_v20, %v7929_v55  ;;  %v9953_v52 = vpop.f32.mrb[82].mxu0  ;;  %v7938_v20 = vadd.f32 %v13659_v31, %v13629_v43  ;;  %v7943_v43 = vadd.f32 %v13659_v31, %v13644_v1 }
0x1feb   : > { %v8094_v29 = vadd.f32 %v9953_v52, %v7932_v35  ;;  %v8031_v6 = vpop.f32.mrb[83].mxu0  ;;  %v8109_v41 = vmax.f32 %v8093_v47, 0.0 }
0x1fec   : > { %v8092_v28 = vadd.f32 %v8031_v6, %v7930_v50  ;;  %v8107_v23 = vmax.f32 %v8091_v9, 0.0 }
0x1fed   : > { %v8110_v32 = vmax.f32 %v8094_v29, 0.0 }
0x1fee   : > { %v8108_v53 = vmax.f32 %v8092_v28, 0.0 }
0x1fef   : > { %v8124_v5 = vpack.c.bf16 %v8110_v32, %v8109_v41 }
0x1ff0   : > { %v8123_v60 = vpack.c.bf16 %v8108_v53, %v8107_v23 }
0x1ff2   : > { %8245 = vmatmul.mubr.bf16.vlgmr.msra.gmra.mrb[96].mxu0 %v8123_v60 }
0x1ff3   : > { %8254 = vmatprep.mubr.bf16.mxu0 %v10637_v0 }
0x1ff8   : > { %v9956_v21 = vpop.f32.mrb[84].mxu0 }
0x1ff9   : > { %v8097_v59 = vadd.f32 %v9956_v21, %v7935_v62  ;;  %v8044_v49 = vpop.f32.mrb[85].mxu0 }
0x1ffa   : > { %v8095_v45 = vadd.f32 %v8044_v49, %v7933_v7  ;;  %v9957_v24 = vpop.f32.mrb[86].mxu0  ;;  %8255 = vmatmul.mubr.bf16.gmra.mrb[100].mxu0 %v8124_v5  ;;  %v7944_v5 = vadd.f32 %v13659_v31, %v13647_v34  ;;  %v7942_v7 = vadd.f32 %v13659_v31, %v13641_v10  ;;  %v10284_v10 = vld [vmem:[#allocation5 + $0x550] sm:$0xff]   ;;  %v10285_v34 = vld [vmem:[#allocation5 + $0x558] sm:$0xff]   ;;  %v10286_v31 = vld [vmem:[#allocation5 + $0x560] sm:$0xff]  }
0x1ffb   : > { %v8098_v16 = vadd.f32 %v9957_v24, %v7936_v39  ;;  %v8047_v58 = vpop.f32.mrb[87].mxu0  ;;  %8264 = vmatprep.mubr.bf16.mxu0 %v10637_v0  ;;  %v8113_v27 = vmax.f32 %v8097_v59, 0.0  ;;  %8616 = vmatpush1.bf16.xpose.msra.mxu0 %v10284_v10 }
0x1ffc   : > { %v8096_v56 = vadd.f32 %v8047_v58, %v7934_v36  ;;  %v8111_v13 = vmax.f32 %v8095_v45, 0.0  ;;  %8617 = vmatprep.subr.bf16.mxu0 %v10637_v0 }
0x1ffd   : > { %v8114_v2 = vmax.f32 %v8098_v16, 0.0 }
0x1ffe   : > { %v8112_v8 = vmax.f32 %v8096_v56, 0.0  ;;  %v10287_v56 = vld [vmem:[#allocation5 + $0x568] sm:$0xff]  }
0x1fff   : > { %v8126_v44 = vpack.c.bf16 %v8114_v2, %v8113_v27  ;;  %v10288_v27 = vld [vmem:[#allocation5 + $0x570] sm:$0xff]   ;;  %v10289_v2 = vld [vmem:[#allocation5 + $0x578] sm:$0xff]  }
0x2000   : > { %v8125_v18 = vpack.c.bf16 %v8112_v8, %v8111_v13  ;;  %v10290_v13 = vld [vmem:[#allocation5 + $0x580] sm:$0xff]   ;;  %v10291_v8 = vld [vmem:[#allocation5 + $0x588] sm:$0xff]  }
0x2002   : > { %8265 = vmatmul.mubr.bf16.gmra.mrb[104].mxu0 %v8125_v18 }
0x2003   : > { %8274 = vmatprep.mubr.bf16.mxu0 %v10637_v0  ;;  %8618 = vmatpush1.bf16.xpose.msra.mxu0 %v10285_v34 }
0x2004   : > { %8619 = vmatprep.subr.bf16.mxu0 %v10637_v0 }
0x2008   : > { %v9960_v55 = vpop.f32.mrb[88].mxu0 }
0x2009   : > { %v8101_v35 = vadd.f32 %v9960_v55, %v7939_v63  ;;  %v8060_v47 = vpop.f32.mrb[89].mxu0 }
0x200a   : > { %v8099_v50 = vadd.f32 %v8060_v47, %v7937_v17  ;;  %v9961_v9 = vpop.f32.mrb[90].mxu0  ;;  %8275 = vmatmul.mubr.bf16.gmra.mrb[108].mxu0 %v8126_v44  ;;  %v10292_v44 = vld [vmem:[#allocation5 + $0x590] sm:$0xff]  }
0x200b   : > { %v8102_v52 = vadd.f32 %v9961_v9, %v7940_v54  ;;  %v8063_v29 = vpop.f32.mrb[91].mxu0  ;;  %8284 = vmatprep.mubr.bf16.mxu0 %v10637_v0  ;;  %v8117_v6 = vmax.f32 %v8101_v35, 0.0  ;;  %8620 = vmatpush1.bf16.xpose.msra.mxu0 %v10286_v31 }
0x200c   : > { %v8100_v15 = vadd.f32 %v8063_v29, %v7938_v20  ;;  %v8115_v57 = vmax.f32 %v8099_v50, 0.0  ;;  %8621 = vmatprep.subr.bf16.mxu0 %v10637_v0 }
0x200d   : > { %v8118_v28 = vmax.f32 %v8102_v52, 0.0 }
0x200e   : > { %v8116_v41 = vmax.f32 %v8100_v15, 0.0 }
0x200f   : > { %v8128_v32 = vpack.c.bf16 %v8118_v28, %v8117_v6 }
0x2010   : > { %v8127_v23 = vpack.c.bf16 %v8116_v41, %v8115_v57 }
0x2012   : > { %8285 = vmatmul.mubr.bf16.gmra.mrb[112].mxu0 %v8127_v23 }
0x2013   : > { %8294 = vmatprep.mubr.bf16.mxu0 %v10637_v0  ;;  %8622 = vmatpush1.bf16.xpose.msra.mxu0 %v10287_v56  ;;  %v10293_v56 = vld [vmem:[#allocation5 + $0x598] sm:$0xff]  }
0x2014   : > { %8623 = vmatprep.subr.bf16.mxu0 %v10637_v0 }
0x2018   : > { %v9964_v53 = vpop.f32.mrb[92].mxu0 }
0x2019   : > { %v8105_v60 = vadd.f32 %v9964_v53, %v7943_v43  ;;  %v8076_v62 = vpop.f32.mrb[93].mxu0 }
0x201a   : > { %v8103_v21 = vadd.f32 %v8076_v62, %v7941_v19  ;;  %v9965_v39 = vpop.f32.mrb[94].mxu0  ;;  %8295 = vmatmul.mubr.bf16.gmra.mrb[116].mxu0 %v8128_v32 }
0x201b   : > { %v8106_v59 = vadd.f32 %v9965_v39, %v7944_v5  ;;  %v8079_v49 = vpop.f32.mrb[95].mxu0  ;;  %8304 = vmatprep.mubr.bf16.mxu0 %v10637_v0  ;;  %v8121_v36 = vmax.f32 %v8105_v60, 0.0  ;;  %8624 = vmatpush1.bf16.xpose.msra.mxu0 %v10288_v27  ;;  %v9427_v27 = vld [vmem:[%s13917_s2 + $0x10] sm:$0x1] }
0x201c   : > { %v8104_v1 = vadd.f32 %v8079_v49, %v7942_v7  ;;  %v8119_v48 = vmax.f32 %v8103_v21, 0.0  ;;  %8625 = vmatprep.subr.bf16.mxu0 %v10637_v0 }
0x201d   : > { %v8122_v45 = vmax.f32 %v8106_v59, 0.0 }
0x201e   : > { %v8120_v24 = vmax.f32 %v8104_v1, 0.0 }
0x201f   : > { %v8130_v16 = vpack.c.bf16 %v8122_v45, %v8121_v36 }
0x2020   : > { %v8129_v58 = vpack.c.bf16 %v8120_v24, %v8119_v48 }
0x2022   : > { %8305 = vmatmul.mubr.bf16.gmra.mrb[120].mxu0 %v8129_v58 }
0x2023   : > { %8314 = vmatprep.mubr.bf16.mxu0 %v10637_v0  ;;  %8626 = vmatpush1.bf16.xpose.msra.mxu0 %v10289_v2  ;;  %v8327_v2 = vunpack.c.l.bf16 %v9427_v27 }
0x2024   : > { %8627 = vmatprep.subr.bf16.mxu0 %v10637_v0 }
0x202a   : > { %8315 = vmatmul.mubr.bf16.gmra.mrb[124].mxu0 %v8130_v16 }
0x202b   : > { %8647 = vmatprep.mubr.bf16.mxu0 %v10637_v0  ;;  %8628 = vmatpush1.bf16.xpose.msra.mxu0 %v10290_v13  ;;  %v13740_v13 = vrot.slane %v8327_v2, %v10953_v30 }
0x202c   : > { %8629 = vmatprep.subr.bf16.mxu0 %v10637_v0 }
0x2033   : > { %8630 = vmatpush1.bf16.xpose.msra.mxu0 %v10291_v8 }
0x2034   : > { %8631 = vmatprep.subr.bf16.mxu0 %v10637_v0 }
0x203b   : > { %8632 = vmatpush1.bf16.xpose.msra.mxu0 %v10292_v44 }
0x203c   : > { %8633 = vmatprep.subr.bf16.mxu0 %v10637_v0 }
0x2043   : > { %8634 = vmatpush1.bf16.xpose.msra.mxu0 %v10293_v56 }
0x20c5   : > { %v8246_v18 = vpop.f32.mrb[96].mxu0 }
0x20c6   : > { %v8248_v63 = vpop.f32.mrb[97].mxu0  ;;  %v8332_v44 = vadd.f32 %v13740_v13, %v8246_v18 }
0x20c7   : > { %v8250_v17 = vpop.f32.mrb[98].mxu0 }
0x20c8   : > { %v8252_v55 = vpop.f32.mrb[99].mxu0 }
0x20c9   : > { %v8348_v54 = vpack.c.bf16 %v8252_v55, %v8248_v63 }
0x20cb   : > { %9970 = vmatprep.mubr.msk.bf16.mxu1 %vm565_vm0, %v8348_v54 }
0x20cd   : > { %v8256_v35 = vpop.f32.mrb[100].mxu0 }
0x20ce   : > { %v8258_v47 = vpop.f32.mrb[101].mxu0  ;;  %v8334_v8 = vadd.f32 %v13740_v13, %v8256_v35 }
0x20cf   : > { %v8260_v20 = vpop.f32.mrb[102].mxu0 }
0x20d0   : > { %v8262_v50 = vpop.f32.mrb[103].mxu0  ;;  %v8335_v55 = vadd.f32 %v13740_v13, %v8260_v20 }
0x20d1   : > { %v8349_v9 = vpack.c.bf16 %v8262_v50, %v8258_v47  ;;  %v8333_v50 = vadd.f32 %v13740_v13, %v8250_v17 }
0x20d3   : > { %9971 = vmatmul.mubr.msk.bf16.vlgmr.msra.gmra.mrb[160].mxu1 %vm565_vm0, %v8349_v9 }
0x20d5   : > { %v8266_v52 = vpop.f32.mrb[104].mxu0 }
0x20d6   : > { %v8268_v29 = vpop.f32.mrb[105].mxu0  ;;  %v8336_v20 = vadd.f32 %v13740_v13, %v8266_v52 }
0x20d7   : > { %v13712_v15 = vpop.f32.mrb[106].mxu0 }
0x20d8   : > { %v8272_v6 = vpop.f32.mrb[107].mxu0 }
0x20d9   : > { %v8350_v28 = vpack.c.bf16 %v8272_v6, %v8268_v29 }
0x20db   : > { %9974 = vmatprep.mubr.msk.bf16.mxu1 %vm565_vm0, %v8350_v28 }
0x20dd   : > { %v8276_v57 = vpop.f32.mrb[108].mxu0 }
0x20de   : > { %v8278_v41 = vpop.f32.mrb[109].mxu0  ;;  %v8338_v18 = vadd.f32 %v13740_v13, %v8276_v57 }
0x20df   : > { %v8280_v32 = vpop.f32.mrb[110].mxu0 }
0x20e0   : > { %v8282_v23 = vpop.f32.mrb[111].mxu0  ;;  %v8339_v17 = vadd.f32 %v13740_v13, %v8280_v32 }
0x20e1   : > { %v8351_v43 = vpack.c.bf16 %v8282_v23, %v8278_v41 }
0x20e3   : > { %9975 = vmatmul.mubr.msk.bf16.gmra.mrb[164].mxu1 %vm565_vm0, %v8351_v43 }
0x20e5   : > { %v13716_v19 = vpop.f32.mrb[112].mxu0 }
0x20e6   : > { %v8288_v53 = vpop.f32.mrb[113].mxu0  ;;  %v8340_v32 = vadd.f32 %v13740_v13, %v13716_v19 }
0x20e7   : > { %v13718_v5 = vpop.f32.mrb[114].mxu0 }
0x20e8   : > { %v8292_v60 = vpop.f32.mrb[115].mxu0 }
0x20e9   : > { %v8352_v62 = vpack.c.bf16 %v8292_v60, %v8288_v53 }
0x20eb   : > { %9978 = vmatprep.mubr.msk.bf16.mxu1 %vm565_vm0, %v8352_v62 }
0x20ed   : > { %v13721_v7 = vpop.f32.mrb[116].mxu0 }
0x20ee   : > { %v8298_v21 = vpop.f32.mrb[117].mxu0 }
0x20ef   : > { %v13723_v39 = vpop.f32.mrb[118].mxu0 }
0x20f0   : > { %v8302_v59 = vpop.f32.mrb[119].mxu0 }
0x20f1   : > { %v8353_v49 = vpack.c.bf16 %v8302_v59, %v8298_v21 }
0x20f3   : > { %9979 = vmatmul.mubr.msk.bf16.gmra.mrb[168].mxu1 %vm565_vm0, %v8353_v49 }
0x20f5   : > { %v13726_v1 = vpop.f32.mrb[120].mxu0 }
0x20f6   : > { %v8308_v36 = vpop.f32.mrb[121].mxu0 }
0x20f7   : > { %v13728_v45 = vpop.f32.mrb[122].mxu0 }
0x20f8   : > { %v8312_v48 = vpop.f32.mrb[123].mxu0 }
0x20f9   : > { %v8354_v24 = vpack.c.bf16 %v8312_v48, %v8308_v36  ;;  %v8337_v36 = vadd.f32 %v13740_v13, %v13712_v15  ;;  %v8342_v15 = vadd.f32 %v13740_v13, %v13721_v7 }
0x20fb   : > { %9982 = vmatprep.mubr.msk.bf16.mxu1 %vm565_vm0, %v8354_v24 }
0x20fd   : > { %v13731_v16 = vpop.f32.mrb[124].mxu0 }
0x20fe   : > { %v8318_v58 = vpop.f32.mrb[125].mxu0 }
0x20ff   : > { %v13733_v10 = vpop.f32.mrb[126].mxu0 }
0x2100   : > { %v8322_v34 = vpop.f32.mrb[127].mxu0 }
0x2101   : > { %v8355_v31 = vpack.c.bf16 %v8322_v34, %v8318_v58 }
0x2103   : > { %9983 = vmatmul.mubr.msk.bf16.gmra.mrb[172].mxu1 %vm565_vm0, %v8355_v31 }
0x21a6   : > { %v9972_v63 = vpop.f32.mrb[160].mxu1 }
0x21a7   : > { %v8496_v54 = vadd.f32 %v9972_v63, %v8334_v8  ;;  %v8431_v47 = vpop.f32.mrb[161].mxu1  ;;  %v8343_v63 = vadd.f32 %v13740_v13, %v13723_v39  ;;  %v8344_v39 = vadd.f32 %v13740_v13, %v13726_v1 }
0x21a8   : > { %v8494_v9 = vadd.f32 %v8431_v47, %v8332_v44  ;;  %v9973_v29 = vpop.f32.mrb[162].mxu1  ;;  %v8341_v47 = vadd.f32 %v13740_v13, %v13718_v5  ;;  %v8346_v5 = vadd.f32 %v13740_v13, %v13731_v16 }
0x21a9   : > { %v8497_v6 = vadd.f32 %v9973_v29, %v8335_v55  ;;  %v8434_v28 = vpop.f32.mrb[163].mxu1  ;;  %v8512_v23 = vmax.f32 %v8496_v54, 0.0 }
0x21aa   : > { %v8495_v41 = vadd.f32 %v8434_v28, %v8333_v50  ;;  %v8510_v53 = vmax.f32 %v8494_v9, 0.0 }
0x21ab   : > { %v8513_v43 = vmax.f32 %v8497_v6, 0.0 }
0x21ac   : > { %v8511_v60 = vmax.f32 %v8495_v41, 0.0 }
0x21ad   : > { %v8527_v62 = vpack.c.bf16 %v8513_v43, %v8512_v23 }
0x21ae   : > { %v8526_v35 = vpack.c.bf16 %v8511_v60, %v8510_v53 }
0x21b0   : > { %8648 = vmatmul.mubr.bf16.vlgmr.msra.gmra.mrb[128].mxu0 %v8526_v35 }
0x21b1   : > { %8657 = vmatprep.mubr.bf16.mxu0 %v10637_v0 }
0x21b6   : > { %v9976_v21 = vpop.f32.mrb[164].mxu1 }
0x21b7   : > { %v8500_v59 = vadd.f32 %v9976_v21, %v8338_v18  ;;  %v8447_v49 = vpop.f32.mrb[165].mxu1 }
0x21b8   : > { %v8498_v48 = vadd.f32 %v8447_v49, %v8336_v20  ;;  %v9977_v24 = vpop.f32.mrb[166].mxu1  ;;  %8658 = vmatmul.mubr.bf16.gmra.mrb[132].mxu0 %v8527_v62  ;;  %v8347_v62 = vadd.f32 %v13740_v13, %v13733_v10  ;;  %v8345_v20 = vadd.f32 %v13740_v13, %v13728_v45  ;;  %v10294_v10 = vld [vmem:[#allocation7 + $0x110] sm:$0xff]   ;;  %v10295_v45 = vld [vmem:[#allocation7 + $0x118] sm:$0xff]  }
0x21b9   : > { %v8501_v58 = vadd.f32 %v9977_v24, %v8339_v17  ;;  %v8450_v34 = vpop.f32.mrb[167].mxu1  ;;  %8667 = vmatprep.mubr.bf16.mxu0 %v10637_v0  ;;  %v8516_v56 = vmax.f32 %v8500_v59, 0.0  ;;  %9986 = vmatprep.subr.bf16.mxu1 %v10294_v10 }
0x21ba   : > { %v8499_v31 = vadd.f32 %v8450_v34, %v8337_v36  ;;  %v8514_v27 = vmax.f32 %v8498_v48, 0.0  ;;  %9987 = vmatpush3.bf16.msra.mxu1 %v10294_v10 }
0x21bb   : > { %v8517_v57 = vmax.f32 %v8501_v58, 0.0  ;;  %9988 = vmatprep.subr.bf16.mxu1 %v10295_v45 }
0x21bc   : > { %v8515_v52 = vmax.f32 %v8499_v31, 0.0 }
0x21bd   : > { %v8529_v2 = vpack.c.bf16 %v8517_v57, %v8516_v56 }
0x21be   : > { %v8528_v8 = vpack.c.bf16 %v8515_v52, %v8514_v27  ;;  %9989 = vmatpush3.bf16.msra.mxu1 %v10295_v45 }
0x21c0   : > { %8668 = vmatmul.mubr.bf16.gmra.mrb[136].mxu0 %v8528_v8 }
0x21c1   : > { %8677 = vmatprep.mubr.bf16.mxu0 %v10637_v0 }
0x21c6   : > { %v9980_v44 = vpop.f32.mrb[168].mxu1 }
0x21c7   : > { %v8504_v55 = vadd.f32 %v9980_v44, %v8342_v15  ;;  %v8463_v54 = vpop.f32.mrb[169].mxu1 }
0x21c8   : > { %v8502_v50 = vadd.f32 %v8463_v54, %v8340_v32  ;;  %v9981_v9 = vpop.f32.mrb[170].mxu1  ;;  %8678 = vmatmul.mubr.bf16.gmra.mrb[140].mxu0 %v8529_v2 }
0x21c9   : > { %v8505_v29 = vadd.f32 %v9981_v9, %v8343_v63  ;;  %v8466_v6 = vpop.f32.mrb[171].mxu1  ;;  %8687 = vmatprep.mubr.bf16.mxu0 %v10637_v0  ;;  %v8520_v28 = vmax.f32 %v8504_v55, 0.0 }
0x21ca   : > { %v8503_v7 = vadd.f32 %v8466_v6, %v8341_v47  ;;  %v8518_v19 = vmax.f32 %v8502_v50, 0.0 }
0x21cb   : > { %v8521_v41 = vmax.f32 %v8505_v29, 0.0 }
0x21cc   : > { %v8519_v23 = vmax.f32 %v8503_v7, 0.0 }
0x21cd   : > { %v8531_v43 = vpack.c.bf16 %v8521_v41, %v8520_v28 }
0x21ce   : > { %v8530_v53 = vpack.c.bf16 %v8519_v23, %v8518_v19 }
0x21d0   : > { %8688 = vmatmul.mubr.bf16.gmra.mrb[144].mxu0 %v8530_v53 }
0x21d1   : > { %8697 = vmatprep.mubr.bf16.mxu0 %v10637_v0 }
0x21d6   : > { %v9984_v60 = vpop.f32.mrb[172].mxu1 }
0x21d7   : > { %v8508_v35 = vadd.f32 %v9984_v60, %v8346_v5  ;;  %v8479_v18 = vpop.f32.mrb[173].mxu1 }
0x21d8   : > { %v8506_v21 = vadd.f32 %v8479_v18, %v8344_v39  ;;  %v9985_v17 = vpop.f32.mrb[174].mxu1  ;;  %8698 = vmatmul.mubr.bf16.gmra.mrb[148].mxu0 %v8531_v43 }
0x21d9   : > { %v8509_v59 = vadd.f32 %v9985_v17, %v8347_v62  ;;  %v8482_v49 = vpop.f32.mrb[175].mxu1  ;;  %8707 = vmatprep.mubr.bf16.mxu0 %v10637_v0  ;;  %v8524_v36 = vmax.f32 %v8508_v35, 0.0 }
0x21da   : > { %v8507_v16 = vadd.f32 %v8482_v49, %v8345_v20  ;;  %v8522_v1 = vmax.f32 %v8506_v21, 0.0 }
0x21db   : > { %v8525_v48 = vmax.f32 %v8509_v59, 0.0 }
0x21dc   : > { %v8523_v24 = vmax.f32 %v8507_v16, 0.0 }
0x21dd   : > { %v8533_v58 = vpack.c.bf16 %v8525_v48, %v8524_v36  ;;  %v9448_v48 = vld [vmem:[%s13917_s2 + $0x11] sm:$0x1] }
0x21de   : > { %v8532_v34 = vpack.c.bf16 %v8523_v24, %v8522_v1  ;;  %v8730_v1 = vunpack.c.l.bf16 %v9448_v48 }
0x21e0   : > { %8708 = vmatmul.mubr.bf16.gmra.mrb[152].mxu0 %v8532_v34  ;;  %v13802_v24 = vrot.slane %v8730_v1, %v10953_v30 }
0x21e1   : > { %8717 = vmatprep.mubr.bf16.mxu0 %v10637_v0 }
0x21e8   : > { %8718 = vmatmul.mubr.bf16.gmra.mrb[156].mxu0 %v8533_v58 }
0x2283   : > { %v8649_v13 = vpop.f32.mrb[128].mxu0 }
0x2284   : > { %v8651_v31 = vpop.f32.mrb[129].mxu0  ;;  %v8735_v34 = vadd.f32 %v13802_v24, %v8649_v13 }
0x2285   : > { %v8653_v56 = vpop.f32.mrb[130].mxu0 }
0x2286   : > { %v8655_v57 = vpop.f32.mrb[131].mxu0 }
0x2287   : > { %v8751_v27 = vpack.c.bf16 %v8655_v57, %v8651_v31 }
0x2289   : > { %9990 = vmatprep.mubr.msk.bf16.mxu1 %vm565_vm0, %v8751_v27  ;;  %v8736_v27 = vadd.f32 %v13802_v24, %v8653_v56 }
0x228b   : > { %v8659_v52 = vpop.f32.mrb[132].mxu0 }
0x228c   : > { %v8661_v2 = vpop.f32.mrb[133].mxu0  ;;  %v8737_v58 = vadd.f32 %v13802_v24, %v8659_v52 }
0x228d   : > { %v8663_v8 = vpop.f32.mrb[134].mxu0 }
0x228e   : > { %v8665_v15 = vpop.f32.mrb[135].mxu0  ;;  %v8738_v45 = vadd.f32 %v13802_v24, %v8663_v8 }
0x228f   : > { %v8752_v32 = vpack.c.bf16 %v8665_v15, %v8661_v2 }
0x2291   : > { %9991 = vmatmul.mubr.msk.bf16.vlgmr.msra.gmra.mrb[176].mxu1 %vm565_vm0, %v8752_v32 }
0x2293   : > { %v8669_v0 = vpop.f32.mrb[136].mxu0 }
0x2294   : > { %v8671_v44 = vpop.f32.mrb[137].mxu0 }
0x2295   : > { %v13776_v63 = vpop.f32.mrb[138].mxu0 }
0x2296   : > { %v8675_v55 = vpop.f32.mrb[139].mxu0 }
0x2297   : > { %v8753_v54 = vpack.c.bf16 %v8675_v55, %v8671_v44 }
0x2299   : > { %9994 = vmatprep.mubr.msk.bf16.mxu1 %vm565_vm0, %v8753_v54 }
0x229b   : > { %v8679_v47 = vpop.f32.mrb[140].mxu0 }
0x229c   : > { %v8681_v50 = vpop.f32.mrb[141].mxu0 }
0x229d   : > { %v8683_v9 = vpop.f32.mrb[142].mxu0 }
0x229e   : > { %v8685_v29 = vpop.f32.mrb[143].mxu0  ;;  %v8742_v8 = vadd.f32 %v13802_v24, %v8683_v9 }
0x229f   : > { %v8754_v6 = vpack.c.bf16 %v8685_v29, %v8681_v50 }
0x22a1   : > { %9995 = vmatmul.mubr.msk.bf16.gmra.mrb[180].mxu1 %vm565_vm0, %v8754_v6 }
0x22a3   : > { %v13780_v7 = vpop.f32.mrb[144].mxu0 }
0x22a4   : > { %v8691_v28 = vpop.f32.mrb[145].mxu0 }
0x22a5   : > { %v13782_v41 = vpop.f32.mrb[146].mxu0 }
0x22a6   : > { %v8695_v19 = vpop.f32.mrb[147].mxu0 }
0x22a7   : > { %v8755_v23 = vpack.c.bf16 %v8695_v19, %v8691_v28 }
0x22a9   : > { %9998 = vmatprep.mubr.msk.bf16.mxu1 %vm565_vm0, %v8755_v23 }
0x22ab   : > { %v8699_v43 = vpop.f32.mrb[148].mxu0 }
0x22ac   : > { %v8701_v53 = vpop.f32.mrb[149].mxu0 }
0x22ad   : > { %v13785_v5 = vpop.f32.mrb[150].mxu0 }
0x22ae   : > { %v8705_v39 = vpop.f32.mrb[151].mxu0 }
0x22af   : > { %v8756_v60 = vpack.c.bf16 %v8705_v39, %v8701_v53 }
0x22b1   : > { %9999 = vmatmul.mubr.msk.bf16.gmra.mrb[184].mxu1 %vm565_vm0, %v8756_v60 }
0x22b3   : > { %v13788_v62 = vpop.f32.mrb[152].mxu0 }
0x22b4   : > { %v8711_v35 = vpop.f32.mrb[153].mxu0 }
0x22b5   : > { %v13790_v18 = vpop.f32.mrb[154].mxu0 }
0x22b6   : > { %v8715_v20 = vpop.f32.mrb[155].mxu0 }
0x22b7   : > { %v8757_v21 = vpack.c.bf16 %v8715_v20, %v8711_v35 }
0x22b9   : > { %10002 = vmatprep.mubr.msk.bf16.mxu1 %vm565_vm0, %v8757_v21 }
0x22bb   : > { %v13793_v17 = vpop.f32.mrb[156].mxu0 }
0x22bc   : > { %v8721_v59 = vpop.f32.mrb[157].mxu0 }
0x22bd   : > { %v13795_v49 = vpop.f32.mrb[158].mxu0 }
0x22be   : > { %v8725_v16 = vpop.f32.mrb[159].mxu0 }
0x22bf   : > { %v8758_v36 = vpack.c.bf16 %v8725_v16, %v8721_v59 }
0x22c1   : > { %10003 = vmatmul.mubr.msk.bf16.gmra.mrb[188].mxu1 %vm565_vm0, %v8758_v36 }
0x2364   : > { %v9992_v10 = vpop.f32.mrb[176].mxu1 }
0x2365   : > { %v8899_v31 = vadd.f32 %v9992_v10, %v8737_v58  ;;  %v8834_v57 = vpop.f32.mrb[177].mxu1 }
0x2366   : > { %v8897_v2 = vadd.f32 %v8834_v57, %v8735_v34  ;;  %v9993_v15 = vpop.f32.mrb[178].mxu1 }
0x2367   : > { %v8915_v32 = vadd.f32 %v8899_v31, %v13491_v38  ;;  %v8900_v44 = vadd.f32 %v9993_v15, %v8738_v45  ;;  %v8837_v55 = vpop.f32.mrb[179].mxu1  ;;  %v8741_v38 = vadd.f32 %v13802_v24, %v8679_v47 }
0x2368   : > { %v8913_v30 = vadd.f32 %v8897_v2, %v13468_v33  ;;  %v8898_v54 = vadd.f32 %v8837_v55, %v8736_v27  ;;  %v8739_v33 = vadd.f32 %v13802_v24, %v8669_v0 }
0x2369   : > { %8931 = vst [vmem:[%s13812_s7 + $0x10] sm:$0xff] %v8915_v32  ;;  %v8916_v13 = vadd.f32 %v8900_v44, %v13494_v42  ;;  %v8740_v42 = vadd.f32 %v13802_v24, %v13776_v63  ;;  %v8745_v63 = vadd.f32 %v13802_v24, %v8699_v43 }
0x236a   : > { %8929 = vst [vmem:[%s13812_s7] sm:$0xff] %v8913_v30  ;;  %v8914_v56 = vadd.f32 %v8898_v54, %v13471_v26 }
0x236b   : > { %8932 = vst [vmem:[%s13812_s7 + $0x18] sm:$0xff] %v8916_v13 }
0x236c   : > { %8930 = vst [vmem:[%s13812_s7 + $0x8] sm:$0xff] %v8914_v56 }
0x2374   : > { %v9996_v52 = vpop.f32.mrb[180].mxu1 }
0x2375   : > { %v8903_v50 = vadd.f32 %v9996_v52, %v8741_v38  ;;  %v8850_v29 = vpop.f32.mrb[181].mxu1 }
0x2376   : > { %v8901_v6 = vadd.f32 %v8850_v29, %v8739_v33  ;;  %v9997_v26 = vpop.f32.mrb[182].mxu1 }
0x2377   : > { %v8919_v28 = vadd.f32 %v8903_v50, %v13537_v14  ;;  %v8904_v19 = vadd.f32 %v9997_v26, %v8742_v8  ;;  %v8853_v23 = vpop.f32.mrb[183].mxu1  ;;  %v8743_v14 = vadd.f32 %v13802_v24, %v13780_v7 }
0x2378   : > { %v8917_v47 = vadd.f32 %v8901_v6, %v13514_v25  ;;  %v8902_v53 = vadd.f32 %v8853_v23, %v8740_v42  ;;  %v8746_v25 = vadd.f32 %v13802_v24, %v13785_v5 }
0x2379   : > { %8935 = vst [vmem:[%s13812_s7 + $0x30] sm:$0xff] %v8919_v28  ;;  %v8920_v0 = vadd.f32 %v8904_v19, %v13540_v22 }
0x237a   : > { %8933 = vst [vmem:[%s13812_s7 + $0x20] sm:$0xff] %v8917_v47  ;;  %v8918_v9 = vadd.f32 %v8902_v53, %v13517_v37  ;;  %v8744_v37 = vadd.f32 %v13802_v24, %v13782_v41  ;;  %v8749_v41 = vadd.f32 %v13802_v24, %v13793_v17 }
0x237b   : > { %8936 = vst [vmem:[%s13812_s7 + $0x38] sm:$0xff] %v8920_v0 }
0x237c   : > { %8934 = vst [vmem:[%s13812_s7 + $0x28] sm:$0xff] %v8918_v9 }
0x2384   : > { %v10000_v39 = vpop.f32.mrb[184].mxu1 }
0x2385   : > { %v8907_v60 = vadd.f32 %v10000_v39, %v8745_v63  ;;  %v8866_v22 = vpop.f32.mrb[185].mxu1 }
0x2386   : > { %v8905_v35 = vadd.f32 %v8866_v22, %v8743_v14  ;;  %v10001_v20 = vpop.f32.mrb[186].mxu1 }
0x2387   : > { %v8923_v21 = vadd.f32 %v8907_v60, %v13569_v46  ;;  %v8908_v43 = vadd.f32 %v10001_v20, %v8746_v25  ;;  %v8869_v59 = vpop.f32.mrb[187].mxu1  ;;  %v8747_v46 = vadd.f32 %v13802_v24, %v13788_v62 }
0x2388   : > { %v8921_v16 = vadd.f32 %v8905_v35, %v13554_v12  ;;  %v8906_v7 = vadd.f32 %v8869_v59, %v8744_v37  ;;  %v8750_v12 = vadd.f32 %v13802_v24, %v13795_v49 }
0x2389   : > { %8939 = vst [vmem:[%s13812_s7 + $0x50] sm:$0xff] %v8923_v21  ;;  %v8924_v5 = vadd.f32 %v8908_v43, %v13572_v61  ;;  %v8748_v61 = vadd.f32 %v13802_v24, %v13790_v18 }
0x238a   : > { %8937 = vst [vmem:[%s13812_s7 + $0x40] sm:$0xff] %v8921_v16  ;;  %v8922_v36 = vadd.f32 %v8906_v7, %v13557_v4 }
0x238b   : > { %8940 = vst [vmem:[%s13812_s7 + $0x58] sm:$0xff] %v8924_v5 }
0x238c   : > { %8938 = vst [vmem:[%s13812_s7 + $0x48] sm:$0xff] %v8922_v36 }
0x2394   : > { %v10004_v48 = vpop.f32.mrb[188].mxu1 }
0x2395   : > { %v8911_v1 = vadd.f32 %v10004_v48, %v8749_v41  ;;  %v8882_v58 = vpop.f32.mrb[189].mxu1 }
0x2396   : > { %v8909_v4 = vadd.f32 %v8882_v58, %v8747_v46  ;;  %v10005_v34 = vpop.f32.mrb[190].mxu1 }
0x2397   : > { %v8927_v17 = vadd.f32 %v8911_v1, %v13597_v3  ;;  %v8912_v62 = vadd.f32 %v10005_v34, %v8750_v12  ;;  %v8885_v10 = vpop.f32.mrb[191].mxu1 }
0x2398   : > { %v8925_v49 = vadd.f32 %v8909_v4, %v13584_v11  ;;  %v8910_v45 = vadd.f32 %v8885_v10, %v8748_v61 }
0x2399   : > { %8943 = vst [vmem:[%s13812_s7 + $0x70] sm:$0xff] %v8927_v17  ;;  %v8928_v31 = vadd.f32 %v8912_v62, %v13600_v51 }
0x239a   : > { %8941 = vst [vmem:[%s13812_s7 + $0x60] sm:$0xff] %v8925_v49  ;;  %v8926_v3 = vadd.f32 %v8910_v45, %v13587_v40 }
0x239b   : > { %8944 = vst [vmem:[%s13812_s7 + $0x78] sm:$0xff] %v8928_v31 }
0x239c   : > { %8942 = vst [vmem:[%s13812_s7 + $0x68] sm:$0xff] %v8926_v3 }
0x239d   : > { %10571 = shalt.err (!%p10568_p2)
}
0x239e   : > { %s10572_s27 = scalar_lea.hbm %s13865_s8, 2048  ;;  %s10576_s16 = scalar_lea.hbm %s13921_s6, 4096 }
0x239f   : > { %p10573_p13 = scmp.ne.s32.totalorder %s13865_s8, %s10572_s27  ;;  %p10577_p4 = scmp.lt.u32.totalorder %s13865_s8, %s13921_s6 }
0x23a0   : > { %p10578_p5 = scmp.lt.u32.totalorder %s10576_s16, %s10572_s27  ;;  %p10580_p11 = scmp.lt.u32.totalorder %s10572_s27, %s13865_s8 }
0x23a1   : > { %p10574_p6 = pnand %p10573_p13, %p13935_p0 }
0x23a2   : > { %p10579_p8 = por %p10578_p5, %p10577_p4 }
0x23a3   : > { %p10575_p10 = pneg %p10574_p6 }
0x23a4   : > { %p10581_p1 = por %p10580_p11, %p10579_p8 }
0x23a6   : > { %p10582_p3 = pnand %p10581_p1, %p10575_p10 }
0x23a8   : > { %10585 = shalt.err (!%p10582_p3)
}
0x23a9   : > { %s10639_s20 = smov 128   ;;  %s10640_s15 = smov 8  }
0x23aa   : > { %10016 = dma.vmem_to_hbm [thread:$0]  (%p13935_p0), %s13867_s17, 2048, %s13865_s8, %s8946_s25, %s10639_s20, %s10639_s20, %s10640_s15  }
0x23ab PF: > { %s8974_s18 = sand.u32 1, %s10616_s21   ;;  %p13936_p7 = scmp.ne.s32.totalorder %s13926_s28, 0 }
0x23ac   : > { %p13937_p9 = scmp.ge.s32.totalorder %s10628_s24, 2  ;;  %s8975_s30 = scalar_lea.sflag [#allocation4], %s8974_s18 }
0x23ae   : > { %p10030_p12 = pnand %p13937_p9, %p13936_p7 }
0x23b0   : > { %10611 = dma.done.wait (!%p10030_p12), %s8975_s30, 2048  }
0x23b1   : > { %10613 = vsyncadd (!%p10030_p12), %s8975_s30, 4294965248  ;;  %p20_p2 = scmp.ge.s32.totalorder %s10786_s26, 4   ;;  %s13938_s21 = smov %s10620_s22 }
0x23b2   : > { %s13939_s22 = smov %s10624_s23  ;;  %s13940_s23 = smov %s10802_s11 }
0x23b3   : > { %s13941_s24 = smov %s10786_s26  ;;  %22 = sbr.rel (!%p20_p2) target bundleno = 6 (0x6), region = 156 }
0x23ba   :  { %8980 = vsyncpa [#allocation3], 1 }
0x23bb   :  { %8982 = vsyncpa [#allocation3 + $0x1], 1 }
0x23bc   :  { %8983 = vsyncpa [#allocation6], 1 }
0x23bd   :  { %8984 = vsyncpa [#allocation4], 1 }
0x23be   :  { %8986 = vsyncpa [#allocation4 + $0x1], 1 }

</bundles_post_ra>
